<compile_context>
chip_gen: v5e
topology: v5e:2x2
jax: 0.10.0
libtpu: 0.0.40
codegen_flags: <defaults>
</compile_context>

<pallas_src>
import math

import numpy as np
import jax
import jax.numpy as jnp
from jax import lax
from jax.experimental import pallas as pl
from jax.experimental.pallas import tpu as pltpu


# ----------------------------------------------------------------------------
# Pallas kernels
# ----------------------------------------------------------------------------
def _conv_stack_kernel(x_ref, w1_ref, s1_ref, t1_ref, w2_ref, s2_ref, t2_ref,
                       se1_ref, so1_ref, se2_ref, so2_ref, o_ref):
    """Fused conv1 + BN + ReLU + pool1 + conv2 + BN + ReLU + pool2.

    x_ref : (B, Lin, 27)    input, time on sublanes / channels on lanes
    wK_ref: (K, Cin, Cout)  per-tap conv weights
    s/t   : (1, C)          folded BN scale / (BN shift + conv bias)
    se/so : (P, L)          even / odd row-selection matrices for the pools
    o_ref : (B, P2, C2)     pooled conv2 features, (time, channel) per sample
    """
    B = o_ref.shape[0]
    K1 = w1_ref.shape[0]
    K2 = w2_ref.shape[0]
    L1 = se1_ref.shape[1]          # conv1 output length (192)
    L2 = se2_ref.shape[1]          # conv2 output length (88)

    for b in range(B):             # B is tiny; static unroll
        xb = x_ref[b, :, :]                                   # (Lin, 27)

        # ---- conv1 (1x9) as 9 shifted matmuls + folded bias/BN + ReLU ----
        y1 = jnp.dot(xb[0:L1, :], w1_ref[0],
                     preferred_element_type=jnp.float32)
        for k in range(1, K1):
            y1 = y1 + jnp.dot(xb[k:k + L1, :], w1_ref[k],
                              preferred_element_type=jnp.float32)
        y1 = jnp.maximum(y1 * s1_ref[...] + t1_ref[...], 0.0)  # (L1, 16)

        # ---- maxpool (1,2) stride 2: max(even rows, odd rows) ----
        p1 = jnp.maximum(
            jnp.dot(se1_ref[...], y1, preferred_element_type=jnp.float32),
            jnp.dot(so1_ref[...], y1, preferred_element_type=jnp.float32))
        # p1: (P1, 16)

        # ---- conv2 (1x9) + folded bias/BN + ReLU ----
        y2 = jnp.dot(p1[0:L2, :], w2_ref[0],
                     preferred_element_type=jnp.float32)
        for k in range(1, K2):
            y2 = y2 + jnp.dot(p1[k:k + L2, :], w2_ref[k],
                              preferred_element_type=jnp.float32)
        y2 = jnp.maximum(y2 * s2_ref[...] + t2_ref[...], 0.0)  # (L2, 32)

        # ---- maxpool -> (P2, 32) ----
        p2 = jnp.maximum(
            jnp.dot(se2_ref[...], y2, preferred_element_type=jnp.float32),
            jnp.dot(so2_ref[...], y2, preferred_element_type=jnp.float32))

        o_ref[b, :, :] = p2


def _fc_stack_kernel(h_ref, w1_ref, b1_ref, w2_ref, b2_ref, o_ref):
    """Fused fc1 + ReLU + fc2; intermediates stay in vregs/VMEM."""
    z = jnp.dot(h_ref[...], w1_ref[...], preferred_element_type=jnp.float32)
    z = jnp.maximum(z + b1_ref[...], 0.0)
    o = jnp.dot(z, w2_ref[...], preferred_element_type=jnp.float32) + b2_ref[...]
    o_ref[...] = o.astype(o_ref.dtype)


# ----------------------------------------------------------------------------
# Wrappers
# ----------------------------------------------------------------------------
def _vmem():
    return pl.BlockSpec(memory_space=pltpu.MemorySpace.VMEM)


def _pool_select_mats(in_len):
    """0/1 matrices selecting even / odd rows (for max-pool kernel 2, stride 2)."""
    out_len = (in_len - 2) // 2 + 1
    j = jnp.arange(out_len)[:, None]
    l = jnp.arange(in_len)[None, :]
    se = (l == 2 * j).astype(jnp.float32)
    so = (l == 2 * j + 1).astype(jnp.float32)
    return se, so


def pamap_forward(params, x):
    """x: (B, 27, 1, W) NCHW (PAMAP windows).  Returns (B, out_dim)."""
    B, Cin, H, W = x.shape
    assert H == 1, "PamapModel is used with H == 1 windows"
    f32 = jnp.float32

    xt = jnp.transpose(x[:, :, 0, :], (0, 2, 1)).astype(f32)          # (B, W, 27)

    # per-tap conv weights: (K, Cin, Cout)
    w1t = jnp.transpose(params["conv1_w"][:, :, 0, :], (2, 1, 0)).astype(f32)
    w2t = jnp.transpose(params["conv2_w"][:, :, 0, :], (2, 1, 0)).astype(f32)

    # fold conv bias + eval-mode BN into one per-channel scale/shift
    def bn_fold(gamma, beta, mean, var, conv_b, eps=1e-5):
        s = gamma / jnp.sqrt(var + eps)
        t = beta + s * (conv_b - mean)
        return s.astype(f32), t.astype(f32)

    s1, t1 = bn_fold(params["bn1_gamma"], params["bn1_beta"],
                     params["bn1_mean"], params["bn1_var"], params["conv1_b"])
    s2, t2 = bn_fold(params["bn2_gamma"], params["bn2_beta"],
                     params["bn2_mean"], params["bn2_var"], params["conv2_b"])

    K = params["conv1_w"].shape[-1]          # 9
    L1 = W - K + 1                           # 192
    P1 = (L1 - 2) // 2 + 1                   # 96
    L2 = P1 - K + 1                          # 88
    P2 = (L2 - 2) // 2 + 1                   # 44
    C2 = params["conv2_w"].shape[0]          # 32

    se1, so1 = _pool_select_mats(L1)
    se2, so2 = _pool_select_mats(L2)

    conv_out = pl.pallas_call(
        _conv_stack_kernel,
        out_shape=jax.ShapeDtypeStruct((B, P2, C2), f32),
        in_specs=[_vmem()] * 11,
        out_specs=_vmem(),
    )(xt, w1t, s1.reshape(1, -1), t1.reshape(1, -1),
      w2t, s2.reshape(1, -1), t2.reshape(1, -1),
      se1, so1, se2, so2)

    # (B, P2, C2) -> (B, P2*C2); torch's channel-major flatten order is folded
    # into the fc1 weight below, so this reshape is free (contiguous).
    h = conv_out.reshape(B, P2 * C2)

    n_feat = params["fc1_w"].shape[0]
    out_dim = params["fc2_w"].shape[0]
    # fc1_w is (n_feat, C2*P2) over torch index (c*P2 + w); reorder to the
    # kernel's (w*C2 + c) row order.
    wf1 = jnp.transpose(params["fc1_w"].reshape(n_feat, C2, P2),
                        (2, 1, 0)).reshape(P2 * C2, n_feat).astype(f32)
    wf2 = jnp.transpose(params["fc2_w"]).astype(f32)

    out = pl.pallas_call(
        _fc_stack_kernel,
        out_shape=jax.ShapeDtypeStruct((B, out_dim), f32),
        in_specs=[_vmem()] * 5,
        out_specs=_vmem(),
    )(h, wf1, params["fc1_b"].reshape(1, -1).astype(f32),
      wf2, params["fc2_b"].reshape(1, -1).astype(f32))
    return out


# ----------------------------------------------------------------------------
# Pure-JAX reference (correctness check only)
# ----------------------------------------------------------------------------
def reference_forward(params, x):
    P = lax.Precision.HIGHEST

    def conv(x, w, b):
        y = lax.conv_general_dilated(x, w, (1, 1), "VALID",
                                     dimension_numbers=("NCHW", "OIHW", "NCHW"),
                                     precision=P)
        return y + b[None, :, None, None]

    def bn(y, gamma, beta, mean, var, eps=1e-5):
        s = gamma / jnp.sqrt(var + eps)
        return y * s[None, :, None, None] + (beta - mean * s)[None, :, None, None]

    def pool(y):   # MaxPool2d(kernel_size=(1,2), stride=2)
        B, C, H, W = y.shape
        Wo = (W - 2) // 2 + 1
        y = y[:, :, ::2, : 2 * Wo]
        return y.reshape(B, C, -1, Wo, 2).max(axis=-1)

    y = jnp.maximum(bn(conv(x, params["conv1_w"], params["conv1_b"]),
                       params["bn1_gamma"], params["bn1_beta"],
                       params["bn1_mean"], params["bn1_var"]), 0.0)
    y = pool(y)
    y = jnp.maximum(bn(conv(y, params["conv2_w"], params["conv2_b"]),
                       params["bn2_gamma"], params["bn2_beta"],
                       params["bn2_mean"], params["bn2_var"]), 0.0)
    y = pool(y)
    y = y.reshape(y.shape[0], -1)
    z = jnp.maximum(jnp.dot(y, params["fc1_w"].T, precision=P) + params["fc1_b"], 0.0)
    return jnp.dot(z, params["fc2_w"].T, precision=P) + params["fc2_b"]


# ----------------------------------------------------------------------------
# Deterministic parameter init (shapes from PamapModel.__init__)
# ----------------------------------------------------------------------------
def init_params(key, n_feature=64, out_dim=10):
    ks = iter(jax.random.split(key, 24))

    def u(shape, fan_in):
        b = 1.0 / math.sqrt(fan_in)
        return jax.random.uniform(next(ks), shape, jnp.float32, -b, b)

    def bn_stats(c):
        gamma = jax.random.uniform(next(ks), (c,), jnp.float32, 0.5, 1.5)
        beta = 0.1 * jax.random.normal(next(ks), (c,), jnp.float32)
        mean = 0.1 * jax.random.normal(next(ks), (c,), jnp.float32)
        var = jax.random.uniform(next(ks), (c,), jnp.float32, 0.5, 1.5)
        return gamma, beta, mean, var

    p = {}
    p["conv1_w"] = u((16, 27, 1, 9), 27 * 9)
    p["conv1_b"] = u((16,), 27 * 9)
    p["bn1_gamma"], p["bn1_beta"], p["bn1_mean"], p["bn1_var"] = bn_stats(16)
    p["conv2_w"] = u((32, 16, 1, 9), 16 * 9)
    p["conv2_b"] = u((32,), 16 * 9)
    p["bn2_gamma"], p["bn2_beta"], p["bn2_mean"], p["bn2_var"] = bn_stats(32)
    p["fc1_w"] = u((n_feature, 32 * 44), 32 * 44)
    p["fc1_b"] = u((n_feature,), 32 * 44)
    p["fc2_w"] = u((out_dim, n_feature), n_feature)
    p["fc2_b"] = u((out_dim,), n_feature)
    return p


# ----------------------------------------------------------------------------
if __name__ == "__main__":
    key = jax.random.PRNGKey(0)
    kp, kx = jax.random.split(key)
    params = init_params(kp)

    # fc1 expects 32*44 = 1408 features -> input must be (B, 27, 1, 200)
    x = jax.random.normal(kx, (2, 27, 1, 200), jnp.float32)

    fwd = jax.jit(pamap_forward)
    out = fwd(params, x)
    jax.block_until_ready(out)
    assert out.shape == (2, 10)

    ref = reference_forward(params, x)
    np.testing.assert_allclose(np.asarray(out), np.asarray(ref),
                               rtol=5e-2, atol=5e-2)
    print("KERNEL_OK")
</pallas_src>

<mosaic_0001>
module attributes {stable_mosaic.version = 11 : i64} {
  func.func @_fc_stack_kernel(%arg0: memref<2x1408xf32, #tpu.memory_space<vmem>>, %arg1: memref<1408x64xf32, #tpu.memory_space<vmem>>, %arg2: memref<1x64xf32, #tpu.memory_space<vmem>>, %arg3: memref<64x10xf32, #tpu.memory_space<vmem>>, %arg4: memref<1x10xf32, #tpu.memory_space<vmem>>, %arg5: memref<2x10xf32, #tpu.memory_space<vmem>>) attributes {dimension_semantics = [], scalar_prefetch = 0 : i64, scratch_operands = 0 : i64, tpu.core_type = #tpu.core_type<tc>} {
    %c0 = arith.constant 0 : index
    %c0_0 = arith.constant 0 : index
    %0 = vector.load %arg0[%c0, %c0_0] : memref<2x1408xf32, #tpu.memory_space<vmem>>, vector<2x1408xf32>
    %c0_1 = arith.constant 0 : index
    %c0_2 = arith.constant 0 : index
    %1 = vector.load %arg1[%c0_1, %c0_2] : memref<1408x64xf32, #tpu.memory_space<vmem>>, vector<1408x64xf32>
    %cst = arith.constant dense<0.000000e+00> : vector<2x64xf32>
    %2 = tpu.matmul %0, %1, %cst {dimension_numbers = #tpu.dot_dimension_numbers<[1], [0], [0], [1], [0, 0, 1, 1], [], []>} : vector<2x1408xf32>, vector<1408x64xf32>, vector<2x64xf32> -> vector<2x64xf32>
    %c0_3 = arith.constant 0 : index
    %c0_4 = arith.constant 0 : index
    %3 = vector.load %arg2[%c0_3, %c0_4] : memref<1x64xf32, #tpu.memory_space<vmem>>, vector<1x64xf32>
    %4 = vector.broadcast %3 : vector<1x64xf32> to vector<2x64xf32>
    %5 = arith.addf %2, %4 : vector<2x64xf32>
    %cst_5 = arith.constant 0.000000e+00 : f32
    %6 = vector.broadcast %cst_5 : f32 to vector<2x64xf32>
    %7 = arith.maximumf %5, %6 : vector<2x64xf32>
    %c0_6 = arith.constant 0 : index
    %c0_7 = arith.constant 0 : index
    %8 = vector.load %arg3[%c0_6, %c0_7] : memref<64x10xf32, #tpu.memory_space<vmem>>, vector<64x10xf32>
    %cst_8 = arith.constant dense<0.000000e+00> : vector<2x10xf32>
    %9 = tpu.matmul %7, %8, %cst_8 {dimension_numbers = #tpu.dot_dimension_numbers<[1], [0], [0], [1], [0, 0, 1, 1], [], []>} : vector<2x64xf32>, vector<64x10xf32>, vector<2x10xf32> -> vector<2x10xf32>
    %c0_9 = arith.constant 0 : index
    %c0_10 = arith.constant 0 : index
    %10 = vector.load %arg4[%c0_9, %c0_10] : memref<1x10xf32, #tpu.memory_space<vmem>>, vector<1x10xf32>
    %11 = vector.broadcast %10 : vector<1x10xf32> to vector<2x10xf32>
    %12 = arith.addf %9, %11 : vector<2x10xf32>
    %c0_11 = arith.constant 0 : index
    %c0_12 = arith.constant 0 : index
    %13 = vector.load %arg5[%c0_11, %c0_12] : memref<2x10xf32, #tpu.memory_space<vmem>>, vector<2x10xf32>
    tpu.vector_store %arg5[%c0_11, %c0_12], %12 {strides = array<i32>} : memref<2x10xf32, #tpu.memory_space<vmem>>, vector<2x10xf32>,
    return
  }
}

module attributes {stable_mosaic.version = 11 : i64} {
  func.func @_conv_stack_kernel(%arg0: memref<2x200x27xf32, #tpu.memory_space<vmem>>, %arg1: memref<9x27x16xf32, #tpu.memory_space<vmem>>, %arg2: memref<1x16xf32, #tpu.memory_space<vmem>>, %arg3: memref<1x16xf32, #tpu.memory_space<vmem>>, %arg4: memref<9x16x32xf32, #tpu.memory_space<vmem>>, %arg5: memref<1x32xf32, #tpu.memory_space<vmem>>, %arg6: memref<1x32xf32, #tpu.memory_space<vmem>>, %arg7: memref<96x192xf32, #tpu.memory_space<vmem>>, %arg8: memref<96x192xf32, #tpu.memory_space<vmem>>, %arg9: memref<44x88xf32, #tpu.memory_space<vmem>>, %arg10: memref<44x88xf32, #tpu.memory_space<vmem>>, %arg11: memref<2x44x32xf32, #tpu.memory_space<vmem>>) attributes {dimension_semantics = [], scalar_prefetch = 0 : i64, scratch_operands = 0 : i64, tpu.core_type = #tpu.core_type<tc>} {
    %c0 = arith.constant 0 : index
    %c0_0 = arith.constant 0 : index
    %c0_1 = arith.constant 0 : index
    %0 = vector.load %arg0[%c0, %c0_0, %c0_1] : memref<2x200x27xf32, #tpu.memory_space<vmem>>, vector<1x200x27xf32>
    %1 = vector.shape_cast %0 : vector<1x200x27xf32> to vector<200x27xf32>
    %2 = vector.extract_strided_slice %1 {offsets = [0, 0], sizes = [192, 27], strides = [1, 1]} : vector<200x27xf32> to vector<192x27xf32>
    %c0_2 = arith.constant 0 : index
    %c0_3 = arith.constant 0 : index
    %c0_4 = arith.constant 0 : index
    %3 = vector.load %arg1[%c0_2, %c0_3, %c0_4] : memref<9x27x16xf32, #tpu.memory_space<vmem>>, vector<1x27x16xf32>
    %4 = vector.shape_cast %3 : vector<1x27x16xf32> to vector<27x16xf32>
    %cst = arith.constant dense<0.000000e+00> : vector<192x16xf32>
    %5 = tpu.matmul %2, %4, %cst {dimension_numbers = #tpu.dot_dimension_numbers<[1], [0], [0], [1], [0, 0, 1, 1], [], []>} : vector<192x27xf32>, vector<27x16xf32>, vector<192x16xf32> -> vector<192x16xf32>
    %6 = vector.extract_strided_slice %1 {offsets = [1, 0], sizes = [192, 27], strides = [1, 1]} : vector<200x27xf32> to vector<192x27xf32>
    %c1 = arith.constant 1 : index
    %c0_5 = arith.constant 0 : index
    %c0_6 = arith.constant 0 : index
    %7 = vector.load %arg1[%c1, %c0_5, %c0_6] : memref<9x27x16xf32, #tpu.memory_space<vmem>>, vector<1x27x16xf32>
    %8 = vector.shape_cast %7 : vector<1x27x16xf32> to vector<27x16xf32>
    %cst_7 = arith.constant dense<0.000000e+00> : vector<192x16xf32>
    %9 = tpu.matmul %6, %8, %cst_7 {dimension_numbers = #tpu.dot_dimension_numbers<[1], [0], [0], [1], [0, 0, 1, 1], [], []>} : vector<192x27xf32>, vector<27x16xf32>, vector<192x16xf32> -> vector<192x16xf32>
    %10 = arith.addf %5, %9 : vector<192x16xf32>
    %11 = vector.extract_strided_slice %1 {offsets = [2, 0], sizes = [192, 27], strides = [1, 1]} : vector<200x27xf32> to vector<192x27xf32>
    %c2 = arith.constant 2 : index
    %c0_8 = arith.constant 0 : index
    %c0_9 = arith.constant 0 : index
    %12 = vector.load %arg1[%c2, %c0_8, %c0_9] : memref<9x27x16xf32, #tpu.memory_space<vmem>>, vector<1x27x16xf32>
    %13 = vector.shape_cast %12 : vector<1x27x16xf32> to vector<27x16xf32>
    %cst_10 = arith.constant dense<0.000000e+00> : vector<192x16xf32>
    %14 = tpu.matmul %11, %13, %cst_10 {dimension_numbers = #tpu.dot_dimension_numbers<[1], [0], [0], [1], [0, 0, 1, 1], [], []>} : vector<192x27xf32>, vector<27x16xf32>, vector<192x16xf32> -> vector<192x16xf32>
    %15 = arith.addf %10, %14 : vector<192x16xf32>
    %16 = vector.extract_strided_slice %1 {offsets = [3, 0], sizes = [192, 27], strides = [1, 1]} : vector<200x27xf32> to vector<192x27xf32>
    %c3 = arith.constant 3 : index
    %c0_11 = arith.constant 0 : index
    %c0_12 = arith.constant 0 : index
    %17 = vector.load %arg1[%c3, %c0_11, %c0_12] : memref<9x27x16xf32, #tpu.memory_space<vmem>>, vector<1x27x16xf32>
    %18 = vector.shape_cast %17 : vector<1x27x16xf32> to vector<27x16xf32>
    %cst_13 = arith.constant dense<0.000000e+00> : vector<192x16xf32>
    %19 = tpu.matmul %16, %18, %cst_13 {dimension_numbers = #tpu.dot_dimension_numbers<[1], [0], [0], [1], [0, 0, 1, 1], [], []>} : vector<192x27xf32>, vector<27x16xf32>, vector<192x16xf32> -> vector<192x16xf32>
    %20 = arith.addf %15, %19 : vector<192x16xf32>
    %21 = vector.extract_strided_slice %1 {offsets = [4, 0], sizes = [192, 27], strides = [1, 1]} : vector<200x27xf32> to vector<192x27xf32>
    %c4 = arith.constant 4 : index
    %c0_14 = arith.constant 0 : index
    %c0_15 = arith.constant 0 : index
    %22 = vector.load %arg1[%c4, %c0_14, %c0_15] : memref<9x27x16xf32, #tpu.memory_space<vmem>>, vector<1x27x16xf32>
    %23 = vector.shape_cast %22 : vector<1x27x16xf32> to vector<27x16xf32>
    %cst_16 = arith.constant dense<0.000000e+00> : vector<192x16xf32>
    %24 = tpu.matmul %21, %23, %cst_16 {dimension_numbers = #tpu.dot_dimension_numbers<[1], [0], [0], [1], [0, 0, 1, 1], [], []>} : vector<192x27xf32>, vector<27x16xf32>, vector<192x16xf32> -> vector<192x16xf32>
    %25 = arith.addf %20, %24 : vector<192x16xf32>
    %26 = vector.extract_strided_slice %1 {offsets = [5, 0], sizes = [192, 27], strides = [1, 1]} : vector<200x27xf32> to vector<192x27xf32>
    %c5 = arith.constant 5 : index
    %c0_17 = arith.constant 0 : index
    %c0_18 = arith.constant 0 : index
    %27 = vector.load %arg1[%c5, %c0_17, %c0_18] : memref<9x27x16xf32, #tpu.memory_space<vmem>>, vector<1x27x16xf32>
    %28 = vector.shape_cast %27 : vector<1x27x16xf32> to vector<27x16xf32>
    %cst_19 = arith.constant dense<0.000000e+00> : vector<192x16xf32>
    %29 = tpu.matmul %26, %28, %cst_19 {dimension_numbers = #tpu.dot_dimension_numbers<[1], [0], [0], [1], [0, 0, 1, 1], [], []>} : vector<192x27xf32>, vector<27x16xf32>, vector<192x16xf32> -> vector<192x16xf32>
    %30 = arith.addf %25, %29 : vector<192x16xf32>
    %31 = vector.extract_strided_slice %1 {offsets = [6, 0], sizes = [192, 27], strides = [1, 1]} : vector<200x27xf32> to vector<192x27xf32>
    %c6 = arith.constant 6 : index
    %c0_20 = arith.constant 0 : index
    %c0_21 = arith.constant 0 : index
    %32 = vector.load %arg1[%c6, %c0_20, %c0_21] : memref<9x27x16xf32, #tpu.memory_space<vmem>>, vector<1x27x16xf32>
    %33 = vector.shape_cast %32 : vector<1x27x16xf32> to vector<27x16xf32>
    %cst_22 = arith.constant dense<0.000000e+00> : vector<192x16xf32>
    %34 = tpu.matmul %31, %33, %cst_22 {dimension_numbers = #tpu.dot_dimension_numbers<[1], [0], [0], [1], [0, 0, 1, 1], [], []>} : vector<192x27xf32>, vector<27x16xf32>, vector<192x16xf32> -> vector<192x16xf32>
    %35 = arith.addf %30, %34 : vector<192x16xf32>
    %36 = vector.extract_strided_slice %1 {offsets = [7, 0], sizes = [192, 27], strides = [1, 1]} : vector<200x27xf32> to vector<192x27xf32>
    %c7 = arith.constant 7 : index
    %c0_23 = arith.constant 0 : index
    %c0_24 = arith.constant 0 : index
    %37 = vector.load %arg1[%c7, %c0_23, %c0_24] : memref<9x27x16xf32, #tpu.memory_space<vmem>>, vector<1x27x16xf32>
    %38 = vector.shape_cast %37 : vector<1x27x16xf32> to vector<27x16xf32>
    %cst_25 = arith.constant dense<0.000000e+00> : vector<192x16xf32>
    %39 = tpu.matmul %36, %38, %cst_25 {dimension_numbers = #tpu.dot_dimension_numbers<[1], [0], [0], [1], [0, 0, 1, 1], [], []>} : vector<192x27xf32>, vector<27x16xf32>, vector<192x16xf32> -> vector<192x16xf32>
    %40 = arith.addf %35, %39 : vector<192x16xf32>
    %41 = vector.extract_strided_slice %1 {offsets = [8, 0], sizes = [192, 27], strides = [1, 1]} : vector<200x27xf32> to vector<192x27xf32>
    %c8 = arith.constant 8 : index
    %c0_26 = arith.constant 0 : index
    %c0_27 = arith.constant 0 : index
    %42 = vector.load %arg1[%c8, %c0_26, %c0_27] : memref<9x27x16xf32, #tpu.memory_space<vmem>>, vector<1x27x16xf32>
    %43 = vector.shape_cast %42 : vector<1x27x16xf32> to vector<27x16xf32>
    %cst_28 = arith.constant dense<0.000000e+00> : vector<192x16xf32>
    %44 = tpu.matmul %41, %43, %cst_28 {dimension_numbers = #tpu.dot_dimension_numbers<[1], [0], [0], [1], [0, 0, 1, 1], [], []>} : vector<192x27xf32>, vector<27x16xf32>, vector<192x16xf32> -> vector<192x16xf32>
    %45 = arith.addf %40, %44 : vector<192x16xf32>
    %c0_29 = arith.constant 0 : index
    %c0_30 = arith.constant 0 : index
    %46 = vector.load %arg2[%c0_29, %c0_30] : memref<1x16xf32, #tpu.memory_space<vmem>>, vector<1x16xf32>
    %47 = vector.broadcast %46 : vector<1x16xf32> to vector<192x16xf32>
    %48 = arith.mulf %45, %47 : vector<192x16xf32>
    %c0_31 = arith.constant 0 : index
    %c0_32 = arith.constant 0 : index
    %49 = vector.load %arg3[%c0_31, %c0_32] : memref<1x16xf32, #tpu.memory_space<vmem>>, vector<1x16xf32>
    %50 = vector.broadcast %49 : vector<1x16xf32> to vector<192x16xf32>
    %51 = arith.addf %48, %50 : vector<192x16xf32>
    %cst_33 = arith.constant 0.000000e+00 : f32
    %52 = vector.broadcast %cst_33 : f32 to vector<192x16xf32>
    %53 = arith.maximumf %51, %52 : vector<192x16xf32>
    %c0_34 = arith.constant 0 : index
    %c0_35 = arith.constant 0 : index
    %54 = vector.load %arg7[%c0_34, %c0_35] : memref<96x192xf32, #tpu.memory_space<vmem>>, vector<96x192xf32>
    %cst_36 = arith.constant dense<0.000000e+00> : vector<96x16xf32>
    %55 = tpu.matmul %54, %53, %cst_36 {dimension_numbers = #tpu.dot_dimension_numbers<[1], [0], [0], [1], [0, 0, 1, 1], [], []>} : vector<96x192xf32>, vector<192x16xf32>, vector<96x16xf32> -> vector<96x16xf32>
    %c0_37 = arith.constant 0 : index
    %c0_38 = arith.constant 0 : index
    %56 = vector.load %arg8[%c0_37, %c0_38] : memref<96x192xf32, #tpu.memory_space<vmem>>, vector<96x192xf32>
    %cst_39 = arith.constant dense<0.000000e+00> : vector<96x16xf32>
    %57 = tpu.matmul %56, %53, %cst_39 {dimension_numbers = #tpu.dot_dimension_numbers<[1], [0], [0], [1], [0, 0, 1, 1], [], []>} : vector<96x192xf32>, vector<192x16xf32>, vector<96x16xf32> -> vector<96x16xf32>
    %58 = arith.maximumf %55, %57 : vector<96x16xf32>
    %59 = vector.extract_strided_slice %58 {offsets = [0, 0], sizes = [88, 16], strides = [1, 1]} : vector<96x16xf32> to vector<88x16xf32>
    %c0_40 = arith.constant 0 : index
    %c0_41 = arith.constant 0 : index
    %c0_42 = arith.constant 0 : index
    %60 = vector.load %arg4[%c0_40, %c0_41, %c0_42] : memref<9x16x32xf32, #tpu.memory_space<vmem>>, vector<1x16x32xf32>
    %61 = vector.shape_cast %60 : vector<1x16x32xf32> to vector<16x32xf32>
    %cst_43 = arith.constant dense<0.000000e+00> : vector<88x32xf32>
    %62 = tpu.matmul %59, %61, %cst_43 {dimension_numbers = #tpu.dot_dimension_numbers<[1], [0], [0], [1], [0, 0, 1, 1], [], []>} : vector<88x16xf32>, vector<16x32xf32>, vector<88x32xf32> -> vector<88x32xf32>
    %63 = vector.extract_strided_slice %58 {offsets = [1, 0], sizes = [88, 16], strides = [1, 1]} : vector<96x16xf32> to vector<88x16xf32>
    %c1_44 = arith.constant 1 : index
    %c0_45 = arith.constant 0 : index
    %c0_46 = arith.constant 0 : index
    %64 = vector.load %arg4[%c1_44, %c0_45, %c0_46] : memref<9x16x32xf32, #tpu.memory_space<vmem>>, vector<1x16x32xf32>
    %65 = vector.shape_cast %64 : vector<1x16x32xf32> to vector<16x32xf32>
    %cst_47 = arith.constant dense<0.000000e+00> : vector<88x32xf32>
    %66 = tpu.matmul %63, %65, %cst_47 {dimension_numbers = #tpu.dot_dimension_numbers<[1], [0], [0], [1], [0, 0, 1, 1], [], []>} : vector<88x16xf32>, vector<16x32xf32>, vector<88x32xf32> -> vector<88x32xf32>
    %67 = arith.addf %62, %66 : vector<88x32xf32>
    %68 = vector.extract_strided_slice %58 {offsets = [2, 0], sizes = [88, 16], strides = [1, 1]} : vector<96x16xf32> to vector<88x16xf32>
    %c2_48 = arith.constant 2 : index
    %c0_49 = arith.constant 0 : index
    %c0_50 = arith.constant 0 : index
    %69 = vector.load %arg4[%c2_48, %c0_49, %c0_50] : memref<9x16x32xf32, #tpu.memory_space<vmem>>, vector<1x16x32xf32>
    %70 = vector.shape_cast %69 : vector<1x16x32xf32> to vector<16x32xf32>
    %cst_51 = arith.constant dense<0.000000e+00> : vector<88x32xf32>
    %71 = tpu.matmul %68, %70, %cst_51 {dimension_numbers = #tpu.dot_dimension_numbers<[1], [0], [0], [1], [0, 0, 1, 1], [], []>} : vector<88x16xf32>, vector<16x32xf32>, vector<88x32xf32> -> vector<88x32xf32>
    %72 = arith.addf %67, %71 : vector<88x32xf32>
    %73 = vector.extract_strided_slice %58 {offsets = [3, 0], sizes = [88, 16], strides = [1, 1]} : vector<96x16xf32> to vector<88x16xf32>
    %c3_52 = arith.constant 3 : index
    %c0_53 = arith.constant 0 : index
    %c0_54 = arith.constant 0 : index
    %74 = vector.load %arg4[%c3_52, %c0_53, %c0_54] : memref<9x16x32xf32, #tpu.memory_space<vmem>>, vector<1x16x32xf32>
    %75 = vector.shape_cast %74 : vector<1x16x32xf32> to vector<16x32xf32>
    %cst_55 = arith.constant dense<0.000000e+00> : vector<88x32xf32>
    %76 = tpu.matmul %73, %75, %cst_55 {dimension_numbers = #tpu.dot_dimension_numbers<[1], [0], [0], [1], [0, 0, 1, 1], [], []>} : vector<88x16xf32>, vector<16x32xf32>, vector<88x32xf32> -> vector<88x32xf32>
    %77 = arith.addf %72, %76 : vector<88x32xf32>
    %78 = vector.extract_strided_slice %58 {offsets = [4, 0], sizes = [88, 16], strides = [1, 1]} : vector<96x16xf32> to vector<88x16xf32>
    %c4_56 = arith.constant 4 : index
    %c0_57 = arith.constant 0 : index
    %c0_58 = arith.constant 0 : index
    %79 = vector.load %arg4[%c4_56, %c0_57, %c0_58] : memref<9x16x32xf32, #tpu.memory_space<vmem>>, vector<1x16x32xf32>
    %80 = vector.shape_cast %79 : vector<1x16x32xf32> to vector<16x32xf32>
    %cst_59 = arith.constant dense<0.000000e+00> : vector<88x32xf32>
    %81 = tpu.matmul %78, %80, %cst_59 {dimension_numbers = #tpu.dot_dimension_numbers<[1], [0], [0], [1], [0, 0, 1, 1], [], []>} : vector<88x16xf32>, vector<16x32xf32>, vector<88x32xf32> -> vector<88x32xf32>
    %82 = arith.addf %77, %81 : vector<88x32xf32>
    %83 = vector.extract_strided_slice %58 {offsets = [5, 0], sizes = [88, 16], strides = [1, 1]} : vector<96x16xf32> to vector<88x16xf32>
    %c5_60 = arith.constant 5 : index
    %c0_61 = arith.constant 0 : index
    %c0_62 = arith.constant 0 : index
    %84 = vector.load %arg4[%c5_60, %c0_61, %c0_62] : memref<9x16x32xf32, #tpu.memory_space<vmem>>, vector<1x16x32xf32>
    %85 = vector.shape_cast %84 : vector<1x16x32xf32> to vector<16x32xf32>
    %cst_63 = arith.constant dense<0.000000e+00> : vector<88x32xf32>
    %86 = tpu.matmul %83, %85, %cst_63 {dimension_numbers = #tpu.dot_dimension_numbers<[1], [0], [0], [1], [0, 0, 1, 1], [], []>} : vector<88x16xf32>, vector<16x32xf32>, vector<88x32xf32> -> vector<88x32xf32>
    %87 = arith.addf %82, %86 : vector<88x32xf32>
    %88 = vector.extract_strided_slice %58 {offsets = [6, 0], sizes = [88, 16], strides = [1, 1]} : vector<96x16xf32> to vector<88x16xf32>
    %c6_64 = arith.constant 6 : index
    %c0_65 = arith.constant 0 : index
    %c0_66 = arith.constant 0 : index
    %89 = vector.load %arg4[%c6_64, %c0_65, %c0_66] : memref<9x16x32xf32, #tpu.memory_space<vmem>>, vector<1x16x32xf32>
    %90 = vector.shape_cast %89 : vector<1x16x32xf32> to vector<16x32xf32>
    %cst_67 = arith.constant dense<0.000000e+00> : vector<88x32xf32>
    %91 = tpu.matmul %88, %90, %cst_67 {dimension_numbers = #tpu.dot_dimension_numbers<[1], [0], [0], [1], [0, 0, 1, 1], [], []>} : vector<88x16xf32>, vector<16x32xf32>, vector<88x32xf32> -> vector<88x32xf32>
    %92 = arith.addf %87, %91 : vector<88x32xf32>
    %93 = vector.extract_strided_slice %58 {offsets = [7, 0], sizes = [88, 16], strides = [1, 1]} : vector<96x16xf32> to vector<88x16xf32>
    %c7_68 = arith.constant 7 : index
    %c0_69 = arith.constant 0 : index
    %c0_70 = arith.constant 0 : index
    %94 = vector.load %arg4[%c7_68, %c0_69, %c0_70] : memref<9x16x32xf32, #tpu.memory_space<vmem>>, vector<1x16x32xf32>
    %95 = vector.shape_cast %94 : vector<1x16x32xf32> to vector<16x32xf32>
    %cst_71 = arith.constant dense<0.000000e+00> : vector<88x32xf32>
    %96 = tpu.matmul %93, %95, %cst_71 {dimension_numbers = #tpu.dot_dimension_numbers<[1], [0], [0], [1], [0, 0, 1, 1], [], []>} : vector<88x16xf32>, vector<16x32xf32>, vector<88x32xf32> -> vector<88x32xf32>
    %97 = arith.addf %92, %96 : vector<88x32xf32>
    %98 = vector.extract_strided_slice %58 {offsets = [8, 0], sizes = [88, 16], strides = [1, 1]} : vector<96x16xf32> to vector<88x16xf32>
    %c8_72 = arith.constant 8 : index
    %c0_73 = arith.constant 0 : index
    %c0_74 = arith.constant 0 : index
    %99 = vector.load %arg4[%c8_72, %c0_73, %c0_74] : memref<9x16x32xf32, #tpu.memory_space<vmem>>, vector<1x16x32xf32>
    %100 = vector.shape_cast %99 : vector<1x16x32xf32> to vector<16x32xf32>
    %cst_75 = arith.constant dense<0.000000e+00> : vector<88x32xf32>
    %101 = tpu.matmul %98, %100, %cst_75 {dimension_numbers = #tpu.dot_dimension_numbers<[1], [0], [0], [1], [0, 0, 1, 1], [], []>} : vector<88x16xf32>, vector<16x32xf32>, vector<88x32xf32> -> vector<88x32xf32>
    %102 = arith.addf %97, %101 : vector<88x32xf32>
    %c0_76 = arith.constant 0 : index
    %c0_77 = arith.constant 0 : index
    %103 = vector.load %arg5[%c0_76, %c0_77] : memref<1x32xf32, #tpu.memory_space<vmem>>, vector<1x32xf32>
    %104 = vector.broadcast %103 : vector<1x32xf32> to vector<88x32xf32>
    %105 = arith.mulf %102, %104 : vector<88x32xf32>
    %c0_78 = arith.constant 0 : index
    %c0_79 = arith.constant 0 : index
    %106 = vector.load %arg6[%c0_78, %c0_79] : memref<1x32xf32, #tpu.memory_space<vmem>>, vector<1x32xf32>
    %107 = vector.broadcast %106 : vector<1x32xf32> to vector<88x32xf32>
    %108 = arith.addf %105, %107 : vector<88x32xf32>
    %cst_80 = arith.constant 0.000000e+00 : f32
    %109 = vector.broadcast %cst_80 : f32 to vector<88x32xf32>
    %110 = arith.maximumf %108, %109 : vector<88x32xf32>
    %c0_81 = arith.constant 0 : index
    %c0_82 = arith.constant 0 : index
    %111 = vector.load %arg9[%c0_81, %c0_82] : memref<44x88xf32, #tpu.memory_space<vmem>>, vector<44x88xf32>
    %cst_83 = arith.constant dense<0.000000e+00> : vector<44x32xf32>
    %112 = tpu.matmul %111, %110, %cst_83 {dimension_numbers = #tpu.dot_dimension_numbers<[1], [0], [0], [1], [0, 0, 1, 1], [], []>} : vector<44x88xf32>, vector<88x32xf32>, vector<44x32xf32> -> vector<44x32xf32>
    %c0_84 = arith.constant 0 : index
    %c0_85 = arith.constant 0 : index
    %113 = vector.load %arg10[%c0_84, %c0_85] : memref<44x88xf32, #tpu.memory_space<vmem>>, vector<44x88xf32>
    %cst_86 = arith.constant dense<0.000000e+00> : vector<44x32xf32>
    %114 = tpu.matmul %113, %110, %cst_86 {dimension_numbers = #tpu.dot_dimension_numbers<[1], [0], [0], [1], [0, 0, 1, 1], [], []>} : vector<44x88xf32>, vector<88x32xf32>, vector<44x32xf32> -> vector<44x32xf32>
    %115 = arith.maximumf %112, %114 : vector<44x32xf32>
    %c0_87 = arith.constant 0 : index
    %c0_88 = arith.constant 0 : index
    %c0_89 = arith.constant 0 : index
    %116 = vector.load %arg11[%c0_87, %c0_88, %c0_89] : memref<2x44x32xf32, #tpu.memory_space<vmem>>, vector<1x44x32xf32>
    %117 = vector.shape_cast %116 : vector<1x44x32xf32> to vector<44x32xf32>
    %118 = vector.shape_cast %115 : vector<44x32xf32> to vector<1x44x32xf32>
    tpu.vector_store %arg11[%c0_87, %c0_88, %c0_89], %118 {strides = array<i32>} : memref<2x44x32xf32, #tpu.memory_space<vmem>>, vector<1x44x32xf32>,
    %c1_90 = arith.constant 1 : index
    %c0_91 = arith.constant 0 : index
    %c0_92 = arith.constant 0 : index
    %119 = vector.load %arg0[%c1_90, %c0_91, %c0_92] : memref<2x200x27xf32, #tpu.memory_space<vmem>>, vector<1x200x27xf32>
    %120 = vector.shape_cast %119 : vector<1x200x27xf32> to vector<200x27xf32>
    %121 = vector.extract_strided_slice %120 {offsets = [0, 0], sizes = [192, 27], strides = [1, 1]} : vector<200x27xf32> to vector<192x27xf32>
    %c0_93 = arith.constant 0 : index
    %c0_94 = arith.constant 0 : index
    %c0_95 = arith.constant 0 : index
    %122 = vector.load %arg1[%c0_93, %c0_94, %c0_95] : memref<9x27x16xf32, #tpu.memory_space<vmem>>, vector<1x27x16xf32>
    %123 = vector.shape_cast %122 : vector<1x27x16xf32> to vector<27x16xf32>
    %cst_96 = arith.constant dense<0.000000e+00> : vector<192x16xf32>
    %124 = tpu.matmul %121, %123, %cst_96 {dimension_numbers = #tpu.dot_dimension_numbers<[1], [0], [0], [1], [0, 0, 1, 1], [], []>} : vector<192x27xf32>, vector<27x16xf32>, vector<192x16xf32> -> vector<192x16xf32>
    %125 = vector.extract_strided_slice %120 {offsets = [1, 0], sizes = [192, 27], strides = [1, 1]} : vector<200x27xf32> to vector<192x27xf32>
    %c1_97 = arith.constant 1 : index
    %c0_98 = arith.constant 0 : index
    %c0_99 = arith.constant 0 : index
    %126 = vector.load %arg1[%c1_97, %c0_98, %c0_99] : memref<9x27x16xf32, #tpu.memory_space<vmem>>, vector<1x27x16xf32>
    %127 = vector.shape_cast %126 : vector<1x27x16xf32> to vector<27x16xf32>
    %cst_100 = arith.constant dense<0.000000e+00> : vector<192x16xf32>
    %128 = tpu.matmul %125, %127, %cst_100 {dimension_numbers = #tpu.dot_dimension_numbers<[1], [0], [0], [1], [0, 0, 1, 1], [], []>} : vector<192x27xf32>, vector<27x16xf32>, vector<192x16xf32> -> vector<192x16xf32>
    %129 = arith.addf %124, %128 : vector<192x16xf32>
    %130 = vector.extract_strided_slice %120 {offsets = [2, 0], sizes = [192, 27], strides = [1, 1]} : vector<200x27xf32> to vector<192x27xf32>
    %c2_101 = arith.constant 2 : index
    %c0_102 = arith.constant 0 : index
    %c0_103 = arith.constant 0 : index
    %131 = vector.load %arg1[%c2_101, %c0_102, %c0_103] : memref<9x27x16xf32, #tpu.memory_space<vmem>>, vector<1x27x16xf32>
    %132 = vector.shape_cast %131 : vector<1x27x16xf32> to vector<27x16xf32>
    %cst_104 = arith.constant dense<0.000000e+00> : vector<192x16xf32>
    %133 = tpu.matmul %130, %132, %cst_104 {dimension_numbers = #tpu.dot_dimension_numbers<[1], [0], [0], [1], [0, 0, 1, 1], [], []>} : vector<192x27xf32>, vector<27x16xf32>, vector<192x16xf32> -> vector<192x16xf32>
    %134 = arith.addf %129, %133 : vector<192x16xf32>
    %135 = vector.extract_strided_slice %120 {offsets = [3, 0], sizes = [192, 27], strides = [1, 1]} : vector<200x27xf32> to vector<192x27xf32>
    %c3_105 = arith.constant 3 : index
    %c0_106 = arith.constant 0 : index
    %c0_107 = arith.constant 0 : index
    %136 = vector.load %arg1[%c3_105, %c0_106, %c0_107] : memref<9x27x16xf32, #tpu.memory_space<vmem>>, vector<1x27x16xf32>
    %137 = vector.shape_cast %136 : vector<1x27x16xf32> to vector<27x16xf32>
    %cst_108 = arith.constant dense<0.000000e+00> : vector<192x16xf32>
    %138 = tpu.matmul %135, %137, %cst_108 {dimension_numbers = #tpu.dot_dimension_numbers<[1], [0], [0], [1], [0, 0, 1, 1], [], []>} : vector<192x27xf32>, vector<27x16xf32>, vector<192x16xf32> -> vector<192x16xf32>
    %139 = arith.addf %134, %138 : vector<192x16xf32>
    %140 = vector.extract_strided_slice %120 {offsets = [4, 0], sizes = [192, 27], strides = [1, 1]} : vector<200x27xf32> to vector<192x27xf32>
    %c4_109 = arith.constant 4 : index
    %c0_110 = arith.constant 0 : index
    %c0_111 = arith.constant 0 : index
    %141 = vector.load %arg1[%c4_109, %c0_110, %c0_111] : memref<9x27x16xf32, #tpu.memory_space<vmem>>, vector<1x27x16xf32>
    %142 = vector.shape_cast %141 : vector<1x27x16xf32> to vector<27x16xf32>
    %cst_112 = arith.constant dense<0.000000e+00> : vector<192x16xf32>
    %143 = tpu.matmul %140, %142, %cst_112 {dimension_numbers = #tpu.dot_dimension_numbers<[1], [0], [0], [1], [0, 0, 1, 1], [], []>} : vector<192x27xf32>, vector<27x16xf32>, vector<192x16xf32> -> vector<192x16xf32>
    %144 = arith.addf %139, %143 : vector<192x16xf32>
    %145 = vector.extract_strided_slice %120 {offsets = [5, 0], sizes = [192, 27], strides = [1, 1]} : vector<200x27xf32> to vector<192x27xf32>
    %c5_113 = arith.constant 5 : index
    %c0_114 = arith.constant 0 : index
    %c0_115 = arith.constant 0 : index
    %146 = vector.load %arg1[%c5_113, %c0_114, %c0_115] : memref<9x27x16xf32, #tpu.memory_space<vmem>>, vector<1x27x16xf32>
    %147 = vector.shape_cast %146 : vector<1x27x16xf32> to vector<27x16xf32>
    %cst_116 = arith.constant dense<0.000000e+00> : vector<192x16xf32>
    %148 = tpu.matmul %145, %147, %cst_116 {dimension_numbers = #tpu.dot_dimension_numbers<[1], [0], [0], [1], [0, 0, 1, 1], [], []>} : vector<192x27xf32>, vector<27x16xf32>, vector<192x16xf32> -> vector<192x16xf32>
    %149 = arith.addf %144, %148 : vector<192x16xf32>
    %150 = vector.extract_strided_slice %120 {offsets = [6, 0], sizes = [192, 27], strides = [1, 1]} : vector<200x27xf32> to vector<192x27xf32>
    %c6_117 = arith.constant 6 : index
    %c0_118 = arith.constant 0 : index
    %c0_119 = arith.constant 0 : index
    %151 = vector.load %arg1[%c6_117, %c0_118, %c0_119] : memref<9x27x16xf32, #tpu.memory_space<vmem>>, vector<1x27x16xf32>
    %152 = vector.shape_cast %151 : vector<1x27x16xf32> to vector<27x16xf32>
    %cst_120 = arith.constant dense<0.000000e+00> : vector<192x16xf32>
    %153 = tpu.matmul %150, %152, %cst_120 {dimension_numbers = #tpu.dot_dimension_numbers<[1], [0], [0], [1], [0, 0, 1, 1], [], []>} : vector<192x27xf32>, vector<27x16xf32>, vector<192x16xf32> -> vector<192x16xf32>
    %154 = arith.addf %149, %153 : vector<192x16xf32>
    %155 = vector.extract_strided_slice %120 {offsets = [7, 0], sizes = [192, 27], strides = [1, 1]} : vector<200x27xf32> to vector<192x27xf32>
    %c7_121 = arith.constant 7 : index
    %c0_122 = arith.constant 0 : index
    %c0_123 = arith.constant 0 : index
    %156 = vector.load %arg1[%c7_121, %c0_122, %c0_123] : memref<9x27x16xf32, #tpu.memory_space<vmem>>, vector<1x27x16xf32>
    %157 = vector.shape_cast %156 : vector<1x27x16xf32> to vector<27x16xf32>
    %cst_124 = arith.constant dense<0.000000e+00> : vector<192x16xf32>
    %158 = tpu.matmul %155, %157, %cst_124 {dimension_numbers = #tpu.dot_dimension_numbers<[1], [0], [0], [1], [0, 0, 1, 1], [], []>} : vector<192x27xf32>, vector<27x16xf32>, vector<192x16xf32> -> vector<192x16xf32>
    %159 = arith.addf %154, %158 : vector<192x16xf32>
    %160 = vector.extract_strided_slice %120 {offsets = [8, 0], sizes = [192, 27], strides = [1, 1]} : vector<200x27xf32> to vector<192x27xf32>
    %c8_125 = arith.constant 8 : index
    %c0_126 = arith.constant 0 : index
    %c0_127 = arith.constant 0 : index
    %161 = vector.load %arg1[%c8_125, %c0_126, %c0_127] : memref<9x27x16xf32, #tpu.memory_space<vmem>>, vector<1x27x16xf32>
    %162 = vector.shape_cast %161 : vector<1x27x16xf32> to vector<27x16xf32>
    %cst_128 = arith.constant dense<0.000000e+00> : vector<192x16xf32>
    %163 = tpu.matmul %160, %162, %cst_128 {dimension_numbers = #tpu.dot_dimension_numbers<[1], [0], [0], [1], [0, 0, 1, 1], [], []>} : vector<192x27xf32>, vector<27x16xf32>, vector<192x16xf32> -> vector<192x16xf32>
    %164 = arith.addf %159, %163 : vector<192x16xf32>
    %c0_129 = arith.constant 0 : index
    %c0_130 = arith.constant 0 : index
    %165 = vector.load %arg2[%c0_129, %c0_130] : memref<1x16xf32, #tpu.memory_space<vmem>>, vector<1x16xf32>
    %166 = vector.broadcast %165 : vector<1x16xf32> to vector<192x16xf32>
    %167 = arith.mulf %164, %166 : vector<192x16xf32>
    %c0_131 = arith.constant 0 : index
    %c0_132 = arith.constant 0 : index
    %168 = vector.load %arg3[%c0_131, %c0_132] : memref<1x16xf32, #tpu.memory_space<vmem>>, vector<1x16xf32>
    %169 = vector.broadcast %168 : vector<1x16xf32> to vector<192x16xf32>
    %170 = arith.addf %167, %169 : vector<192x16xf32>
    %cst_133 = arith.constant 0.000000e+00 : f32
    %171 = vector.broadcast %cst_133 : f32 to vector<192x16xf32>
    %172 = arith.maximumf %170, %171 : vector<192x16xf32>
    %c0_134 = arith.constant 0 : index
    %c0_135 = arith.constant 0 : index
    %173 = vector.load %arg7[%c0_134, %c0_135] : memref<96x192xf32, #tpu.memory_space<vmem>>, vector<96x192xf32>
    %cst_136 = arith.constant dense<0.000000e+00> : vector<96x16xf32>
    %174 = tpu.matmul %173, %172, %cst_136 {dimension_numbers = #tpu.dot_dimension_numbers<[1], [0], [0], [1], [0, 0, 1, 1], [], []>} : vector<96x192xf32>, vector<192x16xf32>, vector<96x16xf32> -> vector<96x16xf32>
    %c0_137 = arith.constant 0 : index
    %c0_138 = arith.constant 0 : index
    %175 = vector.load %arg8[%c0_137, %c0_138] : memref<96x192xf32, #tpu.memory_space<vmem>>, vector<96x192xf32>
    %cst_139 = arith.constant dense<0.000000e+00> : vector<96x16xf32>
    %176 = tpu.matmul %175, %172, %cst_139 {dimension_numbers = #tpu.dot_dimension_numbers<[1], [0], [0], [1], [0, 0, 1, 1], [], []>} : vector<96x192xf32>, vector<192x16xf32>, vector<96x16xf32> -> vector<96x16xf32>
    %177 = arith.maximumf %174, %176 : vector<96x16xf32>
    %178 = vector.extract_strided_slice %177 {offsets = [0, 0], sizes = [88, 16], strides = [1, 1]} : vector<96x16xf32> to vector<88x16xf32>
    %c0_140 = arith.constant 0 : index
    %c0_141 = arith.constant 0 : index
    %c0_142 = arith.constant 0 : index
    %179 = vector.load %arg4[%c0_140, %c0_141, %c0_142] : memref<9x16x32xf32, #tpu.memory_space<vmem>>, vector<1x16x32xf32>
    %180 = vector.shape_cast %179 : vector<1x16x32xf32> to vector<16x32xf32>
    %cst_143 = arith.constant dense<0.000000e+00> : vector<88x32xf32>
    %181 = tpu.matmul %178, %180, %cst_143 {dimension_numbers = #tpu.dot_dimension_numbers<[1], [0], [0], [1], [0, 0, 1, 1], [], []>} : vector<88x16xf32>, vector<16x32xf32>, vector<88x32xf32> -> vector<88x32xf32>
    %182 = vector.extract_strided_slice %177 {offsets = [1, 0], sizes = [88, 16], strides = [1, 1]} : vector<96x16xf32> to vector<88x16xf32>
    %c1_144 = arith.constant 1 : index
    %c0_145 = arith.constant 0 : index
    %c0_146 = arith.constant 0 : index
    %183 = vector.load %arg4[%c1_144, %c0_145, %c0_146] : memref<9x16x32xf32, #tpu.memory_space<vmem>>, vector<1x16x32xf32>
    %184 = vector.shape_cast %183 : vector<1x16x32xf32> to vector<16x32xf32>
    %cst_147 = arith.constant dense<0.000000e+00> : vector<88x32xf32>
    %185 = tpu.matmul %182, %184, %cst_147 {dimension_numbers = #tpu.dot_dimension_numbers<[1], [0], [0], [1], [0, 0, 1, 1], [], []>} : vector<88x16xf32>, vector<16x32xf32>, vector<88x32xf32> -> vector<88x32xf32>
    %186 = arith.addf %181, %185 : vector<88x32xf32>
    %187 = vector.extract_strided_slice %177 {offsets = [2, 0], sizes = [88, 16], strides = [1, 1]} : vector<96x16xf32> to vector<88x16xf32>
    %c2_148 = arith.constant 2 : index
    %c0_149 = arith.constant 0 : index
    %c0_150 = arith.constant 0 : index
    %188 = vector.load %arg4[%c2_148, %c0_149, %c0_150] : memref<9x16x32xf32, #tpu.memory_space<vmem>>, vector<1x16x32xf32>
    %189 = vector.shape_cast %188 : vector<1x16x32xf32> to vector<16x32xf32>
    %cst_151 = arith.constant dense<0.000000e+00> : vector<88x32xf32>
    %190 = tpu.matmul %187, %189, %cst_151 {dimension_numbers = #tpu.dot_dimension_numbers<[1], [0], [0], [1], [0, 0, 1, 1], [], []>} : vector<88x16xf32>, vector<16x32xf32>, vector<88x32xf32> -> vector<88x32xf32>
    %191 = arith.addf %186, %190 : vector<88x32xf32>
    %192 = vector.extract_strided_slice %177 {offsets = [3, 0], sizes = [88, 16], strides = [1, 1]} : vector<96x16xf32> to vector<88x16xf32>
    %c3_152 = arith.constant 3 : index
    %c0_153 = arith.constant 0 : index
    %c0_154 = arith.constant 0 : index
    %193 = vector.load %arg4[%c3_152, %c0_153, %c0_154] : memref<9x16x32xf32, #tpu.memory_space<vmem>>, vector<1x16x32xf32>
    %194 = vector.shape_cast %193 : vector<1x16x32xf32> to vector<16x32xf32>
    %cst_155 = arith.constant dense<0.000000e+00> : vector<88x32xf32>
    %195 = tpu.matmul %192, %194, %cst_155 {dimension_numbers = #tpu.dot_dimension_numbers<[1], [0], [0], [1], [0, 0, 1, 1], [], []>} : vector<88x16xf32>, vector<16x32xf32>, vector<88x32xf32> -> vector<88x32xf32>
    %196 = arith.addf %191, %195 : vector<88x32xf32>
    %197 = vector.extract_strided_slice %177 {offsets = [4, 0], sizes = [88, 16], strides = [1, 1]} : vector<96x16xf32> to vector<88x16xf32>
    %c4_156 = arith.constant 4 : index
    %c0_157 = arith.constant 0 : index
    %c0_158 = arith.constant 0 : index
    %198 = vector.load %arg4[%c4_156, %c0_157, %c0_158] : memref<9x16x32xf32, #tpu.memory_space<vmem>>, vector<1x16x32xf32>
    %199 = vector.shape_cast %198 : vector<1x16x32xf32> to vector<16x32xf32>
    %cst_159 = arith.constant dense<0.000000e+00> : vector<88x32xf32>
    %200 = tpu.matmul %197, %199, %cst_159 {dimension_numbers = #tpu.dot_dimension_numbers<[1], [0], [0], [1], [0, 0, 1, 1], [], []>} : vector<88x16xf32>, vector<16x32xf32>, vector<88x32xf32> -> vector<88x32xf32>
    %201 = arith.addf %196, %200 : vector<88x32xf32>
    %202 = vector.extract_strided_slice %177 {offsets = [5, 0], sizes = [88, 16], strides = [1, 1]} : vector<96x16xf32> to vector<88x16xf32>
    %c5_160 = arith.constant 5 : index
    %c0_161 = arith.constant 0 : index
    %c0_162 = arith.constant 0 : index
    %203 = vector.load %arg4[%c5_160, %c0_161, %c0_162] : memref<9x16x32xf32, #tpu.memory_space<vmem>>, vector<1x16x32xf32>
    %204 = vector.shape_cast %203 : vector<1x16x32xf32> to vector<16x32xf32>
    %cst_163 = arith.constant dense<0.000000e+00> : vector<88x32xf32>
    %205 = tpu.matmul %202, %204, %cst_163 {dimension_numbers = #tpu.dot_dimension_numbers<[1], [0], [0], [1], [0, 0, 1, 1], [], []>} : vector<88x16xf32>, vector<16x32xf32>, vector<88x32xf32> -> vector<88x32xf32>
    %206 = arith.addf %201, %205 : vector<88x32xf32>
    %207 = vector.extract_strided_slice %177 {offsets = [6, 0], sizes = [88, 16], strides = [1, 1]} : vector<96x16xf32> to vector<88x16xf32>
    %c6_164 = arith.constant 6 : index
    %c0_165 = arith.constant 0 : index
    %c0_166 = arith.constant 0 : index
    %208 = vector.load %arg4[%c6_164, %c0_165, %c0_166] : memref<9x16x32xf32, #tpu.memory_space<vmem>>, vector<1x16x32xf32>
    %209 = vector.shape_cast %208 : vector<1x16x32xf32> to vector<16x32xf32>
    %cst_167 = arith.constant dense<0.000000e+00> : vector<88x32xf32>
    %210 = tpu.matmul %207, %209, %cst_167 {dimension_numbers = #tpu.dot_dimension_numbers<[1], [0], [0], [1], [0, 0, 1, 1], [], []>} : vector<88x16xf32>, vector<16x32xf32>, vector<88x32xf32> -> vector<88x32xf32>
    %211 = arith.addf %206, %210 : vector<88x32xf32>
    %212 = vector.extract_strided_slice %177 {offsets = [7, 0], sizes = [88, 16], strides = [1, 1]} : vector<96x16xf32> to vector<88x16xf32>
    %c7_168 = arith.constant 7 : index
    %c0_169 = arith.constant 0 : index
    %c0_170 = arith.constant 0 : index
    %213 = vector.load %arg4[%c7_168, %c0_169, %c0_170] : memref<9x16x32xf32, #tpu.memory_space<vmem>>, vector<1x16x32xf32>
    %214 = vector.shape_cast %213 : vector<1x16x32xf32> to vector<16x32xf32>
    %cst_171 = arith.constant dense<0.000000e+00> : vector<88x32xf32>
    %215 = tpu.matmul %212, %214, %cst_171 {dimension_numbers = #tpu.dot_dimension_numbers<[1], [0], [0], [1], [0, 0, 1, 1], [], []>} : vector<88x16xf32>, vector<16x32xf32>, vector<88x32xf32> -> vector<88x32xf32>
    %216 = arith.addf %211, %215 : vector<88x32xf32>
    %217 = vector.extract_strided_slice %177 {offsets = [8, 0], sizes = [88, 16], strides = [1, 1]} : vector<96x16xf32> to vector<88x16xf32>
    %c8_172 = arith.constant 8 : index
    %c0_173 = arith.constant 0 : index
    %c0_174 = arith.constant 0 : index
    %218 = vector.load %arg4[%c8_172, %c0_173, %c0_174] : memref<9x16x32xf32, #tpu.memory_space<vmem>>, vector<1x16x32xf32>
    %219 = vector.shape_cast %218 : vector<1x16x32xf32> to vector<16x32xf32>
    %cst_175 = arith.constant dense<0.000000e+00> : vector<88x32xf32>
    %220 = tpu.matmul %217, %219, %cst_175 {dimension_numbers = #tpu.dot_dimension_numbers<[1], [0], [0], [1], [0, 0, 1, 1], [], []>} : vector<88x16xf32>, vector<16x32xf32>, vector<88x32xf32> -> vector<88x32xf32>
    %221 = arith.addf %216, %220 : vector<88x32xf32>
    %c0_176 = arith.constant 0 : index
    %c0_177 = arith.constant 0 : index
    %222 = vector.load %arg5[%c0_176, %c0_177] : memref<1x32xf32, #tpu.memory_space<vmem>>, vector<1x32xf32>
    %223 = vector.broadcast %222 : vector<1x32xf32> to vector<88x32xf32>
    %224 = arith.mulf %221, %223 : vector<88x32xf32>
    %c0_178 = arith.constant 0 : index
    %c0_179 = arith.constant 0 : index
    %225 = vector.load %arg6[%c0_178, %c0_179] : memref<1x32xf32, #tpu.memory_space<vmem>>, vector<1x32xf32>
    %226 = vector.broadcast %225 : vector<1x32xf32> to vector<88x32xf32>
    %227 = arith.addf %224, %226 : vector<88x32xf32>
    %cst_180 = arith.constant 0.000000e+00 : f32
    %228 = vector.broadcast %cst_180 : f32 to vector<88x32xf32>
    %229 = arith.maximumf %227, %228 : vector<88x32xf32>
    %c0_181 = arith.constant 0 : index
    %c0_182 = arith.constant 0 : index
    %230 = vector.load %arg9[%c0_181, %c0_182] : memref<44x88xf32, #tpu.memory_space<vmem>>, vector<44x88xf32>
    %cst_183 = arith.constant dense<0.000000e+00> : vector<44x32xf32>
    %231 = tpu.matmul %230, %229, %cst_183 {dimension_numbers = #tpu.dot_dimension_numbers<[1], [0], [0], [1], [0, 0, 1, 1], [], []>} : vector<44x88xf32>, vector<88x32xf32>, vector<44x32xf32> -> vector<44x32xf32>
    %c0_184 = arith.constant 0 : index
    %c0_185 = arith.constant 0 : index
    %232 = vector.load %arg10[%c0_184, %c0_185] : memref<44x88xf32, #tpu.memory_space<vmem>>, vector<44x88xf32>
    %cst_186 = arith.constant dense<0.000000e+00> : vector<44x32xf32>
    %233 = tpu.matmul %232, %229, %cst_186 {dimension_numbers = #tpu.dot_dimension_numbers<[1], [0], [0], [1], [0, 0, 1, 1], [], []>} : vector<44x88xf32>, vector<88x32xf32>, vector<44x32xf32> -> vector<44x32xf32>
    %234 = arith.maximumf %231, %233 : vector<44x32xf32>
    %c1_187 = arith.constant 1 : index
    %c0_188 = arith.constant 0 : index
    %c0_189 = arith.constant 0 : index
    %235 = vector.load %arg11[%c1_187, %c0_188, %c0_189] : memref<2x44x32xf32, #tpu.memory_space<vmem>>, vector<1x44x32xf32>
    %236 = vector.shape_cast %235 : vector<1x44x32xf32> to vector<44x32xf32>
    %237 = vector.shape_cast %234 : vector<44x32xf32> to vector<1x44x32xf32>
    tpu.vector_store %arg11[%c1_187, %c0_188, %c0_189], %237 {strides = array<i32>} : memref<2x44x32xf32, #tpu.memory_space<vmem>>, vector<1x44x32xf32>,
    return
  }
}

</mosaic_0001>

<bundles_post_ra>
// kernel: pamap_forward.3
= control target key start
LH: loop header
LB: loop body
LE: loop exit
PB: predicated region body
PF: predicated region fallthrough
CT: control target
= control target key end

     0   :  { %s1145_s0 = inlined_call_operand.vmem [shape: f32[2,1408], index: 0, kind: input, shape index: {}]   ;;  %s1146_s1 = inlined_call_operand.vmem [shape: f32[1408,64], index: 1, kind: input, shape index: {}]   ;;  %s1147_s2 = inlined_call_operand.vmem [shape: f32[1,64], index: 2, kind: input, shape index: {}]   ;;  %s1148_s3 = inlined_call_operand.vmem [shape: f32[64,10], index: 3, kind: input, shape index: {}]   ;;  %s1149_s4 = inlined_call_operand.vmem [shape: f32[1,10], index: 4, kind: input, shape index: {}]   ;;  %s1150_s5 = inlined_call_operand.hbm [shape: f32[2,10], index: 5, kind: output, shape index: {}]  }
   0x1   :  { %v39_v0 = vld [vmem:[%s1146_s1 + $0x78] sm:$0xff]  ;;  %v38_v2 = vld [vmem:[%s1146_s1 + $0x70] sm:$0xff]  ;;  %v37_v5 = vld [vmem:[%s1146_s1 + $0x68] sm:$0xff] }
   0x2   :  { %v71_v1 = vld [vmem:[%s1146_s1 + $0x178] sm:$0xff]  ;;  %233 = vmatpush.msra.mxu0 %v39_v0  ;;  %v70_v4 = vld [vmem:[%s1146_s1 + $0x170] sm:$0xff]  ;;  %v69_v7 = vld [vmem:[%s1146_s1 + $0x168] sm:$0xff] }
   0x3   :  { %273 = vmatpush.msra.mxu2 %v71_v1  ;;  %v55_v3 = vld [vmem:[%s1146_s1 + $0xf8] sm:$0xff]  ;;  %v54_v6 = vld [vmem:[%s1146_s1 + $0xf0] sm:$0xff]  ;;  %v53_v8 = vld [vmem:[%s1146_s1 + $0xe8] sm:$0xff] }
   0x4   :  { %253 = vmatpush.msra.mxu1 %v55_v3  ;;  %234 = vmatpush.msra.mxu0 %v38_v2  ;;  %v36_v9 = vld [vmem:[%s1146_s1 + $0x60] sm:$0xff]  ;;  %v87_v12 = vld [vmem:[%s1146_s1 + $0x1f8] sm:$0xff]  ;;  %v86_v16 = vld [vmem:[%s1146_s1 + $0x1f0] sm:$0xff] }
   0x5   :  { %274 = vmatpush.msra.mxu2 %v70_v4  ;;  %v68_v10 = vld [vmem:[%s1146_s1 + $0x160] sm:$0xff]  ;;  %v35_v13 = vld [vmem:[%s1146_s1 + $0x58] sm:$0xff]  ;;  %293 = vmatpush.msra.mxu3 %v87_v12  ;;  %v34_v17 = vld [vmem:[%s1146_s1 + $0x50] sm:$0xff] }
   0x6   :  { %254 = vmatpush.msra.mxu1 %v54_v6  ;;  %235 = vmatpush.msra.mxu0 %v37_v5  ;;  %v52_v11 = vld [vmem:[%s1146_s1 + $0xe0] sm:$0xff]  ;;  %v67_v14 = vld [vmem:[%s1146_s1 + $0x158] sm:$0xff]  ;;  %v66_v18 = vld [vmem:[%s1146_s1 + $0x150] sm:$0xff] }
   0x7   :  { %275 = vmatpush.msra.mxu2 %v69_v7  ;;  %v51_v15 = vld [vmem:[%s1146_s1 + $0xd8] sm:$0xff]  ;;  %294 = vmatpush.msra.mxu3 %v86_v16  ;;  %v85_v19 = vld [vmem:[%s1146_s1 + $0x1e8] sm:$0xff]  ;;  %v50_v20 = vld [vmem:[%s1146_s1 + $0xd0] sm:$0xff] }
   0x8   :  { %255 = vmatpush.msra.mxu1 %v53_v8  ;;  %236 = vmatpush.msra.mxu0 %v36_v9  ;;  %v84_v21 = vld [vmem:[%s1146_s1 + $0x1e0] sm:$0xff]  ;;  %v33_v22 = vld [vmem:[%s1146_s1 + $0x48] sm:$0xff]  ;;  %v83_v25 = vld [vmem:[%s1146_s1 + $0x1d8] sm:$0xff] }
   0x9   :  { %276 = vmatpush.msra.mxu2 %v68_v10  ;;  %v65_v23 = vld [vmem:[%s1146_s1 + $0x148] sm:$0xff]  ;;  %295 = vmatpush.msra.mxu3 %v85_v19  ;;  %v32_v26 = vld [vmem:[%s1146_s1 + $0x40] sm:$0xff]  ;;  %v82_v29 = vld [vmem:[%s1146_s1 + $0x1d0] sm:$0xff] }
   0xa   :  { %256 = vmatpush.msra.mxu1 %v52_v11  ;;  %237 = vmatpush.msra.mxu0 %v35_v13  ;;  %v49_v24 = vld [vmem:[%s1146_s1 + $0xc8] sm:$0xff]  ;;  %v64_v27 = vld [vmem:[%s1146_s1 + $0x140] sm:$0xff]  ;;  %v31_v30 = vld [vmem:[%s1146_s1 + $0x38] sm:$0xff] }
   0xb   :  { %277 = vmatpush.msra.mxu2 %v67_v14  ;;  %296 = vmatpush.msra.mxu3 %v84_v21  ;;  %v48_v28 = vld [vmem:[%s1146_s1 + $0xc0] sm:$0xff]  ;;  %v63_v31 = vld [vmem:[%s1146_s1 + $0x138] sm:$0xff]  ;;  %v81_v33 = vld [vmem:[%s1146_s1 + $0x1c8] sm:$0xff] }
   0xc   :  { %257 = vmatpush.msra.mxu1 %v51_v15  ;;  %238 = vmatpush.msra.mxu0 %v34_v17  ;;  %v47_v32 = vld [vmem:[%s1146_s1 + $0xb8] sm:$0xff]  ;;  %v30_v34 = vld [vmem:[%s1146_s1 + $0x30] sm:$0xff]  ;;  %v80_v37 = vld [vmem:[%s1146_s1 + $0x1c0] sm:$0xff] }
   0xd   :  { %278 = vmatpush.msra.mxu2 %v66_v18  ;;  %297 = vmatpush.msra.mxu3 %v83_v25  ;;  %v62_v35 = vld [vmem:[%s1146_s1 + $0x130] sm:$0xff]  ;;  %v29_v38 = vld [vmem:[%s1146_s1 + $0x28] sm:$0xff]  ;;  %v79_v41 = vld [vmem:[%s1146_s1 + $0x1b8] sm:$0xff] }
   0xe   :  { %258 = vmatpush.msra.mxu1 %v50_v20  ;;  %239 = vmatpush.msra.mxu0 %v33_v22  ;;  %v46_v36 = vld [vmem:[%s1146_s1 + $0xb0] sm:$0xff]  ;;  %v61_v39 = vld [vmem:[%s1146_s1 + $0x128] sm:$0xff]  ;;  %v28_v42 = vld [vmem:[%s1146_s1 + $0x20] sm:$0xff] }
   0xf   :  { %279 = vmatpush.msra.mxu2 %v65_v23  ;;  %298 = vmatpush.msra.mxu3 %v82_v29  ;;  %v45_v40 = vld [vmem:[%s1146_s1 + $0xa8] sm:$0xff]  ;;  %v60_v43 = vld [vmem:[%s1146_s1 + $0x120] sm:$0xff]  ;;  %v78_v45 = vld [vmem:[%s1146_s1 + $0x1b0] sm:$0xff] }
  0x10   :  { %259 = vmatpush.msra.mxu1 %v49_v24  ;;  %240 = vmatpush.msra.mxu0 %v32_v26  ;;  %v44_v44 = vld [vmem:[%s1146_s1 + $0xa0] sm:$0xff]  ;;  %v27_v46 = vld [vmem:[%s1146_s1 + $0x18] sm:$0xff]  ;;  %v77_v49 = vld [vmem:[%s1146_s1 + $0x1a8] sm:$0xff] }
  0x11   :  { %280 = vmatpush.msra.mxu2 %v64_v27  ;;  %299 = vmatpush.msra.mxu3 %v81_v33  ;;  %v59_v47 = vld [vmem:[%s1146_s1 + $0x118] sm:$0xff]  ;;  %v26_v50 = vld [vmem:[%s1146_s1 + $0x10] sm:$0xff]  ;;  %v76_v53 = vld [vmem:[%s1146_s1 + $0x1a0] sm:$0xff] }
  0x12   :  { %260 = vmatpush.msra.mxu1 %v48_v28  ;;  %241 = vmatpush.msra.mxu0 %v31_v30  ;;  %v43_v48 = vld [vmem:[%s1146_s1 + $0x98] sm:$0xff]  ;;  %v58_v51 = vld [vmem:[%s1146_s1 + $0x110] sm:$0xff]  ;;  %v25_v54 = vld [vmem:[%s1146_s1 + $0x8] sm:$0xff] }
  0x13   :  { %281 = vmatpush.msra.mxu2 %v63_v31  ;;  %300 = vmatpush.msra.mxu3 %v80_v37  ;;  %v42_v52 = vld [vmem:[%s1146_s1 + $0x90] sm:$0xff]  ;;  %v57_v55 = vld [vmem:[%s1146_s1 + $0x108] sm:$0xff]  ;;  %v75_v57 = vld [vmem:[%s1146_s1 + $0x198] sm:$0xff] }
  0x14   :  { %261 = vmatpush.msra.mxu1 %v47_v32  ;;  %242 = vmatpush.msra.mxu0 %v30_v34  ;;  %v41_v56 = vld [vmem:[%s1146_s1 + $0x88] sm:$0xff]  ;;  %v24_v58 = vld [vmem:[%s1146_s1] sm:$0xff]  ;;  %v103_v60 = vld [vmem:[%s1146_s1 + $0x278] sm:$0xff] }
  0x15   :  { %282 = vmatpush.msra.mxu2 %v62_v35  ;;  %301 = vmatpush.msra.mxu3 %v79_v41  ;;  %v56_v59 = vld [vmem:[%s1146_s1 + $0x100] sm:$0xff]  ;;  %v135_v61 = vld [vmem:[%s1146_s1 + $0x378] sm:$0xff]  ;;  %v74_v63 = vld [vmem:[%s1146_s1 + $0x190] sm:$0xff] }
  0x16   :  { %262 = vmatpush.msra.mxu1 %v46_v36  ;;  %243 = vmatpush.msra.mxu0 %v29_v38  ;;  %v40_v62 = vld [vmem:[%s1146_s1 + $0x80] sm:$0xff]  ;;  %v102_v0 = vld [vmem:[%s1146_s1 + $0x270] sm:$0xff]  ;;  %v119_v1 = vld [vmem:[%s1146_s1 + $0x2f8] sm:$0xff] }
  0x17   :  { %283 = vmatpush.msra.mxu2 %v61_v39  ;;  %302 = vmatpush.msra.mxu3 %v78_v45  ;;  %v134_v2 = vld [vmem:[%s1146_s1 + $0x370] sm:$0xff]  ;;  %v73_v3 = vld [vmem:[%s1146_s1 + $0x188] sm:$0xff]  ;;  %v72_v7 = vld [vmem:[%s1146_s1 + $0x180] sm:$0xff] }
  0x18   :  { %263 = vmatpush.msra.mxu1 %v45_v40  ;;  %244 = vmatpush.msra.mxu0 %v28_v42  ;;  %v101_v4 = vld [vmem:[%s1146_s1 + $0x268] sm:$0xff]  ;;  %v118_v5 = vld [vmem:[%s1146_s1 + $0x2f0] sm:$0xff]  ;;  %v100_v8 = vld [vmem:[%s1146_s1 + $0x260] sm:$0xff] }
  0x19   :  { %284 = vmatpush.msra.mxu2 %v60_v43  ;;  %303 = vmatpush.msra.mxu3 %v77_v49  ;;  %v133_v6 = vld [vmem:[%s1146_s1 + $0x368] sm:$0xff]  ;;  %v132_v10 = vld [vmem:[%s1146_s1 + $0x360] sm:$0xff]  ;;  %v151_v11 = vld [vmem:[%s1146_s1 + $0x3f8] sm:$0xff] }
  0x1a   :  { %264 = vmatpush.msra.mxu1 %v44_v44  ;;  %245 = vmatpush.msra.mxu0 %v27_v46  ;;  %v117_v9 = vld [vmem:[%s1146_s1 + $0x2e8] sm:$0xff]  ;;  %v99_v12 = vld [vmem:[%s1146_s1 + $0x258] sm:$0xff]  ;;  %v116_v13 = vld [vmem:[%s1146_s1 + $0x2e0] sm:$0xff] }
  0x1b   :  { %285 = vmatpush.msra.mxu2 %v59_v47  ;;  %304 = vmatpush.msra.mxu3 %v76_v53  ;;  %v131_v14 = vld [vmem:[%s1146_s1 + $0x358] sm:$0xff]  ;;  %v150_v15 = vld [vmem:[%s1146_s1 + $0x3f0] sm:$0xff]  ;;  %v149_v19 = vld [vmem:[%s1146_s1 + $0x3e8] sm:$0xff] }
  0x1c   :  { %265 = vmatpush.msra.mxu1 %v43_v48  ;;  %246 = vmatpush.msra.mxu0 %v26_v50  ;;  %v98_v16 = vld [vmem:[%s1146_s1 + $0x250] sm:$0xff]  ;;  %v115_v17 = vld [vmem:[%s1146_s1 + $0x2d8] sm:$0xff]  ;;  %v21_v20 = vld [vmem:[%s1145_s0] sm:$0xff] }
  0x1d   :  { %286 = vmatpush.msra.mxu2 %v58_v51  ;;  %305 = vmatpush.msra.mxu3 %v75_v57  ;;  %v130_v18 = vld [vmem:[%s1146_s1 + $0x350] sm:$0xff]  ;;  %v97_v21 = vld [vmem:[%s1146_s1 + $0x248] sm:$0xff]  ;;  %207 = vst [vmem:[#allocation1] ss:$4 sm:$0xff] %v21_v20  ;;  %v148_v24 = vld [vmem:[%s1146_s1 + $0x3e0] sm:$0xff] }
  0x1e   :  { %266 = vmatpush.msra.mxu1 %v42_v52  ;;  %247 = vmatpush.msra.mxu0 %v25_v54  ;;  %v114_v22 = vld [vmem:[%s1146_s1 + $0x2d0] sm:$0xff]  ;;  %v129_v23 = vld [vmem:[%s1146_s1 + $0x348] sm:$0xff]  ;;  %v96_v25 = vld [vmem:[%s1146_s1 + $0x240] sm:$0xff] }
  0x1f   :  { %287 = vmatpush.msra.mxu2 %v57_v55  ;;  %306 = vmatpush.msra.mxu3 %v74_v63  ;;  %v113_v26 = vld [vmem:[%s1146_s1 + $0x2c8] sm:$0xff]  ;;  %v128_v27 = vld [vmem:[%s1146_s1 + $0x340] sm:$0xff]  ;;  %v95_v28 = vld [vmem:[%s1146_s1 + $0x238] sm:$0xff] }
  0x20   :  { %267 = vmatpush.msra.mxu1 %v41_v56  ;;  %248 = vmatpush.msra.mxu0 %v24_v58  ;;  %v112_v29 = vld [vmem:[%s1146_s1 + $0x2c0] sm:$0xff]  ;;  %v147_v30 = vld [vmem:[%s1146_s1 + $0x3d8] sm:$0xff]  ;;  %v94_v32 = vld [vmem:[%s1146_s1 + $0x230] sm:$0xff] }
  0x21   :  { %288 = vmatpush.msra.mxu2 %v56_v59  ;;  %307 = vmatpush.msra.mxu3 %v73_v3  ;;  %v127_v31 = vld [vmem:[%s1146_s1 + $0x338] sm:$0xff]  ;;  %v126_v34 = vld [vmem:[%s1146_s1 + $0x330] sm:$0xff]  ;;  %v22_v36 = vld [vmem:[%s1145_s0 + $0x8] sm:$0xff] }
  0x22   :  { %313 = vmatpush.msrb.mxu0 %v103_v60  ;;  %268 = vmatpush.msra.mxu1 %v40_v62  ;;  %v111_v33 = vld [vmem:[%s1146_s1 + $0x2b8] sm:$0xff]  ;;  %v146_v35 = vld [vmem:[%s1146_s1 + $0x3d0] sm:$0xff]  ;;  %v93_v37 = vld [vmem:[%s1146_s1 + $0x228] sm:$0xff]  ;;  %209 = vst [vmem:[#allocation1 + $0x20] ss:$4 sm:$0xff] %v22_v36 }
  0x23   :  { %353 = vmatpush.msrb.mxu2 %v135_v61  ;;  %308 = vmatpush.msra.mxu3 %v72_v7  ;;  %v110_v38 = vld [vmem:[%s1146_s1 + $0x2b0] sm:$0xff]  ;;  %v145_v39 = vld [vmem:[%s1146_s1 + $0x3c8] sm:$0xff]  ;;  %v144_v46 = vld [vmem:[%s1146_s1 + $0x3c0] sm:$0xff] }
  0x24   :  { %314 = vmatpush.msrb.mxu0 %v102_v0  ;;  %333 = vmatpush.msrb.mxu1 %v119_v1  ;;  %v23_v40 = vld [vmem:[%s1145_s0 + $0x10] sm:$0x3f]  ;;  %v210_v41 = vld.sshfl [vmem:[#allocation1] sm:$0xff pattern:$0x73625140]  ;;  %v125_v45 = vld [vmem:[%s1146_s1 + $0x328] sm:$0xff] }
  0x25   :  { %354 = vmatpush.msrb.mxu2 %v134_v2  ;;  %373 = vmatpush.msrb.mxu3 %v151_v11  ;;  %v212_v42 = vld.sshfl [vmem:[#allocation1 + $0x10] sm:$0xff pattern:$0x73625140]  ;;  %v884_v43 = vld.sshfl [vmem:[#allocation1 + $0x8] sm:$0xff pattern:$0x73625140] }
  0x26   :  { %315 = vmatpush.msrb.mxu0 %v101_v4  ;;  %334 = vmatpush.msrb.mxu1 %v118_v5  ;;  %v886_v44 = vld.sshfl [vmem:[#allocation1 + $0x18] sm:$0xff pattern:$0x73625140]  ;;  %v92_v47 = vld [vmem:[%s1146_s1 + $0x220] sm:$0xff]  ;;  %v109_v48 = vld [vmem:[%s1146_s1 + $0x2a8] sm:$0xff] }
  0x27   :  { %355 = vmatpush.msrb.mxu2 %v133_v6  ;;  %374 = vmatpush.msrb.mxu3 %v150_v15  ;;  %218 = vst [vmem:[#allocation1] ss:$4 sm:$0xff] %v23_v40  ;;  %v124_v49 = vld [vmem:[%s1146_s1 + $0x320] sm:$0xff]  ;;  %v143_v50 = vld [vmem:[%s1146_s1 + $0x3b8] sm:$0xff]  ;;  %v142_v54 = vld [vmem:[%s1146_s1 + $0x3b0] sm:$0xff] }
  0x28   :  { %316 = vmatpush.msrb.mxu0 %v100_v8  ;;  %335 = vmatpush.msrb.mxu1 %v117_v9  ;;  %v91_v51 = vld [vmem:[%s1146_s1 + $0x218] sm:$0xff]  ;;  %v108_v52 = vld [vmem:[%s1146_s1 + $0x2a0] sm:$0xff]  ;;  %v90_v55 = vld [vmem:[%s1146_s1 + $0x210] sm:$0xff] }
  0x29   :  { %356 = vmatpush.msrb.mxu2 %v132_v10  ;;  %375 = vmatpush.msrb.mxu3 %v149_v19  ;;  %v123_v53 = vld [vmem:[%s1146_s1 + $0x318] sm:$0xff]  ;;  %v122_v57 = vld [vmem:[%s1146_s1 + $0x310] sm:$0xff]  ;;  %v141_v58 = vld [vmem:[%s1146_s1 + $0x3a8] sm:$0xff] }
  0x2a   :  { %317 = vmatpush.msrb.mxu0 %v99_v12  ;;  %336 = vmatpush.msrb.mxu1 %v116_v13  ;;  %v107_v56 = vld [vmem:[%s1146_s1 + $0x298] sm:$0xff]  ;;  %v89_v59 = vld [vmem:[%s1146_s1 + $0x208] sm:$0xff]  ;;  %v106_v60 = vld [vmem:[%s1146_s1 + $0x290] sm:$0xff] }
  0x2b   :  { %357 = vmatpush.msrb.mxu2 %v131_v14  ;;  %376 = vmatpush.msrb.mxu3 %v148_v24  ;;  %v121_v61 = vld [vmem:[%s1146_s1 + $0x308] sm:$0xff]  ;;  %v88_v62 = vld [vmem:[%s1146_s1 + $0x200] sm:$0xff]  ;;  %v167_v1 = vld [vmem:[%s1146_s1 + $0x478] sm:$0xff] }
  0x2c   :  { %318 = vmatpush.msrb.mxu0 %v98_v16  ;;  %337 = vmatpush.msrb.mxu1 %v115_v17  ;;  %v105_v63 = vld [vmem:[%s1146_s1 + $0x288] sm:$0xff]  ;;  %v120_v0 = vld [vmem:[%s1146_s1 + $0x300] sm:$0xff]  ;;  %v199_v3 = vld [vmem:[%s1146_s1 + $0x578] sm:$0xff] }
  0x2d   :  { %358 = vmatpush.msrb.mxu2 %v130_v18  ;;  %377 = vmatpush.msrb.mxu3 %v147_v30  ;;  %v104_v2 = vld [vmem:[%s1146_s1 + $0x280] sm:$0xff] }
  0x2e   :  { %319 = vmatpush.msrb.mxu0 %v97_v21  ;;  %338 = vmatpush.msrb.mxu1 %v114_v22  ;;  %v140_v4 = vld [vmem:[%s1146_s1 + $0x3a0] sm:$0xff] }
  0x2f   :  { %359 = vmatpush.msrb.mxu2 %v129_v23  ;;  %378 = vmatpush.msrb.mxu3 %v146_v35 }
  0x30   :  { %320 = vmatpush.msrb.mxu0 %v96_v25  ;;  %339 = vmatpush.msrb.mxu1 %v113_v26 }
  0x31   :  { %360 = vmatpush.msrb.mxu2 %v128_v27  ;;  %379 = vmatpush.msrb.mxu3 %v145_v39 }
  0x32   :  { %321 = vmatpush.msrb.mxu0 %v95_v28  ;;  %340 = vmatpush.msrb.mxu1 %v112_v29 }
  0x33   :  { %361 = vmatpush.msrb.mxu2 %v127_v31  ;;  %380 = vmatpush.msrb.mxu3 %v144_v46 }
  0x34   :  { %322 = vmatpush.msrb.mxu0 %v94_v32  ;;  %341 = vmatpush.msrb.mxu1 %v111_v33 }
  0x35   :  { %362 = vmatpush.msrb.mxu2 %v126_v34  ;;  %381 = vmatpush.msrb.mxu3 %v143_v50 }
  0x36   :  { %323 = vmatpush.msrb.mxu0 %v93_v37  ;;  %342 = vmatpush.msrb.mxu1 %v110_v38 }
  0x37   :  { %363 = vmatpush.msrb.mxu2 %v125_v45  ;;  %382 = vmatpush.msrb.mxu3 %v142_v54 }
  0x38   :  { %324 = vmatpush.msrb.mxu0 %v92_v47  ;;  %343 = vmatpush.msrb.mxu1 %v109_v48 }
  0x39   :  { %364 = vmatpush.msrb.mxu2 %v124_v49  ;;  %383 = vmatpush.msrb.mxu3 %v141_v58 }
  0x3a   :  { %325 = vmatpush.msrb.mxu0 %v91_v51  ;;  %344 = vmatpush.msrb.mxu1 %v108_v52 }
  0x3b   :  { %365 = vmatpush.msrb.mxu2 %v123_v53  ;;  %249 = vmatmul.f32.vlgmr.msra.gmra.mxu0 %v210_v41 }
  0x3c   :  { %326 = vmatpush.msrb.mxu0 %v90_v55  ;;  %345 = vmatpush.msrb.mxu1 %v107_v56 }
  0x3d   :  { %366 = vmatpush.msrb.mxu2 %v122_v57 }
  0x3e   :  { %327 = vmatpush.msrb.mxu0 %v89_v59  ;;  %346 = vmatpush.msrb.mxu1 %v106_v60 }
  0x3f   :  { %367 = vmatpush.msrb.mxu2 %v121_v61 }
  0x40   :  { %328 = vmatpush.msrb.mxu0 %v88_v62  ;;  %347 = vmatpush.msrb.mxu1 %v105_v63 }
  0x41   :  { %368 = vmatpush.msrb.mxu2 %v120_v0 }
  0x42   :  { %393 = vmatpush.msra.mxu0 %v167_v1 }
  0x43   :  { %10 = vsyncpa [#allocation3], 0  ;;  %289 = vmatmul.f32.vlgmr.msra.gmra.mxu2 %v212_v42  ;;  %348 = vmatpush.msrb.mxu1 %v104_v2  ;;  %v166_v5 = vld [vmem:[%s1146_s1 + $0x470] sm:$0xff]  ;;  %v183_v6 = vld [vmem:[%s1146_s1 + $0x4f8] sm:$0xff]  ;;  %vm466_vm0 = vcmask 523264   ;;  %s538_s11 = smov [#allocation2]  }
  0x44   :  { %433 = vmatpush.msra.mxu2 %v199_v3  ;;  %384 = vmatpush.msrb.mxu3 %v140_v4  ;;  %v198_v7 = vld [vmem:[%s1146_s1 + $0x570] sm:$0xff]  ;;  %v139_v8 = vld [vmem:[%s1146_s1 + $0x398] sm:$0xff]  ;;  %v165_v9 = vld [vmem:[%s1146_s1 + $0x468] sm:$0xff]  ;;  %s497_s12 = sshll.u32 %s538_s11, 4  ;;  %s499_s15 = sshll.u32 %s1150_s5, 4  ;;  %vm490_vm1 = vcmask 74752   ;;  %s498_s12 = int_to_ptr.vmem [resolvable:$true] %s497_s12  ;;  %s500_s15 = int_to_ptr.hbm [resolvable:$true] %s499_s15 }
  0x45   :  { %269 = vmatmul.f32.vlgmr.msra.gmra.mxu1 %v884_v43  ;;  %309 = vmatmul.f32.vlgmr.msra.gmra.mxu3 %v886_v44  ;;  %v182_v10 = vld [vmem:[%s1146_s1 + $0x4f0] sm:$0xff]  ;;  %v197_v11 = vld [vmem:[%s1146_s1 + $0x568] sm:$0xff]  ;;  %v164_v13 = vld [vmem:[%s1146_s1 + $0x460] sm:$0xff] }
  0x46   :  { %394 = vmatpush.msra.mxu0 %v166_v5  ;;  %413 = vmatpush.msra.mxu1 %v183_v6  ;;  %v138_v12 = vld [vmem:[%s1146_s1 + $0x390] sm:$0xff]  ;;  %v181_v14 = vld [vmem:[%s1146_s1 + $0x4e8] sm:$0xff]  ;;  %v196_v15 = vld [vmem:[%s1146_s1 + $0x560] sm:$0xff] }
  0x47   :  { %434 = vmatpush.msra.mxu2 %v198_v7  ;;  %385 = vmatpush.msrb.mxu3 %v139_v8  ;;  %v137_v16 = vld [vmem:[%s1146_s1 + $0x388] sm:$0xff]  ;;  %v216_v17 = vld.sshfl [vmem:[#allocation1 + $0x30] sm:$0xff pattern:$0x73625140]  ;;  %v163_v18 = vld [vmem:[%s1146_s1 + $0x458] sm:$0xff] }
  0x48   :  { %395 = vmatpush.msra.mxu0 %v165_v9  ;;  %414 = vmatpush.msra.mxu1 %v182_v10  ;;  %v180_v19 = vld [vmem:[%s1146_s1 + $0x4e0] sm:$0xff]  ;;  %v195_v20 = vld [vmem:[%s1146_s1 + $0x558] sm:$0xff]  ;;  %v162_v24 = vld [vmem:[%s1146_s1 + $0x450] sm:$0xff] }
  0x49   :  { %435 = vmatpush.msra.mxu2 %v197_v11  ;;  %386 = vmatpush.msrb.mxu3 %v138_v12  ;;  %v136_v21 = vld [vmem:[%s1146_s1 + $0x380] sm:$0xff]  ;;  %v217_v23 = vld.sshfl [vmem:[#allocation1 + $0x38] sm:$0xff pattern:$0x73625140]  ;;  %v194_v26 = vld [vmem:[%s1146_s1 + $0x550] sm:$0xff] }
  0x4a   :  { %396 = vmatpush.msra.mxu0 %v164_v13  ;;  %415 = vmatpush.msra.mxu1 %v181_v14  ;;  %v214_v22 = vld.sshfl [vmem:[#allocation1 + $0x20] sm:$0xff pattern:$0x73625140]  ;;  %v179_v25 = vld [vmem:[%s1146_s1 + $0x4d8] sm:$0xff]  ;;  %v161_v28 = vld [vmem:[%s1146_s1 + $0x448] sm:$0xff] }
  0x4b   :  { %436 = vmatpush.msra.mxu2 %v196_v15  ;;  %387 = vmatpush.msrb.mxu3 %v137_v16  ;;  %v215_v27 = vld.sshfl [vmem:[#allocation1 + $0x28] sm:$0xff pattern:$0x73625140]  ;;  %v178_v29 = vld [vmem:[%s1146_s1 + $0x4d0] sm:$0xff]  ;;  %v160_v31 = vld [vmem:[%s1146_s1 + $0x440] sm:$0xff] }
  0x4c   :  { %369 = vmatmul.f32.vlgmr.msrb.gmra.mxu2 %v216_v17  ;;  %397 = vmatpush.msra.mxu0 %v163_v18  ;;  %v193_v30 = vld [vmem:[%s1146_s1 + $0x548] sm:$0xff]  ;;  %v192_v33 = vld [vmem:[%s1146_s1 + $0x540] sm:$0xff]  ;;  %v159_v34 = vld [vmem:[%s1146_s1 + $0x438] sm:$0xff] }
  0x4d   :  { %416 = vmatpush.msra.mxu1 %v180_v19  ;;  %437 = vmatpush.msra.mxu2 %v195_v20  ;;  %v177_v32 = vld [vmem:[%s1146_s1 + $0x4c8] sm:$0xff]  ;;  %v176_v35 = vld [vmem:[%s1146_s1 + $0x4c0] sm:$0xff]  ;;  %v191_v36 = vld [vmem:[%s1146_s1 + $0x538] sm:$0xff] }
  0x4e   :  { %388 = vmatpush.msrb.mxu3 %v136_v21  ;;  %329 = vmatmul.f32.vlgmr.msrb.gmra.mxu0 %v214_v22  ;;  %v158_v37 = vld [vmem:[%s1146_s1 + $0x430] sm:$0xff]  ;;  %v175_v38 = vld [vmem:[%s1146_s1 + $0x4b8] sm:$0xff]  ;;  %v157_v40 = vld [vmem:[%s1146_s1 + $0x428] sm:$0xff] }
  0x4f   :  { %389 = vmatmul.f32.vlgmr.msrb.gmra.mxu3 %v217_v23  ;;  %398 = vmatpush.msra.mxu0 %v162_v24  ;;  %v190_v39 = vld [vmem:[%s1146_s1 + $0x530] sm:$0xff]  ;;  %v189_v42 = vld [vmem:[%s1146_s1 + $0x528] sm:$0xff]  ;;  %v156_v43 = vld [vmem:[%s1146_s1 + $0x420] sm:$0xff] }
  0x50   :  { %417 = vmatpush.msra.mxu1 %v179_v25  ;;  %438 = vmatpush.msra.mxu2 %v194_v26  ;;  %v174_v41 = vld [vmem:[%s1146_s1 + $0x4b0] sm:$0xff]  ;;  %v173_v44 = vld [vmem:[%s1146_s1 + $0x4a8] sm:$0xff]  ;;  %v188_v45 = vld [vmem:[%s1146_s1 + $0x520] sm:$0xff] }
  0x51   :  { %349 = vmatmul.f32.vlgmr.msrb.gmra.mxu1 %v215_v27  ;;  %399 = vmatpush.msra.mxu0 %v161_v28  ;;  %v155_v46 = vld [vmem:[%s1146_s1 + $0x418] sm:$0xff]  ;;  %v172_v47 = vld [vmem:[%s1146_s1 + $0x4a0] sm:$0xff]  ;;  %v154_v49 = vld [vmem:[%s1146_s1 + $0x410] sm:$0xff] }
  0x52   :  { %418 = vmatpush.msra.mxu1 %v178_v29  ;;  %439 = vmatpush.msra.mxu2 %v193_v30  ;;  %v187_v48 = vld [vmem:[%s1146_s1 + $0x518] sm:$0xff]  ;;  %v186_v51 = vld [vmem:[%s1146_s1 + $0x510] sm:$0xff]  ;;  %v153_v52 = vld [vmem:[%s1146_s1 + $0x408] sm:$0xff] }
  0x53   :  { %400 = vmatpush.msra.mxu0 %v160_v31  ;;  %v171_v50 = vld [vmem:[%s1146_s1 + $0x498] sm:$0xff]  ;;  %v170_v53 = vld [vmem:[%s1146_s1 + $0x490] sm:$0xff]  ;;  %v185_v54 = vld [vmem:[%s1146_s1 + $0x508] sm:$0xff] }
  0x54   :  { %419 = vmatpush.msra.mxu1 %v177_v32  ;;  %440 = vmatpush.msra.mxu2 %v192_v33  ;;  %v152_v55 = vld [vmem:[%s1146_s1 + $0x400] sm:$0xff]  ;;  %v169_v56 = vld [vmem:[%s1146_s1 + $0x488] sm:$0xff]  ;;  %v221_v59 = vld.sshfl [vmem:[#allocation1 + $0x10] sm:$0xff pattern:$0x73625140] }
  0x55   :  { %401 = vmatpush.msra.mxu0 %v159_v34  ;;  %v184_v57 = vld [vmem:[%s1146_s1 + $0x500] sm:$0xff]  ;;  %v220_v61 = vld.sshfl [vmem:[#allocation1 + $0x8] sm:$0xff pattern:$0x73625140]  ;;  %v461_v62 = vld [vmem:[%s1148_s3 + $0x38] sm:$0xff] }
  0x56   :  { %420 = vmatpush.msra.mxu1 %v176_v35  ;;  %441 = vmatpush.msra.mxu2 %v191_v36  ;;  %v219_v58 = vld.sshfl [vmem:[#allocation1] sm:$0xff pattern:$0x73625140]  ;;  %v460_v63 = vld [vmem:[%s1148_s3 + $0x30] sm:$0xff]  ;;  %v459_v1 = vld [vmem:[%s1148_s3 + $0x28] sm:$0xff] }
  0x57   :  { %402 = vmatpush.msra.mxu0 %v158_v37  ;;  %v168_v60 = vld [vmem:[%s1146_s1 + $0x480] sm:$0xff]  ;;  %478 = vmatpush.msra.mxu3 %v461_v62  ;;  %v457_v5 = vld [vmem:[%s1148_s3 + $0x18] sm:$0xff]  ;;  %v456_v7 = vld [vmem:[%s1148_s3 + $0x10] sm:$0xff] }
  0x58   :  { %421 = vmatpush.msra.mxu1 %v175_v38  ;;  %442 = vmatpush.msra.mxu2 %v190_v39  ;;  %v510_v0 = vld [vmem:[%s1147_s2] ss:$0 sm:$0xff]  ;;  %v455_v9 = vld [vmem:[%s1148_s3 + $0x8] sm:$0xff] }
  0x59   :  { %403 = vmatpush.msra.mxu0 %v157_v40  ;;  %479 = vmatpush.msra.mxu3 %v460_v63  ;;  %v458_v3 = vld [vmem:[%s1148_s3 + $0x20] sm:$0xff] }
  0x5a   :  { %422 = vmatpush.msra.mxu1 %v174_v41  ;;  %443 = vmatpush.msra.mxu2 %v189_v42  ;;  %v454_v11 = vld [vmem:[%s1148_s3] sm:$0xff] }
  0x5b   :  { %404 = vmatpush.msra.mxu0 %v156_v43  ;;  %480 = vmatpush.msra.mxu3 %v459_v1  ;;  %v511_v30 = vld [vmem:[%s1149_s4] ss:$0 sm:$0xff] }
  0x5c   :  { %423 = vmatpush.msra.mxu1 %v173_v44  ;;  %444 = vmatpush.msra.mxu2 %v188_v45 }
  0x5d   :  { %405 = vmatpush.msra.mxu0 %v155_v46  ;;  %481 = vmatpush.msra.mxu3 %v458_v3 }
  0x5e   :  { %424 = vmatpush.msra.mxu1 %v172_v47  ;;  %445 = vmatpush.msra.mxu2 %v187_v48 }
  0x5f   :  { %406 = vmatpush.msra.mxu0 %v154_v49  ;;  %482 = vmatpush.msra.mxu3 %v457_v5 }
  0x60   :  { %425 = vmatpush.msra.mxu1 %v171_v50  ;;  %446 = vmatpush.msra.mxu2 %v186_v51 }
  0x61   :  { %407 = vmatpush.msra.mxu0 %v153_v52  ;;  %483 = vmatpush.msra.mxu3 %v456_v7 }
  0x62   :  { %426 = vmatpush.msra.mxu1 %v170_v53  ;;  %447 = vmatpush.msra.mxu2 %v185_v54 }
  0x63   :  { %408 = vmatpush.msra.mxu0 %v152_v55  ;;  %484 = vmatpush.msra.mxu3 %v455_v9 }
  0x64   :  { %427 = vmatpush.msra.mxu1 %v169_v56  ;;  %448 = vmatpush.msra.mxu2 %v184_v57 }
  0x65   :  { %409 = vmatmul.f32.vlgmr.msra.gmra.mxu0 %v219_v58  ;;  %449 = vmatmul.f32.vlgmr.msra.gmra.mxu2 %v221_v59 }
  0x66   :  { %428 = vmatpush.msra.mxu1 %v168_v60  ;;  %485 = vmatpush.msra.mxu3 %v454_v11 }
  0x67   :  { %429 = vmatmul.f32.vlgmr.msra.gmra.mxu1 %v220_v61 }
  0xb8   :  { %v250_v2 = vpop.f32.mrf.mxu0 }
  0xb9   :  { %v251_v4 = vadd.f32 %v510_v0, %v250_v2 }
  0xc2   :  { %v270_v6 = vpop.f32.mrf.mxu1 }
  0xc3   :  { %v271_v8 = vadd.f32 %v270_v6, %v251_v4 }
  0xc6   :  { %v290_v10 = vpop.f32.mrf.mxu2 }
  0xc7   :  { %v291_v12 = vadd.f32 %v290_v10, %v271_v8 }
  0xc8   :  { %v310_v13 = vpop.f32.mrf.mxu3 }
  0xc9   :  { %v311_v14 = vadd.f32 %v310_v13, %v291_v12 }
  0xcb   :  { %v330_v15 = vpop.f32.mrf.mxu0 }
  0xcc   :  { %v331_v16 = vadd.f32 %v330_v15, %v311_v14 }
  0xce   :  { %v350_v17 = vpop.f32.mrf.mxu1 }
  0xcf   :  { %v351_v18 = vadd.f32 %v350_v17, %v331_v16  ;;  %v370_v19 = vpop.f32.mrf.mxu2 }
  0xd1   :  { %v371_v20 = vadd.f32 %v370_v19, %v351_v18 }
  0xd2   :  { %v390_v21 = vpop.f32.mrf.mxu3 }
  0xd3   :  { %v391_v22 = vadd.f32 %v390_v21, %v371_v20 }
  0xe2   :  { %v410_v23 = vpop.f32.mrf.mxu0 }
  0xe3   :  { %v411_v24 = vadd.f32 %v410_v23, %v391_v22 }
  0xe4   :  { %v430_v25 = vpop.f32.mrf.mxu1 }
  0xe5   :  { %v431_v26 = vadd.f32 %v430_v25, %v411_v24 }
  0xe8   :  { %v450_v27 = vpop.f32.mrf.mxu2 }
  0xe9   :  { %v451_v28 = vadd.f32 %v450_v27, %v431_v26 }
  0xeb   :  { %v453_v29 = vmax.f32 %v451_v28, 0.0 }
  0xed   :  { %508 = vmatmul.msk.f32.vlgmr.msra.gmra.mxu3 %vm466_vm0, %v453_v29 }
 0x170   :  { %v487_v31 = vpop.f32.mrf.mxu3 }
 0x171   :  { %v488_v32 = vadd.f32 %v511_v30, %v487_v31 }
 0x173   :  { %491 = vst.msk [vmem:[#allocation2] sm:$0x3] %vm490_vm1, %v488_v32 }
 0x174   :  { %502 = dma.vmem_to_hbm [thread:$0]  %s498_s12, 32, %s500_s15, [#allocation3]  }
 0x175   :  { %536 = dma.done.wait [#allocation3], 32  }
 0x176   :  { %537 = vsyncadd [#allocation3], 4294967264 }
 0x177   :  { %507 = vsyncpa [#allocation3], 1 }

// kernel: pamap_forward.2
= control target key start
LH: loop header
LB: loop body
LE: loop exit
PB: predicated region body
PF: predicated region fallthrough
CT: control target
= control target key end

     0   :  { %vm196_vm0 = vcmask 1042432   ;;  %vm97_vm1 = vcmask 1046528   ;;  %vm147_vm2 = vcmask 220160   ;;  %vm434_vm3 = vcmask 1045504   ;;  %s12085_s1 = inlined_call_operand.vmem [shape: f32[9,27,16], index: 1, kind: input, shape index: {}]   ;;  %s12086_s0 = inlined_call_operand.vmem [shape: f32[2,200,27], index: 0, kind: input, shape index: {}]   ;;  %s12087_s2 = inlined_call_operand.vmem [shape: f32[1,16], index: 2, kind: input, shape index: {}]   ;;  %s12088_s3 = inlined_call_operand.vmem [shape: f32[1,16], index: 3, kind: input, shape index: {}]   ;;  %s12089_s7 = inlined_call_operand.vmem [shape: f32[96,192], index: 7, kind: input, shape index: {}]   ;;  %s12090_s8 = inlined_call_operand.vmem [shape: f32[96,192], index: 8, kind: input, shape index: {}]   ;;  %s12091_s4 = inlined_call_operand.vmem [shape: f32[9,16,32], index: 4, kind: input, shape index: {}]   ;;  %s12092_s5 = inlined_call_operand.vmem [shape: f32[1,32], index: 5, kind: input, shape index: {}]   ;;  %s12093_s6 = inlined_call_operand.vmem [shape: f32[1,32], index: 6, kind: input, shape index: {}]   ;;  %s12094_s9 = inlined_call_operand.vmem [shape: f32[44,88], index: 9, kind: input, shape index: {}]   ;;  %s12095_s10 = inlined_call_operand.vmem [shape: f32[44,88], index: 10, kind: input, shape index: {}]   ;;  %s12096_s11 = inlined_call_operand.vmem [shape: f32[2,44,32], index: 11, kind: output, shape index: {}]  }
   0x1   :  { %v6680_v0 = vld [vmem:[%s12085_s1 + $0x38] sm:$0x7]  ;;  %v6679_v2 = vld [vmem:[%s12085_s1 + $0x30] sm:$0xff]  ;;  %v6678_v5 = vld [vmem:[%s12085_s1 + $0x28] sm:$0xff]  ;;  %vm653_vm4 = vcmask 1044480   ;;  %vm1309_vm5 = vcmask 1041408  }
   0x2   :  { %v6734_v1 = vld [vmem:[%s12085_s1 + $0x58] sm:$0x7]  ;;  %6681 = vmatpush.msk.msra.mxu0 %vm196_vm0, %v6680_v0  ;;  %v6733_v3 = vld [vmem:[%s12085_s1 + $0x50] sm:$0xff]  ;;  %v6732_v6 = vld [vmem:[%s12085_s1 + $0x48] sm:$0xff]  ;;  %vm1528_vm6 = vcmask 1040384   ;;  %vm872_vm7 = vcmask 1043456  }
   0x3   :  { %6735 = vmatpush.msk.msra.mxu2 %vm196_vm0, %v6734_v1  ;;  %v6763_v4 = vld [vmem:[%s12085_s1 + $0x78] sm:$0x7]  ;;  %v6762_v7 = vld [vmem:[%s12085_s1 + $0x70] sm:$0xff]  ;;  %v6677_v8 = vld [vmem:[%s12085_s1 + $0x20] sm:$0xff]  ;;  %vm1969_vm8 = vcmask 523264   ;;  %vm2330_vm9 = vcmask 130048  }
   0x4   :  { %6764 = vmatpush.msk.msra.mxu3 %vm196_vm0, %v6763_v4  ;;  %213 = vmatpush.msra.mxu0 %v6679_v2  ;;  %v6761_v9 = vld [vmem:[%s12085_s1 + $0x68] sm:$0xff]  ;;  %v7681_v10 = vld [vmem:[%s12086_s0] sm:$0xff]  ;;  %v66_v15 = vld [vmem:[%s12085_s1 + $0x18] sm:$0x7]  ;;  %vm3242_vm10 = vcmask 719872   ;;  %vm3361_vm11 = vcmask 261120  }
   0x5   :  { %548 = vmatpush.msra.mxu2 %v6733_v3  ;;  %v6731_v11 = vld [vmem:[%s12085_s1 + $0x40] sm:$0xff]  ;;  %v7689_v12 = vld [vmem:[%s12086_s0 + $0x8] sm:$0xff]  ;;  %v98_v13 = vrot.slane %v7681_v10, 1  ;;  %v435_v14 = vrot.slane %v7681_v10, 2  ;;  %v654_v18 = vrot.slane %v7681_v10, 3  ;;  %7524 = vmatpush.msk.msra.mxu1 %vm196_vm0, %v66_v15  ;;  %v65_v21 = vld [vmem:[%s12085_s1 + $0x10] sm:$0xff] }
   0x6   :  { %767 = vmatpush.msra.mxu3 %v6762_v7  ;;  %214 = vmatpush.msra.mxu0 %v6678_v5  ;;  %v99_v16 = vrot.slane %v7689_v12, 1  ;;  %v436_v17 = vrot.slane %v7689_v12, 2  ;;  %v655_v19 = vrot.slane %v7689_v12, 3  ;;  %v6760_v20 = vld [vmem:[%s12085_s1 + $0x60] sm:$0xff]  ;;  %v7710_v22 = vld [vmem:[%s12086_s0 + $0x10] sm:$0xff]  ;;  %v64_v26 = vld [vmem:[%s12085_s1 + $0x8] sm:$0xff] }
   0x7   :  { %549 = vmatpush.msra.mxu2 %v6732_v6  ;;  %7525 = vmatpush.msra.mxu1 %v65_v21  ;;  %v101_v27 = vrot.slane %v7710_v22, 1  ;;  %v438_v28 = vrot.slane %v7710_v22, 2  ;;  %v63_v29 = vld [vmem:[%s12085_s1] sm:$0xff]  ;;  %v657_v30 = vrot.slane %v7710_v22, 3  ;;  %v7735_v33 = vld [vmem:[%s12086_s0 + $0x18] sm:$0xff]  ;;  %v7767_v47 = vld [vmem:[%s12086_s0 + $0x28] sm:$0xff] }
   0x8   :  { %768 = vmatpush.msra.mxu3 %v6761_v9  ;;  %215 = vmatpush.msra.mxu0 %v6677_v8  ;;  %v100_v23 = vsel %vm97_vm1, %v98_v13, %v99_v16  ;;  %v437_v24 = vsel %vm434_vm3, %v435_v14, %v436_v17  ;;  %v656_v25 = vsel %vm653_vm4, %v654_v18, %v655_v19  ;;  %v103_v35 = vrot.slane %v7735_v33, 1  ;;  %v7751_v40 = vld [vmem:[%s12086_s0 + $0x20] sm:$0xff]  ;;  %v7783_v54 = vld [vmem:[%s12086_s0 + $0x30] sm:$0xff]  ;;  %v7799_v61 = vld [vmem:[%s12086_s0 + $0x38] sm:$0xff] }
   0x9   :  { %550 = vmatpush.msra.mxu2 %v6731_v11  ;;  %6682 = vmatmul.msk.f32.vlgmr.msra.gmra.mxu0 %vm147_vm2, %v100_v23  ;;  %v102_v31 = vsel %vm97_vm1, %v99_v16, %v101_v27  ;;  %v439_v32 = vsel %vm434_vm3, %v436_v17, %v438_v28  ;;  %v658_v34 = vsel %vm653_vm4, %v655_v19, %v657_v30  ;;  %v440_v36 = vrot.slane %v7735_v33, 2  ;;  %v7815_v4 = vld [vmem:[%s12086_s0 + $0x40] sm:$0xff]  ;;  %v7831_v13 = vld [vmem:[%s12086_s0 + $0x48] sm:$0xff] }
   0xa   :  { %6736 = vmatmul.msk.f32.vlgmr.msra.gmra.mxu2 %vm147_vm2, %v437_v24  ;;  %769 = vmatpush.msra.mxu3 %v6760_v20  ;;  %v659_v37 = vrot.slane %v7735_v33, 3  ;;  %v104_v38 = vsel %vm97_vm1, %v101_v27, %v103_v35  ;;  %v105_v42 = vrot.slane %v7751_v40, 1  ;;  %v442_v43 = vrot.slane %v7751_v40, 2  ;;  %v7847_v20 = vld [vmem:[%s12086_s0 + $0x50] sm:$0xff] }
   0xb   :  { %6765 = vmatmul.msk.f32.vlgmr.msra.gmra.mxu3 %vm147_vm2, %v656_v25  ;;  %7526 = vmatpush.msra.mxu1 %v64_v26  ;;  %v441_v39 = vsel %vm434_vm3, %v438_v28, %v440_v36  ;;  %v661_v44 = vrot.slane %v7751_v40, 3  ;;  %v107_v49 = vrot.slane %v7767_v47, 1  ;;  %v444_v50 = vrot.slane %v7767_v47, 2  ;;  %v7863_v28 = vld [vmem:[%s12086_s0 + $0x58] sm:$0xff] }
   0xc   :  { %6706 = vmatpush.msk.msrb.mxu0 %vm196_vm0, %v66_v15  ;;  %v660_v41 = vsel %vm653_vm4, %v657_v30, %v659_v37  ;;  %v106_v45 = vsel %vm97_vm1, %v103_v35, %v105_v42  ;;  %v443_v46 = vsel %vm434_vm3, %v440_v36, %v442_v43  ;;  %v663_v51 = vrot.slane %v7767_v47, 3  ;;  %v7879_v36 = vld [vmem:[%s12086_s0 + $0x60] sm:$0xff] }
   0xd   :  { %7527 = vmatpush.msra.mxu1 %v63_v29  ;;  %v662_v48 = vsel %vm653_vm4, %v659_v37, %v661_v44  ;;  %v108_v52 = vsel %vm97_vm1, %v105_v42, %v107_v49  ;;  %v445_v53 = vsel %vm434_vm3, %v442_v43, %v444_v50  ;;  %v109_v56 = vrot.slane %v7783_v54, 1 }
   0xe   :  { %353 = vmatpush.msrb.mxu0 %v65_v21  ;;  %6708 = vmatmul.msk.f32.vlgmr.msra.gmra.mxu1 %vm147_vm2, %v7689_v12  ;;  %v664_v55 = vsel %vm653_vm4, %v661_v44, %v663_v51  ;;  %v446_v57 = vrot.slane %v7783_v54, 2  ;;  %v665_v58 = vrot.slane %v7783_v54, 3  ;;  %v111_v63 = vrot.slane %v7799_v61, 1  ;;  %v7895_v44 = vld [vmem:[%s12086_s0 + $0x68] sm:$0xff] }
   0xf   :  { %v110_v59 = vsel %vm97_vm1, %v107_v49, %v109_v56  ;;  %v448_v0 = vrot.slane %v7799_v61, 2  ;;  %v667_v1 = vrot.slane %v7799_v61, 3  ;;  %v113_v6 = vrot.slane %v7815_v4, 1 }
  0x10   :  { %354 = vmatpush.msrb.mxu0 %v64_v26  ;;  %v447_v60 = vsel %vm434_vm3, %v444_v50, %v446_v57  ;;  %v666_v62 = vsel %vm653_vm4, %v663_v51, %v665_v58  ;;  %v112_v2 = vsel %vm97_vm1, %v109_v56, %v111_v63  ;;  %v450_v7 = vrot.slane %v7815_v4, 2 }
  0x11   :  { %6683 = vmatmul.msk.f32.gmra.mxu0 %vm147_vm2, %v102_v31  ;;  %v449_v3 = vsel %vm434_vm3, %v446_v57, %v448_v0  ;;  %v668_v5 = vsel %vm653_vm4, %v665_v58, %v667_v1  ;;  %v669_v8 = vrot.slane %v7815_v4, 3  ;;  %v114_v9 = vsel %vm97_vm1, %v111_v63, %v113_v6 }
  0x12   :  { %6737 = vmatmul.msk.f32.gmra.mxu2 %vm147_vm2, %v439_v32  ;;  %355 = vmatpush.msrb.mxu0 %v63_v29  ;;  %v451_v11 = vsel %vm434_vm3, %v448_v0, %v450_v7  ;;  %v115_v15 = vrot.slane %v7831_v13, 1  ;;  %v452_v16 = vrot.slane %v7831_v13, 2  ;;  %v671_v17 = vrot.slane %v7831_v13, 3 }
  0x13   :  { %6766 = vmatmul.msk.f32.gmra.mxu3 %vm147_vm2, %v658_v34  ;;  %v670_v14 = vsel %vm653_vm4, %v667_v1, %v669_v8  ;;  %v117_v23 = vrot.slane %v7847_v20, 1  ;;  %v454_v24 = vrot.slane %v7847_v20, 2  ;;  %v673_v25 = vrot.slane %v7847_v20, 3 }
  0x14   :  { %v116_v18 = vsel %vm97_vm1, %v113_v6, %v115_v15  ;;  %v453_v19 = vsel %vm434_vm3, %v450_v7, %v452_v16  ;;  %v672_v21 = vsel %vm653_vm4, %v669_v8, %v671_v17  ;;  %v119_v30 = vrot.slane %v7863_v28, 1 }
  0x15   :  { %v118_v26 = vsel %vm97_vm1, %v115_v15, %v117_v23  ;;  %v455_v27 = vsel %vm434_vm3, %v452_v16, %v454_v24  ;;  %v674_v29 = vsel %vm653_vm4, %v671_v17, %v673_v25  ;;  %v456_v31 = vrot.slane %v7863_v28, 2  ;;  %v7959_v15 = vld [vmem:[%s12086_s0 + $0x88] sm:$0xff] }
  0x16   :  { %6709 = vmatmul.msk.f32.gmra.mxu1 %vm147_vm2, %v7710_v22  ;;  %v675_v32 = vrot.slane %v7863_v28, 3  ;;  %v120_v34 = vsel %vm97_vm1, %v117_v23, %v119_v30  ;;  %v679_v49 = vrot.slane %v7895_v44, 3  ;;  %v131_v17 = vrot.slane %v7959_v15, 1 }
  0x17   :  { %v457_v35 = vsel %vm434_vm3, %v454_v24, %v456_v31  ;;  %vm3367_vm12 = vcmask 257024  }
  0x18   :  { %v676_v37 = vsel %vm653_vm4, %v673_v25, %v675_v32  ;;  %v7977_v25 = vld [vmem:[%s12086_s0 + $0x90] sm:$0xff] }
  0x19   :  { %6684 = vmatmul.msk.f32.gmra.mxu0 %vm147_vm2, %v104_v38  ;;  %v121_v38 = vrot.slane %v7879_v36, 1 }
  0x1a   :  { %6738 = vmatmul.msk.f32.gmra.mxu2 %vm147_vm2, %v441_v39  ;;  %v458_v39 = vrot.slane %v7879_v36, 2 }
  0x1b   :  { %6767 = vmatmul.msk.f32.gmra.mxu3 %vm147_vm2, %v660_v41  ;;  %v677_v41 = vrot.slane %v7879_v36, 3  ;;  %v122_v42 = vsel %vm97_vm1, %v119_v30, %v121_v38 }
  0x1c   :  { %v459_v43 = vsel %vm434_vm3, %v456_v31, %v458_v39 }
  0x1e   :  { %6710 = vmatmul.msk.f32.gmra.mxu1 %vm147_vm2, %v7735_v33 }
  0x21   :  { %6685 = vmatmul.msk.f32.gmra.mxu0 %vm147_vm2, %v106_v45  ;;  %v678_v45 = vsel %vm653_vm4, %v675_v32, %v677_v41  ;;  %v689_v32 = vrot.slane %v7977_v25, 3 }
  0x22   :  { %6739 = vmatmul.msk.f32.gmra.mxu2 %vm147_vm2, %v443_v46  ;;  %v123_v46 = vrot.slane %v7895_v44, 1 }
  0x23   :  { %6768 = vmatmul.msk.f32.gmra.mxu3 %vm147_vm2, %v662_v48  ;;  %v460_v48 = vrot.slane %v7895_v44, 2 }
  0x24   :  { %v124_v50 = vsel %vm97_vm1, %v121_v38, %v123_v46 }
  0x25   :  { %v461_v51 = vsel %vm434_vm3, %v458_v39, %v460_v48  ;;  %v7997_v39 = vld [vmem:[%s12086_s0 + $0x98] sm:$0xff] }
  0x26   :  { %6711 = vmatmul.msk.f32.gmra.mxu1 %vm147_vm2, %v7751_v40 }
  0x29   :  { %6686 = vmatmul.msk.f32.gmra.mxu0 %vm147_vm2, %v108_v52  ;;  %v7911_v52 = vld [vmem:[%s12086_s0 + $0x70] sm:$0xff] }
  0x2a   :  { %6740 = vmatmul.msk.f32.gmra.mxu2 %vm147_vm2, %v445_v53  ;;  %v680_v53 = vsel %vm653_vm4, %v677_v41, %v679_v49  ;;  %v462_v56 = vrot.slane %v7911_v52, 2  ;;  %v681_v57 = vrot.slane %v7911_v52, 3 }
  0x2b   :  { %6769 = vmatmul.msk.f32.gmra.mxu3 %vm147_vm2, %v664_v55  ;;  %v125_v55 = vrot.slane %v7911_v52, 1 }
  0x2d   :  { %v126_v58 = vsel %vm97_vm1, %v123_v46, %v125_v55 }
  0x2e   :  { %6712 = vmatmul.msk.f32.gmra.mxu1 %vm147_vm2, %v7767_v47 }
  0x31   :  { %6687 = vmatmul.msk.f32.gmra.mxu0 %vm147_vm2, %v110_v59  ;;  %v463_v59 = vsel %vm434_vm3, %v460_v48, %v462_v56 }
  0x32   :  { %6741 = vmatmul.msk.f32.gmra.mxu2 %vm147_vm2, %v447_v60  ;;  %v7927_v60 = vld [vmem:[%s12086_s0 + $0x78] sm:$0xff] }
  0x33   :  { %6770 = vmatmul.msk.f32.gmra.mxu3 %vm147_vm2, %v666_v62  ;;  %v682_v62 = vsel %vm653_vm4, %v679_v49, %v681_v57  ;;  %v127_v63 = vrot.slane %v7927_v60, 1  ;;  %v464_v0 = vrot.slane %v7927_v60, 2  ;;  %v683_v1 = vrot.slane %v7927_v60, 3 }
  0x34   :  { %v691_v49 = vrot.slane %v7997_v39, 3 }
  0x35   :  { %v684_v6 = vsel %vm653_vm4, %v681_v57, %v683_v1 }
  0x36   :  { %6713 = vmatmul.msk.f32.gmra.mxu1 %vm147_vm2, %v7783_v54 }
  0x39   :  { %6688 = vmatmul.msk.f32.gmra.mxu0 %vm147_vm2, %v112_v2  ;;  %v128_v2 = vsel %vm97_vm1, %v125_v55, %v127_v63 }
  0x3a   :  { %6742 = vmatmul.msk.f32.gmra.mxu2 %vm147_vm2, %v449_v3  ;;  %v465_v3 = vsel %vm434_vm3, %v462_v56, %v464_v0 }
  0x3b   :  { %6771 = vmatmul.msk.f32.gmra.mxu3 %vm147_vm2, %v668_v5  ;;  %v7943_v5 = vld [vmem:[%s12086_s0 + $0x80] sm:$0xff] }
  0x3c   :  { %v129_v7 = vrot.slane %v7943_v5, 1  ;;  %v466_v8 = vrot.slane %v7943_v5, 2 }
  0x3e   :  { %6714 = vmatmul.msk.f32.gmra.mxu1 %vm147_vm2, %v7799_v61  ;;  %v132_v23 = vsel %vm97_vm1, %v129_v7, %v131_v17 }
  0x41   :  { %6689 = vmatmul.msk.f32.gmra.mxu0 %vm147_vm2, %v114_v9  ;;  %v685_v9 = vrot.slane %v7943_v5, 3 }
  0x42   :  { %6743 = vmatmul.msk.f32.gmra.mxu2 %vm147_vm2, %v451_v11  ;;  %v130_v11 = vsel %vm97_vm1, %v127_v63, %v129_v7 }
  0x43   :  { %6772 = vmatmul.msk.f32.gmra.mxu3 %vm147_vm2, %v670_v14  ;;  %v467_v14 = vsel %vm434_vm3, %v464_v0, %v466_v8  ;;  %v686_v16 = vsel %vm653_vm4, %v683_v1, %v685_v9 }
  0x46   :  { %6715 = vmatmul.msk.f32.gmra.mxu1 %vm147_vm2, %v7815_v4 }
  0x49   :  { %6690 = vmatmul.msk.f32.gmra.mxu0 %vm147_vm2, %v116_v18  ;;  %v468_v18 = vrot.slane %v7959_v15, 2 }
  0x4a   :  { %6744 = vmatmul.msk.f32.gmra.mxu2 %vm147_vm2, %v453_v19  ;;  %v687_v19 = vrot.slane %v7959_v15, 3 }
  0x4b   :  { %6773 = vmatmul.msk.f32.gmra.mxu3 %vm147_vm2, %v672_v21  ;;  %v469_v24 = vsel %vm434_vm3, %v466_v8, %v468_v18 }
  0x4c   :  { %v690_v41 = vsel %vm653_vm4, %v687_v19, %v689_v32 }
  0x4e   :  { %6716 = vmatmul.msk.f32.gmra.mxu1 %vm147_vm2, %v7831_v13 }
  0x51   :  { %6691 = vmatmul.msk.f32.gmra.mxu0 %vm147_vm2, %v118_v26  ;;  %v688_v26 = vsel %vm653_vm4, %v685_v9, %v687_v19 }
  0x52   :  { %6745 = vmatmul.msk.f32.gmra.mxu2 %vm147_vm2, %v455_v27  ;;  %v133_v27 = vrot.slane %v7977_v25, 1 }
  0x53   :  { %6774 = vmatmul.msk.f32.gmra.mxu3 %vm147_vm2, %v674_v29  ;;  %v470_v29 = vrot.slane %v7977_v25, 2 }
  0x55   :  { %v471_v38 = vsel %vm434_vm3, %v468_v18, %v470_v29 }
  0x56   :  { %6717 = vmatmul.msk.f32.gmra.mxu1 %vm147_vm2, %v7847_v20 }
  0x59   :  { %6692 = vmatmul.msk.f32.gmra.mxu0 %vm147_vm2, %v120_v34 }
  0x5a   :  { %6746 = vmatmul.msk.f32.gmra.mxu2 %vm147_vm2, %v457_v35 }
  0x5b   :  { %6775 = vmatmul.msk.f32.gmra.mxu3 %vm147_vm2, %v676_v37  ;;  %v134_v37 = vsel %vm97_vm1, %v131_v17, %v133_v27 }
  0x5e   :  { %6718 = vmatmul.msk.f32.gmra.mxu1 %vm147_vm2, %v7863_v28 }
  0x61   :  { %6693 = vmatmul.msk.f32.gmra.mxu0 %vm147_vm2, %v122_v42  ;;  %v135_v42 = vrot.slane %v7997_v39, 1 }
  0x62   :  { %6747 = vmatmul.msk.f32.gmra.mxu2 %vm147_vm2, %v459_v43  ;;  %v472_v43 = vrot.slane %v7997_v39, 2 }
  0x63   :  { %6776 = vmatmul.msk.f32.gmra.mxu3 %vm147_vm2, %v678_v45  ;;  %v136_v55 = vsel %vm97_vm1, %v133_v27, %v135_v42 }
  0x64   :  { %v473_v56 = vsel %vm434_vm3, %v470_v29, %v472_v43 }
  0x66   :  { %6719 = vmatmul.msk.f32.gmra.mxu1 %vm147_vm2, %v7879_v36 }
  0x69   :  { %6694 = vmatmul.msk.f32.gmra.mxu0 %vm147_vm2, %v124_v50 }
  0x6a   :  { %6748 = vmatmul.msk.f32.gmra.mxu2 %vm147_vm2, %v461_v51 }
  0x6b   :  { %6777 = vmatmul.msk.f32.gmra.mxu3 %vm147_vm2, %v680_v53 }
  0x6e   :  { %6720 = vmatmul.msk.f32.gmra.mxu1 %vm147_vm2, %v7895_v44 }
  0x71   :  { %6695 = vmatmul.msk.f32.gmra.mxu0 %vm147_vm2, %v126_v58  ;;  %v8015_v58 = vld [vmem:[%s12086_s0 + $0xa0] sm:$0xff] }
  0x72   :  { %6749 = vmatmul.msk.f32.gmra.mxu2 %vm147_vm2, %v463_v59  ;;  %v692_v59 = vsel %vm653_vm4, %v689_v32, %v691_v49  ;;  %v474_v63 = vrot.slane %v8015_v58, 2 }
  0x73   :  { %6778 = vmatmul.msk.f32.gmra.mxu3 %vm147_vm2, %v682_v62  ;;  %v137_v62 = vrot.slane %v8015_v58, 1 }
  0x75   :  { %v138_v9 = vsel %vm97_vm1, %v135_v42, %v137_v62  ;;  %v6850_v42 = vld [vmem:[%s12085_s1 + $0xd8] sm:$0x7] }
  0x76   :  { %6721 = vmatmul.msk.f32.gmra.mxu1 %vm147_vm2, %v7911_v52  ;;  %6851 = vmatpush.msk.msrb.mxu2 %vm196_vm0, %v6850_v42 }
  0x79   :  { %6696 = vmatmul.msk.f32.gmra.mxu0 %vm147_vm2, %v128_v2 }
  0x7a   :  { %6750 = vmatmul.msk.f32.gmra.mxu2 %vm147_vm2, %v465_v3  ;;  %v693_v3 = vrot.slane %v8015_v58, 3 }
  0x7b   :  { %6779 = vmatmul.msk.f32.gmra.mxu3 %vm147_vm2, %v684_v6 }
  0x7c   :  { %v694_v17 = vsel %vm653_vm4, %v691_v49, %v693_v3 }
  0x7e   :  { %6722 = vmatmul.msk.f32.gmra.mxu1 %vm147_vm2, %v7927_v60 }
  0x81   :  { %6697 = vmatmul.msk.f32.gmra.mxu0 %vm147_vm2, %v130_v11  ;;  %v475_v11 = vsel %vm434_vm3, %v472_v43, %v474_v63 }
  0x82   :  { %6751 = vmatmul.msk.f32.gmra.mxu2 %vm147_vm2, %v467_v14 }
  0x83   :  { %6780 = vmatmul.msk.f32.gmra.mxu3 %vm147_vm2, %v686_v16  ;;  %v8033_v16 = vld [vmem:[%s12086_s0 + $0xa8] sm:$0xff] }
  0x84   :  { %v139_v18 = vrot.slane %v8033_v16, 1  ;;  %v476_v19 = vrot.slane %v8033_v16, 2  ;;  %v695_v27 = vrot.slane %v8033_v16, 3 }
  0x86   :  { %v7968_v21 = vpop.f32.mrf.mxu0  ;;  %6723 = vmatmul.msk.f32.gmra.mxu1 %vm147_vm2, %v7943_v5  ;;  %v696_v43 = vsel %vm653_vm4, %v693_v3, %v695_v27  ;;  %v6820_v3 = vld [vmem:[%s12085_s1 + $0xb0] sm:$0xff] }
  0x89   :  { %6698 = vmatmul.msk.f32.gmra.mxu0 %vm147_vm2, %v132_v23 }
  0x8a   :  { %6752 = vmatmul.msk.f32.gmra.mxu2 %vm147_vm2, %v469_v24 }
  0x8b   :  { %6781 = vmatmul.msk.f32.gmra.mxu3 %vm147_vm2, %v688_v26  ;;  %v360_v31 = vpop.f32.mrf.mxu1 }
  0x8d   :  { %v7985_v30 = vpop.f32.mrf.mxu2 }
  0x8e   :  { %v220_v34 = vpop.f32.mrf.mxu0  ;;  %v7988_v35 = vpop.f32.mrf.mxu3  ;;  %6724 = vmatmul.msk.f32.gmra.mxu1 %vm147_vm2, %v7959_v15 }
  0x8f   :  { %v361_v45 = vadd.f32 %v360_v31, %v220_v34  ;;  %v140_v34 = vsel %vm97_vm1, %v137_v62, %v139_v18 }
  0x91   :  { %6699 = vmatmul.msk.f32.gmra.mxu0 %vm147_vm2, %v134_v37  ;;  %v477_v37 = vsel %vm434_vm3, %v474_v63, %v476_v19 }
  0x92   :  { %6753 = vmatmul.msk.f32.gmra.mxu2 %vm147_vm2, %v471_v38 }
  0x93   :  { %6782 = vmatmul.msk.f32.gmra.mxu3 %vm147_vm2, %v690_v41  ;;  %v363_v48 = vpop.f32.mrf.mxu1  ;;  %v8051_v41 = vld [vmem:[%s12086_s0 + $0xb0] sm:$0xff] }
  0x94   :  { %v141_v49 = vrot.slane %v8051_v41, 1  ;;  %v697_v63 = vrot.slane %v8051_v41, 3 }
  0x95   :  { %v555_v46 = vpop.f32.mrf.mxu2 }
  0x96   :  { %v625_v50 = vadd.f32 %v555_v46, %v361_v45  ;;  %v223_v51 = vpop.f32.mrf.mxu0  ;;  %v774_v53 = vpop.f32.mrf.mxu3  ;;  %6725 = vmatmul.msk.f32.gmra.mxu1 %vm147_vm2, %v7977_v25  ;;  %v6792_v45 = vld [vmem:[%s12085_s1 + $0x98] sm:$0x7]  ;;  %v6849_v46 = vld [vmem:[%s12085_s1 + $0xd0] sm:$0xff] }
  0x97   :  { %v364_v0 = vadd.f32 %v363_v48, %v223_v51  ;;  %v6879_v48 = vld [vmem:[%s12085_s1 + $0xf8] sm:$0x7]  ;;  %6793 = vmatpush.msk.msra.mxu0 %vm196_vm0, %v6792_v45  ;;  %1423 = vmatpush.msrb.mxu2 %v6849_v46 }
  0x98   :  { %v8008_v57 = vadd.f32 %v774_v53, %v625_v50  ;;  %v478_v50 = vrot.slane %v8051_v41, 2  ;;  %v6791_v53 = vld [vmem:[%s12085_s1 + $0x90] sm:$0xff]  ;;  %6880 = vmatpush.msk.msrb.mxu3 %vm196_vm0, %v6879_v48 }
  0x99   :  { %6700 = vmatmul.msk.f32.gmra.mxu0 %vm147_vm2, %v136_v55  ;;  %v6821_v55 = vld [vmem:[%s12085_s1 + $0xb8] sm:$0x7] }
  0x9a   :  { %12129 = vst [vmem:[#allocation2_spill] sm:$0xff] %v8008_v57  ;;  %6754 = vmatmul.msk.f32.gmra.mxu2 %vm147_vm2, %v473_v56  ;;  %v6848_v56 = vld [vmem:[%s12085_s1 + $0xc8] sm:$0xff]  ;;  %986 = vmatpush.msra.mxu0 %v6791_v53 }
  0x9b   :  { %6783 = vmatmul.msk.f32.gmra.mxu3 %vm147_vm2, %v692_v59  ;;  %v366_v2 = vpop.f32.mrf.mxu1  ;;  %6822 = vmatpush.msk.msrb.mxu1 %vm196_vm0, %v6821_v55 }
  0x9c   :  { %1424 = vmatpush.msrb.mxu2 %v6848_v56  ;;  %v8139_v56 = vld [vmem:[%s12086_s0 + $0xc0] sm:$0xff] }
  0x9d   :  { %v558_v1 = vpop.f32.mrf.mxu2  ;;  %1204 = vmatpush.msrb.mxu1 %v6820_v3 }
  0x9e   :  { %v626_v6 = vadd.f32 %v558_v1, %v364_v0  ;;  %v226_v7 = vpop.f32.mrf.mxu0  ;;  %v777_v8 = vpop.f32.mrf.mxu3  ;;  %6726 = vmatmul.msk.f32.gmra.mxu1 %vm147_vm2, %v7997_v39  ;;  %v6878_v0 = vld [vmem:[%s12085_s1 + $0xf0] sm:$0xff] }
  0x9f   :  { %v367_v23 = vadd.f32 %v366_v2, %v226_v7  ;;  %v6790_v2 = vld [vmem:[%s12085_s1 + $0x88] sm:$0xff]  ;;  %1642 = vmatpush.msrb.mxu3 %v6878_v0 }
  0xa0   :  { %v8026_v14 = vadd.f32 %v777_v8, %v626_v6  ;;  %v6847_v6 = vld [vmem:[%s12085_s1 + $0xc0] sm:$0xff]  ;;  %987 = vmatpush.msra.mxu0 %v6790_v2  ;;  %v701_v2 = vrot.slane %v8139_v56, 3 }
  0xa1   :  { %6701 = vmatmul.msk.f32.gmra.mxu0 %vm147_vm2, %v138_v9  ;;  %v142_v9 = vsel %vm97_vm1, %v139_v18, %v141_v49  ;;  %1425 = vmatpush.msrb.mxu2 %v6847_v6  ;;  %v6789_v18 = vld [vmem:[%s12085_s1 + $0x80] sm:$0xff] }
  0xa2   :  { %12130 = vst [vmem:[#allocation3_spill] sm:$0xff] %v8026_v14  ;;  %6755 = vmatmul.msk.f32.gmra.mxu2 %vm147_vm2, %v475_v11  ;;  %v479_v11 = vsel %vm434_vm3, %v476_v19, %v478_v50  ;;  %v6819_v19 = vld [vmem:[%s12085_s1 + $0xa8] sm:$0xff]  ;;  %988 = vmatpush.msra.mxu0 %v6789_v18  ;;  %v1092_v18 = vrot.slane %v7689_v12, 5 }
  0xa3   :  { %6784 = vmatmul.msk.f32.gmra.mxu3 %vm147_vm2, %v694_v17  ;;  %v369_v26 = vpop.f32.mrf.mxu1  ;;  %v6877_v17 = vld [vmem:[%s12085_s1 + $0xe8] sm:$0xff]  ;;  %1205 = vmatpush.msrb.mxu1 %v6819_v19  ;;  %v1310_v19 = vrot.slane %v7681_v10, 6 }
  0xa4   :  { %1643 = vmatpush.msrb.mxu3 %v6877_v17  ;;  %v1091_v17 = vrot.slane %v7681_v10, 5 }
  0xa5   :  { %v561_v24 = vpop.f32.mrf.mxu2 }
  0xa6   :  { %v627_v29 = vadd.f32 %v561_v24, %v367_v23  ;;  %v229_v31 = vpop.f32.mrf.mxu0  ;;  %v780_v32 = vpop.f32.mrf.mxu3  ;;  %6727 = vmatmul.msk.f32.gmra.mxu1 %vm147_vm2, %v8015_v58  ;;  %v8109_v24 = vld [vmem:[%s12086_s0 + $0xb8] sm:$0xff] }
  0xa7   :  { %v370_v51 = vadd.f32 %v369_v26, %v229_v31  ;;  %v698_v26 = vsel %vm653_vm4, %v695_v27, %v697_v63  ;;  %v6818_v31 = vld [vmem:[%s12085_s1 + $0xa0] sm:$0xff] }
  0xa8   :  { %v8044_v38 = vadd.f32 %v780_v32, %v627_v29  ;;  %v6876_v29 = vld [vmem:[%s12085_s1 + $0xe0] sm:$0xff]  ;;  %v143_v32 = vrot.slane %v8109_v24, 1  ;;  %1206 = vmatpush.msrb.mxu1 %v6818_v31 }
  0xa9   :  { %6702 = vmatmul.msk.f32.gmra.mxu0 %vm147_vm2, %v140_v34  ;;  %v480_v34 = vrot.slane %v8109_v24, 2  ;;  %1644 = vmatpush.msrb.mxu3 %v6876_v29 }
  0xaa   :  { %12131 = vst [vmem:[#allocation4_spill] sm:$0xff] %v8044_v38  ;;  %6756 = vmatmul.msk.f32.gmra.mxu2 %vm147_vm2, %v477_v37 }
  0xab   :  { %6785 = vmatmul.msk.f32.gmra.mxu3 %vm147_vm2, %v696_v43  ;;  %v372_v62 = vpop.f32.mrf.mxu1  ;;  %v699_v43 = vrot.slane %v8109_v24, 3  ;;  %v481_v53 = vsel %vm434_vm3, %v478_v50, %v480_v34  ;;  %v482_v50 = vrot.slane %v8139_v56, 2 }
  0xad   :  { %v564_v59 = vpop.f32.mrf.mxu2 }
  0xae   :  { %v628_v1 = vadd.f32 %v564_v59, %v370_v51  ;;  %v232_v7 = vpop.f32.mrf.mxu0  ;;  %v783_v8 = vpop.f32.mrf.mxu3  ;;  %6728 = vmatmul.msk.f32.gmra.mxu1 %vm147_vm2, %v8033_v16  ;;  %v144_v51 = vsel %vm97_vm1, %v141_v49, %v143_v32  ;;  %v700_v59 = vsel %vm653_vm4, %v697_v63, %v699_v43  ;;  %v145_v49 = vrot.slane %v8139_v56, 1 }
  0xaf   :  { %v373_v27 = vadd.f32 %v372_v62, %v232_v7 }
  0xb0   :  { %v8102_v23 = vadd.f32 %v783_v8, %v628_v1  ;;  %v146_v63 = vsel %vm97_vm1, %v143_v32, %v145_v49  ;;  %v483_v8 = vsel %vm434_vm3, %v480_v34, %v482_v50  ;;  %v1529_v34 = vrot.slane %v7681_v10, 7 }
  0xb1   :  { %6703 = vmatmul.msk.f32.gmra.mxu0 %vm147_vm2, %v142_v9  ;;  %v874_v49 = vrot.slane %v7689_v12, 4  ;;  %v1313_v50 = vrot.slane %v7710_v22, 6 }
  0xb2   :  { %6757 = vmatmul.msk.f32.gmra.mxu2 %vm147_vm2, %v479_v11  ;;  %v702_v11 = vsel %vm653_vm4, %v699_v43, %v701_v2  ;;  %v1532_v2 = vrot.slane %v7710_v22, 7 }
  0xb3   :  { %6786 = vmatmul.msk.f32.gmra.mxu3 %vm147_vm2, %v698_v26  ;;  %v375_v42 = vpop.f32.mrf.mxu1  ;;  %v1311_v26 = vrot.slane %v7689_v12, 6 }
  0xb5   :  { %v567_v37 = vpop.f32.mrf.mxu2 }
  0xb6   :  { %v629_v45 = vadd.f32 %v567_v37, %v373_v27  ;;  %v235_v46 = vpop.f32.mrf.mxu0  ;;  %v786_v48 = vpop.f32.mrf.mxu3  ;;  %6729 = vmatmul.msk.f32.gmra.mxu1 %vm147_vm2, %v8051_v41  ;;  %v1530_v27 = vrot.slane %v7689_v12, 7  ;;  %v1093_v37 = vsel %vm196_vm0, %v1091_v17, %v1092_v18  ;;  %v1096_v17 = vrot.slane %v7735_v33, 5 }
  0xb7   :  { %v376_v62 = vadd.f32 %v375_v42, %v235_v46  ;;  %v1312_v46 = vsel %vm1309_vm5, %v1310_v19, %v1311_v26  ;;  %v1315_v19 = vrot.slane %v7735_v33, 6 }
  0xb8   :  { %v8132_v55 = vadd.f32 %v786_v48, %v629_v45 }
  0xb9   :  { %6704 = vmatmul.msk.f32.gmra.mxu0 %vm147_vm2, %v144_v51  ;;  %v1531_v51 = vsel %vm1528_vm6, %v1529_v34, %v1530_v27 }
  0xba   :  { %6758 = vmatmul.msk.f32.gmra.mxu2 %vm147_vm2, %v481_v53  ;;  %v1094_v53 = vrot.slane %v7710_v22, 5 }
  0xbb   :  { %6787 = vmatmul.msk.f32.gmra.mxu3 %vm147_vm2, %v700_v59  ;;  %v378_v1 = vpop.f32.mrf.mxu1  ;;  %v873_v59 = vrot.slane %v7681_v10, 4 }
  0xbc   :  { %v1097_v34 = vsel %vm196_vm0, %v1094_v53, %v1096_v17 }
  0xbd   :  { %v570_v0 = vpop.f32.mrf.mxu2 }
  0xbe   :  { %v630_v3 = vadd.f32 %v570_v0, %v376_v62  ;;  %v238_v6 = vpop.f32.mrf.mxu0  ;;  %v789_v7 = vpop.f32.mrf.mxu3  ;;  %6730 = vmatmul.msk.f32.gmra.mxu1 %vm147_vm2, %v8109_v24 }
  0xbf   :  { %v379_v29 = vadd.f32 %v378_v1, %v238_v6 }
  0xc0   :  { %v8150_v9 = vadd.f32 %v789_v7, %v630_v3  ;;  %v1095_v3 = vsel %vm196_vm0, %v1092_v18, %v1094_v53  ;;  %v876_v18 = vrot.slane %v7710_v22, 4  ;;  %v878_v53 = vrot.slane %v7735_v33, 4 }
  0xc1   :  { %6705 = vmatmul.msk.f32.gmra.mxu0 %vm147_vm2, %v146_v63 }
  0xc2   :  { %6759 = vmatmul.msk.f32.gmra.mxu2 %vm147_vm2, %v483_v8  ;;  %v875_v8 = vsel %vm872_vm7, %v873_v59, %v874_v49  ;;  %v1317_v59 = vrot.slane %v7751_v40, 6 }
  0xc3   :  { %6788 = vmatmul.msk.f32.gmra.mxu3 %vm147_vm2, %v702_v11  ;;  %v381_v32 = vpop.f32.mrf.mxu1  ;;  %v1533_v11 = vsel %vm1528_vm6, %v1530_v27, %v1532_v2 }
  0xc5   :  { %v573_v31 = vpop.f32.mrf.mxu2 }
  0xc6   :  { %v631_v42 = vadd.f32 %v573_v31, %v379_v29  ;;  %v241_v43 = vpop.f32.mrf.mxu0  ;;  %v792_v45 = vpop.f32.mrf.mxu3  ;;  %6823 = vmatmul.msk.f32.vlgmr.msrb.gmra.mxu1 %vm147_vm2, %v1093_v37 }
  0xc7   :  { %v382_v62 = vadd.f32 %v381_v32, %v241_v43  ;;  %v1534_v32 = vrot.slane %v7735_v33, 7  ;;  %v877_v43 = vsel %vm872_vm7, %v874_v49, %v876_v18 }
  0xc8   :  { %v8166_v48 = vadd.f32 %v792_v45, %v631_v42  ;;  %v1316_v45 = vsel %vm1309_vm5, %v1313_v50, %v1315_v19 }
  0xc9   :  { %6707 = vmatmul.msk.f32.vlgmr.msrb.gmra.mxu0 %vm147_vm2, %v7681_v10  ;;  %v1314_v10 = vsel %vm1309_vm5, %v1311_v26, %v1313_v50  ;;  %v1535_v22 = vsel %vm1528_vm6, %v1532_v2, %v1534_v32 }
  0xca   :  { %6852 = vmatmul.msk.f32.vlgmr.msrb.gmra.mxu2 %vm147_vm2, %v1312_v46 }
  0xcb   :  { %6881 = vmatmul.msk.f32.vlgmr.msrb.gmra.mxu3 %vm147_vm2, %v1531_v51  ;;  %v384_v1 = vpop.f32.mrf.mxu1  ;;  %v1098_v51 = vrot.slane %v7751_v40, 5 }
  0xcd   :  { %v576_v0 = vpop.f32.mrf.mxu2 }
  0xce   :  { %v632_v6 = vadd.f32 %v576_v0, %v382_v62  ;;  %v244_v7 = vpop.f32.mrf.mxu0  ;;  %v795_v63 = vpop.f32.mrf.mxu3  ;;  %6824 = vmatmul.msk.f32.gmra.mxu1 %vm147_vm2, %v1095_v3  ;;  %v1536_v0 = vrot.slane %v7751_v40, 7 }
  0xcf   :  { %v385_v29 = vadd.f32 %v384_v1, %v244_v7  ;;  %v1099_v1 = vsel %vm196_vm0, %v1096_v17, %v1098_v51  ;;  %v879_v7 = vsel %vm872_vm7, %v876_v18, %v878_v53  ;;  %v1319_v17 = vrot.slane %v7767_v47, 6 }
  0xd0   :  { %v8182_v12 = vadd.f32 %v795_v63, %v632_v6  ;;  %v1318_v63 = vsel %vm1309_vm5, %v1315_v19, %v1317_v59  ;;  %v1537_v33 = vsel %vm1528_vm6, %v1534_v32, %v1536_v0 }
  0xd1   :  { %6794 = vmatmul.msk.f32.vlgmr.msra.gmra.mxu0 %vm147_vm2, %v875_v8 }
  0xd2   :  { %6853 = vmatmul.msk.f32.gmra.mxu2 %vm147_vm2, %v1314_v10  ;;  %v1100_v10 = vrot.slane %v7767_v47, 5 }
  0xd3   :  { %6882 = vmatmul.msk.f32.gmra.mxu3 %vm147_vm2, %v1533_v11  ;;  %v387_v31 = vpop.f32.mrf.mxu1  ;;  %v880_v11 = vrot.slane %v7751_v40, 4 }
  0xd5   :  { %v579_v26 = vpop.f32.mrf.mxu2 }
  0xd6   :  { %v633_v27 = vadd.f32 %v579_v26, %v385_v29  ;;  %v247_v37 = vpop.f32.mrf.mxu0  ;;  %v798_v42 = vpop.f32.mrf.mxu3  ;;  %6825 = vmatmul.msk.f32.gmra.mxu1 %vm147_vm2, %v1097_v34  ;;  %v1538_v26 = vrot.slane %v7767_v47, 7 }
  0xd7   :  { %v388_v62 = vadd.f32 %v387_v31, %v247_v37  ;;  %v1101_v31 = vsel %vm196_vm0, %v1098_v51, %v1100_v10  ;;  %v881_v37 = vsel %vm872_vm7, %v878_v53, %v880_v11  ;;  %v1321_v51 = vrot.slane %v7783_v54, 6 }
  0xd8   :  { %v8196_v46 = vadd.f32 %v798_v42, %v633_v27  ;;  %v1320_v42 = vsel %vm1309_vm5, %v1317_v59, %v1319_v17  ;;  %v1539_v40 = vsel %vm1528_vm6, %v1536_v0, %v1538_v26 }
  0xd9   :  { %6795 = vmatmul.msk.f32.gmra.mxu0 %vm147_vm2, %v877_v43 }
  0xda   :  { %6854 = vmatmul.msk.f32.gmra.mxu2 %vm147_vm2, %v1316_v45  ;;  %v1102_v45 = vrot.slane %v7783_v54, 5 }
  0xdb   :  { %6883 = vmatmul.msk.f32.gmra.mxu3 %vm147_vm2, %v1535_v22  ;;  %v390_v50 = vpop.f32.mrf.mxu1  ;;  %v882_v22 = vrot.slane %v7767_v47, 4 }
  0xdd   :  { %v582_v49 = vpop.f32.mrf.mxu2 }
  0xde   :  { %v634_v2 = vadd.f32 %v582_v49, %v388_v62  ;;  %v250_v3 = vpop.f32.mrf.mxu0  ;;  %v801_v6 = vpop.f32.mrf.mxu3  ;;  %6826 = vmatmul.msk.f32.gmra.mxu1 %vm147_vm2, %v1099_v1  ;;  %v1540_v49 = vrot.slane %v7783_v54, 7 }
  0xdf   :  { %v391_v29 = vadd.f32 %v390_v50, %v250_v3  ;;  %v1103_v50 = vsel %vm196_vm0, %v1100_v10, %v1102_v45  ;;  %v883_v3 = vsel %vm872_vm7, %v880_v11, %v882_v22  ;;  %v1323_v10 = vrot.slane %v7799_v61, 6 }
  0xe0   :  { %v8210_v8 = vadd.f32 %v801_v6, %v634_v2  ;;  %v1322_v6 = vsel %vm1309_vm5, %v1319_v17, %v1321_v51  ;;  %v1541_v47 = vsel %vm1528_vm6, %v1538_v26, %v1540_v49 }
  0xe1   :  { %6796 = vmatmul.msk.f32.gmra.mxu0 %vm147_vm2, %v879_v7 }
  0xe2   :  { %6855 = vmatmul.msk.f32.gmra.mxu2 %vm147_vm2, %v1318_v63  ;;  %v1104_v63 = vrot.slane %v7799_v61, 5 }
  0xe3   :  { %6884 = vmatmul.msk.f32.gmra.mxu3 %vm147_vm2, %v1537_v33  ;;  %v393_v19 = vpop.f32.mrf.mxu1  ;;  %v884_v33 = vrot.slane %v7783_v54, 4 }
  0xe5   :  { %v585_v18 = vpop.f32.mrf.mxu2 }
  0xe6   :  { %v635_v32 = vadd.f32 %v585_v18, %v391_v29  ;;  %v253_v34 = vpop.f32.mrf.mxu0  ;;  %v804_v27 = vpop.f32.mrf.mxu3  ;;  %6827 = vmatmul.msk.f32.gmra.mxu1 %vm147_vm2, %v1101_v31  ;;  %v1542_v18 = vrot.slane %v7799_v61, 7 }
  0xe7   :  { %v394_v62 = vadd.f32 %v393_v19, %v253_v34  ;;  %v1105_v19 = vsel %vm196_vm0, %v1102_v45, %v1104_v63  ;;  %v885_v34 = vsel %vm872_vm7, %v882_v22, %v884_v33  ;;  %v1325_v45 = vrot.slane %v7815_v4, 6 }
  0xe8   :  { %v8224_v43 = vadd.f32 %v804_v27, %v635_v32  ;;  %v1324_v27 = vsel %vm1309_vm5, %v1321_v51, %v1323_v10  ;;  %v1543_v54 = vsel %vm1528_vm6, %v1540_v49, %v1542_v18 }
  0xe9   :  { %6797 = vmatmul.msk.f32.gmra.mxu0 %vm147_vm2, %v881_v37 }
  0xea   :  { %6856 = vmatmul.msk.f32.gmra.mxu2 %vm147_vm2, %v1320_v42  ;;  %v1106_v42 = vrot.slane %v7815_v4, 5 }
  0xeb   :  { %6885 = vmatmul.msk.f32.gmra.mxu3 %vm147_vm2, %v1539_v40  ;;  %v396_v59 = vpop.f32.mrf.mxu1  ;;  %v886_v40 = vrot.slane %v7799_v61, 4 }
  0xed   :  { %v588_v53 = vpop.f32.mrf.mxu2 }
  0xee   :  { %v636_v0 = vadd.f32 %v588_v53, %v394_v62  ;;  %v256_v1 = vpop.f32.mrf.mxu0  ;;  %v807_v2 = vpop.f32.mrf.mxu3  ;;  %6828 = vmatmul.msk.f32.gmra.mxu1 %vm147_vm2, %v1103_v50  ;;  %v1544_v53 = vrot.slane %v7815_v4, 7 }
  0xef   :  { %v397_v29 = vadd.f32 %v396_v59, %v256_v1  ;;  %v1107_v59 = vsel %vm196_vm0, %v1104_v63, %v1106_v42  ;;  %v887_v1 = vsel %vm872_vm7, %v884_v33, %v886_v40  ;;  %v1327_v63 = vrot.slane %v7831_v13, 6 }
  0xf0   :  { %v8238_v7 = vadd.f32 %v807_v2, %v636_v0  ;;  %v1326_v2 = vsel %vm1309_vm5, %v1323_v10, %v1325_v45  ;;  %v1545_v61 = vsel %vm1528_vm6, %v1542_v18, %v1544_v53 }
  0xf1   :  { %6798 = vmatmul.msk.f32.gmra.mxu0 %vm147_vm2, %v883_v3 }
  0xf2   :  { %6857 = vmatmul.msk.f32.gmra.mxu2 %vm147_vm2, %v1322_v6  ;;  %v1108_v6 = vrot.slane %v7831_v13, 5 }
  0xf3   :  { %6886 = vmatmul.msk.f32.gmra.mxu3 %vm147_vm2, %v1541_v47  ;;  %v399_v17 = vpop.f32.mrf.mxu1  ;;  %v888_v47 = vrot.slane %v7815_v4, 4 }
  0xf5   :  { %v591_v11 = vpop.f32.mrf.mxu2 }
  0xf6   :  { %v637_v26 = vadd.f32 %v591_v11, %v397_v29  ;;  %v259_v31 = vpop.f32.mrf.mxu0  ;;  %v810_v32 = vpop.f32.mrf.mxu3  ;;  %6829 = vmatmul.msk.f32.gmra.mxu1 %vm147_vm2, %v1105_v19  ;;  %v1546_v11 = vrot.slane %v7831_v13, 7 }
  0xf7   :  { %v400_v62 = vadd.f32 %v399_v17, %v259_v31  ;;  %v1109_v17 = vsel %vm196_vm0, %v1106_v42, %v1108_v6  ;;  %v889_v31 = vsel %vm872_vm7, %v886_v40, %v888_v47  ;;  %v1329_v42 = vrot.slane %v7847_v20, 6 }
  0xf8   :  { %v8252_v37 = vadd.f32 %v810_v32, %v637_v26  ;;  %v1328_v32 = vsel %vm1309_vm5, %v1325_v45, %v1327_v63  ;;  %v1547_v4 = vsel %vm1528_vm6, %v1544_v53, %v1546_v11 }
  0xf9   :  { %6799 = vmatmul.msk.f32.gmra.mxu0 %vm147_vm2, %v885_v34 }
  0xfa   :  { %6858 = vmatmul.msk.f32.gmra.mxu2 %vm147_vm2, %v1324_v27  ;;  %v1110_v27 = vrot.slane %v7847_v20, 5 }
  0xfb   :  { %6887 = vmatmul.msk.f32.gmra.mxu3 %vm147_vm2, %v1543_v54  ;;  %v402_v51 = vpop.f32.mrf.mxu1  ;;  %v890_v54 = vrot.slane %v7831_v13, 4 }
  0xfd   :  { %v594_v22 = vpop.f32.mrf.mxu2 }
  0xfe   :  { %v638_v49 = vadd.f32 %v594_v22, %v400_v62  ;;  %v262_v50 = vpop.f32.mrf.mxu0  ;;  %v813_v0 = vpop.f32.mrf.mxu3  ;;  %6830 = vmatmul.msk.f32.gmra.mxu1 %vm147_vm2, %v1107_v59  ;;  %v1548_v22 = vrot.slane %v7847_v20, 7 }
  0xff   :  { %v403_v29 = vadd.f32 %v402_v51, %v262_v50  ;;  %v1111_v51 = vsel %vm196_vm0, %v1108_v6, %v1110_v27  ;;  %v891_v50 = vsel %vm872_vm7, %v888_v47, %v890_v54  ;;  %v1331_v6 = vrot.slane %v7863_v28, 6 }
 0x100   :  { %v8266_v3 = vadd.f32 %v813_v0, %v638_v49  ;;  %v1330_v0 = vsel %vm1309_vm5, %v1327_v63, %v1329_v42  ;;  %v1549_v13 = vsel %vm1528_vm6, %v1546_v11, %v1548_v22 }
 0x101   :  { %6800 = vmatmul.msk.f32.gmra.mxu0 %vm147_vm2, %v887_v1 }
 0x102   :  { %6859 = vmatmul.msk.f32.gmra.mxu2 %vm147_vm2, %v1326_v2  ;;  %v1112_v2 = vrot.slane %v7863_v28, 5 }
 0x103   :  { %6888 = vmatmul.msk.f32.gmra.mxu3 %vm147_vm2, %v1545_v61  ;;  %v405_v10 = vpop.f32.mrf.mxu1  ;;  %v892_v61 = vrot.slane %v7847_v20, 4 }
 0x105   :  { %v597_v33 = vpop.f32.mrf.mxu2 }
 0x106   :  { %v639_v18 = vadd.f32 %v597_v33, %v403_v29  ;;  %v265_v19 = vpop.f32.mrf.mxu0  ;;  %v816_v26 = vpop.f32.mrf.mxu3  ;;  %6831 = vmatmul.msk.f32.gmra.mxu1 %vm147_vm2, %v1109_v17  ;;  %v1550_v33 = vrot.slane %v7863_v28, 7 }
 0x107   :  { %v406_v62 = vadd.f32 %v405_v10, %v265_v19  ;;  %v1113_v10 = vsel %vm196_vm0, %v1110_v27, %v1112_v2  ;;  %v893_v19 = vsel %vm872_vm7, %v890_v54, %v892_v61  ;;  %v1333_v27 = vrot.slane %v7879_v36, 6 }
 0x108   :  { %v8280_v34 = vadd.f32 %v816_v26, %v639_v18  ;;  %v1332_v26 = vsel %vm1309_vm5, %v1329_v42, %v1331_v6  ;;  %v1551_v20 = vsel %vm1528_vm6, %v1548_v22, %v1550_v33 }
 0x109   :  { %6801 = vmatmul.msk.f32.gmra.mxu0 %vm147_vm2, %v889_v31 }
 0x10a   :  { %6860 = vmatmul.msk.f32.gmra.mxu2 %vm147_vm2, %v1328_v32  ;;  %v1114_v32 = vrot.slane %v7879_v36, 5 }
 0x10b   :  { %6889 = vmatmul.msk.f32.gmra.mxu3 %vm147_vm2, %v1547_v4  ;;  %v408_v45 = vpop.f32.mrf.mxu1  ;;  %v894_v4 = vrot.slane %v7863_v28, 4 }
 0x10d   :  { %v600_v40 = vpop.f32.mrf.mxu2 }
 0x10e   :  { %v640_v53 = vadd.f32 %v600_v40, %v406_v62  ;;  %v268_v59 = vpop.f32.mrf.mxu0  ;;  %v819_v49 = vpop.f32.mrf.mxu3  ;;  %6832 = vmatmul.msk.f32.gmra.mxu1 %vm147_vm2, %v1111_v51  ;;  %v1552_v40 = vrot.slane %v7879_v36, 7 }
 0x10f   :  { %v409_v29 = vadd.f32 %v408_v45, %v268_v59  ;;  %v1115_v45 = vsel %vm196_vm0, %v1112_v2, %v1114_v32  ;;  %v895_v59 = vsel %vm872_vm7, %v892_v61, %v894_v4  ;;  %v1335_v2 = vrot.slane %v7895_v44, 6 }
 0x110   :  { %v8294_v1 = vadd.f32 %v819_v49, %v640_v53  ;;  %v1334_v49 = vsel %vm1309_vm5, %v1331_v6, %v1333_v27  ;;  %v1553_v28 = vsel %vm1528_vm6, %v1550_v33, %v1552_v40 }
 0x111   :  { %6802 = vmatmul.msk.f32.gmra.mxu0 %vm147_vm2, %v891_v50 }
 0x112   :  { %12132 = vst [vmem:[#allocation5_spill] sm:$0xff] %v8294_v1  ;;  %6861 = vmatmul.msk.f32.gmra.mxu2 %vm147_vm2, %v1330_v0  ;;  %v1116_v0 = vrot.slane %v7895_v44, 5 }
 0x113   :  { %6890 = vmatmul.msk.f32.gmra.mxu3 %vm147_vm2, %v1549_v13  ;;  %v411_v63 = vpop.f32.mrf.mxu1  ;;  %v896_v13 = vrot.slane %v7879_v36, 4 }
 0x115   :  { %v603_v47 = vpop.f32.mrf.mxu2 }
 0x116   :  { %v641_v11 = vadd.f32 %v603_v47, %v409_v29  ;;  %v271_v17 = vpop.f32.mrf.mxu0  ;;  %v822_v18 = vpop.f32.mrf.mxu3  ;;  %6833 = vmatmul.msk.f32.gmra.mxu1 %vm147_vm2, %v1113_v10  ;;  %v1554_v47 = vrot.slane %v7895_v44, 7 }
 0x117   :  { %v412_v62 = vadd.f32 %v411_v63, %v271_v17  ;;  %v1117_v63 = vsel %vm196_vm0, %v1114_v32, %v1116_v0  ;;  %v897_v17 = vsel %vm872_vm7, %v894_v4, %v896_v13  ;;  %v1337_v32 = vrot.slane %v7911_v52, 6 }
 0x118   :  { %v8308_v31 = vadd.f32 %v822_v18, %v641_v11  ;;  %v1336_v18 = vsel %vm1309_vm5, %v1333_v27, %v1335_v2  ;;  %v1555_v36 = vsel %vm1528_vm6, %v1552_v40, %v1554_v47 }
 0x119   :  { %6803 = vmatmul.msk.f32.gmra.mxu0 %vm147_vm2, %v893_v19 }
 0x11a   :  { %12133 = vst [vmem:[#allocation6_spill] sm:$0xff] %v8308_v31  ;;  %6862 = vmatmul.msk.f32.gmra.mxu2 %vm147_vm2, %v1332_v26  ;;  %v1118_v26 = vrot.slane %v7911_v52, 5 }
 0x11b   :  { %6891 = vmatmul.msk.f32.gmra.mxu3 %vm147_vm2, %v1551_v20  ;;  %v414_v42 = vpop.f32.mrf.mxu1  ;;  %v898_v20 = vrot.slane %v7895_v44, 4 }
 0x11d   :  { %v606_v54 = vpop.f32.mrf.mxu2 }
 0x11e   :  { %v642_v22 = vadd.f32 %v606_v54, %v412_v62  ;;  %v274_v51 = vpop.f32.mrf.mxu0  ;;  %v825_v53 = vpop.f32.mrf.mxu3  ;;  %6834 = vmatmul.msk.f32.gmra.mxu1 %vm147_vm2, %v1115_v45  ;;  %v1556_v54 = vrot.slane %v7911_v52, 7 }
 0x11f   :  { %v415_v29 = vadd.f32 %v414_v42, %v274_v51  ;;  %v1119_v42 = vsel %vm196_vm0, %v1116_v0, %v1118_v26  ;;  %v899_v51 = vsel %vm872_vm7, %v896_v13, %v898_v20  ;;  %v1339_v0 = vrot.slane %v7927_v60, 6 }
 0x120   :  { %v8322_v50 = vadd.f32 %v825_v53, %v642_v22  ;;  %v1338_v53 = vsel %vm1309_vm5, %v1335_v2, %v1337_v32  ;;  %v1557_v44 = vsel %vm1528_vm6, %v1554_v47, %v1556_v54  ;;  %v1558_v2 = vrot.slane %v7927_v60, 7 }
 0x121   :  { %6804 = vmatmul.msk.f32.gmra.mxu0 %vm147_vm2, %v895_v59 }
 0x122   :  { %12134 = vst [vmem:[#allocation7_spill] sm:$0xff] %v8322_v50  ;;  %6863 = vmatmul.msk.f32.gmra.mxu2 %vm147_vm2, %v1334_v49  ;;  %v1120_v49 = vrot.slane %v7927_v60, 5 }
 0x123   :  { %6892 = vmatmul.msk.f32.gmra.mxu3 %vm147_vm2, %v1553_v28  ;;  %v417_v6 = vpop.f32.mrf.mxu1  ;;  %v900_v28 = vrot.slane %v7911_v52, 4  ;;  %v1559_v52 = vsel %vm1528_vm6, %v1556_v54, %v1558_v2 }
 0x125   :  { %v609_v61 = vpop.f32.mrf.mxu2 }
 0x126   :  { %v643_v33 = vadd.f32 %v609_v61, %v415_v29  ;;  %v277_v10 = vpop.f32.mrf.mxu0  ;;  %v828_v11 = vpop.f32.mrf.mxu3  ;;  %6835 = vmatmul.msk.f32.gmra.mxu1 %vm147_vm2, %v1117_v63  ;;  %v1121_v61 = vsel %vm196_vm0, %v1118_v26, %v1120_v49  ;;  %v1341_v26 = vrot.slane %v7943_v5, 6 }
 0x127   :  { %v418_v62 = vadd.f32 %v417_v6, %v277_v10  ;;  %v901_v10 = vsel %vm872_vm7, %v898_v20, %v900_v28 }
 0x128   :  { %v8336_v19 = vadd.f32 %v828_v11, %v643_v33  ;;  %v1340_v11 = vsel %vm1309_vm5, %v1337_v32, %v1339_v0  ;;  %v1560_v32 = vrot.slane %v7943_v5, 7 }
 0x129   :  { %6805 = vmatmul.msk.f32.gmra.mxu0 %vm147_vm2, %v897_v17 }
 0x12a   :  { %12135 = vst [vmem:[#allocation8_spill] sm:$0xff] %v8336_v19  ;;  %6864 = vmatmul.msk.f32.gmra.mxu2 %vm147_vm2, %v1336_v18  ;;  %v1122_v18 = vrot.slane %v7943_v5, 5 }
 0x12b   :  { %6893 = vmatmul.msk.f32.gmra.mxu3 %vm147_vm2, %v1555_v36  ;;  %v420_v27 = vpop.f32.mrf.mxu1  ;;  %v902_v36 = vrot.slane %v7927_v60, 4 }
 0x12d   :  { %v612_v4 = vpop.f32.mrf.mxu2 }
 0x12e   :  { %v644_v40 = vadd.f32 %v612_v4, %v418_v62  ;;  %v280_v45 = vpop.f32.mrf.mxu0  ;;  %v831_v22 = vpop.f32.mrf.mxu3  ;;  %6836 = vmatmul.msk.f32.gmra.mxu1 %vm147_vm2, %v1119_v42  ;;  %v1123_v4 = vsel %vm196_vm0, %v1120_v49, %v1122_v18  ;;  %v1343_v49 = vrot.slane %v7959_v15, 6 }
 0x12f   :  { %v421_v29 = vadd.f32 %v420_v27, %v280_v45  ;;  %v1342_v45 = vsel %vm1309_vm5, %v1339_v0, %v1341_v26 }
 0x130   :  { %v8350_v59 = vadd.f32 %v831_v22, %v644_v40  ;;  %v903_v40 = vsel %vm872_vm7, %v900_v28, %v902_v36 }
 0x131   :  { %6806 = vmatmul.msk.f32.gmra.mxu0 %vm147_vm2, %v899_v51  ;;  %v1561_v51 = vsel %vm1528_vm6, %v1558_v2, %v1560_v32 }
 0x132   :  { %12136 = vst [vmem:[#allocation9_spill] sm:$0xff] %v8350_v59  ;;  %6865 = vmatmul.msk.f32.gmra.mxu2 %vm147_vm2, %v1338_v53  ;;  %v1124_v53 = vrot.slane %v7959_v15, 5 }
 0x133   :  { %6894 = vmatmul.msk.f32.gmra.mxu3 %vm147_vm2, %v1557_v44  ;;  %v423_v47 = vpop.f32.mrf.mxu1  ;;  %v904_v44 = vrot.slane %v7943_v5, 4 }
 0x135   :  { %v615_v13 = vpop.f32.mrf.mxu2 }
 0x136   :  { %v645_v6 = vadd.f32 %v615_v13, %v421_v29  ;;  %v283_v63 = vpop.f32.mrf.mxu0  ;;  %v834_v33 = vpop.f32.mrf.mxu3  ;;  %6837 = vmatmul.msk.f32.gmra.mxu1 %vm147_vm2, %v1121_v61  ;;  %v1562_v29 = vrot.slane %v7959_v15, 7  ;;  %v1125_v13 = vsel %vm196_vm0, %v1122_v18, %v1124_v53  ;;  %v1564_v18 = vrot.slane %v7977_v25, 7 }
 0x137   :  { %v424_v62 = vadd.f32 %v423_v47, %v283_v63  ;;  %v905_v47 = vsel %vm872_vm7, %v902_v36, %v904_v44  ;;  %v1344_v63 = vsel %vm1309_vm5, %v1341_v26, %v1343_v49 }
 0x138   :  { %v8364_v17 = vadd.f32 %v834_v33, %v645_v6  ;;  %v1563_v5 = vsel %vm1528_vm6, %v1560_v32, %v1562_v29  ;;  %v1565_v32 = vsel %vm1528_vm6, %v1562_v29, %v1564_v18 }
 0x139   :  { %6807 = vmatmul.msk.f32.gmra.mxu0 %vm147_vm2, %v901_v10  ;;  %v1126_v10 = vrot.slane %v7977_v25, 5 }
 0x13a   :  { %12137 = vst [vmem:[#allocation10_spill] sm:$0xff] %v8364_v17  ;;  %6866 = vmatmul.msk.f32.gmra.mxu2 %vm147_vm2, %v1340_v11  ;;  %v906_v11 = vrot.slane %v7959_v15, 4  ;;  %v1128_v15 = vrot.slane %v7997_v39, 5 }
 0x13b   :  { %6895 = vmatmul.msk.f32.gmra.mxu3 %vm147_vm2, %v1559_v52  ;;  %v426_v60 = vpop.f32.mrf.mxu1  ;;  %v1345_v52 = vrot.slane %v7977_v25, 6  ;;  %v1127_v36 = vsel %vm196_vm0, %v1124_v53, %v1126_v10  ;;  %v1130_v53 = vrot.slane %v8015_v58, 5 }
 0x13d   :  { %v618_v20 = vpop.f32.mrf.mxu2 }
 0x13e   :  { %v646_v27 = vadd.f32 %v618_v20, %v424_v62  ;;  %v286_v54 = vpop.f32.mrf.mxu0  ;;  %v837_v42 = vpop.f32.mrf.mxu3  ;;  %6838 = vmatmul.msk.f32.gmra.mxu1 %vm147_vm2, %v1123_v4  ;;  %v907_v62 = vsel %vm872_vm7, %v904_v44, %v906_v11  ;;  %v1346_v20 = vsel %vm1309_vm5, %v1343_v49, %v1345_v52  ;;  %v908_v4 = vrot.slane %v7977_v25, 4 }
 0x13f   :  { %v427_v28 = vadd.f32 %v426_v60, %v286_v54  ;;  %v6908_v54 = vld [vmem:[%s12085_s1 + $0x118] sm:$0x7]  ;;  %v910_v44 = vrot.slane %v7997_v39, 4  ;;  %v1349_v49 = vrot.slane %v8015_v58, 6 }
 0x140   :  { %v8378_v22 = vadd.f32 %v837_v42, %v646_v27  ;;  %v1347_v27 = vrot.slane %v7997_v39, 6  ;;  %v1566_v42 = vrot.slane %v7997_v39, 7  ;;  %6909 = vmatpush.msk.msrb.mxu0 %vm196_vm0, %v6908_v54  ;;  %v909_v60 = vsel %vm872_vm7, %v906_v11, %v908_v4 }
 0x141   :  { %6808 = vmatmul.msk.f32.gmra.mxu0 %vm147_vm2, %v903_v40  ;;  %v1129_v40 = vsel %vm196_vm0, %v1126_v10, %v1128_v15  ;;  %v1132_v39 = vrot.slane %v8033_v16, 5 }
 0x142   :  { %12138 = vst [vmem:[#allocation11_spill] sm:$0xff] %v8378_v22  ;;  %6867 = vmatmul.msk.f32.gmra.mxu2 %vm147_vm2, %v1342_v45  ;;  %v1348_v25 = vsel %vm1309_vm5, %v1345_v52, %v1347_v27 }
 0x143   :  { %6896 = vmatmul.msk.f32.gmra.mxu3 %vm147_vm2, %v1561_v51  ;;  %v1567_v51 = vsel %vm1528_vm6, %v1564_v18, %v1566_v42  ;;  %v1133_v10 = vsel %vm196_vm0, %v1130_v53, %v1132_v39 }
 0x145   :  { %v621_v0 = vpop.f32.mrf.mxu2 }
 0x146   :  { %v647_v61 = vadd.f32 %v621_v0, %v427_v28  ;;  %v8390_v2 = vpop.f32.mrf.mxu0  ;;  %v840_v6 = vpop.f32.mrf.mxu3  ;;  %6839 = vmatmul.msk.f32.gmra.mxu1 %vm147_vm2, %v1125_v13  ;;  %v1568_v28 = vrot.slane %v8015_v58, 7  ;;  %v1131_v0 = vsel %vm196_vm0, %v1128_v15, %v1130_v53  ;;  %v911_v13 = vsel %vm872_vm7, %v908_v4, %v910_v44 }
 0x147   :  { %v1572_v15 = vrot.slane %v8051_v41, 7  ;;  %v1355_v53 = vrot.slane %v8109_v24, 6 }
 0x148   :  { %v8394_v33 = vadd.f32 %v840_v6, %v647_v61  ;;  %v1350_v61 = vsel %vm1309_vm5, %v1347_v27, %v1349_v49  ;;  %v1569_v6 = vsel %vm1528_vm6, %v1566_v42, %v1568_v28  ;;  %v6906_v27 = vld [vmem:[%s12085_s1 + $0x108] sm:$0xff] }
 0x149   :  { %6809 = vmatmul.msk.f32.gmra.mxu0 %vm147_vm2, %v905_v47  ;;  %v912_v47 = vrot.slane %v8015_v58, 4  ;;  %v1134_v58 = vrot.slane %v8051_v41, 5 }
 0x14a   :  { %12139 = vst [vmem:[#allocation12_spill] sm:$0xff] %v8394_v33  ;;  %6868 = vmatmul.msk.f32.gmra.mxu2 %vm147_vm2, %v1344_v63  ;;  %v1351_v63 = vrot.slane %v8033_v16, 6 }
 0x14b   :  { %6897 = vmatmul.msk.f32.gmra.mxu3 %vm147_vm2, %v1563_v5  ;;  %v1570_v5 = vrot.slane %v8033_v16, 7  ;;  %v913_v52 = vsel %vm872_vm7, %v910_v44, %v912_v47  ;;  %v1135_v4 = vsel %vm196_vm0, %v1132_v39, %v1134_v58  ;;  %v1574_v44 = vrot.slane %v8109_v24, 7 }
 0x14c   :  { %v1352_v18 = vsel %vm1309_vm5, %v1349_v49, %v1351_v63  ;;  %v1357_v39 = vrot.slane %v8139_v56, 6 }
 0x14e   :  { %v8406_v26 = vpop.f32.mrf.mxu0  ;;  %6840 = vmatmul.msk.f32.gmra.mxu1 %vm147_vm2, %v1127_v36  ;;  %v1571_v36 = vsel %vm1528_vm6, %v1568_v28, %v1570_v5 }
 0x14f   :  { %12140 = vst [vmem:[#allocation13_spill] sm:$0xff] %v8406_v26 }
 0x151   :  { %6810 = vmatmul.msk.f32.gmra.mxu0 %vm147_vm2, %v907_v62  ;;  %v914_v62 = vrot.slane %v8033_v16, 4 }
 0x152   :  { %6869 = vmatmul.msk.f32.gmra.mxu2 %vm147_vm2, %v1346_v20  ;;  %v1353_v20 = vrot.slane %v8051_v41, 6 }
 0x153   :  { %6898 = vmatmul.msk.f32.gmra.mxu3 %vm147_vm2, %v1565_v32  ;;  %v6907_v32 = vld [vmem:[%s12085_s1 + $0x110] sm:$0xff]  ;;  %v915_v16 = vsel %vm872_vm7, %v912_v47, %v914_v62  ;;  %v1576_v47 = vrot.slane %v8139_v56, 7 }
 0x154   :  { %1765 = vmatpush.msrb.mxu0 %v6907_v32  ;;  %v1354_v42 = vsel %vm1309_vm5, %v1351_v63, %v1353_v20 }
 0x156   :  { %v8424_v45 = vpop.f32.mrf.mxu0  ;;  %6841 = vmatmul.msk.f32.gmra.mxu1 %vm147_vm2, %v1129_v40  ;;  %1766 = vmatpush.msrb.mxu0 %v6906_v27  ;;  %v6905_v40 = vld [vmem:[%s12085_s1 + $0x100] sm:$0xff] }
 0x157   :  { %12141 = vst [vmem:[#allocation14_spill] sm:$0xff] %v8424_v45 }
 0x158   :  { %1767 = vmatpush.msrb.mxu0 %v6905_v40  ;;  %v7540_v40 = vld [vmem:[%s12086_s0 + $0x28] sm:$0xff] }
 0x159   :  { %6811 = vmatmul.msk.f32.gmra.mxu0 %vm147_vm2, %v909_v60  ;;  %v1573_v60 = vsel %vm1528_vm6, %v1570_v5, %v1572_v15 }
 0x15a   :  { %6870 = vmatmul.msk.f32.gmra.mxu2 %vm147_vm2, %v1348_v25  ;;  %v1136_v25 = vrot.slane %v8109_v24, 5 }
 0x15b   :  { %6899 = vmatmul.msk.f32.gmra.mxu3 %vm147_vm2, %v1567_v51  ;;  %v916_v51 = vrot.slane %v8051_v41, 4  ;;  %v1138_v41 = vrot.slane %v8139_v56, 5 }
 0x15c   :  { %v1137_v49 = vsel %vm196_vm0, %v1134_v58, %v1136_v25 }
 0x15d   :  { %v1139_v63 = vsel %vm196_vm0, %v1136_v25, %v1138_v41  ;;  %v7541_v25 = vld [vmem:[%s12086_s0 + $0x30] sm:$0xff] }
 0x15e   :  { %v8438_v29 = vpop.f32.mrf.mxu0  ;;  %6842 = vmatmul.msk.f32.gmra.mxu1 %vm147_vm2, %v1131_v0  ;;  %v917_v0 = vsel %vm872_vm7, %v914_v62, %v916_v51 }
 0x15f   :  { %12142 = vst [vmem:[#allocation15_spill] sm:$0xff] %v8438_v29 }
 0x161   :  { %6812 = vmatmul.msk.f32.gmra.mxu0 %vm147_vm2, %v911_v13  ;;  %v1356_v13 = vsel %vm1309_vm5, %v1353_v20, %v1355_v53  ;;  %v7536_v20 = vld [vmem:[%s12086_s0 + $0x8] sm:$0xff] }
 0x162   :  { %6871 = vmatmul.msk.f32.gmra.mxu2 %vm147_vm2, %v1350_v61  ;;  %v1575_v61 = vsel %vm1528_vm6, %v1572_v15, %v1574_v44 }
 0x163   :  { %6900 = vmatmul.msk.f32.gmra.mxu3 %vm147_vm2, %v1569_v6  ;;  %v918_v6 = vrot.slane %v8109_v24, 4  ;;  %v920_v24 = vrot.slane %v8139_v56, 4  ;;  %v7537_v56 = vld [vmem:[%s12086_s0 + $0x10] sm:$0xff] }
 0x165   :  { %v921_v58 = vsel %vm872_vm7, %v918_v6, %v920_v24 }
 0x166   :  { %v8452_v11 = vpop.f32.mrf.mxu0  ;;  %6843 = vmatmul.msk.f32.gmra.mxu1 %vm147_vm2, %v1133_v10  ;;  %v919_v10 = vsel %vm872_vm7, %v916_v51, %v918_v6  ;;  %v8575_v6 = vpop.f32.mrf.mxu2 }
 0x167   :  { %12143 = vst [vmem:[#allocation16_spill] sm:$0xff] %v8452_v11 }
 0x168   :  { %12147 = vst [vmem:[#allocation20_spill] sm:$0xff] %v8575_v6 }
 0x169   :  { %6813 = vmatmul.msk.f32.gmra.mxu0 %vm147_vm2, %v913_v52  ;;  %v1358_v52 = vsel %vm1309_vm5, %v1355_v53, %v1357_v39  ;;  %v7542_v53 = vld [vmem:[%s12086_s0 + $0x38] sm:$0xff]  ;;  %v7545_v39 = vld [vmem:[%s12086_s0 + $0x50] sm:$0xff] }
 0x16a   :  { %6872 = vmatmul.msk.f32.gmra.mxu2 %vm147_vm2, %v1352_v18  ;;  %v1577_v18 = vsel %vm1528_vm6, %v1574_v44, %v1576_v47  ;;  %v8581_v47 = vpop.f32.mrf.mxu3 }
 0x16b   :  { %6901 = vmatmul.msk.f32.gmra.mxu3 %vm147_vm2, %v1571_v36  ;;  %12148 = vst [vmem:[#allocation21_spill] sm:$0xff] %v8581_v47 }
 0x16e   :  { %v8472_v54 = vpop.f32.mrf.mxu0  ;;  %6844 = vmatmul.msk.f32.gmra.mxu1 %vm147_vm2, %v1135_v4  ;;  %v7538_v4 = vld [vmem:[%s12086_s0 + $0x18] sm:$0xff] }
 0x171   :  { %6814 = vmatmul.msk.f32.gmra.mxu0 %vm147_vm2, %v915_v16  ;;  %v7539_v16 = vld [vmem:[%s12086_s0 + $0x20] sm:$0xff] }
 0x172   :  { %6873 = vmatmul.msk.f32.gmra.mxu2 %vm147_vm2, %v1354_v42  ;;  %v8593_v24 = vpop.f32.mrf.mxu3 }
 0x173   :  { %6902 = vmatmul.msk.f32.gmra.mxu3 %vm147_vm2, %v1573_v60  ;;  %12152 = vst [vmem:[#allocation25_spill] sm:$0xff] %v8593_v24 }
 0x176   :  { %v8489_v28 = vpop.f32.mrf.mxu0  ;;  %6845 = vmatmul.msk.f32.gmra.mxu1 %vm147_vm2, %v1137_v49  ;;  %v7543_v49 = vld [vmem:[%s12086_s0 + $0x40] sm:$0xff] }
 0x179   :  { %6815 = vmatmul.msk.f32.gmra.mxu0 %vm147_vm2, %v917_v0 }
 0x17a   :  { %6874 = vmatmul.msk.f32.gmra.mxu2 %vm147_vm2, %v1356_v13  ;;  %v7544_v13 = vld [vmem:[%s12086_s0 + $0x48] sm:$0xff] }
 0x17b   :  { %6903 = vmatmul.msk.f32.gmra.mxu3 %vm147_vm2, %v1575_v61  ;;  %v8571_v61 = vpop.f32.mrf.mxu1 }
 0x17c   :  { %12145 = vst [vmem:[#allocation18_spill] sm:$0xff] %v8571_v61 }
 0x17e   :  { %v8503_v5 = vpop.f32.mrf.mxu0  ;;  %6846 = vmatmul.msk.f32.gmra.mxu1 %vm147_vm2, %v1139_v63 }
 0x181   :  { %6816 = vmatmul.msk.f32.gmra.mxu0 %vm147_vm2, %v919_v10 }
 0x182   :  { %6875 = vmatmul.msk.f32.gmra.mxu2 %vm147_vm2, %v1358_v52  ;;  %v7546_v52 = vld [vmem:[%s12086_s0 + $0x58] sm:$0xff] }
 0x183   :  { %6904 = vmatmul.msk.f32.gmra.mxu3 %vm147_vm2, %v1577_v18  ;;  %v8583_v63 = vpop.f32.mrf.mxu1  ;;  %v8591_v18 = vpop.f32.mrf.mxu2 }
 0x184   :  { %12149 = vst [vmem:[#allocation22_spill] sm:$0xff] %v8583_v63 }
 0x185   :  { %12151 = vst [vmem:[#allocation24_spill] sm:$0xff] %v8591_v18 }
 0x186   :  { %v8513_v36 = vpop.f32.mrf.mxu0 }
 0x189   :  { %6817 = vmatmul.msk.f32.gmra.mxu0 %vm147_vm2, %v921_v58 }
 0x18e   :  { %v8517_v62 = vpop.f32.mrf.mxu0 }
 0x191   :  { %6910 = vmatmul.msk.f32.vlgmr.msrb.gmra.mxu0 %vm147_vm2, %v7536_v20  ;;  %v8597_v20 = vpop.f32.mrf.mxu1 }
 0x192   :  { %12154 = vst [vmem:[#allocation27_spill] sm:$0xff] %v8597_v20 }
 0x196   :  { %v8523_v32 = vpop.f32.mrf.mxu0 }
 0x199   :  { %6911 = vmatmul.msk.f32.gmra.mxu0 %vm147_vm2, %v7537_v56  ;;  %v7547_v56 = vld [vmem:[%s12086_s0 + $0x60] sm:$0xff] }
 0x19e   :  { %v8529_v15 = vpop.f32.mrf.mxu0 }
 0x1a1   :  { %6912 = vmatmul.msk.f32.gmra.mxu0 %vm147_vm2, %v7538_v4  ;;  %v8603_v4 = vpop.f32.mrf.mxu2 }
 0x1a2   :  { %12155 = vst [vmem:[#allocation28_spill] sm:$0xff] %v8603_v4 }
 0x1a6   :  { %v8535_v27 = vpop.f32.mrf.mxu0 }
 0x1a7   :  { %v1073_v11 = vadd.f32 %v8535_v27, %v8224_v43  ;;  %v358_v43 = vadd.f32 %v8390_v2, %v7968_v21  ;;  %v1068_v21 = vadd.f32 %v8503_v5, %v8150_v9 }
 0x1a9   :  { %6913 = vmatmul.msk.f32.gmra.mxu0 %vm147_vm2, %v7539_v16 }
 0x1ae   :  { %v8541_v42 = vpop.f32.mrf.mxu0 }
 0x1b1   :  { %6914 = vmatmul.msk.f32.gmra.mxu0 %vm147_vm2, %v7540_v40  ;;  %v8607_v40 = vpop.f32.mrf.mxu3 }
 0x1b2   :  { %12157 = vst [vmem:[#allocation30_spill] sm:$0xff] %v8607_v40 }
 0x1b6   :  { %v8547_v60 = vpop.f32.mrf.mxu0 }
 0x1b9   :  { %6915 = vmatmul.msk.f32.gmra.mxu0 %vm147_vm2, %v7541_v25  ;;  %v7548_v25 = vld [vmem:[%s12086_s0 + $0x68] sm:$0xff] }
 0x1be   :  { %v8553_v51 = vpop.f32.mrf.mxu0 }
 0x1c1   :  { %6916 = vmatmul.msk.f32.gmra.mxu0 %vm147_vm2, %v7542_v53  ;;  %v8613_v53 = vpop.f32.mrf.mxu1 }
 0x1c2   :  { %12158 = vst [vmem:[#allocation31_spill] sm:$0xff] %v8613_v53 }
 0x1c6   :  { %v8559_v44 = vpop.f32.mrf.mxu0 }
 0x1c9   :  { %6917 = vmatmul.msk.f32.gmra.mxu0 %vm147_vm2, %v7543_v49  ;;  %v8615_v49 = vpop.f32.mrf.mxu2 }
 0x1ca   :  { %12159 = vst [vmem:[#allocation32_spill] sm:$0xff] %v8615_v49 }
 0x1ce   :  { %v8565_v0 = vpop.f32.mrf.mxu0 }
 0x1cf   :  { %12144 = vst [vmem:[#allocation17_spill] sm:$0xff] %v8565_v0 }
 0x1d1   :  { %6918 = vmatmul.msk.f32.gmra.mxu0 %vm147_vm2, %v7544_v13  ;;  %v8629_v1 = vpop.f32.mrf.mxu2 }
 0x1d2   :  { %12164 = vst [vmem:[#allocation37_spill] sm:$0xff] %v8629_v1 }
 0x1d6   :  { %v8573_v41 = vpop.f32.mrf.mxu0 }
 0x1d7   :  { %12146 = vst [vmem:[#allocation19_spill] sm:$0xff] %v8573_v41 }
 0x1d9   :  { %6919 = vmatmul.msk.f32.gmra.mxu0 %vm147_vm2, %v7545_v39  ;;  %v7549_v39 = vld [vmem:[%s12086_s0 + $0x70] sm:$0xff]  ;;  %v8645_v50 = vpop.f32.mrf.mxu2 }
 0x1da   :  { %12168 = vst [vmem:[#allocation41_spill] sm:$0xff] %v8645_v50 }
 0x1de   :  { %v8585_v10 = vpop.f32.mrf.mxu0 }
 0x1df   :  { %12150 = vst [vmem:[#allocation23_spill] sm:$0xff] %v8585_v10 }
 0x1e1   :  { %6920 = vmatmul.msk.f32.gmra.mxu0 %vm147_vm2, %v7546_v52  ;;  %v8623_v52 = vpop.f32.mrf.mxu3 }
 0x1e2   :  { %12161 = vst [vmem:[#allocation34_spill] sm:$0xff] %v8623_v52 }
 0x1e6   :  { %v8595_v58 = vpop.f32.mrf.mxu0 }
 0x1e7   :  { %12153 = vst [vmem:[#allocation26_spill] sm:$0xff] %v8595_v58 }
 0x1e9   :  { %6921 = vmatmul.msk.f32.gmra.mxu0 %vm147_vm2, %v7547_v56  ;;  %v8625_v56 = vpop.f32.mrf.mxu1  ;;  %v8635_v41 = vpop.f32.mrf.mxu3 }
 0x1ea   :  { %12162 = vst [vmem:[#allocation35_spill] sm:$0xff] %v8625_v56 }
 0x1eb   :  { %12165 = vst [vmem:[#allocation38_spill] sm:$0xff] %v8635_v41 }
 0x1ee   :  { %v8605_v16 = vpop.f32.mrf.mxu0 }
 0x1ef   :  { %12156 = vst [vmem:[#allocation29_spill] sm:$0xff] %v8605_v16 }
 0x1f1   :  { %6922 = vmatmul.msk.f32.gmra.mxu0 %vm147_vm2, %v7548_v25  ;;  %v7550_v25 = vld [vmem:[%s12086_s0 + $0x78] sm:$0xff]  ;;  %v8637_v31 = vpop.f32.mrf.mxu1  ;;  %v8647_v58 = vpop.f32.mrf.mxu3 }
 0x1f2   :  { %12166 = vst [vmem:[#allocation39_spill] sm:$0xff] %v8637_v31  ;;  %v1077_v31 = vadd.f32 %v8559_v44, %v8280_v34 }
 0x1f3   :  { %12169 = vst [vmem:[#allocation42_spill] sm:$0xff] %v8647_v58 }
 0x1f6   :  { %v8617_v13 = vpop.f32.mrf.mxu0 }
 0x1f7   :  { %12160 = vst [vmem:[#allocation33_spill] sm:$0xff] %v8617_v13 }
 0x1f9   :  { %6923 = vmatmul.msk.f32.gmra.mxu0 %vm147_vm2, %v7549_v39  ;;  %v7551_v39 = vld [vmem:[%s12086_s0 + $0x80] sm:$0xff]  ;;  %v8651_v33 = vpop.f32.mrf.mxu1  ;;  %v8661_v59 = vpop.f32.mrf.mxu3 }
 0x1fa   :  { %12173 = vst [vmem:[#allocation46_spill] sm:$0xff] %v8661_v59 }
 0x1fe   :  { %v8627_v0 = vpop.f32.mrf.mxu0 }
 0x1ff   :  { %12163 = vst [vmem:[#allocation36_spill] sm:$0xff] %v8627_v0 }
 0x201   :  { %6924 = vmatmul.msk.f32.gmra.mxu0 %vm147_vm2, %v7550_v25  ;;  %v7552_v25 = vld [vmem:[%s12086_s0 + $0x88] sm:$0xff]  ;;  %v8667_v13 = vpop.f32.mrf.mxu1  ;;  %v8677_v22 = vpop.f32.mrf.mxu3 }
 0x202   :  { %12176 = vst [vmem:[#allocation49_spill] sm:$0xff] %v8677_v22 }
 0x206   :  { %v8639_v10 = vpop.f32.mrf.mxu0 }
 0x207   :  { %12167 = vst [vmem:[#allocation40_spill] sm:$0xff] %v8639_v10  ;;  %v8657_v10 = vpop.f32.mrf.mxu2 }
 0x208   :  { %12171 = vst [vmem:[#allocation44_spill] sm:$0xff] %v8657_v10 }
 0x209   :  { %6925 = vmatmul.msk.f32.gmra.mxu0 %vm147_vm2, %v7551_v39  ;;  %v7553_v39 = vld [vmem:[%s12086_s0 + $0x90] sm:$0xff] }
 0x20e   :  { %v8649_v19 = vpop.f32.mrf.mxu0 }
 0x20f   :  { %12170 = vst [vmem:[#allocation43_spill] sm:$0xff] %v8649_v19  ;;  %v8669_v17 = vpop.f32.mrf.mxu2  ;;  %v8679_v19 = vpop.f32.mrf.mxu1 }
 0x210   :  { %12174 = vst [vmem:[#allocation47_spill] sm:$0xff] %v8669_v17 }
 0x211   :  { %6926 = vmatmul.msk.f32.gmra.mxu0 %vm147_vm2, %v7552_v25  ;;  %v7554_v25 = vld [vmem:[%s12086_s0 + $0x98] sm:$0xff] }
 0x216   :  { %v8659_v16 = vpop.f32.mrf.mxu0 }
 0x217   :  { %12172 = vst [vmem:[#allocation45_spill] sm:$0xff] %v8659_v16  ;;  %v8683_v47 = vpop.f32.mrf.mxu2  ;;  %v8691_v24 = vpop.f32.mrf.mxu1 }
 0x219   :  { %6927 = vmatmul.msk.f32.gmra.mxu0 %vm147_vm2, %v7553_v39  ;;  %v7555_v39 = vld [vmem:[%s12086_s0 + $0xa0] sm:$0xff] }
 0x21e   :  { %v8671_v0 = vpop.f32.mrf.mxu0 }
 0x21f   :  { %12175 = vst [vmem:[#allocation48_spill] sm:$0xff] %v8671_v0  ;;  %v8689_v0 = vpop.f32.mrf.mxu3  ;;  %v1238_v18 = vpop.f32.mrf.mxu1 }
 0x220   :  { %12178 = vst [vmem:[#allocation51_spill] sm:$0xff] %v8689_v0 }
 0x221   :  { %6928 = vmatmul.msk.f32.gmra.mxu0 %vm147_vm2, %v7554_v25  ;;  %v7556_v25 = vld [vmem:[%s12086_s0 + $0xa8] sm:$0xff] }
 0x226   :  { %v8681_v16 = vpop.f32.mrf.mxu0 }
 0x227   :  { %12177 = vst [vmem:[#allocation50_spill] sm:$0xff] %v8681_v16  ;;  %v8699_v16 = vpop.f32.mrf.mxu2  ;;  %v8701_v6 = vpop.f32.mrf.mxu3 }
 0x228   :  { %12180 = vst [vmem:[#allocation53_spill] sm:$0xff] %v8701_v6 }
 0x229   :  { %6929 = vmatmul.msk.f32.gmra.mxu0 %vm147_vm2, %v7555_v39  ;;  %v7557_v39 = vld [vmem:[%s12086_s0 + $0xb0] sm:$0xff] }
 0x22e   :  { %v8693_v40 = vpop.f32.mrf.mxu0 }
 0x22f   :  { %12179 = vst [vmem:[#allocation52_spill] sm:$0xff] %v8693_v40  ;;  %v8709_v40 = vpop.f32.mrf.mxu2  ;;  %v8713_v4 = vpop.f32.mrf.mxu3 }
 0x231   :  { %6930 = vmatmul.msk.f32.gmra.mxu0 %vm147_vm2, %v7556_v25  ;;  %v7558_v25 = vld [vmem:[%s12086_s0 + $0xb8] sm:$0xff] }
 0x236   :  { %v8703_v52 = vpop.f32.mrf.mxu0 }
 0x237   :  { %12181 = vst [vmem:[#allocation54_spill] sm:$0xff] %v8703_v52  ;;  %v1241_v52 = vpop.f32.mrf.mxu1  ;;  %v1460_v61 = vpop.f32.mrf.mxu2 }
 0x238   :  { %v8725_v49 = vpop.f32.mrf.mxu3 }
 0x239   :  { %6931 = vmatmul.msk.f32.gmra.mxu0 %vm147_vm2, %v7557_v39  ;;  %v7559_v39 = vld [vmem:[%s12086_s0 + $0xc0] sm:$0xff] }
 0x23e   :  { %v8711_v41 = vpop.f32.mrf.mxu0 }
 0x23f   :  { %12182 = vst [vmem:[#allocation55_spill] sm:$0xff] %v8711_v41  ;;  %v1244_v41 = vpop.f32.mrf.mxu1  ;;  %v1463_v59 = vpop.f32.mrf.mxu2 }
 0x240   :  { %v1682_v1 = vpop.f32.mrf.mxu3 }
 0x241   :  { %6932 = vmatmul.msk.f32.gmra.mxu0 %vm147_vm2, %v7558_v25 }
 0x246   :  { %v8719_v58 = vpop.f32.mrf.mxu0 }
 0x247   :  { %12183 = vst [vmem:[#allocation56_spill] sm:$0xff] %v8719_v58  ;;  %v1247_v20 = vpop.f32.mrf.mxu1  ;;  %v1466_v25 = vpop.f32.mrf.mxu2 }
 0x248   :  { %v1685_v22 = vpop.f32.mrf.mxu3 }
 0x249   :  { %6933 = vmatmul.msk.f32.gmra.mxu0 %vm147_vm2, %v7559_v39 }
 0x24e   :  { %v8727_v63 = vpop.f32.mrf.mxu0 }
 0x24f   :  { %12184 = vst [vmem:[#allocation57_spill] sm:$0xff] %v8727_v63  ;;  %v1250_v58 = vpop.f32.mrf.mxu1  ;;  %v1469_v53 = vpop.f32.mrf.mxu2  ;;  %v1076_v63 = vadd.f32 %v8553_v51, %v8266_v3  ;;  %v1072_v3 = vadd.f32 %v8529_v15, %v8210_v8  ;;  %v624_v15 = vadd.f32 %v7985_v30, %v358_v43 }
 0x250   :  { %v1688_v57 = vpop.f32.mrf.mxu3 }
 0x251   :  { %v1294_v17 = vadd.f32 %v1250_v58, %v1076_v63  ;;  %v1291_v63 = vadd.f32 %v1241_v52, %v1073_v11  ;;  %v1290_v27 = vadd.f32 %v1238_v18, %v1072_v3 }
 0x256   :  { %v8729_v26 = vpop.f32.mrf.mxu0 }
 0x257   :  { %12185 = vst [vmem:[#allocation58_spill] sm:$0xff] %v8729_v26  ;;  %v1253_v0 = vpop.f32.mrf.mxu1  ;;  %v1472_v39 = vpop.f32.mrf.mxu2  ;;  %v1075_v26 = vadd.f32 %v8547_v60, %v8252_v37  ;;  %v1513_v37 = vadd.f32 %v1469_v53, %v1294_v17  ;;  %v12193_v53 = vld [vmem:[#allocation53_spill] sm:$0xff] }
 0x258   :  { %v1691_v56 = vpop.f32.mrf.mxu3  ;;  %v1295_v60 = vadd.f32 %v1253_v0, %v1077_v31  ;;  %v1069_v31 = vadd.f32 %v8513_v36, %v8166_v48  ;;  %v8772_v48 = vld [vmem:[%s12087_s2] ss:$0 sm:$0xff] }
 0x259   :  { %v1732_v8 = vadd.f32 %v1688_v57, %v1513_v37  ;;  %v1509_v57 = vadd.f32 %v8709_v40, %v1290_v27 }
 0x25a   :  { %v1287_v30 = vadd.f32 %v8667_v13, %v1069_v31  ;;  %v12201_v31 = vld [vmem:[#allocation2_spill] sm:$0xff] }
 0x25b   :  { %v1728_v18 = vadd.f32 %v8713_v4, %v1509_v57 }
 0x25e   :  { %v8731_v50 = vpop.f32.mrf.mxu0 }
 0x25f   :  { %12186 = vst [vmem:[#allocation59_spill] sm:$0xff] %v8731_v50  ;;  %v8733_v29 = vpop.f32.mrf.mxu1  ;;  %v8739_v6 = vpop.f32.mrf.mxu2  ;;  %v1074_v50 = vadd.f32 %v8541_v42, %v8238_v7 }
 0x260   :  { %12187 = vst [vmem:[#allocation60_spill] sm:$0xff] %v8733_v29  ;;  %v1293_v29 = vadd.f32 %v1247_v20, %v1075_v26  ;;  %v8747_v38 = vpop.f32.mrf.mxu3  ;;  %v1070_v26 = vadd.f32 %v8517_v62, %v8182_v12  ;;  %v12189_v20 = vld [vmem:[#allocation4_spill] sm:$0xff] }
 0x261   :  { %12188 = vst [vmem:[#allocation61_spill] sm:$0xff] %v8739_v6  ;;  %v1292_v51 = vadd.f32 %v1244_v41, %v1074_v50  ;;  %v1071_v6 = vadd.f32 %v8523_v32, %v8196_v46  ;;  %v1514_v50 = vadd.f32 %v1472_v39, %v1295_v60  ;;  %v1510_v32 = vadd.f32 %v1460_v61, %v1291_v63  ;;  %v12196_v39 = vld [vmem:[#allocation15_spill] sm:$0xff]  ;;  %v12198_v60 = vld [vmem:[#allocation44_spill] sm:$0xff] }
 0x262   :  { %v1512_v34 = vadd.f32 %v1466_v25, %v1293_v29  ;;  %v1288_v12 = vadd.f32 %v8679_v19, %v1070_v26  ;;  %v843_v41 = vadd.f32 %v7988_v35, %v624_v15  ;;  %v8795_v35 = vld [vmem:[%s12088_s3] ss:$0 sm:$0xff]  ;;  %v12195_v25 = vld [vmem:[#allocation3_spill] sm:$0xff]  ;;  %v12204_v15 = vld [vmem:[#allocation41_spill] sm:$0xff] }
 0x263   :  { %v1511_v44 = vadd.f32 %v1463_v59, %v1292_v51  ;;  %v1289_v46 = vadd.f32 %v8691_v24, %v1071_v6  ;;  %v1733_v2 = vadd.f32 %v1691_v56, %v1514_v50  ;;  %v1729_v5 = vadd.f32 %v8725_v49, %v1510_v32  ;;  %v12197_v51 = vld [vmem:[#allocation35_spill] sm:$0xff]  ;;  %v12200_v26 = vld [vmem:[#allocation58_spill] sm:$0xff] }
 0x264   :  { %v1731_v11 = vadd.f32 %v1685_v22, %v1512_v34  ;;  %v1067_v22 = vadd.f32 %v8489_v28, %v8132_v55  ;;  %v1286_v55 = vadd.f32 %v8651_v33, %v1068_v21  ;;  %v1507_v28 = vadd.f32 %v8683_v47, %v1288_v12  ;;  %v12191_v33 = vld [vmem:[#allocation39_spill] sm:$0xff]  ;;  %v12205_v12 = vld [vmem:[#allocation49_spill] sm:$0xff] }
 0x265   :  { %v1730_v59 = vadd.f32 %v1682_v1, %v1511_v44  ;;  %v1508_v62 = vadd.f32 %v8699_v16, %v1289_v46  ;;  %v12192_v47 = vld [vmem:[#allocation47_spill] sm:$0xff]  ;;  %v1064_v3 = vadd.f32 %v12196_v39, %v12195_v25  ;;  %v12202_v46 = vld [vmem:[#allocation14_spill] sm:$0xff]  ;;  %v12217_v39 = vld [vmem:[#allocation28_spill] sm:$0xff] }
 0x266   :  { %v1802_v45 = vpop.f32.mrf.mxu0  ;;  %v1285_v16 = vadd.f32 %v12191_v33, %v1067_v22  ;;  %v1506_v40 = vadd.f32 %v12192_v47, %v1287_v30  ;;  %v12194_v4 = vld [vmem:[#allocation59_spill] sm:$0xff]  ;;  %v1063_v32 = vadd.f32 %v12202_v46, %v12201_v31  ;;  %v12214_v47 = vld [vmem:[#allocation42_spill] sm:$0xff] }
 0x267   :  { %v8753_v7 = vpop.f32.mrf.mxu1  ;;  %v8762_v17 = vpop.f32.mrf.mxu2  ;;  %v1852_v24 = vadd.f32 %v1802_v45, %v1729_v5  ;;  %v1727_v49 = vadd.f32 %v12193_v53, %v1508_v62  ;;  %v1851_v45 = vadd.f32 %v12194_v4, %v1728_v18  ;;  %v12199_v63 = vld [vmem:[#allocation51_spill] sm:$0xff] }
 0x268   :  { %v8778_v9 = vpop.f32.mrf.mxu3  ;;  %v1726_v34 = vadd.f32 %v12199_v63, %v1507_v28  ;;  %v1504_v21 = vadd.f32 %v12204_v15, %v1285_v16  ;;  %v1725_v57 = vadd.f32 %v12205_v12, %v1506_v40  ;;  %v12223_v12 = vld [vmem:[#allocation20_spill] sm:$0xff] }
 0x269   :  { %v1850_v27 = vadd.f32 %v12200_v26, %v1727_v49  ;;  %v1880_v44 = vmul.f32 %v8772_v48, %v1852_v24  ;;  %v1879_v22 = vmul.f32 %v8772_v48, %v1851_v45  ;;  %v12211_v24 = vld [vmem:[#allocation56_spill] sm:$0xff]  ;;  %v12215_v49 = vld [vmem:[#allocation55_spill] sm:$0xff] }
 0x26a   :  { %v1723_v40 = vadd.f32 %v12214_v47, %v1504_v21 }
 0x26e   :  { %v1805_v10 = vpop.f32.mrf.mxu0 }
 0x26f   :  { %v1853_v1 = vadd.f32 %v1805_v10, %v1730_v59  ;;  %v8787_v6 = vpop.f32.mrf.mxu1  ;;  %v8811_v43 = vpop.f32.mrf.mxu2 }
 0x270   :  { %v8830_v18 = vpop.f32.mrf.mxu3 }
 0x271   :  { %v1881_v13 = vmul.f32 %v8772_v48, %v1853_v1  ;;  %v12208_v1 = vld [vmem:[#allocation27_spill] sm:$0xff] }
 0x273   :  { %v1909_v62 = vadd.f32 %v8795_v35, %v1881_v13 }
 0x275   :  { %v1933_v13 = vmax.f32 %v1909_v62, 0.0 }
 0x276   :  { %v1808_v14 = vpop.f32.mrf.mxu0 }
 0x277   :  { %v1854_v36 = vadd.f32 %v1808_v14, %v1731_v11  ;;  %v1066_v14 = vadd.f32 %v8472_v54, %v8102_v23  ;;  %v12190_v23 = vld [vmem:[#allocation16_spill] sm:$0xff]  ;;  %v12203_v11 = vld [vmem:[#allocation31_spill] sm:$0xff]  ;;  %v8838_v53 = vpop.f32.mrf.mxu1  ;;  %v8851_v31 = vpop.f32.mrf.mxu2 }
 0x278   :  { %v1065_v54 = vadd.f32 %v12190_v23, %v12189_v20  ;;  %v1908_v23 = vadd.f32 %v8795_v35, %v1880_v44 }
 0x279   :  { %v1882_v58 = vmul.f32 %v8772_v48, %v1854_v36  ;;  %v1284_v37 = vadd.f32 %v12197_v51, %v1066_v14  ;;  %v12218_v51 = vld [vmem:[#allocation38_spill] sm:$0xff] }
 0x27b   :  { %v1910_v50 = vadd.f32 %v8795_v35, %v1882_v58  ;;  %v1848_v58 = vadd.f32 %v12211_v24, %v1725_v57 }
 0x27d   :  { %v1934_v20 = vmax.f32 %v1910_v50, 0.0  ;;  %v1876_v63 = vmul.f32 %v8772_v48, %v1848_v58 }
 0x27e   :  { %v1811_v42 = vpop.f32.mrf.mxu0 }
 0x27f   :  { %v1855_v29 = vadd.f32 %v1811_v42, %v1732_v8  ;;  %v1505_v42 = vadd.f32 %v12198_v60, %v1286_v55  ;;  %v12210_v55 = vld [vmem:[#allocation46_spill] sm:$0xff] }
 0x280   :  { %v12219_v60 = vld [vmem:[#allocation54_spill] sm:$0xff] }
 0x281   :  { %v1883_v0 = vmul.f32 %v8772_v48, %v1855_v29  ;;  %v1283_v29 = vadd.f32 %v12203_v11, %v1065_v54  ;;  %v1724_v28 = vadd.f32 %v12210_v55, %v1505_v42  ;;  %v12212_v54 = vld [vmem:[#allocation22_spill] sm:$0xff]  ;;  %v1846_v42 = vadd.f32 %v12219_v60, %v1723_v40 }
 0x282   :  { %v1281_v33 = vadd.f32 %v12212_v54, %v1063_v32  ;;  %v12222_v32 = vld [vmem:[#allocation52_spill] sm:$0xff]  ;;  %v12229_v54 = vld [vmem:[#allocation45_spill] sm:$0xff] }
 0x283   :  { %v1911_v56 = vadd.f32 %v8795_v35, %v1883_v0  ;;  %v1282_v0 = vadd.f32 %v12208_v1, %v1064_v3  ;;  %v1847_v4 = vadd.f32 %v12215_v49, %v1724_v28  ;;  %v1874_v62 = vmul.f32 %v8772_v48, %v1846_v42  ;;  %v12226_v1 = vld [vmem:[#allocation25_spill] sm:$0xff]  ;;  %v12230_v49 = vld [vmem:[#allocation43_spill] sm:$0xff] }
 0x285   :  { %v1935_v30 = vmax.f32 %v1911_v56, 0.0  ;;  %v12216_v56 = vld [vmem:[#allocation18_spill] sm:$0xff]  ;;  %v1501_v3 = vadd.f32 %v12217_v39, %v1282_v0  ;;  %v1902_v47 = vadd.f32 %v8795_v35, %v1874_v62 }
 0x286   :  { %v1814_v19 = vpop.f32.mrf.mxu0 }
 0x287   :  { %v1856_v61 = vadd.f32 %v1814_v19, %v1733_v2  ;;  %v12206_v2 = vld [vmem:[#allocation57_spill] sm:$0xff]  ;;  %v1926_v39 = vmax.f32 %v1902_v47, 0.0 }
 0x288   :  { %v1849_v36 = vadd.f32 %v12206_v2, %v1726_v34  ;;  %v12207_v19 = vld [vmem:[#allocation13_spill] sm:$0xff]  ;;  %v1932_v34 = vmax.f32 %v1908_v23, 0.0  ;;  %v12224_v2 = vld [vmem:[#allocation30_spill] sm:$0xff]  ;;  %v8870_v23 = vpop.f32.mrf.mxu1 }
 0x289   :  { %v1884_v10 = vmul.f32 %v8772_v48, %v1856_v61  ;;  %v1062_v5 = vadd.f32 %v12207_v19, %v843_v41  ;;  %v12209_v61 = vld [vmem:[#allocation37_spill] sm:$0xff]  ;;  %v12213_v41 = vld [vmem:[#allocation32_spill] sm:$0xff] }
 0x28a   :  { %v1503_v14 = vadd.f32 %v12209_v61, %v1284_v37  ;;  %v1502_v16 = vadd.f32 %v12213_v41, %v1283_v29  ;;  %v1877_v45 = vmul.f32 %v8772_v48, %v1849_v36  ;;  %v1875_v29 = vmul.f32 %v8772_v48, %v1847_v4  ;;  %v8864_v61 = vpop.f32.mrf.mxu3 }
 0x28b   :  { %v1912_v52 = vadd.f32 %v8795_v35, %v1884_v10  ;;  %v1878_v10 = vmul.f32 %v8772_v48, %v1850_v27  ;;  %v1280_v25 = vadd.f32 %v12216_v56, %v1062_v5  ;;  %v12220_v27 = vld [vmem:[#allocation24_spill] sm:$0xff]  ;;  %v1720_v36 = vadd.f32 %v12224_v2, %v1501_v3  ;;  %v8880_v56 = vpop.f32.mrf.mxu2 }
 0x28c   :  { %v1722_v37 = vadd.f32 %v12218_v51, %v1503_v14  ;;  %v1500_v44 = vadd.f32 %v12220_v27, %v1281_v33  ;;  %v1905_v21 = vadd.f32 %v8795_v35, %v1877_v45  ;;  %v1904_v5 = vadd.f32 %v8795_v35, %v1876_v63  ;;  %v12227_v14 = vld [vmem:[#allocation48_spill] sm:$0xff] }
 0x28d   :  { %v1936_v8 = vmax.f32 %v1912_v52, 0.0  ;;  %v1907_v52 = vadd.f32 %v8795_v35, %v1879_v22  ;;  %v1906_v26 = vadd.f32 %v8795_v35, %v1878_v10  ;;  %v1499_v57 = vadd.f32 %v12223_v12, %v1280_v25  ;;  %v12225_v22 = vld [vmem:[#allocation50_spill] sm:$0xff]  ;;  %v12228_v10 = vld [vmem:[#allocation21_spill] sm:$0xff] }
 0x28e   :  { %v8821_v59 = vpop.f32.mrf.mxu0  ;;  %v1845_v11 = vadd.f32 %v12222_v32, %v1722_v37  ;;  %v1719_v0 = vadd.f32 %v12226_v1, %v1500_v44  ;;  %v1843_v55 = vadd.f32 %v12227_v14, %v1720_v36  ;;  %v1929_v24 = vmax.f32 %v1905_v21, 0.0  ;;  %v12231_v36 = vld [vmem:[#allocation11_spill] sm:$0xff]  ;;  %v12235_v14 = vld [vmem:[#allocation9_spill] sm:$0xff] }
 0x28f   :  { %2006 = vmatpush.msra.mxu1 %v1936_v8  ;;  %2172 = vmatpush.msra.mxu3 %v1936_v8  ;;  %v12221_v8 = vld [vmem:[#allocation34_spill] sm:$0xff]  ;;  %v1931_v15 = vmax.f32 %v1907_v52, 0.0  ;;  %v1930_v19 = vmax.f32 %v1906_v26, 0.0  ;;  %v1903_v58 = vadd.f32 %v8795_v35, %v1875_v29 }
 0x290   :  { %v1721_v50 = vadd.f32 %v12221_v8, %v1502_v16  ;;  %v1873_v28 = vmul.f32 %v8772_v48, %v1845_v11  ;;  %v1842_v33 = vadd.f32 %v12229_v54, %v1719_v0  ;;  %v1928_v16 = vmax.f32 %v1904_v5, 0.0  ;;  %v1271_v26 = vpop.f32.mrf.mxu1  ;;  %v1945_v29 = vld [vmem:[%s12089_s7] sm:$0xff]  ;;  %v12234_v5 = vld [vmem:[#allocation33_spill] sm:$0xff] }
 0x291   :  { %2007 = vmatpush.msra.mxu1 %v1935_v30  ;;  %2173 = vmatpush.msra.mxu3 %v1935_v30  ;;  %v1871_v45 = vmul.f32 %v8772_v48, %v1843_v55  ;;  %v12236_v55 = vld [vmem:[#allocation29_spill] sm:$0xff] }
 0x292   :  { %v1844_v30 = vadd.f32 %v12225_v22, %v1721_v50  ;;  %v1901_v52 = vadd.f32 %v8795_v35, %v1873_v28  ;;  %v1870_v25 = vmul.f32 %v8772_v48, %v1842_v33  ;;  %v8886_v42 = vpop.f32.mrf.mxu3  ;;  %v12232_v22 = vld [vmem:[#allocation36_spill] sm:$0xff]  ;;  %v1082_v28 = vadd.f32 %v12236_v55, %v12235_v14 }
 0x293   :  { %2008 = vmatpush.msra.mxu1 %v1934_v20  ;;  %2174 = vmatpush.msra.mxu3 %v1934_v20  ;;  %v1718_v20 = vadd.f32 %v12228_v10, %v1499_v57  ;;  %v1899_v60 = vadd.f32 %v8795_v35, %v1871_v45  ;;  %v1490_v32 = vpop.f32.mrf.mxu2  ;;  %v1947_v57 = vld [vmem:[%s12089_s7 + $0x10] sm:$0xff]  ;;  %v12242_v45 = vld [vmem:[#allocation23_spill] sm:$0xff] }
 0x294   :  { %v1872_v41 = vmul.f32 %v8772_v48, %v1844_v30  ;;  %v1925_v37 = vmax.f32 %v1901_v52, 0.0  ;;  %v1084_v30 = vadd.f32 %v12232_v22, %v12231_v36  ;;  %v12238_v10 = vld [vmem:[#allocation40_spill] sm:$0xff]  ;;  %v1300_v52 = vadd.f32 %v8870_v23, %v1082_v28  ;;  %v12248_v28 = vld [vmem:[#allocation61_spill] sm:$0xff] }
 0x295   :  { %2009 = vmatpush.msra.mxu1 %v1933_v13  ;;  %2175 = vmatpush.msra.mxu3 %v1933_v13  ;;  %v1841_v4 = vadd.f32 %v12230_v49, %v1718_v20  ;;  %v1927_v13 = vmax.f32 %v1903_v58, 0.0  ;;  %v1923_v44 = vmax.f32 %v1899_v60, 0.0  ;;  %v12237_v58 = vld [vmem:[#allocation12_spill] sm:$0xff]  ;;  %v1949_v49 = vld [vmem:[%s12089_s7 + $0x20] sm:$0xff] }
 0x296   :  { %v8853_v46 = vpop.f32.mrf.mxu0  ;;  %v1900_v3 = vadd.f32 %v8795_v35, %v1872_v41  ;;  %v1085_v20 = vadd.f32 %v12238_v10, %v12237_v58  ;;  %v12239_v33 = vld [vmem:[#allocation8_spill] sm:$0xff]  ;;  %v12240_v41 = vld [vmem:[#allocation26_spill] sm:$0xff] }
 0x297   :  { %2010 = vmatpush.msra.mxu1 %v1932_v34  ;;  %2176 = vmatpush.msra.mxu3 %v1932_v34  ;;  %v1869_v51 = vmul.f32 %v8772_v48, %v1841_v4  ;;  %v1898_v34 = vadd.f32 %v8795_v35, %v1870_v25  ;;  %v12241_v4 = vld [vmem:[#allocation7_spill] sm:$0xff] }
 0x298   :  { %v1924_v63 = vmax.f32 %v1900_v3, 0.0  ;;  %v1274_v12 = vpop.f32.mrf.mxu1  ;;  %v12243_v3 = vld [vmem:[#allocation6_spill] sm:$0xff] }
 0x299   :  { %2011 = vmatpush.msra.mxu1 %v1931_v15  ;;  %2177 = vmatpush.msra.mxu3 %v1931_v15  ;;  %v1897_v8 = vadd.f32 %v8795_v35, %v1869_v51  ;;  %v1922_v50 = vmax.f32 %v1898_v34, 0.0  ;;  %v12244_v51 = vld [vmem:[#allocation19_spill] sm:$0xff] }
 0x29a   :  { %v1709_v15 = vpop.f32.mrf.mxu3 }
 0x29b   :  { %2012 = vmatpush.msra.mxu1 %v1930_v19  ;;  %2178 = vmatpush.msra.mxu3 %v1930_v19  ;;  %v1921_v11 = vmax.f32 %v1897_v8, 0.0  ;;  %v1493_v2 = vpop.f32.mrf.mxu2  ;;  %v12233_v19 = vld [vmem:[#allocation10_spill] sm:$0xff]  ;;  %v12246_v8 = vld [vmem:[#allocation17_spill] sm:$0xff] }
 0x29c   :  { %v1083_v1 = vadd.f32 %v12234_v5, %v12233_v19 }
 0x29d   :  { %2013 = vmatpush.msra.mxu1 %v1929_v24  ;;  %2179 = vmatpush.msra.mxu3 %v1929_v24  ;;  %v1302_v24 = vadd.f32 %v1274_v12, %v1084_v30 }
 0x29e   :  { %v8875_v40 = vpop.f32.mrf.mxu0  ;;  %v1301_v47 = vadd.f32 %v1271_v26, %v1083_v1 }
 0x29f   :  { %2014 = vmatpush.msra.mxu1 %v1928_v16  ;;  %2180 = vmatpush.msra.mxu3 %v1928_v16  ;;  %v1081_v16 = vadd.f32 %v12240_v41, %v12239_v33  ;;  %v1521_v25 = vadd.f32 %v1493_v2, %v1302_v24 }
 0x2a0   :  { %v1277_v54 = vpop.f32.mrf.mxu1  ;;  %v1520_v26 = vadd.f32 %v1490_v32, %v1301_v47  ;;  %v12247_v32 = vld [vmem:[#allocation60_spill] sm:$0xff] }
 0x2a1   :  { %2015 = vmatpush.msra.mxu1 %v1927_v13  ;;  %2181 = vmatpush.msra.mxu3 %v1927_v13  ;;  %v1080_v13 = vadd.f32 %v12242_v45, %v12241_v4  ;;  %v1299_v34 = vadd.f32 %v8838_v53, %v1081_v16  ;;  %v1951_v53 = vld [vmem:[%s12089_s7 + $0x30] sm:$0xff] }
 0x2a2   :  { %v1712_v0 = vpop.f32.mrf.mxu3  ;;  %v1739_v22 = vadd.f32 %v1709_v15, %v1520_v26  ;;  %v2112_v26 = vld [vmem:[%s12090_s8] sm:$0xff] }
 0x2a3   :  { %2016 = vmatpush.msra.mxu1 %v1926_v39  ;;  %2182 = vmatpush.msra.mxu3 %v1926_v39  ;;  %v1303_v39 = vadd.f32 %v1277_v54, %v1085_v20  ;;  %v1496_v60 = vpop.f32.mrf.mxu2  ;;  %v1740_v12 = vadd.f32 %v1712_v0, %v1521_v25  ;;  %v1518_v36 = vadd.f32 %v8851_v31, %v1299_v34  ;;  %v1953_v20 = vld [vmem:[%s12089_s7 + $0x40] sm:$0xff]  ;;  %v1948_v34 = vld [vmem:[%s12089_s7 + $0x18] sm:$0xff] }
 0x2a5   :  { %2017 = vmatpush.msra.mxu1 %v1925_v37  ;;  %2183 = vmatpush.msra.mxu3 %v1925_v37  ;;  %v1079_v37 = vadd.f32 %v12244_v51, %v12243_v3  ;;  %v1522_v23 = vadd.f32 %v1496_v60, %v1303_v39  ;;  %v1737_v31 = vadd.f32 %v8864_v61, %v1518_v36  ;;  %v1957_v60 = vld [vmem:[%s12089_s7 + $0x60] sm:$0xff]  ;;  %v1967_v36 = vld [vmem:[%s12089_s7 + $0xb0] sm:$0xff] }
 0x2a6   :  { %v8889_v27 = vpop.f32.mrf.mxu0 }
 0x2a7   :  { %2018 = vmatpush.msra.mxu1 %v1924_v63  ;;  %2184 = vmatpush.msra.mxu3 %v1924_v63 }
 0x2a9   :  { %2019 = vmatpush.msra.mxu1 %v1923_v44  ;;  %2185 = vmatpush.msra.mxu3 %v1923_v44  ;;  %v12245_v44 = vld [vmem:[#allocation5_spill] sm:$0xff] }
 0x2aa   :  { %v1715_v2 = vpop.f32.mrf.mxu3 }
 0x2ab   :  { %2020 = vmatpush.msra.mxu1 %v1922_v50  ;;  %2186 = vmatpush.msra.mxu3 %v1922_v50  ;;  %v1078_v50 = vadd.f32 %v12246_v8, %v12245_v44  ;;  %v1961_v44 = vld [vmem:[%s12089_s7 + $0x80] sm:$0xff]  ;;  %v1950_v8 = vld [vmem:[%s12089_s7 + $0x28] sm:$0xff] }
 0x2ad   :  { %2021 = vmatpush.msra.mxu1 %v1921_v11  ;;  %2187 = vmatpush.msra.mxu3 %v1921_v11  ;;  %v1298_v11 = vadd.f32 %v8787_v6, %v1080_v13  ;;  %v1296_v19 = vadd.f32 %v12247_v32, %v1078_v50  ;;  %v2114_v50 = vld [vmem:[%s12090_s8 + $0x10] sm:$0xff]  ;;  %v2113_v32 = vld [vmem:[%s12090_s8 + $0x8] sm:$0xff] }
 0x2ae   :  { %v1829_v21 = vpop.f32.mrf.mxu0  ;;  %2022 = vmatmul.f32.vlgmr.msra.gmra.mxu1 %v1945_v29  ;;  %v1519_v29 = vadd.f32 %v8880_v56, %v1300_v52  ;;  %v1741_v56 = vadd.f32 %v1715_v2, %v1522_v23  ;;  %2188 = vmatmul.f32.vlgmr.msra.gmra.mxu3 %v2112_v26  ;;  %v1965_v23 = vld [vmem:[%s12089_s7 + $0xa0] sm:$0xff]  ;;  %v2118_v2 = vld [vmem:[%s12090_s8 + $0x30] sm:$0xff] }
 0x2af   :  { %v1517_v5 = vadd.f32 %v8811_v43, %v1298_v11  ;;  %v1515_v24 = vadd.f32 %v12248_v28, %v1296_v19  ;;  %v1860_v43 = vadd.f32 %v8889_v27, %v1737_v31  ;;  %v1963_v11 = vld [vmem:[%s12089_s7 + $0x90] sm:$0xff]  ;;  %v1964_v31 = vld [vmem:[%s12089_s7 + $0x98] sm:$0xff]  ;;  %v1966_v28 = vld [vmem:[%s12089_s7 + $0xa8] sm:$0xff] }
 0x2b0   :  { %v1738_v6 = vadd.f32 %v8886_v42, %v1519_v29  ;;  %v1952_v29 = vld [vmem:[%s12089_s7 + $0x38] sm:$0xff]  ;;  %v2122_v19 = vld [vmem:[%s12090_s8 + $0x50] sm:$0xff] }
 0x2b1   :  { %v1736_v58 = vadd.f32 %v8830_v18, %v1517_v5  ;;  %v1734_v27 = vadd.f32 %v8747_v38, %v1515_v24  ;;  %v1888_v33 = vmul.f32 %v8772_v48, %v1860_v43  ;;  %v1960_v5 = vld [vmem:[%s12089_s7 + $0x78] sm:$0xff]  ;;  %v2121_v24 = vld [vmem:[%s12090_s8 + $0x48] sm:$0xff] }
 0x2b2   :  { %v1861_v15 = vadd.f32 %v1829_v21, %v1738_v6  ;;  %v2115_v6 = vld [vmem:[%s12090_s8 + $0x18] sm:$0xff] }
 0x2b3   :  { %v1859_v10 = vadd.f32 %v8875_v40, %v1736_v58  ;;  %v1857_v40 = vadd.f32 %v8821_v59, %v1734_v27  ;;  %v1955_v59 = vld [vmem:[%s12089_s7 + $0x50] sm:$0xff] }
 0x2b4   :  { %v1889_v61 = vmul.f32 %v8772_v48, %v1861_v15  ;;  %v2119_v15 = vld [vmem:[%s12090_s8 + $0x38] sm:$0xff]  ;;  %v2130_v58 = vld [vmem:[%s12090_s8 + $0x90] sm:$0xff] }
 0x2b5   :  { %v1887_v16 = vmul.f32 %v8772_v48, %v1859_v10  ;;  %v1885_v45 = vmul.f32 %v8772_v48, %v1857_v40  ;;  %v2133_v40 = vld [vmem:[%s12090_s8 + $0xa8] sm:$0xff] }
 0x2b6   :  { %v1832_v62 = vpop.f32.mrf.mxu0  ;;  %2025 = vmatmul.f32.gmra.mxu1 %v1947_v57  ;;  %v1297_v57 = vadd.f32 %v8753_v7, %v1079_v37  ;;  %2191 = vmatmul.f32.gmra.mxu3 %v2114_v50 }
 0x2b7   :  { %v1862_v1 = vadd.f32 %v1832_v62, %v1739_v22  ;;  %v1915_v52 = vadd.f32 %v8795_v35, %v1887_v16  ;;  %v1956_v22 = vld [vmem:[%s12089_s7 + $0x58] sm:$0xff] }
 0x2b8   :  { %v1516_v0 = vadd.f32 %v8762_v17, %v1297_v57  ;;  %v1954_v57 = vld [vmem:[%s12089_s7 + $0x48] sm:$0xff] }
 0x2b9   :  { %v1890_v42 = vmul.f32 %v8772_v48, %v1862_v1  ;;  %v1939_v3 = vmax.f32 %v1915_v52, 0.0  ;;  %v1962_v1 = vld [vmem:[%s12089_s7 + $0x88] sm:$0xff] }
 0x2ba   :  { %v1735_v17 = vadd.f32 %v8778_v9, %v1516_v0  ;;  %v2117_v0 = vld [vmem:[%s12090_s8 + $0x28] sm:$0xff] }
 0x2bb   :  { %v1918_v9 = vadd.f32 %v8795_v35, %v1890_v42  ;;  %v1968_v42 = vld [vmem:[%s12089_s7 + $0xb8] sm:$0xff]  ;;  %v7009_v52 = vld [vmem:[%s12091_s4 + $0x48] sm:$0xff] }
 0x2bc   :  { %v1858_v54 = vadd.f32 %v8853_v46, %v1735_v17  ;;  %v1916_v46 = vadd.f32 %v8795_v35, %v1888_v33  ;;  %v2132_v17 = vld [vmem:[%s12090_s8 + $0xa0] sm:$0xff]  ;;  %2755 = vmatpush.msra.mxu0 %v7009_v52 }
 0x2bd   :  { %v1942_v38 = vmax.f32 %v1918_v9, 0.0 }
 0x2be   :  { %v1835_v63 = vpop.f32.mrf.mxu0  ;;  %2028 = vmatmul.f32.gmra.mxu1 %v1949_v49  ;;  %v1917_v49 = vadd.f32 %v8795_v35, %v1889_v61  ;;  %v1886_v4 = vmul.f32 %v8772_v48, %v1858_v54  ;;  %v1940_v25 = vmax.f32 %v1916_v46, 0.0  ;;  %v2125_v61 = vld [vmem:[%s12090_s8 + $0x68] sm:$0xff] }
 0x2bf   :  { %v1863_v30 = vadd.f32 %v1835_v63, %v1740_v12  ;;  %v1946_v63 = vld [vmem:[%s12089_s7 + $0x8] sm:$0xff]  ;;  %v2116_v12 = vld [vmem:[%s12090_s8 + $0x20] sm:$0xff] }
 0x2c0   :  { %v1941_v13 = vmax.f32 %v1917_v49, 0.0  ;;  %v1914_v39 = vadd.f32 %v8795_v35, %v1886_v4  ;;  %2194 = vmatmul.f32.gmra.mxu3 %v2116_v12  ;;  %v2129_v54 = vld [vmem:[%s12090_s8 + $0x88] sm:$0xff] }
 0x2c1   :  { %v1891_v14 = vmul.f32 %v8772_v48, %v1863_v30  ;;  %v2120_v30 = vld [vmem:[%s12090_s8 + $0x40] sm:$0xff]  ;;  %v2291_v4 = vld [vmem:[%s12091_s4 + $0x8] sm:$0xff] }
 0x2c2   :  { %v1938_v51 = vmax.f32 %v1914_v39, 0.0  ;;  %2439 = vmatpush.msrb.mxu3 %v2291_v4  ;;  %v6958_v39 = vld [vmem:[%s12091_s4 + $0x10] sm:$0xff] }
 0x2c3   :  { %v1919_v18 = vadd.f32 %v8795_v35, %v1891_v14  ;;  %v2128_v14 = vld [vmem:[%s12090_s8 + $0x80] sm:$0xff] }
 0x2c5   :  { %v1943_v47 = vmax.f32 %v1919_v18, 0.0  ;;  %v2127_v18 = vld [vmem:[%s12090_s8 + $0x78] sm:$0xff] }
 0x2c6   :  { %v1838_v7 = vpop.f32.mrf.mxu0  ;;  %2031 = vmatmul.f32.gmra.mxu1 %v1951_v53  ;;  %v1958_v53 = vld [vmem:[%s12089_s7 + $0x68] sm:$0xff] }
 0x2c7   :  { %v1864_v55 = vadd.f32 %v1838_v7, %v1741_v56  ;;  %v2124_v56 = vld [vmem:[%s12090_s8 + $0x60] sm:$0xff]  ;;  %v2126_v7 = vld [vmem:[%s12090_s8 + $0x70] sm:$0xff] }
 0x2c8   :  { %2197 = vmatmul.f32.gmra.mxu3 %v2118_v2 }
 0x2c9   :  { %v1892_v62 = vmul.f32 %v8772_v48, %v1864_v55  ;;  %v1913_v48 = vadd.f32 %v8795_v35, %v1885_v45 }
 0x2cb   :  { %v1920_v21 = vadd.f32 %v8795_v35, %v1892_v62  ;;  %v1937_v37 = vmax.f32 %v1913_v48, 0.0  ;;  %v1959_v35 = vld [vmem:[%s12089_s7 + $0x70] sm:$0xff]  ;;  %v2123_v62 = vld [vmem:[%s12090_s8 + $0x58] sm:$0xff] }
 0x2cc   :  { %v7021_v48 = vld [vmem:[%s12091_s4 + $0x50] sm:$0xff] }
 0x2cd   :  { %v1944_v41 = vmax.f32 %v1920_v21, 0.0  ;;  %v2134_v21 = vld [vmem:[%s12090_s8 + $0xb0] sm:$0xff] }
 0x2ce   :  { %2034 = vmatmul.f32.gmra.mxu1 %v1953_v20 }
 0x2cf   :  { %2067 = vmatpush.msra.mxu2 %v1944_v41  ;;  %2233 = vmatpush.msrb.mxu1 %v1944_v41  ;;  %v2131_v41 = vld [vmem:[%s12090_s8 + $0x98] sm:$0xff] }
 0x2d0   :  { %2200 = vmatmul.f32.gmra.mxu3 %v2120_v30 }
 0x2d1   :  { %2068 = vmatpush.msra.mxu2 %v1943_v47  ;;  %2234 = vmatpush.msrb.mxu1 %v1943_v47  ;;  %v2135_v47 = vld [vmem:[%s12090_s8 + $0xb8] sm:$0xff] }
 0x2d3   :  { %2069 = vmatpush.msra.mxu2 %v1942_v38  ;;  %2235 = vmatpush.msrb.mxu1 %v1942_v38  ;;  %v2290_v38 = vld [vmem:[%s12091_s4] sm:$0xff] }
 0x2d4   :  { %2440 = vmatpush.msrb.mxu3 %v2290_v38 }
 0x2d5   :  { %2070 = vmatpush.msra.mxu2 %v1941_v13  ;;  %2236 = vmatpush.msrb.mxu1 %v1941_v13 }
 0x2d6   :  { %2037 = vmatmul.f32.gmra.mxu1 %v1955_v59  ;;  %v6959_v59 = vld [vmem:[%s12091_s4 + $0x18] sm:$0xff] }
 0x2d7   :  { %2071 = vmatpush.msra.mxu2 %v1940_v25  ;;  %2237 = vmatpush.msrb.mxu1 %v1940_v25  ;;  %v7022_v25 = vld [vmem:[%s12091_s4 + $0x58] sm:$0xff] }
 0x2d8   :  { %2203 = vmatmul.f32.gmra.mxu3 %v2122_v19 }
 0x2d9   :  { %2072 = vmatpush.msra.mxu2 %v1939_v3  ;;  %2238 = vmatpush.msrb.mxu1 %v1939_v3  ;;  %v7008_v3 = vld [vmem:[%s12091_s4 + $0x40] sm:$0xff] }
 0x2da   :  { %2756 = vmatpush.msra.mxu0 %v7008_v3 }
 0x2db   :  { %2073 = vmatpush.msra.mxu2 %v1938_v51  ;;  %2239 = vmatpush.msrb.mxu1 %v1938_v51 }
 0x2dd   :  { %2074 = vmatpush.msra.mxu2 %v1937_v37  ;;  %2240 = vmatpush.msrb.mxu1 %v1937_v37 }
 0x2de   :  { %2040 = vmatmul.f32.gmra.mxu1 %v1957_v60  ;;  %6934 = vmatmul.msk.f32.vlgmr.msra.gmra.mxu2 %vm1969_vm8, %v1946_v63 }
 0x2df   :  { %2367 = vmatpush.msrb.mxu2 %v6959_v59  ;;  %2864 = vmatpush.msra.mxu1 %v7022_v25 }
 0x2e0   :  { %2206 = vmatmul.f32.gmra.mxu3 %v2124_v56 }
 0x2e1   :  { %2368 = vmatpush.msrb.mxu2 %v6958_v39  ;;  %2865 = vmatpush.msra.mxu1 %v7021_v48 }
 0x2e6   :  { %2043 = vmatmul.f32.gmra.mxu1 %v1959_v35  ;;  %6935 = vmatmul.msk.f32.gmra.mxu2 %vm1969_vm8, %v1948_v34 }
 0x2e8   :  { %2209 = vmatmul.f32.gmra.mxu3 %v2126_v7 }
 0x2ee   :  { %2046 = vmatmul.f32.gmra.mxu1 %v1961_v44  ;;  %6936 = vmatmul.msk.f32.gmra.mxu2 %vm1969_vm8, %v1950_v8 }
 0x2f0   :  { %2212 = vmatmul.f32.gmra.mxu3 %v2128_v14 }
 0x2f6   :  { %2049 = vmatmul.f32.gmra.mxu1 %v1963_v11  ;;  %6937 = vmatmul.msk.f32.gmra.mxu2 %vm1969_vm8, %v1952_v29 }
 0x2f8   :  { %2215 = vmatmul.f32.gmra.mxu3 %v2130_v58 }
 0x2fe   :  { %2052 = vmatmul.f32.gmra.mxu1 %v1965_v23  ;;  %6938 = vmatmul.msk.f32.gmra.mxu2 %vm1969_vm8, %v1954_v57 }
 0x300   :  { %2218 = vmatmul.f32.gmra.mxu3 %v2132_v17 }
 0x306   :  { %2055 = vmatmul.f32.gmra.mxu1 %v1967_v36  ;;  %6939 = vmatmul.msk.f32.gmra.mxu2 %vm1969_vm8, %v1956_v22 }
 0x308   :  { %2221 = vmatmul.f32.gmra.mxu3 %v2134_v21 }
 0x30e   :  { %6940 = vmatmul.msk.f32.gmra.mxu2 %vm1969_vm8, %v1958_v53  ;;  %6946 = vmatmul.msk.f32.vlgmr.msrb.gmra.mxu1 %vm1969_vm8, %v2113_v32 }
 0x316   :  { %6941 = vmatmul.msk.f32.gmra.mxu2 %vm1969_vm8, %v1960_v5  ;;  %6947 = vmatmul.msk.f32.gmra.mxu1 %vm1969_vm8, %v2115_v6 }
 0x31e   :  { %6942 = vmatmul.msk.f32.gmra.mxu2 %vm1969_vm8, %v1962_v1  ;;  %6948 = vmatmul.msk.f32.gmra.mxu1 %vm1969_vm8, %v2117_v0 }
 0x326   :  { %6943 = vmatmul.msk.f32.gmra.mxu2 %vm1969_vm8, %v1964_v31  ;;  %6949 = vmatmul.msk.f32.gmra.mxu1 %vm1969_vm8, %v2119_v15 }
 0x32b   :  { %v2023_v55 = vpop.f32.mrf.mxu1 }
 0x32e   :  { %6944 = vmatmul.msk.f32.gmra.mxu2 %vm1969_vm8, %v1966_v28  ;;  %6950 = vmatmul.msk.f32.gmra.mxu1 %vm1969_vm8, %v2121_v24 }
 0x331   :  { %v2189_v13 = vpop.f32.mrf.mxu3 }
 0x333   :  { %v9073_v43 = vpop.f32.mrf.mxu1 }
 0x336   :  { %6945 = vmatmul.msk.f32.gmra.mxu2 %vm1969_vm8, %v1968_v42  ;;  %6951 = vmatmul.msk.f32.gmra.mxu1 %vm1969_vm8, %v2123_v62 }
 0x339   :  { %v2192_v60 = vpop.f32.mrf.mxu3 }
 0x33b   :  { %v9086_v10 = vpop.f32.mrf.mxu1 }
 0x33e   :  { %6952 = vmatmul.msk.f32.gmra.mxu1 %vm1969_vm8, %v2125_v61 }
 0x343   :  { %v9095_v20 = vpop.f32.mrf.mxu1  ;;  %v2195_v34 = vpop.f32.mrf.mxu3 }
 0x346   :  { %6953 = vmatmul.msk.f32.gmra.mxu1 %vm1969_vm8, %v2127_v18 }
 0x34b   :  { %v9101_v27 = vpop.f32.mrf.mxu1  ;;  %v2198_v29 = vpop.f32.mrf.mxu3 }
 0x34e   :  { %6954 = vmatmul.msk.f32.gmra.mxu1 %vm1969_vm8, %v2129_v54 }
 0x353   :  { %v9107_v33 = vpop.f32.mrf.mxu1  ;;  %v2201_v7 = vpop.f32.mrf.mxu3 }
 0x356   :  { %6955 = vmatmul.msk.f32.gmra.mxu1 %vm1969_vm8, %v2131_v41 }
 0x35b   :  { %v9113_v9 = vpop.f32.mrf.mxu1  ;;  %v2204_v21 = vpop.f32.mrf.mxu3 }
 0x35e   :  { %6956 = vmatmul.msk.f32.gmra.mxu1 %vm1969_vm8, %v2133_v40 }
 0x361   :  { %v2076_v46 = vpop.f32.mrf.mxu2 }
 0x362   :  { %v2077_v44 = vadd.f32 %v2076_v46, %v2023_v55 }
 0x363   :  { %v9119_v16 = vpop.f32.mrf.mxu1  ;;  %v2207_v25 = vpop.f32.mrf.mxu3 }
 0x366   :  { %6957 = vmatmul.msk.f32.gmra.mxu1 %vm1969_vm8, %v2135_v47 }
 0x369   :  { %v2079_v37 = vpop.f32.mrf.mxu2 }
 0x36a   :  { %v2080_v23 = vadd.f32 %v2079_v37, %v9073_v43 }
 0x36b   :  { %v9125_v49 = vpop.f32.mrf.mxu1 }
 0x371   :  { %v2082_v35 = vpop.f32.mrf.mxu2 }
 0x372   :  { %v2083_v31 = vadd.f32 %v2082_v35, %v9086_v10 }
 0x373   :  { %v9133_v45 = vpop.f32.mrf.mxu1 }
 0x379   :  { %v2085_v11 = vpop.f32.mrf.mxu2 }
 0x37a   :  { %v2086_v17 = vadd.f32 %v2085_v11, %v9095_v20 }
 0x37b   :  { %v9153_v51 = vpop.f32.mrf.mxu1 }
 0x381   :  { %v2088_v5 = vpop.f32.mrf.mxu2 }
 0x382   :  { %v2089_v46 = vadd.f32 %v2088_v5, %v9101_v27 }
 0x383   :  { %v9155_v63 = vpop.f32.mrf.mxu1 }
 0x389   :  { %v2091_v10 = vpop.f32.mrf.mxu2 }
 0x38b   :  { %v2242_v26 = vpop.f32.mrf.mxu1 }
 0x38c   :  { %v2243_v8 = vadd.f32 %v2242_v26, %v2189_v13 }
 0x38e   :  { %v9157_v50 = vmax.f32 %v2077_v44, %v2243_v8 }
 0x390   :  { %6971 = vmatmul.msk.f32.vlgmr.msrb.gmra.mxu3 %vm2330_vm9, %v9157_v50  ;;  %v2307_v36 = vrot.slane %v9157_v50, 1  ;;  %v2696_v22 = vrot.slane %v9157_v50, 4  ;;  %v2805_v32 = vrot.slane %v9157_v50, 5 }
 0x391   :  { %v2094_v59 = vpop.f32.mrf.mxu2 }
 0x393   :  { %v2245_v12 = vpop.f32.mrf.mxu1 }
 0x394   :  { %v2246_v57 = vadd.f32 %v2245_v12, %v2192_v60 }
 0x396   :  { %v9162_v2 = vmax.f32 %v2080_v23, %v2246_v57  ;;  %v2210_v23 = vpop.f32.mrf.mxu3 }
 0x398   :  { %6972 = vmatmul.msk.f32.gmra.mxu3 %vm2330_vm9, %v9162_v2  ;;  %v2308_v30 = vrot.slane %v9162_v2, 1  ;;  %v2697_v53 = vrot.slane %v9162_v2, 4  ;;  %v2806_v19 = vrot.slane %v9162_v2, 5 }
 0x399   :  { %v2097_v8 = vpop.f32.mrf.mxu2 }
 0x39a   :  { %v2309_v6 = vsel %vm97_vm1, %v2307_v36, %v2308_v30  ;;  %v2698_v56 = vsel %vm872_vm7, %v2696_v22, %v2697_v53  ;;  %v2807_v1 = vsel %vm196_vm0, %v2805_v32, %v2806_v19 }
 0x39b   :  { %v2248_v0 = vpop.f32.mrf.mxu1  ;;  %6960 = vmatmul.msk.f32.vlgmr.msrb.gmra.mxu2 %vm2330_vm9, %v2309_v6  ;;  %7010 = vmatmul.msk.f32.vlgmr.msra.gmra.mxu0 %vm2330_vm9, %v2698_v56 }
 0x39c   :  { %v2249_v15 = vadd.f32 %v2248_v0, %v2195_v34  ;;  %7023 = vmatmul.msk.f32.vlgmr.msra.gmra.mxu1 %vm2330_vm9, %v2807_v1  ;;  %v2092_v34 = vadd.f32 %v2091_v10, %v9107_v33 }
 0x39e   :  { %v9179_v14 = vmax.f32 %v2083_v31, %v2249_v15  ;;  %v2213_v31 = vpop.f32.mrf.mxu3  ;;  %v2098_v15 = vadd.f32 %v2097_v8, %v9119_v16 }
 0x3a0   :  { %6973 = vmatmul.msk.f32.gmra.mxu3 %vm2330_vm9, %v9179_v14  ;;  %v2310_v55 = vrot.slane %v9179_v14, 1  ;;  %v2699_v28 = vrot.slane %v9179_v14, 4  ;;  %v2808_v24 = vrot.slane %v9179_v14, 5 }
 0x3a1   :  { %v2100_v56 = vpop.f32.mrf.mxu2 }
 0x3a2   :  { %v2311_v58 = vsel %vm97_vm1, %v2308_v30, %v2310_v55  ;;  %v2700_v43 = vsel %vm872_vm7, %v2697_v53, %v2699_v28  ;;  %v2809_v42 = vsel %vm196_vm0, %v2806_v19, %v2808_v24  ;;  %v2095_v30 = vadd.f32 %v2094_v59, %v9113_v9  ;;  %v7060_v59 = vld [vmem:[%s12091_s4 + $0x80] sm:$0xff] }
 0x3a3   :  { %v2251_v62 = vpop.f32.mrf.mxu1  ;;  %6961 = vmatmul.msk.f32.gmra.mxu2 %vm2330_vm9, %v2311_v58  ;;  %7011 = vmatmul.msk.f32.gmra.mxu0 %vm2330_vm9, %v2700_v43  ;;  %v6995_v58 = vld [vmem:[%s12091_s4 + $0x30] sm:$0xff] }
 0x3a4   :  { %v2252_v61 = vadd.f32 %v2251_v62, %v2198_v29  ;;  %7024 = vmatmul.msk.f32.gmra.mxu1 %vm2330_vm9, %v2809_v42 }
 0x3a6   :  { %v9193_v18 = vmax.f32 %v2086_v17, %v2252_v61 }
 0x3a8   :  { %6974 = vmatmul.msk.f32.gmra.mxu3 %vm2330_vm9, %v9193_v18  ;;  %v2312_v54 = vrot.slane %v9193_v18, 1  ;;  %v2701_v41 = vrot.slane %v9193_v18, 4  ;;  %v2810_v40 = vrot.slane %v9193_v18, 5 }
 0x3aa   :  { %v2313_v47 = vsel %vm97_vm1, %v2310_v55, %v2312_v54  ;;  %v2702_v20 = vsel %vm872_vm7, %v2699_v28, %v2701_v41  ;;  %v2811_v4 = vsel %vm196_vm0, %v2808_v24, %v2810_v40  ;;  %v6996_v28 = vld [vmem:[%s12091_s4 + $0x38] sm:$0xff] }
 0x3ab   :  { %v2254_v38 = vpop.f32.mrf.mxu1  ;;  %6962 = vmatmul.msk.f32.gmra.mxu2 %vm2330_vm9, %v2313_v47  ;;  %7012 = vmatmul.msk.f32.gmra.mxu0 %vm2330_vm9, %v2702_v20  ;;  %v2216_v47 = vpop.f32.mrf.mxu3 }
 0x3ac   :  { %v2255_v13 = vadd.f32 %v2254_v38, %v2201_v7  ;;  %7025 = vmatmul.msk.f32.gmra.mxu1 %vm2330_vm9, %v2811_v4  ;;  %2646 = vmatpush.msra.mxu3 %v6996_v28 }
 0x3ae   :  { %v9207_v52 = vmax.f32 %v2089_v46, %v2255_v13  ;;  %2647 = vmatpush.msra.mxu3 %v6995_v58  ;;  %v7061_v46 = vld [vmem:[%s12091_s4 + $0x88] sm:$0xff]  ;;  %v6982_v13 = vld [vmem:[%s12091_s4 + $0x20] sm:$0xff] }
 0x3af   :  { %3148 = vmatpush.msrb.mxu0 %v7061_v46 }
 0x3b0   :  { %6975 = vmatmul.msk.f32.gmra.mxu3 %vm2330_vm9, %v9207_v52  ;;  %v2314_v39 = vrot.slane %v9207_v52, 1  ;;  %v2703_v3 = vrot.slane %v9207_v52, 4  ;;  %v2812_v48 = vrot.slane %v9207_v52, 5 }
 0x3b1   :  { %3149 = vmatpush.msrb.mxu0 %v7060_v59  ;;  %v2485_v59 = vrot.slane %v9207_v52, 2 }
 0x3b2   :  { %v2315_v37 = vsel %vm97_vm1, %v2312_v54, %v2314_v39  ;;  %v2704_v27 = vsel %vm872_vm7, %v2701_v41, %v2703_v3  ;;  %v2813_v60 = vsel %vm196_vm0, %v2810_v40, %v2812_v48  ;;  %v6983_v41 = vld [vmem:[%s12091_s4 + $0x28] sm:$0xff]  ;;  %v2103_v40 = vpop.f32.mrf.mxu2 }
 0x3b3   :  { %v2257_v35 = vpop.f32.mrf.mxu1  ;;  %6963 = vmatmul.msk.f32.gmra.mxu2 %vm2330_vm9, %v2315_v37  ;;  %7013 = vmatmul.msk.f32.gmra.mxu0 %vm2330_vm9, %v2704_v27  ;;  %v2104_v37 = vadd.f32 %v2103_v40, %v9133_v45 }
 0x3b4   :  { %v2258_v26 = vadd.f32 %v2257_v35, %v2204_v21  ;;  %7026 = vmatmul.msk.f32.gmra.mxu1 %vm2330_vm9, %v2813_v60  ;;  %v2101_v21 = vadd.f32 %v2100_v56, %v9125_v49  ;;  %2537 = vmatpush.msra.mxu2 %v6983_v41  ;;  %v2481_v41 = vrot.slane %v9179_v14, 2 }
 0x3b6   :  { %v9221_v44 = vmax.f32 %v2092_v34, %v2258_v26  ;;  %2538 = vmatpush.msra.mxu2 %v6982_v13  ;;  %v2219_v34 = vpop.f32.mrf.mxu3 }
 0x3b8   :  { %6976 = vmatmul.msk.f32.gmra.mxu3 %vm2330_vm9, %v9221_v44  ;;  %v2316_v11 = vrot.slane %v9221_v44, 1  ;;  %v2705_v29 = vrot.slane %v9221_v44, 4  ;;  %v2814_v12 = vrot.slane %v9221_v44, 5  ;;  %v2596_v13 = vrot.slane %v9221_v44, 3 }
 0x3ba   :  { %v2317_v57 = vsel %vm97_vm1, %v2314_v39, %v2316_v11  ;;  %v2706_v33 = vsel %vm872_vm7, %v2703_v3, %v2705_v29  ;;  %v2815_v36 = vsel %vm196_vm0, %v2812_v48, %v2814_v12  ;;  %v2106_v35 = vpop.f32.mrf.mxu2 }
 0x3bb   :  { %v2260_v22 = vpop.f32.mrf.mxu1  ;;  %6964 = vmatmul.msk.f32.gmra.mxu2 %vm2330_vm9, %v2317_v57  ;;  %7014 = vmatmul.msk.f32.gmra.mxu0 %vm2330_vm9, %v2706_v33  ;;  %v2107_v57 = vadd.f32 %v2106_v35, %v9153_v51 }
 0x3bc   :  { %v2261_v53 = vadd.f32 %v2260_v22, %v2207_v25  ;;  %7027 = vmatmul.msk.f32.gmra.mxu1 %vm2330_vm9, %v2815_v36 }
 0x3be   :  { %v9235_v32 = vmax.f32 %v2095_v30, %v2261_v53 }
 0x3c0   :  { %6977 = vmatmul.msk.f32.gmra.mxu3 %vm2330_vm9, %v9235_v32  ;;  %v2318_v19 = vrot.slane %v9235_v32, 1  ;;  %v2707_v5 = vrot.slane %v9235_v32, 4  ;;  %v2816_v6 = vrot.slane %v9235_v32, 5 }
 0x3c2   :  { %v2319_v1 = vsel %vm97_vm1, %v2316_v11, %v2318_v19  ;;  %v2708_v0 = vsel %vm872_vm7, %v2705_v29, %v2707_v5  ;;  %v2817_v9 = vsel %vm196_vm0, %v2814_v12, %v2816_v6 }
 0x3c3   :  { %v2263_v7 = vpop.f32.mrf.mxu1  ;;  %6965 = vmatmul.msk.f32.gmra.mxu2 %vm2330_vm9, %v2319_v1  ;;  %7015 = vmatmul.msk.f32.gmra.mxu0 %vm2330_vm9, %v2708_v0  ;;  %v2588_v0 = vrot.slane %v9162_v2, 3 }
 0x3c4   :  { %v2264_v55 = vadd.f32 %v2263_v7, %v2210_v23  ;;  %7028 = vmatmul.msk.f32.gmra.mxu1 %vm2330_vm9, %v2817_v9 }
 0x3c6   :  { %v9252_v24 = vmax.f32 %v2098_v15, %v2264_v55 }
 0x3c8   :  { %6978 = vmatmul.msk.f32.gmra.mxu3 %vm2330_vm9, %v9252_v24  ;;  %v2320_v43 = vrot.slane %v9252_v24, 1  ;;  %v2709_v16 = vrot.slane %v9252_v24, 4  ;;  %v2818_v42 = vrot.slane %v9252_v24, 5 }
 0x3ca   :  { %v2321_v62 = vsel %vm97_vm1, %v2318_v19, %v2320_v43  ;;  %v2710_v17 = vsel %vm872_vm7, %v2707_v5, %v2709_v16  ;;  %v2819_v10 = vsel %vm196_vm0, %v2816_v6, %v2818_v42  ;;  %v2109_v19 = vpop.f32.mrf.mxu2  ;;  %v2222_v5 = vpop.f32.mrf.mxu3 }
 0x3cb   :  { %v2266_v61 = vpop.f32.mrf.mxu1  ;;  %6966 = vmatmul.msk.f32.gmra.mxu2 %vm2330_vm9, %v2321_v62  ;;  %7016 = vmatmul.msk.f32.gmra.mxu0 %vm2330_vm9, %v2710_v17  ;;  %v2110_v9 = vadd.f32 %v2109_v19, %v9155_v63  ;;  %v2590_v62 = vrot.slane %v9179_v14, 3  ;;  %v2479_v17 = vrot.slane %v9162_v2, 2 }
 0x3cc   :  { %v2267_v54 = vadd.f32 %v2266_v61, %v2213_v31  ;;  %7029 = vmatmul.msk.f32.gmra.mxu1 %vm2330_vm9, %v2819_v10  ;;  %v2587_v31 = vrot.slane %v9157_v50, 3  ;;  %v2478_v61 = vrot.slane %v9157_v50, 2 }
 0x3cd   :  { %v2591_v10 = vsel %vm653_vm4, %v2588_v0, %v2590_v62 }
 0x3ce   :  { %v9272_v20 = vmax.f32 %v2101_v21, %v2267_v54  ;;  %v2589_v55 = vsel %vm653_vm4, %v2587_v31, %v2588_v0  ;;  %v2480_v21 = vsel %vm434_vm3, %v2478_v61, %v2479_v17  ;;  %v2592_v54 = vrot.slane %v9193_v18, 3  ;;  %v7035_v0 = vld [vmem:[%s12091_s4 + $0x68] sm:$0xff] }
 0x3cf   :  { %2973 = vmatpush.msrb.mxu2 %v7035_v0 }
 0x3d0   :  { %6979 = vmatmul.msk.f32.gmra.mxu3 %vm2330_vm9, %v9272_v20  ;;  %v2322_v4 = vrot.slane %v9272_v20, 1  ;;  %v2711_v38 = vrot.slane %v9272_v20, 4  ;;  %v2820_v49 = vrot.slane %v9272_v20, 5  ;;  %v2593_v40 = vsel %vm653_vm4, %v2590_v62, %v2592_v54 }
 0x3d2   :  { %v2323_v25 = vsel %vm97_vm1, %v2320_v43, %v2322_v4  ;;  %v2712_v39 = vsel %vm872_vm7, %v2709_v16, %v2711_v38  ;;  %v2821_v3 = vsel %vm196_vm0, %v2818_v42, %v2820_v49 }
 0x3d3   :  { %v2269_v48 = vpop.f32.mrf.mxu1  ;;  %6967 = vmatmul.msk.f32.gmra.mxu2 %vm2330_vm9, %v2323_v25  ;;  %7017 = vmatmul.msk.f32.gmra.mxu0 %vm2330_vm9, %v2712_v39 }
 0x3d4   :  { %v2270_v27 = vadd.f32 %v2269_v48, %v2216_v47  ;;  %7030 = vmatmul.msk.f32.gmra.mxu1 %vm2330_vm9, %v2821_v3  ;;  %v2482_v47 = vsel %vm434_vm3, %v2479_v17, %v2481_v41  ;;  %v2598_v3 = vrot.slane %v9235_v32, 3  ;;  %v2487_v48 = vrot.slane %v9221_v44, 2 }
 0x3d6   :  { %v9295_v60 = vmax.f32 %v2104_v37, %v2270_v27  ;;  %v2599_v37 = vsel %vm653_vm4, %v2596_v13, %v2598_v3  ;;  %v2488_v27 = vsel %vm434_vm3, %v2485_v59, %v2487_v48 }
 0x3d8   :  { %6980 = vmatmul.msk.f32.gmra.mxu3 %vm2330_vm9, %v9295_v60  ;;  %v2324_v26 = vrot.slane %v9295_v60, 1  ;;  %v2713_v8 = vrot.slane %v9295_v60, 4  ;;  %v2822_v11 = vrot.slane %v9295_v60, 5 }
 0x3da   :  { %v2325_v29 = vsel %vm97_vm1, %v2322_v4, %v2324_v26  ;;  %v2714_v45 = vsel %vm872_vm7, %v2711_v38, %v2713_v8  ;;  %v2823_v12 = vsel %vm196_vm0, %v2820_v49, %v2822_v11  ;;  %v2594_v4 = vrot.slane %v9207_v52, 3 }
 0x3db   :  { %v2272_v23 = vpop.f32.mrf.mxu1  ;;  %6968 = vmatmul.msk.f32.gmra.mxu2 %vm2330_vm9, %v2325_v29  ;;  %7018 = vmatmul.msk.f32.gmra.mxu0 %vm2330_vm9, %v2714_v45  ;;  %v2483_v38 = vrot.slane %v9193_v18, 2  ;;  %v2602_v45 = vrot.slane %v9272_v20, 3 }
 0x3dc   :  { %v2273_v33 = vadd.f32 %v2272_v23, %v2219_v34  ;;  %7031 = vmatmul.msk.f32.gmra.mxu1 %vm2330_vm9, %v2823_v12  ;;  %v2595_v49 = vsel %vm653_vm4, %v2592_v54, %v2594_v4  ;;  %v2597_v25 = vsel %vm653_vm4, %v2594_v4, %v2596_v13  ;;  %v2600_v34 = vrot.slane %v9252_v24, 3  ;;  %v7048_v12 = vld [vmem:[%s12091_s4 + $0x78] sm:$0xff] }
 0x3dd   :  { %v2484_v46 = vsel %vm434_vm3, %v2481_v41, %v2483_v38  ;;  %v2486_v39 = vsel %vm434_vm3, %v2483_v38, %v2485_v59  ;;  %3082 = vmatpush.msrb.mxu3 %v7048_v12 }
 0x3de   :  { %v9309_v36 = vmax.f32 %v2107_v57, %v2273_v33  ;;  %v2491_v57 = vrot.slane %v9252_v24, 2 }
 0x3e0   :  { %6981 = vmatmul.msk.f32.gmra.mxu3 %vm2330_vm9, %v9309_v36  ;;  %v2326_v22 = vrot.slane %v9309_v36, 1  ;;  %v2715_v30 = vrot.slane %v9309_v36, 4  ;;  %v2824_v53 = vrot.slane %v9309_v36, 5 }
 0x3e2   :  { %v2327_v6 = vsel %vm97_vm1, %v2324_v26, %v2326_v22  ;;  %v2716_v51 = vsel %vm872_vm7, %v2713_v8, %v2715_v30  ;;  %v2825_v56 = vsel %vm196_vm0, %v2822_v11, %v2824_v53  ;;  %v2489_v26 = vrot.slane %v9235_v32, 2 }
 0x3e3   :  { %v2275_v1 = vpop.f32.mrf.mxu1  ;;  %6969 = vmatmul.msk.f32.gmra.mxu2 %vm2330_vm9, %v2327_v6  ;;  %7019 = vmatmul.msk.f32.gmra.mxu0 %vm2330_vm9, %v2716_v51  ;;  %v2601_v8 = vsel %vm653_vm4, %v2598_v3, %v2600_v34  ;;  %v2493_v51 = vrot.slane %v9272_v20, 2  ;;  %v2915_v3 = vrot.slane %v9162_v2, 6 }
 0x3e4   :  { %v2276_v7 = vadd.f32 %v2275_v1, %v2222_v5  ;;  %7032 = vmatmul.msk.f32.gmra.mxu1 %vm2330_vm9, %v2825_v56  ;;  %v2490_v11 = vsel %vm434_vm3, %v2487_v48, %v2489_v26  ;;  %v2604_v5 = vrot.slane %v9295_v60, 3 }
 0x3e6   :  { %v9325_v15 = vmax.f32 %v2110_v9, %v2276_v7  ;;  %v2605_v1 = vsel %vm653_vm4, %v2602_v45, %v2604_v5  ;;  %v7034_v9 = vld [vmem:[%s12091_s4 + $0x60] sm:$0xff]  ;;  %v2494_v7 = vsel %vm434_vm3, %v2491_v57, %v2493_v51 }
 0x3e7   :  { %2974 = vmatpush.msrb.mxu2 %v7034_v9 }
 0x3e8   :  { %6997 = vmatmul.msk.f32.vlgmr.msra.gmra.mxu3 %vm2330_vm9, %v2589_v55  ;;  %v2328_v28 = vrot.slane %v9325_v15, 1  ;;  %v2717_v58 = vrot.slane %v9325_v15, 4  ;;  %v2826_v43 = vrot.slane %v9325_v15, 5  ;;  %v2606_v55 = vrot.slane %v9309_v36, 3 }
 0x3e9   :  { %v2608_v62 = vrot.slane %v9325_v15, 3  ;;  %v2499_v38 = vrot.slane %v9325_v15, 2 }
 0x3ea   :  { %v2329_v16 = vsel %vm97_vm1, %v2326_v22, %v2328_v28  ;;  %v2718_v63 = vsel %vm872_vm7, %v2715_v30, %v2717_v58  ;;  %v2827_v42 = vsel %vm196_vm0, %v2824_v53, %v2826_v43  ;;  %v2603_v22 = vsel %vm653_vm4, %v2600_v34, %v2602_v45  ;;  %v7047_v30 = vld [vmem:[%s12091_s4 + $0x70] sm:$0xff] }
 0x3eb   :  { %6970 = vmatmul.msk.f32.gmra.mxu2 %vm2330_vm9, %v2329_v16  ;;  %7020 = vmatmul.msk.f32.gmra.mxu0 %vm2330_vm9, %v2718_v63  ;;  %v2492_v53 = vsel %vm434_vm3, %v2489_v26, %v2491_v57  ;;  %v2495_v58 = vrot.slane %v9295_v60, 2  ;;  %v2607_v16 = vsel %vm653_vm4, %v2604_v5, %v2606_v55  ;;  %v3028_v26 = vrot.slane %v9193_v18, 7 }
 0x3ec   :  { %7033 = vmatmul.msk.f32.gmra.mxu1 %vm2330_vm9, %v2827_v42  ;;  %3083 = vmatpush.msrb.mxu3 %v7047_v30 }
 0x3ed   :  { %v2496_v63 = vsel %vm434_vm3, %v2493_v51, %v2495_v58 }
 0x3f0   :  { %6998 = vmatmul.msk.f32.gmra.mxu3 %vm2330_vm9, %v2591_v10  ;;  %v2497_v10 = vrot.slane %v9309_v36, 2 }
 0x3f2   :  { %v2498_v54 = vsel %vm434_vm3, %v2495_v58, %v2497_v10  ;;  %v2500_v13 = vsel %vm434_vm3, %v2497_v10, %v2499_v38  ;;  %v2925_v10 = vrot.slane %v9235_v32, 6 }
 0x3f3   :  { %6984 = vmatmul.msk.f32.vlgmr.msra.gmra.mxu2 %vm2330_vm9, %v2480_v21  ;;  %7062 = vmatmul.msk.f32.vlgmr.msrb.gmra.mxu0 %vm2330_vm9, %v9162_v2  ;;  %v2609_v21 = vsel %vm653_vm4, %v2606_v55, %v2608_v62 }
 0x3f8   :  { %6999 = vmatmul.msk.f32.gmra.mxu3 %vm2330_vm9, %v2593_v40  ;;  %v3024_v40 = vrot.slane %v9162_v2, 7 }
 0x3fb   :  { %6985 = vmatmul.msk.f32.gmra.mxu2 %vm2330_vm9, %v2482_v47  ;;  %7063 = vmatmul.msk.f32.gmra.mxu0 %vm2330_vm9, %v9179_v14  ;;  %v3023_v47 = vrot.slane %v9157_v50, 7 }
 0x400   :  { %7000 = vmatmul.msk.f32.gmra.mxu3 %vm2330_vm9, %v2595_v49 }
 0x403   :  { %6986 = vmatmul.msk.f32.gmra.mxu2 %vm2330_vm9, %v2484_v46  ;;  %7064 = vmatmul.msk.f32.gmra.mxu0 %vm2330_vm9, %v9193_v18  ;;  %v3025_v46 = vsel %vm1528_vm6, %v3023_v47, %v3024_v40  ;;  %v2927_v47 = vrot.slane %v9252_v24, 6 }
 0x408   :  { %7001 = vmatmul.msk.f32.gmra.mxu3 %vm2330_vm9, %v2597_v25  ;;  %v3026_v25 = vrot.slane %v9179_v14, 7 }
 0x40a   :  { %v3029_v2 = vsel %vm1528_vm6, %v3026_v25, %v3028_v26 }
 0x40b   :  { %6987 = vmatmul.msk.f32.gmra.mxu2 %vm2330_vm9, %v2486_v39  ;;  %7065 = vmatmul.msk.f32.gmra.mxu0 %vm2330_vm9, %v9207_v52 }
 0x410   :  { %7002 = vmatmul.msk.f32.gmra.mxu3 %vm2330_vm9, %v2599_v37  ;;  %v3027_v37 = vsel %vm1528_vm6, %v3024_v40, %v3026_v25  ;;  %v2929_v25 = vrot.slane %v9272_v20, 6 }
 0x413   :  { %v2442_v35 = vpop.f32.mrf.mxu3  ;;  %6988 = vmatmul.msk.f32.gmra.mxu2 %vm2330_vm9, %v2488_v27  ;;  %7066 = vmatmul.msk.f32.gmra.mxu0 %vm2330_vm9, %v9221_v44  ;;  %v2914_v27 = vrot.slane %v9157_v50, 6 }
 0x418   :  { %7003 = vmatmul.msk.f32.gmra.mxu3 %vm2330_vm9, %v2601_v8  ;;  %v9464_v45 = vpop.f32.mrf.mxu0 }
 0x41b   :  { %v2445_v29 = vpop.f32.mrf.mxu3  ;;  %6989 = vmatmul.msk.f32.gmra.mxu2 %vm2330_vm9, %v2490_v11  ;;  %7067 = vmatmul.msk.f32.gmra.mxu0 %vm2330_vm9, %v9235_v32  ;;  %v2917_v11 = vrot.slane %v9179_v14, 6 }
 0x41d   :  { %v2918_v50 = vsel %vm1309_vm5, %v2915_v3, %v2917_v11 }
 0x41e   :  { %v2370_v23 = vpop.f32.mrf.mxu2 }
 0x41f   :  { %v9392_v33 = vadd.f32 %v2442_v35, %v2370_v23  ;;  %v2916_v35 = vsel %vm1309_vm5, %v2914_v27, %v2915_v3  ;;  %v3030_v23 = vrot.slane %v9207_v52, 7  ;;  %v2930_v3 = vsel %vm1309_vm5, %v2927_v47, %v2929_v25 }
 0x420   :  { %7004 = vmatmul.msk.f32.gmra.mxu3 %vm2330_vm9, %v2603_v22  ;;  %v2919_v22 = vrot.slane %v9193_v18, 6  ;;  %v3042_v27 = vrot.slane %v9309_v36, 7 }
 0x421   :  { %v3031_v14 = vsel %vm1528_vm6, %v3028_v26, %v3030_v23 }
 0x423   :  { %v2448_v19 = vpop.f32.mrf.mxu3  ;;  %6990 = vmatmul.msk.f32.gmra.mxu2 %vm2330_vm9, %v2492_v53  ;;  %7068 = vmatmul.msk.f32.gmra.mxu0 %vm2330_vm9, %v9252_v24  ;;  %v9475_v53 = vpop.f32.mrf.mxu0 }
 0x424   :  { %12249 = vst [vmem:[#allocation4_spill] sm:$0xff] %v9475_v53 }
 0x426   :  { %v2373_v6 = vpop.f32.mrf.mxu2 }
 0x427   :  { %v9405_v56 = vadd.f32 %v2445_v29, %v2373_v6  ;;  %v3032_v6 = vrot.slane %v9221_v44, 7 }
 0x428   :  { %7005 = vmatmul.msk.f32.gmra.mxu3 %vm2330_vm9, %v2605_v1  ;;  %v2921_v1 = vrot.slane %v9207_v52, 6  ;;  %v2923_v52 = vrot.slane %v9221_v44, 6 }
 0x429   :  { %v3033_v0 = vsel %vm1528_vm6, %v3030_v23, %v3032_v6 }
 0x42a   :  { %v2922_v9 = vsel %vm1309_vm5, %v2919_v22, %v2921_v1 }
 0x42b   :  { %v2451_v31 = vpop.f32.mrf.mxu3  ;;  %6991 = vmatmul.msk.f32.gmra.mxu2 %vm2330_vm9, %v2494_v7  ;;  %7069 = vmatmul.msk.f32.gmra.mxu0 %vm2330_vm9, %v9272_v20  ;;  %v9492_v55 = vpop.f32.mrf.mxu0 }
 0x42e   :  { %v2376_v28 = vpop.f32.mrf.mxu2 }
 0x42f   :  { %v9421_v43 = vadd.f32 %v2448_v19, %v2376_v28  ;;  %v2920_v19 = vsel %vm1309_vm5, %v2917_v11, %v2919_v22  ;;  %v3044_v11 = vrot.slane %v9325_v15, 7 }
 0x430   :  { %7006 = vmatmul.msk.f32.gmra.mxu3 %vm2330_vm9, %v2607_v16  ;;  %v2924_v16 = vsel %vm1309_vm5, %v2921_v1, %v2923_v52 }
 0x433   :  { %v2454_v42 = vpop.f32.mrf.mxu3  ;;  %6992 = vmatmul.msk.f32.gmra.mxu2 %vm2330_vm9, %v2496_v63  ;;  %7070 = vmatmul.msk.f32.gmra.mxu0 %vm2330_vm9, %v9295_v60  ;;  %v9504_v62 = vpop.f32.mrf.mxu0 }
 0x436   :  { %v2379_v17 = vpop.f32.mrf.mxu2 }
 0x437   :  { %v9431_v61 = vadd.f32 %v2451_v31, %v2379_v17  ;;  %v3034_v31 = vrot.slane %v9235_v32, 7  ;;  %v2928_v32 = vsel %vm1309_vm5, %v2925_v10, %v2927_v47  ;;  %v3397_v47 = vld [vmem:[%s12085_s1 + $0x10] sm:$0xff] }
 0x438   :  { %7007 = vmatmul.msk.f32.gmra.mxu3 %vm2330_vm9, %v2609_v21  ;;  %v2926_v21 = vsel %vm1309_vm5, %v2923_v52, %v2925_v10 }
 0x439   :  { %v3035_v58 = vsel %vm1528_vm6, %v3032_v6, %v3034_v31 }
 0x43b   :  { %v2457_v41 = vpop.f32.mrf.mxu3  ;;  %6993 = vmatmul.msk.f32.gmra.mxu2 %vm2330_vm9, %v2498_v54  ;;  %7071 = vmatmul.msk.f32.gmra.mxu0 %vm2330_vm9, %v9309_v36  ;;  %v9520_v38 = vpop.f32.mrf.mxu0 }
 0x43e   :  { %v2382_v4 = vpop.f32.mrf.mxu2 }
 0x43f   :  { %v9442_v49 = vadd.f32 %v2454_v42, %v2382_v4  ;;  %v3036_v42 = vrot.slane %v9252_v24, 7 }
 0x440   :  { %7049 = vmatmul.msk.f32.vlgmr.msrb.gmra.mxu3 %vm2330_vm9, %v3025_v46 }
 0x441   :  { %v3037_v44 = vsel %vm1528_vm6, %v3034_v31, %v3036_v42 }
 0x443   :  { %v2460_v59 = vpop.f32.mrf.mxu3  ;;  %6994 = vmatmul.msk.f32.gmra.mxu2 %vm2330_vm9, %v2500_v13  ;;  %7072 = vmatmul.msk.f32.gmra.mxu0 %vm2330_vm9, %v9325_v15  ;;  %v3040_v13 = vrot.slane %v9295_v60, 7 }
 0x446   :  { %v2385_v39 = vpop.f32.mrf.mxu2 }
 0x447   :  { %v9452_v48 = vadd.f32 %v2457_v41, %v2385_v39  ;;  %v3038_v41 = vrot.slane %v9272_v20, 7  ;;  %v9533_v39 = vpop.f32.mrf.mxu0  ;;  %v3043_v20 = vsel %vm1528_vm6, %v3040_v13, %v3042_v27 }
 0x448   :  { %7050 = vmatmul.msk.f32.gmra.mxu3 %vm2330_vm9, %v3027_v37 }
 0x449   :  { %v3039_v4 = vsel %vm1528_vm6, %v3036_v42, %v3038_v41  ;;  %v3041_v24 = vsel %vm1528_vm6, %v3038_v41, %v3040_v13  ;;  %v3398_v42 = vld [vmem:[%s12085_s1 + $0x18] sm:$0x7]  ;;  %v7112_v41 = vld [vmem:[%s12085_s1 + $0x30] sm:$0xff]  ;;  %v9615_v13 = vld [vmem:[%s12086_s0 + $0xc8] sm:$0xff] }
 0x44a   :  { %7139 = vmatpush.msk.msra.mxu3 %vm196_vm0, %v3398_v42  ;;  %12251 = vst [vmem:[#allocation39_spill] sm:$0xff] %v9615_v13 }
 0x44b   :  { %v2463_v34 = vpop.f32.mrf.mxu3  ;;  %7036 = vmatmul.msk.f32.vlgmr.msrb.gmra.mxu2 %vm2330_vm9, %v2916_v35 }
 0x44c   :  { %3681 = vmatpush.msra.mxu3 %v3397_v47 }
 0x44e   :  { %v2388_v8 = vpop.f32.mrf.mxu2 }
 0x44f   :  { %v9461_v29 = vadd.f32 %v2460_v59, %v2388_v8 }
 0x450   :  { %7051 = vmatmul.msk.f32.gmra.mxu3 %vm2330_vm9, %v3029_v2  ;;  %v9550_v2 = vpop.f32.mrf.mxu0 }
 0x453   :  { %v2466_v12 = vpop.f32.mrf.mxu3  ;;  %7037 = vmatmul.msk.f32.gmra.mxu2 %vm2330_vm9, %v2918_v50 }
 0x456   :  { %v2391_v57 = vpop.f32.mrf.mxu2 }
 0x457   :  { %v9471_v30 = vadd.f32 %v2463_v34, %v2391_v57  ;;  %v2931_v34 = vrot.slane %v9295_v60, 6  ;;  %v3045_v60 = vsel %vm1528_vm6, %v3042_v27, %v3044_v11  ;;  %v9628_v27 = vld [vmem:[%s12086_s0 + $0xd0] sm:$0xff] }
 0x458   :  { %7052 = vmatmul.msk.f32.gmra.mxu3 %vm2330_vm9, %v3031_v14  ;;  %v9561_v22 = vpop.f32.mrf.mxu0  ;;  %12252 = vst [vmem:[#allocation47_spill] sm:$0xff] %v9628_v27 }
 0x459   :  { %v2932_v26 = vsel %vm1309_vm5, %v2929_v25, %v2931_v34 }
 0x45b   :  { %v9478_v5 = vpop.f32.mrf.mxu3  ;;  %7038 = vmatmul.msk.f32.gmra.mxu2 %vm2330_vm9, %v2920_v19  ;;  %v2935_v19 = vrot.slane %v9325_v15, 6 }
 0x45e   :  { %v2394_v51 = vpop.f32.mrf.mxu2 }
 0x45f   :  { %v9483_v18 = vadd.f32 %v2466_v12, %v2394_v51  ;;  %v2933_v12 = vrot.slane %v9309_v36, 6 }
 0x460   :  { %7053 = vmatmul.msk.f32.gmra.mxu3 %vm2330_vm9, %v3033_v0  ;;  %v9572_v1 = vpop.f32.mrf.mxu0 }
 0x461   :  { %v2934_v23 = vsel %vm1309_vm5, %v2931_v34, %v2933_v12  ;;  %v2936_v6 = vsel %vm1309_vm5, %v2933_v12, %v2935_v19  ;;  %v3428_v34 = vrot.slane %v9615_v13, 1 }
 0x463   :  { %v9488_v7 = vpop.f32.mrf.mxu3  ;;  %7039 = vmatmul.msk.f32.gmra.mxu2 %vm2330_vm9, %v2922_v9 }
 0x466   :  { %v9494_v28 = vpop.f32.mrf.mxu2 }
 0x468   :  { %7054 = vmatmul.msk.f32.gmra.mxu3 %vm2330_vm9, %v3035_v58  ;;  %v9578_v31 = vpop.f32.mrf.mxu0 }
 0x46b   :  { %v9500_v63 = vpop.f32.mrf.mxu3  ;;  %7040 = vmatmul.msk.f32.gmra.mxu2 %vm2330_vm9, %v2924_v16  ;;  %v7113_v16 = vld [vmem:[%s12085_s1 + $0x38] sm:$0x7] }
 0x46c   :  { %7114 = vmatpush.msk.msra.mxu2 %vm196_vm0, %v7113_v16  ;;  %v9655_v16 = vld [vmem:[%s12086_s0 + $0xd8] sm:$0xff] }
 0x46d   :  { %12255 = vst [vmem:[#allocation3_spill] sm:$0xff] %v9655_v16  ;;  %v3431_v47 = vrot.slane %v9655_v16, 1 }
 0x46e   :  { %v9506_v17 = vpop.f32.mrf.mxu2  ;;  %3541 = vmatpush.msra.mxu2 %v7112_v41  ;;  %v7164_v41 = vld [vmem:[%s12085_s1 + $0x40] sm:$0xff] }
 0x470   :  { %7055 = vmatmul.msk.f32.gmra.mxu3 %vm2330_vm9, %v3037_v44  ;;  %v9592_v10 = vpop.f32.mrf.mxu0 }
 0x473   :  { %v9512_v54 = vpop.f32.mrf.mxu3  ;;  %7041 = vmatmul.msk.f32.gmra.mxu2 %vm2330_vm9, %v2926_v21  ;;  %v9598_v21 = vpop.f32.mrf.mxu1 }
 0x474   :  { %12250 = vst [vmem:[#allocation16_spill] sm:$0xff] %v9598_v21 }
 0x476   :  { %v9516_v40 = vpop.f32.mrf.mxu2 }
 0x478   :  { %7056 = vmatmul.msk.f32.gmra.mxu3 %vm2330_vm9, %v3039_v4  ;;  %v7111_v4 = vld [vmem:[%s12085_s1 + $0x28] sm:$0xff]  ;;  %v9635_v11 = vpop.f32.mrf.mxu0 }
 0x479   :  { %3542 = vmatpush.msra.mxu2 %v7111_v4  ;;  %12253 = vst [vmem:[#allocation53_spill] sm:$0xff] %v9635_v11  ;;  %v3761_v4 = vrot.slane %v9615_v13, 2 }
 0x47b   :  { %v9524_v46 = vpop.f32.mrf.mxu3  ;;  %7042 = vmatmul.msk.f32.gmra.mxu2 %vm2330_vm9, %v2928_v32  ;;  %v3396_v32 = vld [vmem:[%s12085_s1 + $0x8] sm:$0xff]  ;;  %v9647_v19 = vpop.f32.mrf.mxu1 }
 0x47c   :  { %3682 = vmatpush.msra.mxu3 %v3396_v32  ;;  %12254 = vst [vmem:[#allocation59_spill] sm:$0xff] %v9647_v19  ;;  %v3762_v32 = vrot.slane %v9628_v27, 2  ;;  %v9779_v19 = vld [vmem:[%s12086_s0 + $0x108] sm:$0xff] }
 0x47d   :  { %12279 = vst [vmem:[#allocation54_spill] sm:$0xff] %v9779_v19 }
 0x47e   :  { %v9528_v59 = vpop.f32.mrf.mxu2 }
 0x480   :  { %7057 = vmatmul.msk.f32.gmra.mxu3 %vm2330_vm9, %v3041_v24  ;;  %v7110_v24 = vld [vmem:[%s12085_s1 + $0x20] sm:$0xff] }
 0x481   :  { %3543 = vmatpush.msra.mxu2 %v7110_v24 }
 0x483   :  { %v9536_v37 = vpop.f32.mrf.mxu3  ;;  %7043 = vmatmul.msk.f32.gmra.mxu2 %vm2330_vm9, %v2930_v3  ;;  %v3395_v3 = vld [vmem:[%s12085_s1] sm:$0xff] }
 0x484   :  { %3683 = vmatpush.msra.mxu3 %v3395_v3  ;;  %v3763_v3 = vsel %vm434_vm3, %v3761_v4, %v3762_v32 }
 0x486   :  { %v9540_v35 = vpop.f32.mrf.mxu2 }
 0x488   :  { %7058 = vmatmul.msk.f32.gmra.mxu3 %vm2330_vm9, %v3043_v20  ;;  %v3429_v20 = vrot.slane %v9628_v27, 1 }
 0x48a   :  { %v3432_v24 = vsel %vm97_vm1, %v3429_v20, %v3431_v47 }
 0x48b   :  { %v9546_v8 = vpop.f32.mrf.mxu3  ;;  %7044 = vmatmul.msk.f32.gmra.mxu2 %vm2330_vm9, %v2932_v26  ;;  %v7167_v26 = vld [vmem:[%s12085_s1 + $0x58] sm:$0x7] }
 0x48c   :  { %7168 = vmatpush.msk.msra.mxu0 %vm196_vm0, %v7167_v26  ;;  %v9673_v26 = vpop.f32.mrf.mxu0 }
 0x48d   :  { %12257 = vst [vmem:[#allocation35_spill] sm:$0xff] %v9673_v26 }
 0x48e   :  { %v9552_v50 = vpop.f32.mrf.mxu2 }
 0x490   :  { %7059 = vmatmul.msk.f32.gmra.mxu3 %vm2330_vm9, %v3045_v60  ;;  %v3430_v60 = vsel %vm97_vm1, %v3428_v34, %v3429_v20 }
 0x493   :  { %v9558_v57 = vpop.f32.mrf.mxu3  ;;  %7045 = vmatmul.msk.f32.gmra.mxu2 %vm2330_vm9, %v2934_v23  ;;  %v7166_v23 = vld [vmem:[%s12085_s1 + $0x50] sm:$0xff] }
 0x494   :  { %3874 = vmatpush.msra.mxu0 %v7166_v23 }
 0x496   :  { %v9563_v14 = vpop.f32.mrf.mxu2 }
 0x498   :  { %7140 = vmatmul.msk.f32.vlgmr.msra.gmra.mxu3 %vm147_vm2, %v9615_v13  ;;  %v9699_v13 = vld [vmem:[%s12086_s0 + $0xe8] sm:$0xff] }
 0x499   :  { %12263 = vst [vmem:[#allocation31_spill] sm:$0xff] %v9699_v13 }
 0x49b   :  { %v9567_v51 = vpop.f32.mrf.mxu3  ;;  %7046 = vmatmul.msk.f32.gmra.mxu2 %vm2330_vm9, %v2936_v6  ;;  %v7165_v6 = vld [vmem:[%s12085_s1 + $0x48] sm:$0xff] }
 0x49c   :  { %3875 = vmatpush.msra.mxu0 %v7165_v6  ;;  %v3764_v6 = vrot.slane %v9655_v16, 2 }
 0x49e   :  { %v9570_v36 = vpop.f32.mrf.mxu2  ;;  %3876 = vmatpush.msra.mxu0 %v7164_v41  ;;  %v9684_v41 = vpop.f32.mrf.mxu1 }
 0x49f   :  { %7169 = vmatmul.msk.f32.vlgmr.msra.gmra.mxu0 %vm147_vm2, %v3763_v3  ;;  %12260 = vst [vmem:[#allocation58_spill] sm:$0xff] %v9684_v41  ;;  %v3765_v3 = vsel %vm434_vm3, %v3762_v32, %v3764_v6  ;;  %v9800_v41 = vld [vmem:[%s12086_s0 + $0x110] sm:$0xff] }
 0x4a0   :  { %7141 = vmatmul.msk.f32.gmra.mxu3 %vm147_vm2, %v9628_v27  ;;  %v9694_v27 = vpop.f32.mrf.mxu0  ;;  %12283 = vst [vmem:[#allocation20_spill] sm:$0xff] %v9800_v41 }
 0x4a1   :  { %12262 = vst [vmem:[#allocation14_spill] sm:$0xff] %v9694_v27  ;;  %v9718_v27 = vld [vmem:[%s12086_s0 + $0xf0] sm:$0xff] }
 0x4a2   :  { %12267 = vst [vmem:[#allocation13_spill] sm:$0xff] %v9718_v27 }
 0x4a3   :  { %v9574_v0 = vpop.f32.mrf.mxu3  ;;  %7115 = vmatmul.msk.f32.vlgmr.msra.gmra.mxu2 %vm147_vm2, %v3430_v60  ;;  %v9678_v60 = vld [vmem:[%s12086_s0 + $0xe0] sm:$0xff] }
 0x4a4   :  { %12258 = vst [vmem:[#allocation44_spill] sm:$0xff] %v9678_v60  ;;  %v3433_v20 = vrot.slane %v9678_v60, 1  ;;  %v3766_v32 = vrot.slane %v9678_v60, 2 }
 0x4a6   :  { %v9576_v9 = vpop.f32.mrf.mxu2  ;;  %v3434_v4 = vsel %vm97_vm1, %v3431_v47, %v3433_v20  ;;  %v3435_v47 = vrot.slane %v9699_v13, 1 }
 0x4a7   :  { %7170 = vmatmul.msk.f32.gmra.mxu0 %vm147_vm2, %v3765_v3  ;;  %v9707_v3 = vpop.f32.mrf.mxu1 }
 0x4a8   :  { %7142 = vmatmul.msk.f32.gmra.mxu3 %vm147_vm2, %v9655_v16  ;;  %v3436_v26 = vsel %vm97_vm1, %v3433_v20, %v3435_v47  ;;  %v3767_v16 = vsel %vm434_vm3, %v3764_v6, %v3766_v32  ;;  %12265 = vst [vmem:[#allocation49_spill] sm:$0xff] %v9707_v3  ;;  %v3437_v20 = vrot.slane %v9718_v27, 1  ;;  %v3768_v6 = vrot.slane %v9699_v13, 2 }
 0x4ab   :  { %v9580_v52 = vpop.f32.mrf.mxu3  ;;  %7116 = vmatmul.msk.f32.gmra.mxu2 %vm147_vm2, %v3432_v24 }
 0x4ae   :  { %v9582_v58 = vpop.f32.mrf.mxu2 }
 0x4af   :  { %7171 = vmatmul.msk.f32.gmra.mxu0 %vm147_vm2, %v3767_v16 }
 0x4b0   :  { %7143 = vmatmul.msk.f32.gmra.mxu3 %vm147_vm2, %v9678_v60  ;;  %v3769_v60 = vsel %vm434_vm3, %v3766_v32, %v3768_v6  ;;  %v3770_v32 = vrot.slane %v9718_v27, 2 }
 0x4b3   :  { %v9584_v15 = vpop.f32.mrf.mxu3  ;;  %7117 = vmatmul.msk.f32.gmra.mxu2 %vm147_vm2, %v3434_v4 }
 0x4b6   :  { %v9596_v44 = vpop.f32.mrf.mxu2 }
 0x4b7   :  { %7172 = vmatmul.msk.f32.gmra.mxu0 %vm147_vm2, %v3769_v60 }
 0x4b8   :  { %7144 = vmatmul.msk.f32.gmra.mxu3 %vm147_vm2, %v9699_v13  ;;  %v3771_v13 = vsel %vm434_vm3, %v3768_v6, %v3770_v32 }
 0x4bb   :  { %v9617_v25 = vpop.f32.mrf.mxu3  ;;  %7118 = vmatmul.msk.f32.gmra.mxu2 %vm147_vm2, %v3436_v26  ;;  %v9734_v26 = vpop.f32.mrf.mxu1 }
 0x4be   :  { %v9637_v12 = vpop.f32.mrf.mxu2 }
 0x4bf   :  { %7173 = vmatmul.msk.f32.gmra.mxu0 %vm147_vm2, %v3771_v13 }
 0x4c0   :  { %7145 = vmatmul.msk.f32.gmra.mxu3 %vm147_vm2, %v9718_v27 }
 0x4c3   :  { %v9657_v42 = vpop.f32.mrf.mxu3 }
 0x4c4   :  { %12256 = vst [vmem:[#allocation15_spill] sm:$0xff] %v9657_v42 }
 0x4c6   :  { %v9667_v34 = vpop.f32.mrf.mxu2 }
 0x4cb   :  { %v9680_v23 = vpop.f32.mrf.mxu3 }
 0x4cc   :  { %12259 = vst [vmem:[#allocation51_spill] sm:$0xff] %v9680_v23  ;;  %v9724_v23 = vpop.f32.mrf.mxu0 }
 0x4cd   :  { %12269 = vst [vmem:[#allocation37_spill] sm:$0xff] %v9724_v23 }
 0x4ce   :  { %v9688_v24 = vpop.f32.mrf.mxu2 }
 0x4cf   :  { %12261 = vst [vmem:[#allocation2_spill] sm:$0xff] %v9688_v24  ;;  %v9739_v24 = vld [vmem:[%s12086_s0 + $0xf8] sm:$0xff] }
 0x4d0   :  { %12271 = vst [vmem:[#allocation56_spill] sm:$0xff] %v9739_v24  ;;  %v3772_v6 = vrot.slane %v9739_v24, 2  ;;  %7146 = vmatmul.msk.f32.gmra.mxu3 %vm147_vm2, %v9739_v24 }
 0x4d3   :  { %v9701_v11 = vpop.f32.mrf.mxu3 }
 0x4d4   :  { %12264 = vst [vmem:[#allocation41_spill] sm:$0xff] %v9701_v11  ;;  %v3438_v11 = vsel %vm97_vm1, %v3435_v47, %v3437_v20  ;;  %v3439_v47 = vrot.slane %v9739_v24, 1  ;;  %v9747_v60 = vpop.f32.mrf.mxu0 }
 0x4d5   :  { %7119 = vmatmul.msk.f32.gmra.mxu2 %vm147_vm2, %v3438_v11  ;;  %12273 = vst [vmem:[#allocation32_spill] sm:$0xff] %v9747_v60 }
 0x4d6   :  { %v9709_v4 = vpop.f32.mrf.mxu2 }
 0x4d7   :  { %12266 = vst [vmem:[#allocation57_spill] sm:$0xff] %v9709_v4  ;;  %v9755_v4 = vpop.f32.mrf.mxu1 }
 0x4db   :  { %v9720_v42 = vpop.f32.mrf.mxu3 }
 0x4dc   :  { %12268 = vst [vmem:[#allocation27_spill] sm:$0xff] %v9720_v42  ;;  %v3440_v42 = vsel %vm97_vm1, %v3437_v20, %v3439_v47 }
 0x4dd   :  { %7120 = vmatmul.msk.f32.gmra.mxu2 %vm147_vm2, %v3440_v42  ;;  %v9774_v42 = vpop.f32.mrf.mxu0 }
 0x4de   :  { %v9728_v16 = vpop.f32.mrf.mxu2  ;;  %12278 = vst [vmem:[#allocation38_spill] sm:$0xff] %v9774_v42 }
 0x4df   :  { %12270 = vst [vmem:[#allocation46_spill] sm:$0xff] %v9728_v16  ;;  %v3773_v16 = vsel %vm434_vm3, %v3770_v32, %v3772_v6 }
 0x4e0   :  { %7174 = vmatmul.msk.f32.gmra.mxu0 %vm147_vm2, %v3773_v16 }
 0x4e3   :  { %v9743_v23 = vpop.f32.mrf.mxu3 }
 0x4e4   :  { %12272 = vst [vmem:[#allocation22_spill] sm:$0xff] %v9743_v23  ;;  %v9760_v23 = vld [vmem:[%s12086_s0 + $0x100] sm:$0xff] }
 0x4e5   :  { %12275 = vst [vmem:[#allocation55_spill] sm:$0xff] %v9760_v23  ;;  %v3441_v20 = vrot.slane %v9760_v23, 1  ;;  %v3774_v32 = vrot.slane %v9760_v23, 2  ;;  %7147 = vmatmul.msk.f32.gmra.mxu3 %vm147_vm2, %v9760_v23  ;;  %v9795_v42 = vpop.f32.mrf.mxu0 }
 0x4e6   :  { %v9749_v11 = vpop.f32.mrf.mxu2  ;;  %12282 = vst [vmem:[#allocation52_spill] sm:$0xff] %v9795_v42 }
 0x4e7   :  { %12274 = vst [vmem:[#allocation42_spill] sm:$0xff] %v9749_v11  ;;  %v3442_v60 = vsel %vm97_vm1, %v3439_v47, %v3441_v20  ;;  %v3443_v47 = vrot.slane %v9779_v19, 1  ;;  %v3775_v24 = vsel %vm434_vm3, %v3772_v6, %v3774_v32  ;;  %v3776_v6 = vrot.slane %v9779_v19, 2 }
 0x4e8   :  { %7121 = vmatmul.msk.f32.gmra.mxu2 %vm147_vm2, %v3442_v60  ;;  %7175 = vmatmul.msk.f32.gmra.mxu0 %vm147_vm2, %v3775_v24 }
 0x4e9   :  { %v3444_v11 = vsel %vm97_vm1, %v3441_v20, %v3443_v47  ;;  %v3445_v20 = vrot.slane %v9800_v41, 1  ;;  %v3777_v23 = vsel %vm434_vm3, %v3774_v32, %v3776_v6  ;;  %v3778_v32 = vrot.slane %v9800_v41, 2 }
 0x4eb   :  { %v9766_v27 = vpop.f32.mrf.mxu3  ;;  %v3446_v21 = vsel %vm97_vm1, %v3443_v47, %v3445_v20 }
 0x4ec   :  { %12276 = vst [vmem:[#allocation18_spill] sm:$0xff] %v9766_v27  ;;  %v9783_v27 = vpop.f32.mrf.mxu1 }
 0x4ed   :  { %7148 = vmatmul.msk.f32.gmra.mxu3 %vm147_vm2, %v9779_v19  ;;  %v3779_v19 = vsel %vm434_vm3, %v3776_v6, %v3778_v32  ;;  %v2581_v6 = vadd.f32 %v9596_v44, %v9483_v18 }
 0x4ee   :  { %v9768_v13 = vpop.f32.mrf.mxu2 }
 0x4ef   :  { %12277 = vst [vmem:[#allocation28_spill] sm:$0xff] %v9768_v13  ;;  %v9823_v13 = vpop.f32.mrf.mxu0 }
 0x4f0   :  { %7122 = vmatmul.msk.f32.gmra.mxu2 %vm147_vm2, %v3444_v11  ;;  %7176 = vmatmul.msk.f32.gmra.mxu0 %vm147_vm2, %v3777_v23  ;;  %12285 = vst [vmem:[#allocation50_spill] sm:$0xff] %v9823_v13  ;;  %v2579_v13 = vadd.f32 %v9576_v9, %v9461_v29 }
 0x4f3   :  { %v9793_v60 = vpop.f32.mrf.mxu3 }
 0x4f4   :  { %12281 = vst [vmem:[#allocation34_spill] sm:$0xff] %v9793_v60  ;;  %v9806_v24 = vpop.f32.mrf.mxu1  ;;  %v9819_v60 = vld [vmem:[%s12086_s0 + $0x118] sm:$0xff] }
 0x4f5   :  { %v3447_v47 = vrot.slane %v9819_v60, 1  ;;  %7149 = vmatmul.msk.f32.gmra.mxu3 %vm147_vm2, %v9800_v41 }
 0x4f6   :  { %v9787_v16 = vpop.f32.mrf.mxu2 }
 0x4f7   :  { %12280 = vst [vmem:[#allocation24_spill] sm:$0xff] %v9787_v16  ;;  %v3448_v3 = vsel %vm97_vm1, %v3445_v20, %v3447_v47  ;;  %v9839_v20 = vld [vmem:[%s12086_s0 + $0x120] sm:$0xff]  ;;  %v9854_v16 = vpop.f32.mrf.mxu0 }
 0x4f8   :  { %7123 = vmatmul.msk.f32.gmra.mxu2 %vm147_vm2, %v3446_v21  ;;  %7177 = vmatmul.msk.f32.gmra.mxu0 %vm147_vm2, %v3779_v19  ;;  %v2470_v21 = vadd.f32 %v9478_v5, %v9494_v28  ;;  %v3449_v41 = vrot.slane %v9839_v20, 1  ;;  %v3780_v19 = vrot.slane %v9819_v60, 2  ;;  %v2580_v5 = vadd.f32 %v9582_v58, %v9471_v30 }
 0x4f9   :  { %v2473_v30 = vadd.f32 %v9488_v7, %v9506_v17  ;;  %v2690_v58 = vadd.f32 %v9580_v52, %v2581_v6  ;;  %v2577_v7 = vadd.f32 %v9563_v14, %v9442_v49  ;;  %v2688_v17 = vadd.f32 %v9567_v51, %v2579_v13  ;;  %v9876_v52 = vld [vmem:[%s12086_s0 + $0x128] sm:$0xff] }
 0x4fa   :  { %v2689_v29 = vadd.f32 %v9574_v0, %v2580_v5  ;;  %v3782_v0 = vrot.slane %v9839_v20, 2 }
 0x4fb   :  { %v9814_v42 = vpop.f32.mrf.mxu3  ;;  %v2583_v9 = vadd.f32 %v9667_v34, %v2473_v30 }
 0x4fc   :  { %12284 = vst [vmem:[#allocation30_spill] sm:$0xff] %v9814_v42  ;;  %v2891_v53 = vpop.f32.mrf.mxu1  ;;  %v2582_v42 = vadd.f32 %v9637_v12, %v2470_v21  ;;  %v3450_v12 = vsel %vm97_vm1, %v3447_v47, %v3449_v41  ;;  %v3781_v21 = vsel %vm434_vm3, %v3778_v32, %v3780_v19  ;;  %v2573_v47 = vadd.f32 %v9516_v40, %v9392_v33 }
 0x4fd   :  { %7150 = vmatmul.msk.f32.gmra.mxu3 %vm147_vm2, %v9819_v60  ;;  %v2576_v33 = vadd.f32 %v9552_v50, %v9431_v61  ;;  %v2798_v40 = vadd.f32 %v9561_v22, %v2689_v29  ;;  %v2692_v14 = vadd.f32 %v9617_v25, %v2583_v9  ;;  %v2686_v32 = vadd.f32 %v9546_v8, %v2577_v7  ;;  %v12291_v7 = vld [vmem:[#allocation34_spill] sm:$0xff] }
 0x4fe   :  { %v9808_v11 = vpop.f32.mrf.mxu2  ;;  %v2682_v13 = vadd.f32 %v9500_v63, %v2573_v47  ;;  %v2574_v61 = vadd.f32 %v9528_v59, %v9405_v56  ;;  %v12290_v47 = vld [vmem:[#allocation28_spill] sm:$0xff] }
 0x4ff   :  { %v2685_v8 = vadd.f32 %v9536_v37, %v2576_v33  ;;  %v3178_v22 = vpop.f32.mrf.mxu0  ;;  %v2907_v25 = vadd.f32 %v9806_v24, %v2798_v40  ;;  %v2795_v56 = vadd.f32 %v9520_v38, %v2686_v32 }
 0x500   :  { %7124 = vmatmul.msk.f32.gmra.mxu2 %vm147_vm2, %v3448_v3  ;;  %v2691_v3 = vadd.f32 %v9584_v15, %v2582_v42  ;;  %7178 = vmatmul.msk.f32.gmra.mxu0 %vm147_vm2, %v3781_v21  ;;  %v2578_v15 = vadd.f32 %v9570_v36, %v9452_v48  ;;  %v2799_v48 = vadd.f32 %v9572_v1, %v2690_v58  ;;  %v3451_v36 = vrot.slane %v9876_v52, 1  ;;  %v12286_v58 = vld [vmem:[#allocation24_spill] sm:$0xff] }
 0x501   :  { %v3783_v1 = vsel %vm434_vm3, %v3780_v19, %v3782_v0  ;;  %v2801_v19 = vadd.f32 %v9592_v10, %v2692_v14  ;;  %v2791_v5 = vadd.f32 %v9464_v45, %v2682_v13  ;;  %v3784_v10 = vrot.slane %v9876_v52, 2  ;;  %v12293_v14 = vld [vmem:[#allocation58_spill] sm:$0xff] }
 0x502   :  { %v2800_v44 = vadd.f32 %v9578_v31, %v2691_v3  ;;  %v2575_v31 = vadd.f32 %v9540_v35, %v9421_v43  ;;  %v2687_v49 = vadd.f32 %v9558_v57, %v2578_v15  ;;  %v3452_v34 = vsel %vm97_vm1, %v3449_v41, %v3451_v36  ;;  %v12295_v13 = vld [vmem:[#allocation18_spill] sm:$0xff] }
 0x503   :  { %v9847_v28 = vpop.f32.mrf.mxu3  ;;  %v2797_v43 = vadd.f32 %v9550_v2, %v2688_v17  ;;  %v2908_v50 = vadd.f32 %v2891_v53, %v2799_v48  ;;  %v2794_v38 = vadd.f32 %v9504_v62, %v2685_v8  ;;  %v2904_v30 = vadd.f32 %v9734_v26, %v2795_v56  ;;  %v12287_v29 = vld [vmem:[#allocation30_spill] sm:$0xff] }
 0x504   :  { %v2894_v42 = vpop.f32.mrf.mxu1  ;;  %v2684_v63 = vadd.f32 %v9524_v46, %v2575_v31  ;;  %v2796_v2 = vadd.f32 %v9533_v39, %v2687_v49  ;;  %v9911_v46 = vld [vmem:[%s12086_s0 + $0x130] sm:$0xff]  ;;  %v2683_v39 = vadd.f32 %v9512_v54, %v2574_v61  ;;  %v3785_v54 = vsel %vm434_vm3, %v3782_v0, %v3784_v10  ;;  %v9939_v49 = vld [vmem:[%s12092_s5] ss:$0 sm:$0xff] }
 0x505   :  { %v2909_v51 = vadd.f32 %v2894_v42, %v2800_v44  ;;  %7151 = vmatmul.msk.f32.gmra.mxu3 %vm147_vm2, %v9839_v20  ;;  %v2906_v53 = vadd.f32 %v9783_v27, %v2797_v43  ;;  %v3453_v24 = vrot.slane %v9911_v46, 1  ;;  %v12289_v44 = vld [vmem:[#allocation49_spill] sm:$0xff]  ;;  %v3013_v26 = vadd.f32 %v12290_v47, %v2904_v30  ;;  %v12296_v43 = vld [vmem:[#allocation50_spill] sm:$0xff] }
 0x506   :  { %v9827_v23 = vpop.f32.mrf.mxu2  ;;  %v2793_v45 = vadd.f32 %v9492_v55, %v2684_v63  ;;  %v2905_v27 = vadd.f32 %v9755_v4, %v2796_v2  ;;  %v2903_v42 = vadd.f32 %v12289_v44, %v2794_v38  ;;  %v12297_v63 = vld [vmem:[#allocation59_spill] sm:$0xff]  ;;  %v12305_v30 = vld [vmem:[#allocation41_spill] sm:$0xff]  ;;  %v9994_v47 = vld [vmem:[%s12086_s0 + $0x140] sm:$0xff] }
 0x507   :  { %v3016_v59 = vadd.f32 %v9827_v23, %v2907_v25  ;;  %v3015_v23 = vadd.f32 %v9808_v11, %v2906_v53  ;;  %v12288_v11 = vld [vmem:[#allocation4_spill] sm:$0xff]  ;;  %v3181_v40 = vpop.f32.mrf.mxu0  ;;  %v12299_v25 = vld [vmem:[#allocation22_spill] sm:$0xff]  ;;  %v12302_v38 = vld [vmem:[#allocation27_spill] sm:$0xff] }
 0x508   :  { %7125 = vmatmul.msk.f32.gmra.mxu2 %vm147_vm2, %v3450_v12  ;;  %7179 = vmatmul.msk.f32.gmra.mxu0 %vm147_vm2, %v3783_v1  ;;  %v3014_v15 = vadd.f32 %v12286_v58, %v2905_v27  ;;  %v9961_v53 = vld [vmem:[%s12093_s6] ss:$0 sm:$0xff] }
 0x509   :  { %v3125_v9 = vadd.f32 %v12287_v29, %v3016_v59  ;;  %v3124_v17 = vadd.f32 %v12291_v7, %v3015_v23  ;;  %v12303_v23 = vld [vmem:[#allocation38_spill] sm:$0xff] }
 0x50a   :  { %v3123_v32 = vadd.f32 %v12295_v13, %v3014_v15  ;;  %v12306_v15 = vld [vmem:[#allocation32_spill] sm:$0xff]  ;;  %v12311_v13 = vld [vmem:[#allocation35_spill] sm:$0xff] }
 0x50b   :  { %v3112_v35 = vpop.f32.mrf.mxu3 }
 0x50c   :  { %v2897_v3 = vpop.f32.mrf.mxu1 }
 0x50d   :  { %v2910_v21 = vadd.f32 %v2897_v3, %v2801_v19  ;;  %7152 = vmatmul.msk.f32.gmra.mxu3 %vm147_vm2, %v9876_v52  ;;  %v12300_v19 = vld [vmem:[#allocation52_spill] sm:$0xff]  ;;  %v12301_v3 = vld [vmem:[#allocation57_spill] sm:$0xff] }
 0x50e   :  { %v3000_v18 = vpop.f32.mrf.mxu2 }
 0x50f   :  { %v3017_v41 = vadd.f32 %v3000_v18, %v2908_v50  ;;  %v3454_v18 = vsel %vm97_vm1, %v3451_v36, %v3453_v24  ;;  %v12292_v36 = vld [vmem:[#allocation16_spill] sm:$0xff] }
 0x510   :  { %7126 = vmatmul.msk.f32.gmra.mxu2 %vm147_vm2, %v3452_v34  ;;  %7180 = vmatmul.msk.f32.gmra.mxu0 %vm147_vm2, %v3785_v54  ;;  %v2900_v0 = vadd.f32 %v12292_v36, %v2791_v5  ;;  %v12294_v34 = vld [vmem:[#allocation42_spill] sm:$0xff]  ;;  %v3190_v5 = vadd.f32 %v12300_v19, %v3124_v17  ;;  %v3457_v17 = vrot.slane %v9994_v47, 1  ;;  %v12309_v36 = vld [vmem:[#allocation15_spill] sm:$0xff] }
 0x511   :  { %v3126_v12 = vadd.f32 %v9847_v28, %v3017_v41  ;;  %v2792_v28 = vadd.f32 %v12288_v11, %v2683_v39  ;;  %v3012_v1 = vadd.f32 %v12294_v34, %v2903_v42  ;;  %v3122_v41 = vadd.f32 %v12299_v25, %v3013_v26 }
 0x513   :  { %v3115_v48 = vpop.f32.mrf.mxu3  ;;  %v3192_v31 = vadd.f32 %v9854_v16, %v3126_v12  ;;  %v2901_v8 = vadd.f32 %v12297_v63, %v2792_v28  ;;  %v3121_v27 = vadd.f32 %v12302_v38, %v3012_v1  ;;  %v3189_v12 = vadd.f32 %v12303_v23, %v3123_v32  ;;  %v12308_v28 = vld [vmem:[#allocation37_spill] sm:$0xff]  ;;  %v10061_v38 = vld [vmem:[%s12086_s0 + $0x150] sm:$0xff] }
 0x514   :  { %v3188_v29 = vadd.f32 %v12306_v15, %v3122_v41  ;;  %v3236_v15 = vld [vmem:[%s12094_s9] sm:$0xff] }
 0x515   :  { %v3207_v59 = vmul.f32 %v9939_v49, %v3192_v31  ;;  %7153 = vmatmul.msk.f32.gmra.mxu3 %vm147_vm2, %v9911_v46  ;;  %v3187_v44 = vadd.f32 %v12308_v28, %v3121_v27  ;;  %v3204_v42 = vmul.f32 %v9939_v49, %v3189_v12  ;;  %v12310_v31 = vld [vmem:[#allocation14_spill] sm:$0xff] }
 0x516   :  { %v3003_v6 = vpop.f32.mrf.mxu2 }
 0x517   :  { %v3018_v57 = vadd.f32 %v3003_v6, %v2909_v51  ;;  %v2902_v51 = vadd.f32 %v12293_v14, %v2793_v45  ;;  %v9948_v6 = vld [vmem:[%s12086_s0 + $0x138] sm:$0xff]  ;;  %v3010_v45 = vadd.f32 %v12301_v3, %v2901_v8 }
 0x518   :  { %7127 = vmatmul.msk.f32.gmra.mxu2 %vm147_vm2, %v3454_v18  ;;  %v3455_v50 = vrot.slane %v9948_v6, 1 }
 0x519   :  { %v3127_v37 = vadd.f32 %v3112_v35, %v3018_v57  ;;  %v3191_v35 = vadd.f32 %v12296_v43, %v3125_v9  ;;  %v3786_v57 = vrot.slane %v9911_v46, 2 }
 0x51a   :  { %v3456_v39 = vsel %vm97_vm1, %v3453_v24, %v3455_v50  ;;  %v3458_v34 = vsel %vm97_vm1, %v3455_v50, %v3457_v17 }
 0x51b   :  { %v3193_v62 = vadd.f32 %v3178_v22, %v3127_v37  ;;  %v12298_v22 = vld [vmem:[#allocation46_spill] sm:$0xff]  ;;  %v3787_v37 = vsel %vm434_vm3, %v3784_v10, %v3786_v57  ;;  %v3206_v24 = vmul.f32 %v9939_v49, %v3191_v35  ;;  %v10023_v35 = vadd.f32 %v9961_v53, %v3204_v42 }
 0x51c   :  { %v3011_v2 = vadd.f32 %v12298_v22, %v2902_v51  ;;  %7181 = vmatmul.msk.f32.gmra.mxu0 %vm147_vm2, %v3787_v37  ;;  %v12304_v10 = vld [vmem:[#allocation2_spill] sm:$0xff] }
 0x51d   :  { %v3208_v61 = vmul.f32 %v9939_v49, %v3193_v62  ;;  %v3009_v54 = vadd.f32 %v12304_v10, %v2900_v0  ;;  %v3205_v62 = vmul.f32 %v9939_v49, %v3190_v5  ;;  %v10000_v7 = vadd.f32 %v9961_v53, %v3206_v24  ;;  %7154 = vmatmul.msk.f32.gmra.mxu3 %vm147_vm2, %v9948_v6 }
 0x51e   :  { %v3006_v55 = vpop.f32.mrf.mxu2  ;;  %v3120_v58 = vadd.f32 %v12305_v30, %v3011_v2  ;;  %v10037_v2 = vld [vmem:[%s12086_s0 + $0x148] sm:$0xff]  ;;  %v3230_v25 = vmax.f32 %v10023_v35, 0.0  ;;  %v3790_v5 = vrot.slane %v9994_v47, 2  ;;  %v3461_v24 = vrot.slane %v10061_v38, 1 }
 0x51f   :  { %v3019_v4 = vadd.f32 %v3006_v55, %v2910_v21  ;;  %v9976_v18 = vadd.f32 %v9961_v53, %v3208_v61  ;;  %v9985_v55 = vadd.f32 %v9961_v53, %v3207_v59  ;;  %v3118_v0 = vadd.f32 %v12309_v36, %v3009_v54  ;;  %v12312_v61 = vld [vmem:[#allocation53_spill] sm:$0xff] }
 0x520   :  { %7128 = vmatmul.msk.f32.gmra.mxu2 %vm147_vm2, %v3456_v39  ;;  %v10011_v51 = vadd.f32 %v9961_v53, %v3205_v62  ;;  %v3232_v43 = vmax.f32 %v10000_v7, 0.0  ;;  %v3459_v19 = vrot.slane %v10037_v2, 1  ;;  %v3792_v27 = vrot.slane %v10037_v2, 2  ;;  %v3685_v62 = vpop.f32.mrf.mxu3 }
 0x521   :  { %v3128_v33 = vadd.f32 %v3115_v48, %v3019_v4  ;;  %v12307_v4 = vld [vmem:[#allocation51_spill] sm:$0xff]  ;;  %v3234_v26 = vmax.f32 %v9976_v18, 0.0  ;;  %v3788_v48 = vrot.slane %v9948_v6, 2  ;;  %v3233_v14 = vmax.f32 %v9985_v55, 0.0  ;;  %v10105_v18 = vld [vmem:[%s12086_s0 + $0x160] sm:$0xff] }
 0x522   :  { %v3119_v11 = vadd.f32 %v12307_v4, %v3010_v45  ;;  %v3184_v50 = vadd.f32 %v12312_v61, %v3118_v0  ;;  %v3460_v37 = vsel %vm97_vm1, %v3457_v17, %v3459_v19  ;;  %v3793_v54 = vsel %vm434_vm3, %v3790_v5, %v3792_v27  ;;  %v3238_v0 = vld [vmem:[%s12094_s9 + $0x10] sm:$0xff] }
 0x523   :  { %v3194_v16 = vadd.f32 %v3181_v40, %v3128_v33  ;;  %v3186_v33 = vadd.f32 %v12310_v31, %v3120_v58  ;;  %v3203_v40 = vmul.f32 %v9939_v49, %v3188_v29  ;;  %v3789_v1 = vsel %vm434_vm3, %v3786_v57, %v3788_v48  ;;  %v10124_v31 = vld [vmem:[%s12086_s0 + $0x168] sm:$0xff] }
 0x524   :  { %v3185_v32 = vadd.f32 %v12311_v13, %v3119_v11  ;;  %7182 = vmatmul.msk.f32.gmra.mxu0 %vm147_vm2, %v3789_v1  ;;  %v3231_v57 = vmax.f32 %v10011_v51, 0.0  ;;  %v3791_v3 = vsel %vm434_vm3, %v3788_v48, %v3790_v5  ;;  %v3462_v30 = vsel %vm97_vm1, %v3459_v19, %v3461_v24  ;;  %v10168_v19 = vld [vmem:[%s12086_s0 + $0x178] sm:$0xff] }
 0x525   :  { %v3209_v56 = vmul.f32 %v9939_v49, %v3194_v16  ;;  %v3202_v16 = vmul.f32 %v9939_v49, %v3187_v44  ;;  %v10030_v63 = vadd.f32 %v9961_v53, %v3203_v40  ;;  %v3201_v8 = vmul.f32 %v9939_v49, %v3186_v33  ;;  %7155 = vmatmul.msk.f32.gmra.mxu3 %vm147_vm2, %v9994_v47 }
 0x526   :  { %v3200_v22 = vmul.f32 %v9939_v49, %v3185_v32  ;;  %v3794_v29 = vrot.slane %v10061_v38, 2  ;;  %v3545_v11 = vpop.f32.mrf.mxu2  ;;  %v3798_v33 = vrot.slane %v10105_v18, 2  ;;  %v3239_v32 = vld [vmem:[%s12094_s9 + $0x18] sm:$0xff]  ;;  %v3800_v35 = vrot.slane %v10124_v31, 2 }
 0x527   :  { %v9973_v21 = vadd.f32 %v9961_v53, %v3209_v56  ;;  %v10041_v41 = vadd.f32 %v9961_v53, %v3202_v16  ;;  %v3199_v56 = vmul.f32 %v9939_v49, %v3184_v50  ;;  %v3229_v59 = vmax.f32 %v10030_v63, 0.0  ;;  %v7225_v16 = vld [vmem:[%s12085_s1 + $0x98] sm:$0x7]  ;;  %v10151_v63 = vpop.f32.mrf.mxu0 }
 0x528   :  { %7129 = vmatmul.msk.f32.gmra.mxu2 %vm147_vm2, %v3458_v34  ;;  %v10048_v39 = vadd.f32 %v9961_v53, %v3201_v8  ;;  %v3215_v49 = vadd.f32 %v9961_v53, %v3200_v22  ;;  %v10088_v28 = vadd.f32 %v3685_v62, %v3545_v11  ;;  %v3795_v44 = vsel %vm434_vm3, %v3792_v27, %v3794_v29  ;;  %v3688_v55 = vpop.f32.mrf.mxu3 }
 0x529   :  { %v3235_v9 = vmax.f32 %v9973_v21, 0.0  ;;  %v3228_v45 = vmax.f32 %v10041_v41, 0.0  ;;  %v3214_v12 = vadd.f32 %v9961_v53, %v3199_v56  ;;  %v10080_v53 = vld [vmem:[%s12086_s0 + $0x158] sm:$0xff]  ;;  %v3237_v21 = vld [vmem:[%s12094_s9 + $0x8] sm:$0xff]  ;;  %7226 = vmatpush.msk.msrb.mxu2 %vm196_vm0, %v7225_v16  ;;  %v3801_v22 = vsel %vm434_vm3, %v3798_v33, %v3800_v35  ;;  %v3240_v41 = vld [vmem:[%s12094_s9 + $0x20] sm:$0xff] }
 0x52a   :  { %v3227_v23 = vmax.f32 %v10048_v39, 0.0  ;;  %v3226_v10 = vmax.f32 %v3215_v49, 0.0  ;;  %v3463_v4 = vrot.slane %v10080_v53, 1  ;;  %v3241_v49 = vld [vmem:[%s12094_s9 + $0x28] sm:$0xf]  ;;  %v7222_v16 = vld [vmem:[%s12085_s1 + $0x80] sm:$0xff] }
 0x52b   :  { %3266 = vmatpush.msrb.mxu1 %v3235_v9  ;;  %v3225_v58 = vmax.f32 %v3214_v12, 0.0  ;;  %v3804_v12 = vrot.slane %v10168_v19, 2 }
 0x52c   :  { %7183 = vmatmul.msk.f32.gmra.mxu0 %vm147_vm2, %v3791_v3  ;;  %v3464_v42 = vsel %vm97_vm1, %v3461_v24, %v3463_v4 }
 0x52d   :  { %3267 = vmatpush.msrb.mxu1 %v3234_v26  ;;  %7156 = vmatmul.msk.f32.gmra.mxu3 %vm147_vm2, %v10037_v2 }
 0x52e   :  { %v3548_v7 = vpop.f32.mrf.mxu2 }
 0x52f   :  { %3268 = vmatpush.msrb.mxu1 %v3233_v14  ;;  %v10109_v17 = vadd.f32 %v3688_v55, %v3548_v7  ;;  %v10179_v27 = vpop.f32.mrf.mxu0 }
 0x530   :  { %7130 = vmatmul.msk.f32.gmra.mxu2 %vm147_vm2, %v3460_v37  ;;  %v3691_v40 = vpop.f32.mrf.mxu3 }
 0x531   :  { %3269 = vmatpush.msrb.mxu1 %v3232_v43 }
 0x533   :  { %3270 = vmatpush.msrb.mxu1 %v3231_v57 }
 0x534   :  { %7184 = vmatmul.msk.f32.gmra.mxu0 %vm147_vm2, %v3793_v54 }
 0x535   :  { %3271 = vmatpush.msrb.mxu1 %v3230_v25  ;;  %7157 = vmatmul.msk.f32.gmra.mxu3 %vm147_vm2, %v10061_v38 }
 0x536   :  { %v3551_v51 = vpop.f32.mrf.mxu2 }
 0x537   :  { %3272 = vmatpush.msrb.mxu1 %v3229_v59  ;;  %v10128_v34 = vadd.f32 %v3691_v40, %v3551_v51  ;;  %v10203_v62 = vpop.f32.mrf.mxu0  ;;  %v7253_v40 = vld [vmem:[%s12085_s1 + $0xb0] sm:$0xff]  ;;  %v12313_v51 = vld [vmem:[#allocation39_spill] sm:$0xff] }
 0x538   :  { %7131 = vmatmul.msk.f32.gmra.mxu2 %vm147_vm2, %v3462_v30  ;;  %v3694_v61 = vpop.f32.mrf.mxu3 }
 0x539   :  { %3273 = vmatpush.msrb.mxu1 %v3228_v45 }
 0x53b   :  { %3274 = vmatpush.msrb.mxu1 %v3227_v23 }
 0x53c   :  { %7185 = vmatmul.msk.f32.gmra.mxu0 %vm147_vm2, %v3795_v44  ;;  %v7224_v44 = vld [vmem:[%s12085_s1 + $0x90] sm:$0xff] }
 0x53d   :  { %3275 = vmatpush.msrb.mxu1 %v3226_v10  ;;  %7158 = vmatmul.msk.f32.gmra.mxu3 %vm147_vm2, %v10080_v53 }
 0x53e   :  { %4308 = vmatpush.msrb.mxu2 %v7224_v44 }
 0x53f   :  { %3276 = vmatpush.msrb.mxu1 %v3225_v58 }
 0x540   :  { %7073 = vmatmul.msk.f32.vlgmr.msrb.gmra.mxu1 %vm3242_vm10, %v3236_v15  ;;  %7132 = vmatmul.msk.f32.gmra.mxu2 %vm147_vm2, %v3464_v42  ;;  %v3697_v56 = vpop.f32.mrf.mxu3  ;;  %v7254_v42 = vld [vmem:[%s12085_s1 + $0xb8] sm:$0x7] }
 0x541   :  { %3325 = vmatpush.msra.mxu1 %v3235_v9  ;;  %v3796_v9 = vrot.slane %v10080_v53, 2  ;;  %7255 = vmatpush.msk.msrb.mxu3 %vm196_vm0, %v7254_v42 }
 0x543   :  { %3326 = vmatpush.msra.mxu1 %v3234_v26  ;;  %v3465_v26 = vrot.slane %v10105_v18, 1  ;;  %v3797_v48 = vsel %vm434_vm3, %v3794_v29, %v3796_v9  ;;  %v3799_v1 = vsel %vm434_vm3, %v3796_v9, %v3798_v33  ;;  %v3296_v29 = vld [vmem:[%s12095_s10] sm:$0xff]  ;;  %v7223_v33 = vld [vmem:[%s12085_s1 + $0x88] sm:$0xff]  ;;  %4525 = vmatpush.msrb.mxu3 %v7253_v40  ;;  %v12316_v40 = vld [vmem:[#allocation44_spill] sm:$0xff] }
 0x544   :  { %7186 = vmatmul.msk.f32.gmra.mxu0 %vm147_vm2, %v3797_v48  ;;  %4309 = vmatpush.msrb.mxu2 %v7223_v33  ;;  %v3299_v33 = vld [vmem:[%s12095_s10 + $0x18] sm:$0xff] }
 0x545   :  { %3327 = vmatpush.msra.mxu1 %v3233_v14  ;;  %v3466_v36 = vsel %vm97_vm1, %v3463_v4, %v3465_v26  ;;  %v3467_v14 = vrot.slane %v10124_v31, 1  ;;  %7159 = vmatmul.msk.f32.gmra.mxu3 %vm147_vm2, %v10105_v18  ;;  %v10210_v4 = vld [vmem:[%s12086_s0 + $0x188] sm:$0xff] }
 0x546   :  { %v3475_v9 = vrot.slane %v10210_v4, 1  ;;  %4310 = vmatpush.msrb.mxu2 %v7222_v16 }
 0x547   :  { %3328 = vmatpush.msra.mxu1 %v3232_v43  ;;  %v3468_v13 = vsel %vm97_vm1, %v3465_v26, %v3467_v14  ;;  %v10143_v43 = vld [vmem:[%s12086_s0 + $0x170] sm:$0xff] }
 0x548   :  { %7074 = vmatmul.msk.f32.gmra.mxu1 %vm3242_vm10, %v3237_v21  ;;  %7133 = vmatmul.msk.f32.gmra.mxu2 %vm147_vm2, %v3466_v36  ;;  %v3469_v50 = vrot.slane %v10143_v43, 1  ;;  %v3802_v5 = vrot.slane %v10143_v43, 2  ;;  %v3700_v24 = vpop.f32.mrf.mxu3  ;;  %v3297_v36 = vld [vmem:[%s12095_s10 + $0x8] sm:$0xff] }
 0x549   :  { %3329 = vmatpush.msra.mxu1 %v3231_v57  ;;  %v3554_v57 = vpop.f32.mrf.mxu2 }
 0x54a   :  { %v10153_v8 = vadd.f32 %v3694_v61, %v3554_v57  ;;  %v3803_v3 = vsel %vm434_vm3, %v3800_v35, %v3802_v5  ;;  %v7195_v35 = vld [vmem:[%s12085_s1 + $0x70] sm:$0xff]  ;;  %v7252_v61 = vld [vmem:[%s12085_s1 + $0xa8] sm:$0xff] }
 0x54b   :  { %3330 = vmatpush.msra.mxu1 %v3230_v25  ;;  %v3470_v25 = vsel %vm97_vm1, %v3467_v14, %v3469_v50  ;;  %v3808_v14 = vrot.slane %v10210_v4, 2  ;;  %4526 = vmatpush.msrb.mxu3 %v7252_v61 }
 0x54c   :  { %7187 = vmatmul.msk.f32.gmra.mxu0 %vm147_vm2, %v3799_v1  ;;  %v4195_v1 = vrot.slane %v12313_v51, 4 }
 0x54d   :  { %3331 = vmatpush.msra.mxu1 %v3229_v59  ;;  %7160 = vmatmul.msk.f32.gmra.mxu3 %vm147_vm2, %v10124_v31  ;;  %v3471_v59 = vrot.slane %v10168_v19, 1 }
 0x54f   :  { %3332 = vmatpush.msra.mxu1 %v3228_v45  ;;  %v3472_v45 = vsel %vm97_vm1, %v3469_v50, %v3471_v59  ;;  %v12314_v50 = vld [vmem:[#allocation47_spill] sm:$0xff] }
 0x550   :  { %7075 = vmatmul.msk.f32.gmra.mxu1 %vm3242_vm10, %v3238_v0  ;;  %7134 = vmatmul.msk.f32.gmra.mxu2 %vm147_vm2, %v3468_v13  ;;  %v7196_v0 = vld [vmem:[%s12085_s1 + $0x78] sm:$0x7]  ;;  %v10244_v13 = vpop.f32.mrf.mxu0  ;;  %v4196_v57 = vrot.slane %v12314_v50, 4  ;;  %v4630_v42 = vrot.slane %v12314_v50, 6 }
 0x551   :  { %3333 = vmatpush.msra.mxu1 %v3227_v23  ;;  %v10189_v23 = vld [vmem:[%s12086_s0 + $0x180] sm:$0xff] }
 0x552   :  { %v3806_v11 = vrot.slane %v10189_v23, 2 }
 0x553   :  { %3334 = vmatpush.msra.mxu1 %v3226_v10  ;;  %v3473_v10 = vrot.slane %v10189_v23, 1  ;;  %v3703_v21 = vpop.f32.mrf.mxu3 }
 0x554   :  { %7188 = vmatmul.msk.f32.gmra.mxu0 %vm147_vm2, %v3801_v22  ;;  %v3807_v7 = vsel %vm434_vm3, %v3804_v12, %v3806_v11  ;;  %v4412_v22 = vrot.slane %v12313_v51, 5 }
 0x555   :  { %3335 = vmatpush.msra.mxu1 %v3225_v58  ;;  %7161 = vmatmul.msk.f32.gmra.mxu3 %vm147_vm2, %v10143_v43  ;;  %v3805_v58 = vsel %vm434_vm3, %v3802_v5, %v3804_v12  ;;  %v3474_v15 = vsel %vm97_vm1, %v3471_v59, %v3473_v10  ;;  %v3476_v48 = vsel %vm97_vm1, %v3473_v10, %v3475_v9  ;;  %v7194_v5 = vld [vmem:[%s12085_s1 + $0x68] sm:$0xff]  ;;  %v3298_v12 = vld [vmem:[%s12095_s10 + $0x10] sm:$0xff]  ;;  %v7280_v9 = vld [vmem:[%s12085_s1 + $0xc0] sm:$0xff] }
 0x556   :  { %v3809_v59 = vsel %vm434_vm3, %v3806_v11, %v3808_v14  ;;  %v7282_v10 = vld [vmem:[%s12085_s1 + $0xd0] sm:$0xff]  ;;  %v4629_v11 = vrot.slane %v12313_v51, 6  ;;  %v4200_v14 = vrot.slane %v12316_v40, 4  ;;  %v4417_v51 = vrot.slane %v12316_v40, 5 }
 0x557   :  { %7197 = vmatpush.msk.msrb.mxu1 %vm196_vm0, %v7196_v0 }
 0x558   :  { %7076 = vmatmul.msk.f32.gmra.mxu1 %vm3242_vm10, %v3239_v32  ;;  %7135 = vmatmul.msk.f32.gmra.mxu2 %vm147_vm2, %v3470_v25  ;;  %v3557_v39 = vpop.f32.mrf.mxu2  ;;  %v4413_v25 = vrot.slane %v12314_v50, 5 }
 0x559   :  { %v10172_v37 = vadd.f32 %v3697_v56, %v3557_v39  ;;  %4091 = vmatpush.msrb.mxu1 %v7195_v35  ;;  %v7251_v39 = vld [vmem:[%s12085_s1 + $0xa0] sm:$0xff] }
 0x55a   :  { %4527 = vmatpush.msrb.mxu3 %v7251_v39  ;;  %v4634_v39 = vrot.slane %v12316_v40, 6 }
 0x55b   :  { %4092 = vmatpush.msrb.mxu1 %v7194_v5 }
 0x55c   :  { %7189 = vmatmul.msk.f32.gmra.mxu0 %vm147_vm2, %v3803_v3  ;;  %v7283_v3 = vld [vmem:[%s12085_s1 + $0xd8] sm:$0x7] }
 0x55d   :  { %7162 = vmatmul.msk.f32.gmra.mxu3 %vm147_vm2, %v10168_v19  ;;  %7284 = vmatpush.msk.msrb.mxu0 %vm196_vm0, %v7283_v3 }
 0x55f   :  { %4742 = vmatpush.msrb.mxu0 %v7282_v10 }
 0x560   :  { %7077 = vmatmul.msk.f32.gmra.mxu1 %vm3242_vm10, %v3240_v41  ;;  %7136 = vmatmul.msk.f32.gmra.mxu2 %vm147_vm2, %v3472_v45  ;;  %v3560_v54 = vpop.f32.mrf.mxu2  ;;  %v4197_v45 = vsel %vm872_vm7, %v4195_v1, %v4196_v57 }
 0x561   :  { %v10193_v30 = vadd.f32 %v3700_v24, %v3560_v54  ;;  %v7193_v24 = vld [vmem:[%s12085_s1 + $0x60] sm:$0xff]  ;;  %v7281_v54 = vld [vmem:[%s12085_s1 + $0xc8] sm:$0xff] }
 0x562   :  { %4093 = vmatpush.msrb.mxu1 %v7193_v24  ;;  %4743 = vmatpush.msrb.mxu0 %v7281_v54  ;;  %v3301_v54 = vld [vmem:[%s12095_s10 + $0x28] sm:$0xf] }
 0x564   :  { %7190 = vmatmul.msk.f32.gmra.mxu0 %vm147_vm2, %v3805_v58  ;;  %v12315_v58 = vld [vmem:[#allocation3_spill] sm:$0xff] }
 0x565   :  { %7163 = vmatmul.msk.f32.gmra.mxu3 %vm147_vm2, %v10189_v23  ;;  %4744 = vmatpush.msrb.mxu0 %v7280_v9  ;;  %v4632_v1 = vrot.slane %v12315_v58, 6 }
 0x567   :  { %v4633_v61 = vsel %vm1309_vm5, %v4630_v42, %v4632_v1 }
 0x568   :  { %7078 = vmatmul.msk.f32.gmra.mxu1 %vm3242_vm10, %v3241_v49  ;;  %7137 = vmatmul.msk.f32.gmra.mxu2 %vm147_vm2, %v3474_v15  ;;  %v3706_v32 = vpop.f32.mrf.mxu3  ;;  %v4414_v49 = vsel %vm196_vm0, %v4412_v22, %v4413_v25  ;;  %v4198_v15 = vrot.slane %v12315_v58, 4 }
 0x56a   :  { %v4201_v50 = vsel %vm872_vm7, %v4198_v15, %v4200_v14 }
 0x56b   :  { %v3563_v55 = vpop.f32.mrf.mxu2 }
 0x56c   :  { %v10221_v26 = vadd.f32 %v3703_v21, %v3563_v55  ;;  %7191 = vmatmul.msk.f32.gmra.mxu0 %vm147_vm2, %v3807_v7  ;;  %v10297_v55 = vpop.f32.mrf.mxu0 }
 0x56d   :  { %7256 = vmatmul.msk.f32.vlgmr.msrb.gmra.mxu3 %vm147_vm2, %v4414_v49 }
 0x570   :  { %7079 = vmatmul.msk.f32.vlgmr.msra.gmra.mxu1 %vm3242_vm10, %v3296_v29  ;;  %7138 = vmatmul.msk.f32.gmra.mxu2 %vm147_vm2, %v3476_v48  ;;  %v4415_v29 = vrot.slane %v12315_v58, 5  ;;  %v3709_v44 = vpop.f32.mrf.mxu3  ;;  %v4631_v48 = vsel %vm1309_vm5, %v4629_v11, %v4630_v42  ;;  %v10349_v11 = vld [vmem:[%s12086_s0 + $0xc8] sm:$0xff]  ;;  %v10355_v42 = vld [vmem:[%s12086_s0 + $0xd0] sm:$0xff] }
 0x572   :  { %v4416_v0 = vsel %vm196_vm0, %v4413_v25, %v4415_v29  ;;  %v3300_v25 = vld [vmem:[%s12095_s10 + $0x20] sm:$0xff] }
 0x573   :  { %v3566_v41 = vpop.f32.mrf.mxu2 }
 0x574   :  { %v10262_v56 = vadd.f32 %v3706_v32, %v3566_v41  ;;  %7192 = vmatmul.msk.f32.gmra.mxu0 %vm147_vm2, %v3809_v59  ;;  %v10319_v22 = vpop.f32.mrf.mxu0  ;;  %v12317_v41 = vld [vmem:[#allocation31_spill] sm:$0xff] }
 0x575   :  { %7257 = vmatmul.msk.f32.gmra.mxu3 %vm147_vm2, %v4416_v0  ;;  %v4202_v5 = vrot.slane %v12317_v41, 4  ;;  %v4419_v59 = vrot.slane %v12317_v41, 5 }
 0x577   :  { %v4203_v24 = vsel %vm872_vm7, %v4200_v14, %v4202_v5  ;;  %v4420_v10 = vsel %vm196_vm0, %v4417_v51, %v4419_v59  ;;  %v4636_v14 = vrot.slane %v12317_v41, 6 }
 0x578   :  { %7080 = vmatmul.msk.f32.gmra.mxu1 %vm3242_vm10, %v3297_v36  ;;  %7227 = vmatmul.msk.f32.vlgmr.msrb.gmra.mxu2 %vm147_vm2, %v4197_v45  ;;  %v4199_v36 = vsel %vm872_vm7, %v4196_v57, %v4198_v15  ;;  %v3712_v32 = vpop.f32.mrf.mxu3  ;;  %v4418_v57 = vsel %vm196_vm0, %v4415_v29, %v4417_v51  ;;  %v12318_v15 = vld [vmem:[#allocation13_spill] sm:$0xff] }
 0x579   :  { %v4204_v29 = vrot.slane %v12318_v15, 4  ;;  %v4421_v40 = vrot.slane %v12318_v15, 5 }
 0x57b   :  { %v3569_v21 = vpop.f32.mrf.mxu2  ;;  %v4205_v0 = vsel %vm872_vm7, %v4202_v5, %v4204_v29  ;;  %v4422_v51 = vsel %vm196_vm0, %v4419_v59, %v4421_v40 }
 0x57c   :  { %v10299_v7 = vadd.f32 %v3709_v44, %v3569_v21  ;;  %7285 = vmatmul.msk.f32.vlgmr.msrb.gmra.mxu0 %vm147_vm2, %v4631_v48  ;;  %v10340_v58 = vpop.f32.mrf.mxu0  ;;  %v3978_v44 = vrot.slane %v10349_v11, 3  ;;  %v3979_v21 = vrot.slane %v10355_v42, 3 }
 0x57d   :  { %7258 = vmatmul.msk.f32.gmra.mxu3 %vm147_vm2, %v4418_v57 }
 0x580   :  { %7081 = vmatmul.msk.f32.gmra.mxu1 %vm3242_vm10, %v3298_v12  ;;  %7228 = vmatmul.msk.f32.gmra.mxu2 %vm147_vm2, %v4199_v36  ;;  %v3715_v3 = vpop.f32.mrf.mxu3  ;;  %v4635_v12 = vsel %vm1309_vm5, %v4632_v1, %v4634_v39  ;;  %v4637_v1 = vsel %vm1309_vm5, %v4634_v39, %v4636_v14 }
 0x583   :  { %v3572_v35 = vpop.f32.mrf.mxu2 }
 0x584   :  { %v10314_v16 = vadd.f32 %v3712_v32, %v3572_v35  ;;  %7286 = vmatmul.msk.f32.gmra.mxu0 %vm147_vm2, %v4633_v61  ;;  %v12320_v32 = vld [vmem:[#allocation56_spill] sm:$0xff]  ;;  %v10370_v61 = vpop.f32.mrf.mxu0 }
 0x585   :  { %7259 = vmatmul.msk.f32.gmra.mxu3 %vm147_vm2, %v4420_v10  ;;  %v4206_v35 = vrot.slane %v12320_v32, 4  ;;  %v12322_v10 = vld [vmem:[#allocation55_spill] sm:$0xff] }
 0x587   :  { %v4207_v59 = vsel %vm872_vm7, %v4204_v29, %v4206_v35  ;;  %v10394_v29 = vld [vmem:[%s12086_s0 + $0xe0] sm:$0xff] }
 0x588   :  { %7082 = vmatmul.msk.f32.gmra.mxu1 %vm3242_vm10, %v3299_v33  ;;  %7229 = vmatmul.msk.f32.gmra.mxu2 %vm147_vm2, %v4201_v50  ;;  %v3718_v9 = vpop.f32.mrf.mxu3  ;;  %v3980_v33 = vsel %vm653_vm4, %v3978_v44, %v3979_v21  ;;  %v10375_v50 = vld [vmem:[%s12086_s0 + $0xd8] sm:$0xff]  ;;  %v3983_v44 = vrot.slane %v10394_v29, 3 }
 0x589   :  { %v3981_v57 = vrot.slane %v10375_v50, 3 }
 0x58b   :  { %v3575_v45 = vpop.f32.mrf.mxu2  ;;  %v3982_v39 = vsel %vm653_vm4, %v3979_v21, %v3981_v57 }
 0x58c   :  { %v10331_v49 = vadd.f32 %v3715_v3, %v3575_v45  ;;  %7287 = vmatmul.msk.f32.gmra.mxu0 %vm147_vm2, %v4635_v12  ;;  %v4423_v3 = vrot.slane %v12320_v32, 5  ;;  %v4638_v45 = vrot.slane %v12318_v15, 6 }
 0x58d   :  { %7260 = vmatmul.msk.f32.gmra.mxu3 %vm147_vm2, %v4422_v51 }
 0x58e   :  { %v4424_v12 = vsel %vm196_vm0, %v4421_v40, %v4423_v3  ;;  %v4425_v40 = vrot.slane %v12322_v10, 5 }
 0x590   :  { %7083 = vmatmul.msk.f32.gmra.mxu1 %vm3242_vm10, %v3300_v25  ;;  %7230 = vmatmul.msk.f32.gmra.mxu2 %vm147_vm2, %v4203_v24  ;;  %v3721_v25 = vpop.f32.mrf.mxu3  ;;  %v4639_v24 = vsel %vm1309_vm5, %v4636_v14, %v4638_v45  ;;  %v4640_v14 = vrot.slane %v12320_v32, 6  ;;  %v4426_v51 = vsel %vm196_vm0, %v4423_v3, %v4425_v40 }
 0x593   :  { %v3578_v48 = vpop.f32.mrf.mxu2 }
 0x594   :  { %v10358_v36 = vadd.f32 %v3718_v9, %v3578_v48  ;;  %7288 = vmatmul.msk.f32.gmra.mxu0 %vm147_vm2, %v4637_v1  ;;  %v10398_v9 = vpop.f32.mrf.mxu0  ;;  %v4641_v1 = vsel %vm1309_vm5, %v4638_v45, %v4640_v14 }
 0x595   :  { %7261 = vmatmul.msk.f32.gmra.mxu3 %vm147_vm2, %v4424_v12 }
 0x596   :  { %12319 = vst [vmem:[#allocation25_spill] sm:$0xff] %v10358_v36 }
 0x598   :  { %7084 = vmatmul.msk.f32.gmra.mxu1 %vm3242_vm10, %v3301_v54  ;;  %7231 = vmatmul.msk.f32.gmra.mxu2 %vm147_vm2, %v4205_v0  ;;  %v4208_v54 = vrot.slane %v12322_v10, 4  ;;  %v3724_v15 = vpop.f32.mrf.mxu3 }
 0x59a   :  { %v4209_v0 = vsel %vm872_vm7, %v4206_v35, %v4208_v54  ;;  %v10415_v35 = vld [vmem:[%s12086_s0 + $0xe8] sm:$0xff] }
 0x59b   :  { %v3581_v41 = vpop.f32.mrf.mxu2 }
 0x59c   :  { %v10379_v5 = vadd.f32 %v3721_v25, %v3581_v41  ;;  %7289 = vmatmul.msk.f32.gmra.mxu0 %vm147_vm2, %v4639_v24  ;;  %v12324_v25 = vld [vmem:[#allocation54_spill] sm:$0xff]  ;;  %v10422_v45 = vpop.f32.mrf.mxu0 }
 0x59d   :  { %7262 = vmatmul.msk.f32.gmra.mxu3 %vm147_vm2, %v4426_v51  ;;  %v4210_v41 = vrot.slane %v12324_v25, 4  ;;  %v4427_v24 = vrot.slane %v12324_v25, 5 }
 0x59e   :  { %12321 = vst [vmem:[#allocation48_spill] sm:$0xff] %v10379_v5 }
 0x59f   :  { %v4211_v3 = vsel %vm872_vm7, %v4208_v54, %v4210_v41 }
 0x5a0   :  { %7198 = vmatmul.msk.f32.vlgmr.msrb.gmra.mxu1 %vm147_vm2, %v3980_v33  ;;  %7232 = vmatmul.msk.f32.gmra.mxu2 %vm147_vm2, %v4207_v59  ;;  %v3984_v33 = vsel %vm653_vm4, %v3981_v57, %v3983_v44  ;;  %v3985_v57 = vrot.slane %v10415_v35, 3  ;;  %v3727_v32 = vpop.f32.mrf.mxu3 }
 0x5a2   :  { %v3986_v12 = vsel %vm653_vm4, %v3983_v44, %v3985_v57  ;;  %v10436_v44 = vld [vmem:[%s12086_s0 + $0xf0] sm:$0xff] }
 0x5a3   :  { %v3584_v21 = vpop.f32.mrf.mxu2  ;;  %v3987_v51 = vrot.slane %v10436_v44, 3 }
 0x5a4   :  { %v10400_v48 = vadd.f32 %v3724_v15, %v3584_v21  ;;  %7290 = vmatmul.msk.f32.gmra.mxu0 %vm147_vm2, %v4641_v1  ;;  %v4642_v15 = vrot.slane %v12322_v10, 6  ;;  %v4428_v21 = vsel %vm196_vm0, %v4425_v40, %v4427_v24 }
 0x5a5   :  { %7263 = vmatmul.msk.f32.gmra.mxu3 %vm147_vm2, %v4428_v21  ;;  %v10448_v21 = vpop.f32.mrf.mxu0 }
 0x5a6   :  { %12323 = vst [vmem:[#allocation21_spill] sm:$0xff] %v10400_v48 }
 0x5a7   :  { %12328 = vst [vmem:[#allocation11_spill] sm:$0xff] %v10448_v21  ;;  %v4652_v21 = vrot.slane %v9876_v52, 6 }
 0x5a8   :  { %7199 = vmatmul.msk.f32.gmra.mxu1 %vm147_vm2, %v3982_v39  ;;  %7233 = vmatmul.msk.f32.gmra.mxu2 %vm147_vm2, %v4209_v0  ;;  %v4643_v0 = vsel %vm1309_vm5, %v4640_v14, %v4642_v15  ;;  %v3730_v10 = vpop.f32.mrf.mxu3 }
 0x5ab   :  { %v3587_v59 = vpop.f32.mrf.mxu2 }
 0x5ac   :  { %v10419_v39 = vadd.f32 %v3727_v32, %v3587_v59  ;;  %7291 = vmatmul.msk.f32.gmra.mxu0 %vm147_vm2, %v4643_v0  ;;  %v3988_v59 = vsel %vm653_vm4, %v3985_v57, %v3987_v51  ;;  %v10459_v57 = vld [vmem:[%s12086_s0 + $0xf8] sm:$0xff] }
 0x5ae   :  { %12325 = vst [vmem:[#allocation45_spill] sm:$0xff] %v10419_v39 }
 0x5b0   :  { %7200 = vmatmul.msk.f32.gmra.mxu1 %vm147_vm2, %v3984_v33  ;;  %7234 = vmatmul.msk.f32.gmra.mxu2 %vm147_vm2, %v4211_v3  ;;  %v12326_v33 = vld [vmem:[#allocation20_spill] sm:$0xff] }
 0x5b1   :  { %v4212_v54 = vrot.slane %v12326_v33, 4  ;;  %v4429_v3 = vrot.slane %v12326_v33, 5 }
 0x5b3   :  { %v3590_v1 = vpop.f32.mrf.mxu2  ;;  %v4213_v14 = vsel %vm872_vm7, %v4210_v41, %v4212_v54  ;;  %v4430_v0 = vsel %vm196_vm0, %v4427_v24, %v4429_v3  ;;  %v4214_v41 = vrot.slane %v9819_v60, 4 }
 0x5b4   :  { %v10440_v40 = vadd.f32 %v3730_v10, %v3590_v1  ;;  %7264 = vmatmul.msk.f32.gmra.mxu3 %vm147_vm2, %v4430_v0  ;;  %v3733_v10 = vpop.f32.mrf.mxu3  ;;  %v4431_v0 = vrot.slane %v9819_v60, 5  ;;  %v10482_v60 = vld [vmem:[%s12086_s0 + $0x100] sm:$0xff] }
 0x5b5   :  { %12331 = vst [vmem:[#allocation33_spill] sm:$0xff] %v10482_v60 }
 0x5b6   :  { %12327 = vst [vmem:[#allocation43_spill] sm:$0xff] %v10440_v40  ;;  %v4646_v40 = vrot.slane %v12326_v33, 6  ;;  %v4432_v48 = vsel %vm196_vm0, %v4429_v3, %v4431_v0  ;;  %v3991_v33 = vrot.slane %v10482_v60, 3  ;;  %v4437_v60 = vrot.slane %v9911_v46, 5 }
 0x5b8   :  { %7201 = vmatmul.msk.f32.gmra.mxu1 %vm147_vm2, %v3986_v12  ;;  %v4644_v12 = vrot.slane %v12324_v25, 6  ;;  %7235 = vmatmul.msk.f32.gmra.mxu2 %vm147_vm2, %v4213_v14  ;;  %v3989_v25 = vrot.slane %v10459_v57, 3 }
 0x5ba   :  { %v4645_v39 = vsel %vm1309_vm5, %v4642_v15, %v4644_v12  ;;  %v4215_v15 = vsel %vm872_vm7, %v4212_v54, %v4214_v41  ;;  %v4216_v54 = vrot.slane %v9839_v20, 4 }
 0x5bb   :  { %7292 = vmatmul.msk.f32.gmra.mxu0 %vm147_vm2, %v4645_v39  ;;  %v3593_v1 = vpop.f32.mrf.mxu2  ;;  %v4647_v39 = vsel %vm1309_vm5, %v4644_v12, %v4646_v40 }
 0x5bc   :  { %v10463_v24 = vadd.f32 %v3733_v10, %v3593_v1  ;;  %7265 = vmatmul.msk.f32.gmra.mxu3 %vm147_vm2, %v4432_v48  ;;  %v10477_v10 = vpop.f32.mrf.mxu0  ;;  %v4217_v1 = vsel %vm872_vm7, %v4214_v41, %v4216_v54  ;;  %v4218_v41 = vrot.slane %v9876_v52, 4 }
 0x5bd   :  { %v10443_v32 = vpop.f32.mrf.mxu1  ;;  %12330 = vst [vmem:[#allocation10_spill] sm:$0xff] %v10477_v10  ;;  %v4435_v10 = vrot.slane %v9876_v52, 5 }
 0x5be   :  { %12329 = vst [vmem:[#allocation36_spill] sm:$0xff] %v10463_v24  ;;  %v10496_v24 = vld [vmem:[%s12086_s0 + $0x118] sm:$0xff] }
 0x5bf   :  { %12333 = vst [vmem:[#allocation29_spill] sm:$0xff] %v10496_v24  ;;  %v4648_v5 = vrot.slane %v10496_v24, 6 }
 0x5c0   :  { %7202 = vmatmul.msk.f32.gmra.mxu1 %vm147_vm2, %v3988_v59  ;;  %v3990_v59 = vsel %vm653_vm4, %v3987_v51, %v3989_v25  ;;  %7236 = vmatmul.msk.f32.gmra.mxu2 %vm147_vm2, %v4215_v15  ;;  %v3736_v51 = vpop.f32.mrf.mxu3  ;;  %v3992_v15 = vsel %vm653_vm4, %v3989_v25, %v3991_v33 }
 0x5c3   :  { %7293 = vmatmul.msk.f32.gmra.mxu0 %vm147_vm2, %v4647_v39  ;;  %v3596_v3 = vpop.f32.mrf.mxu2 }
 0x5c4   :  { %v10486_v12 = vadd.f32 %v3736_v51, %v3596_v3  ;;  %v4649_v51 = vsel %vm1309_vm5, %v4646_v40, %v4648_v5 }
 0x5c5   :  { %v10466_v14 = vpop.f32.mrf.mxu1 }
 0x5c6   :  { %12332 = vst [vmem:[#allocation9_spill] sm:$0xff] %v10486_v12 }
 0x5c8   :  { %7203 = vmatmul.msk.f32.gmra.mxu1 %vm147_vm2, %v3990_v59  ;;  %v4433_v59 = vrot.slane %v9839_v20, 5  ;;  %7237 = vmatmul.msk.f32.gmra.mxu2 %vm147_vm2, %v4217_v1  ;;  %v10508_v20 = vld [vmem:[%s12086_s0 + $0x108] sm:$0xff]  ;;  %v3739_v3 = vpop.f32.mrf.mxu3 }
 0x5c9   :  { %12334 = vst [vmem:[#allocation12_spill] sm:$0xff] %v10508_v20  ;;  %v3993_v25 = vrot.slane %v10508_v20, 3  ;;  %v10524_v20 = vld [vmem:[%s12086_s0 + $0x120] sm:$0xff] }
 0x5ca   :  { %v4434_v39 = vsel %vm196_vm0, %v4431_v0, %v4433_v59  ;;  %v10512_v0 = vpop.f32.mrf.mxu0  ;;  %12337 = vst [vmem:[#allocation26_spill] sm:$0xff] %v10524_v20 }
 0x5cb   :  { %7266 = vmatmul.msk.f32.gmra.mxu3 %vm147_vm2, %v4434_v39  ;;  %7294 = vmatmul.msk.f32.gmra.mxu0 %vm147_vm2, %v4649_v51  ;;  %v3599_v1 = vpop.f32.mrf.mxu2  ;;  %12335 = vst [vmem:[#allocation40_spill] sm:$0xff] %v10512_v0  ;;  %v3994_v12 = vsel %vm653_vm4, %v3991_v33, %v3993_v25  ;;  %v4650_v51 = vrot.slane %v10524_v20, 6  ;;  %v10536_v33 = vld [vmem:[%s12086_s0 + $0x110] sm:$0xff] }
 0x5cc   :  { %v10514_v40 = vadd.f32 %v3739_v3, %v3599_v1  ;;  %v4436_v3 = vsel %vm196_vm0, %v4433_v59, %v4435_v10  ;;  %12338 = vst [vmem:[#allocation7_spill] sm:$0xff] %v10536_v33 }
 0x5cd   :  { %v10489_v48 = vpop.f32.mrf.mxu1  ;;  %v4651_v1 = vsel %vm1309_vm5, %v4648_v5, %v4650_v51 }
 0x5ce   :  { %12336 = vst [vmem:[#allocation8_spill] sm:$0xff] %v10514_v40  ;;  %v3995_v40 = vrot.slane %v10536_v33, 3  ;;  %v4653_v33 = vsel %vm1309_vm5, %v4650_v51, %v4652_v21  ;;  %v4654_v51 = vrot.slane %v9911_v46, 6 }
 0x5d0   :  { %7204 = vmatmul.msk.f32.gmra.mxu1 %vm147_vm2, %v3992_v15  ;;  %v4219_v15 = vsel %vm872_vm7, %v4216_v54, %v4218_v41  ;;  %v4220_v54 = vrot.slane %v9911_v46, 4  ;;  %v3996_v36 = vsel %vm653_vm4, %v3993_v25, %v3995_v40 }
 0x5d1   :  { %7238 = vmatmul.msk.f32.gmra.mxu2 %vm147_vm2, %v4219_v15  ;;  %v3742_v15 = vpop.f32.mrf.mxu3 }
 0x5d2   :  { %v4221_v5 = vsel %vm872_vm7, %v4218_v41, %v4220_v54  ;;  %v4222_v41 = vrot.slane %v9948_v6, 4 }
 0x5d3   :  { %7267 = vmatmul.msk.f32.gmra.mxu3 %vm147_vm2, %v4436_v3  ;;  %7295 = vmatmul.msk.f32.gmra.mxu0 %vm147_vm2, %v4651_v1  ;;  %v3602_v0 = vpop.f32.mrf.mxu2  ;;  %v4438_v1 = vsel %vm196_vm0, %v4435_v10, %v4437_v60 }
 0x5d4   :  { %v10540_v59 = vadd.f32 %v3742_v15, %v3602_v0  ;;  %v3997_v0 = vrot.slane %v10496_v24, 3  ;;  %v4223_v52 = vsel %vm872_vm7, %v4220_v54, %v4222_v41  ;;  %v4655_v24 = vsel %vm1309_vm5, %v4652_v21, %v4654_v51 }
 0x5d5   :  { %v10517_v39 = vpop.f32.mrf.mxu1  ;;  %v4224_v54 = vrot.slane %v9994_v47, 4 }
 0x5d6   :  { %12339 = vst [vmem:[#allocation23_spill] sm:$0xff] %v10540_v59  ;;  %v3998_v10 = vsel %vm653_vm4, %v3995_v40, %v3997_v0  ;;  %v3999_v40 = vrot.slane %v10524_v20, 3 }
 0x5d8   :  { %7205 = vmatmul.msk.f32.gmra.mxu1 %vm147_vm2, %v3994_v12  ;;  %v10543_v12 = vpop.f32.mrf.mxu0  ;;  %v4000_v21 = vsel %vm653_vm4, %v3997_v0, %v3999_v40 }
 0x5d9   :  { %7239 = vmatmul.msk.f32.gmra.mxu2 %vm147_vm2, %v4221_v5  ;;  %v3745_v25 = vpop.f32.mrf.mxu3 }
 0x5db   :  { %7268 = vmatmul.msk.f32.gmra.mxu3 %vm147_vm2, %v4438_v1  ;;  %7296 = vmatmul.msk.f32.gmra.mxu0 %vm147_vm2, %v4653_v33  ;;  %v3605_v15 = vpop.f32.mrf.mxu2 }
 0x5dc   :  { %v10558_v59 = vadd.f32 %v3745_v25, %v3605_v15 }
 0x5dd   :  { %v10545_v3 = vpop.f32.mrf.mxu1 }
 0x5de   :  { %12340 = vst [vmem:[#allocation6_spill] sm:$0xff] %v10558_v59 }
 0x5e0   :  { %7206 = vmatmul.msk.f32.gmra.mxu1 %vm147_vm2, %v3996_v36  ;;  %v4439_v36 = vrot.slane %v9948_v6, 5  ;;  %v10566_v1 = vpop.f32.mrf.mxu0 }
 0x5e1   :  { %7240 = vmatmul.msk.f32.gmra.mxu2 %vm147_vm2, %v4223_v52  ;;  %v3748_v25 = vpop.f32.mrf.mxu3  ;;  %v4225_v52 = vsel %vm872_vm7, %v4222_v41, %v4224_v54  ;;  %v4226_v41 = vrot.slane %v10037_v2, 4 }
 0x5e2   :  { %v4440_v33 = vsel %vm196_vm0, %v4437_v60, %v4439_v36  ;;  %v4441_v60 = vrot.slane %v9994_v47, 5 }
 0x5e3   :  { %7269 = vmatmul.msk.f32.gmra.mxu3 %vm147_vm2, %v4440_v33  ;;  %7297 = vmatmul.msk.f32.gmra.mxu0 %vm147_vm2, %v4655_v24  ;;  %v3608_v46 = vpop.f32.mrf.mxu2 }
 0x5e4   :  { %v10576_v15 = vadd.f32 %v3748_v25, %v3608_v46  ;;  %v4442_v24 = vsel %vm196_vm0, %v4439_v36, %v4441_v60  ;;  %v4227_v25 = vsel %vm872_vm7, %v4224_v54, %v4226_v41  ;;  %v4228_v54 = vrot.slane %v10061_v38, 4 }
 0x5e5   :  { %v10561_v5 = vpop.f32.mrf.mxu1 }
 0x5e6   :  { %12341 = vst [vmem:[#allocation19_spill] sm:$0xff] %v10576_v15 }
 0x5e8   :  { %7207 = vmatmul.msk.f32.gmra.mxu1 %vm147_vm2, %v3998_v10  ;;  %v4656_v10 = vrot.slane %v9948_v6, 6  ;;  %v10593_v6 = vpop.f32.mrf.mxu0 }
 0x5e9   :  { %7241 = vmatmul.msk.f32.gmra.mxu2 %vm147_vm2, %v4225_v52  ;;  %v3751_v0 = vpop.f32.mrf.mxu3 }
 0x5ea   :  { %v4657_v20 = vsel %vm1309_vm5, %v4654_v51, %v4656_v10 }
 0x5eb   :  { %7270 = vmatmul.msk.f32.gmra.mxu3 %vm147_vm2, %v4442_v24  ;;  %7298 = vmatmul.msk.f32.gmra.mxu0 %vm147_vm2, %v4657_v20  ;;  %v3611_v36 = vpop.f32.mrf.mxu2 }
 0x5ec   :  { %v10602_v51 = vadd.f32 %v3751_v0, %v3611_v36 }
 0x5ed   :  { %v3337_v59 = vpop.f32.mrf.mxu1 }
 0x5ee   :  { %v3355_v33 = vmax.f32 %v10443_v32, %v3337_v59  ;;  %v10598_v32 = vld [vmem:[%s12086_s0 + $0x128] sm:$0xff]  ;;  %12342 = vst [vmem:[#allocation5_spill] sm:$0xff] %v10602_v51 }
 0x5ef   :  { %v4001_v59 = vrot.slane %v10598_v32, 3 }
 0x5f0   :  { %3362 = vst.msk [vmem:[%s12096_s11] sm:$0xff] %vm3361_vm11, %v3355_v33  ;;  %7208 = vmatmul.msk.f32.gmra.mxu1 %vm147_vm2, %v4000_v21  ;;  %v4443_v21 = vrot.slane %v10037_v2, 5  ;;  %v4658_v33 = vrot.slane %v9994_v47, 6  ;;  %v10626_v0 = vpop.f32.mrf.mxu0 }
 0x5f1   :  { %v4002_v52 = vsel %vm653_vm4, %v3999_v40, %v4001_v59  ;;  %7242 = vmatmul.msk.f32.gmra.mxu2 %vm147_vm2, %v4227_v25  ;;  %v4229_v25 = vsel %vm872_vm7, %v4226_v41, %v4228_v54  ;;  %v10647_v41 = vld [vmem:[%s12086_s0 + $0x138] sm:$0xff] }
 0x5f2   :  { %v4444_v15 = vsel %vm196_vm0, %v4441_v60, %v4443_v21  ;;  %v4659_v20 = vsel %vm1309_vm5, %v4656_v10, %v4658_v33  ;;  %v3754_v60 = vpop.f32.mrf.mxu3 }
 0x5f3   :  { %7271 = vmatmul.msk.f32.gmra.mxu3 %vm147_vm2, %v4444_v15  ;;  %7299 = vmatmul.msk.f32.gmra.mxu0 %vm147_vm2, %v4659_v20  ;;  %v3614_v10 = vpop.f32.mrf.mxu2 }
 0x5f4   :  { %v10628_v36 = vadd.f32 %v3754_v60, %v3614_v10 }
 0x5f5   :  { %v3340_v46 = vpop.f32.mrf.mxu1 }
 0x5f6   :  { %v3356_v24 = vmax.f32 %v10466_v14, %v3340_v46  ;;  %v10622_v14 = vld [vmem:[%s12086_s0 + $0x130] sm:$0xff] }
 0x5f7   :  { %12343 = vst [vmem:[#allocation17_spill] sm:$0xff] %v10622_v14  ;;  %v4003_v40 = vrot.slane %v10622_v14, 3 }
 0x5f8   :  { %3363 = vst.msk [vmem:[%s12096_s11 + $0x8] sm:$0xff] %vm3361_vm11, %v3356_v24  ;;  %7209 = vmatmul.msk.f32.gmra.mxu1 %vm147_vm2, %v4002_v52  ;;  %v4445_v52 = vrot.slane %v10061_v38, 5  ;;  %v4660_v24 = vrot.slane %v10037_v2, 6 }
 0x5f9   :  { %v4004_v46 = vsel %vm653_vm4, %v4001_v59, %v4003_v40  ;;  %7243 = vmatmul.msk.f32.gmra.mxu2 %vm147_vm2, %v4229_v25  ;;  %v4447_v25 = vrot.slane %v10080_v53, 5 }
 0x5fa   :  { %v4446_v20 = vsel %vm196_vm0, %v4443_v21, %v4445_v52  ;;  %v4661_v14 = vsel %vm1309_vm5, %v4658_v33, %v4660_v24  ;;  %v4230_v21 = vrot.slane %v10080_v53, 4  ;;  %v10654_v33 = vpop.f32.mrf.mxu0 }
 0x5fb   :  { %7272 = vmatmul.msk.f32.gmra.mxu3 %vm147_vm2, %v4446_v20  ;;  %7300 = vmatmul.msk.f32.gmra.mxu0 %vm147_vm2, %v4661_v14  ;;  %v10651_v59 = vpop.f32.mrf.mxu2  ;;  %v4448_v14 = vsel %vm196_vm0, %v4445_v52, %v4447_v25 }
 0x5fc   :  { %v4231_v10 = vsel %vm872_vm7, %v4228_v54, %v4230_v21  ;;  %v4007_v54 = vrot.slane %v9994_v47, 3 }
 0x5fd   :  { %v3343_v15 = vpop.f32.mrf.mxu1 }
 0x5fe   :  { %v3357_v51 = vmax.f32 %v10489_v48, %v3343_v15  ;;  %v4005_v48 = vrot.slane %v10647_v41, 3  ;;  %v4662_v15 = vrot.slane %v10061_v38, 6 }
 0x600   :  { %3364 = vst.msk [vmem:[%s12096_s11 + $0x10] sm:$0xff] %vm3361_vm11, %v3357_v51  ;;  %7210 = vmatmul.msk.f32.gmra.mxu1 %vm147_vm2, %v4004_v46  ;;  %v4006_v60 = vsel %vm653_vm4, %v4003_v40, %v4005_v48  ;;  %v4663_v20 = vsel %vm1309_vm5, %v4660_v24, %v4662_v15  ;;  %v4232_v40 = vrot.slane %v10105_v18, 4  ;;  %v4008_v24 = vsel %vm653_vm4, %v4005_v48, %v4007_v54 }
 0x601   :  { %7244 = vmatmul.msk.f32.gmra.mxu2 %vm147_vm2, %v4231_v10  ;;  %v4449_v10 = vrot.slane %v10105_v18, 5  ;;  %v4009_v48 = vrot.slane %v10037_v2, 3 }
 0x603   :  { %7273 = vmatmul.msk.f32.gmra.mxu3 %vm147_vm2, %v4448_v14  ;;  %7301 = vmatmul.msk.f32.gmra.mxu0 %vm147_vm2, %v4663_v20  ;;  %v10680_v14 = vpop.f32.mrf.mxu0  ;;  %v4450_v47 = vsel %vm196_vm0, %v4447_v25, %v4449_v10 }
 0x605   :  { %v3346_v51 = vpop.f32.mrf.mxu1 }
 0x606   :  { %v3358_v46 = vmax.f32 %v10517_v39, %v3346_v51  ;;  %v10672_v39 = vpop.f32.mrf.mxu2  ;;  %v4233_v51 = vsel %vm872_vm7, %v4230_v21, %v4232_v40  ;;  %v4234_v21 = vrot.slane %v10124_v31, 4 }
 0x608   :  { %3365 = vst.msk [vmem:[%s12096_s11 + $0x18] sm:$0xff] %vm3361_vm11, %v3358_v46  ;;  %7211 = vmatmul.msk.f32.gmra.mxu1 %vm147_vm2, %v4006_v60  ;;  %v4664_v46 = vrot.slane %v10080_v53, 6 }
 0x609   :  { %7245 = vmatmul.msk.f32.gmra.mxu2 %vm147_vm2, %v4233_v51  ;;  %v4451_v51 = vrot.slane %v10124_v31, 5 }
 0x60a   :  { %v4665_v20 = vsel %vm1309_vm5, %v4662_v15, %v4664_v46  ;;  %v4010_v15 = vsel %vm653_vm4, %v4007_v54, %v4009_v48 }
 0x60b   :  { %7274 = vmatmul.msk.f32.gmra.mxu3 %vm147_vm2, %v4450_v47  ;;  %7302 = vmatmul.msk.f32.gmra.mxu0 %vm147_vm2, %v4665_v20  ;;  %v4452_v2 = vsel %vm196_vm0, %v4449_v10, %v4451_v51  ;;  %v10710_v54 = vpop.f32.mrf.mxu0  ;;  %v4236_v10 = vrot.slane %v10143_v43, 4 }
 0x60d   :  { %v3349_v52 = vpop.f32.mrf.mxu1 }
 0x60e   :  { %v3359_v60 = vmax.f32 %v10545_v3, %v3349_v52  ;;  %v10693_v3 = vpop.f32.mrf.mxu2  ;;  %v4235_v52 = vsel %vm872_vm7, %v4232_v40, %v4234_v21  ;;  %v4011_v40 = vrot.slane %v10061_v38, 3  ;;  %v7341_v38 = vld [vmem:[%s12085_s1 + $0x118] sm:$0x7] }
 0x60f   :  { %7342 = vmatpush.msk.msra.mxu2 %vm196_vm0, %v7341_v38 }
 0x610   :  { %3366 = vst.msk [vmem:[%s12096_s11 + $0x20] sm:$0xff] %vm3361_vm11, %v3359_v60  ;;  %7212 = vmatmul.msk.f32.gmra.mxu1 %vm147_vm2, %v4008_v24  ;;  %v4666_v24 = vrot.slane %v10105_v18, 6 }
 0x611   :  { %7246 = vmatmul.msk.f32.gmra.mxu2 %vm147_vm2, %v4235_v52  ;;  %v4453_v52 = vrot.slane %v10143_v43, 5 }
 0x612   :  { %v4667_v47 = vsel %vm1309_vm5, %v4664_v46, %v4666_v24  ;;  %v3950_v46 = vadd.f32 %v10151_v63, %v10088_v28 }
 0x613   :  { %7275 = vmatmul.msk.f32.gmra.mxu3 %vm147_vm2, %v4452_v2  ;;  %7303 = vmatmul.msk.f32.gmra.mxu0 %vm147_vm2, %v4667_v47  ;;  %v4454_v47 = vsel %vm196_vm0, %v4451_v51, %v4453_v52  ;;  %v7312_v51 = vld [vmem:[%s12085_s1 + $0xf8] sm:$0x7] }
 0x614   :  { %7313 = vmatpush.msk.msra.mxu1 %vm196_vm0, %v7312_v51 }
 0x615   :  { %v3352_v25 = vpop.f32.mrf.mxu1 }
 0x616   :  { %v3360_v60 = vmax.f32 %v10561_v5, %v3352_v25  ;;  %v10714_v5 = vpop.f32.mrf.mxu2  ;;  %v4012_v25 = vsel %vm653_vm4, %v4009_v48, %v4011_v40  ;;  %v4013_v48 = vrot.slane %v10080_v53, 3 }
 0x618   :  { %3368 = vst.msk [vmem:[%s12096_s11 + $0x28] sm:$0xf] %vm3367_vm12, %v3360_v60  ;;  %7213 = vmatmul.msk.f32.gmra.mxu1 %vm147_vm2, %v4010_v15  ;;  %v4237_v15 = vsel %vm872_vm7, %v4234_v21, %v4236_v10  ;;  %v4668_v60 = vrot.slane %v10124_v31, 6 }
 0x619   :  { %7247 = vmatmul.msk.f32.gmra.mxu2 %vm147_vm2, %v4237_v15  ;;  %v4455_v15 = vrot.slane %v10168_v19, 5 }
 0x61a   :  { %v4669_v28 = vsel %vm1309_vm5, %v4666_v24, %v4668_v60  ;;  %v10742_v24 = vpop.f32.mrf.mxu0 }
 0x61b   :  { %7276 = vmatmul.msk.f32.gmra.mxu3 %vm147_vm2, %v4454_v47  ;;  %7304 = vmatmul.msk.f32.gmra.mxu0 %vm147_vm2, %v4669_v28  ;;  %v4456_v47 = vsel %vm196_vm0, %v4453_v52, %v4455_v15 }
 0x61d   :  { %v4095_v20 = vpop.f32.mrf.mxu1 }
 0x61e   :  { %v4167_v2 = vadd.f32 %v4095_v20, %v3950_v46  ;;  %v10737_v21 = vpop.f32.mrf.mxu2  ;;  %v3951_v46 = vadd.f32 %v10179_v27, %v10109_v17  ;;  %v4014_v20 = vsel %vm653_vm4, %v4011_v40, %v4013_v48  ;;  %v4015_v17 = vrot.slane %v10105_v18, 3 }
 0x61f   :  { %v4240_v40 = vrot.slane %v10189_v23, 4  ;;  %v4457_v18 = vrot.slane %v10189_v23, 5 }
 0x620   :  { %v10730_v63 = vadd.f32 %v10651_v59, %v4167_v2  ;;  %7214 = vmatmul.msk.f32.gmra.mxu1 %vm147_vm2, %v4012_v25  ;;  %v4238_v59 = vrot.slane %v10168_v19, 4  ;;  %v4670_v2 = vrot.slane %v10143_v43, 6 }
 0x622   :  { %12344 = vst [vmem:[#allocation60_spill] sm:$0xff] %v10730_v63  ;;  %v4239_v25 = vsel %vm872_vm7, %v4236_v10, %v4238_v59  ;;  %v4671_v28 = vsel %vm1309_vm5, %v4668_v60, %v4670_v2  ;;  %v3952_v10 = vadd.f32 %v10203_v62, %v10128_v34  ;;  %v10767_v52 = vpop.f32.mrf.mxu0  ;;  %v4017_v62 = vrot.slane %v10124_v31, 3 }
 0x623   :  { %7248 = vmatmul.msk.f32.gmra.mxu2 %vm147_vm2, %v4239_v25  ;;  %7277 = vmatmul.msk.f32.gmra.mxu3 %vm147_vm2, %v4456_v47  ;;  %v4458_v25 = vsel %vm196_vm0, %v4455_v15, %v4457_v18  ;;  %v3953_v47 = vadd.f32 %v10244_v13, %v10153_v8  ;;  %v7340_v13 = vld [vmem:[%s12085_s1 + $0x110] sm:$0xff] }
 0x624   :  { %7305 = vmatmul.msk.f32.gmra.mxu0 %vm147_vm2, %v4671_v28  ;;  %v4459_v28 = vrot.slane %v10210_v4, 5  ;;  %5081 = vmatpush.msra.mxu2 %v7340_v13  ;;  %v3956_v13 = vadd.f32 %v10340_v58, %v10221_v26 }
 0x625   :  { %v4098_v53 = vpop.f32.mrf.mxu1 }
 0x626   :  { %v4168_v38 = vadd.f32 %v4098_v53, %v3951_v46  ;;  %v10762_v27 = vpop.f32.mrf.mxu2  ;;  %v4241_v46 = vsel %vm872_vm7, %v4238_v59, %v4240_v40  ;;  %v4672_v53 = vrot.slane %v10168_v19, 6  ;;  %v4242_v59 = vrot.slane %v10210_v4, 4 }
 0x628   :  { %v10756_v51 = vadd.f32 %v10672_v39, %v4168_v38  ;;  %7215 = vmatmul.msk.f32.gmra.mxu1 %vm147_vm2, %v4014_v20  ;;  %v4016_v39 = vsel %vm653_vm4, %v4013_v48, %v4015_v17  ;;  %v4673_v38 = vsel %vm1309_vm5, %v4670_v2, %v4672_v53  ;;  %v4018_v2 = vsel %vm653_vm4, %v4015_v17, %v4017_v62 }
 0x629   :  { %v4019_v17 = vrot.slane %v10143_v43, 3  ;;  %v7338_v43 = vld [vmem:[%s12085_s1 + $0x100] sm:$0xff] }
 0x62a   :  { %12345 = vst [vmem:[#allocation61_spill] sm:$0xff] %v10756_v51 }
 0x62b   :  { %7249 = vmatmul.msk.f32.gmra.mxu2 %vm147_vm2, %v4241_v46  ;;  %7278 = vmatmul.msk.f32.gmra.mxu3 %vm147_vm2, %v4458_v25  ;;  %v4020_v25 = vsel %vm653_vm4, %v4017_v62, %v4019_v17  ;;  %v7309_v62 = vld [vmem:[%s12085_s1 + $0xe0] sm:$0xff] }
 0x62c   :  { %7306 = vmatmul.msk.f32.gmra.mxu0 %vm147_vm2, %v4673_v38  ;;  %v4676_v38 = vrot.slane %v10210_v4, 6 }
 0x62d   :  { %v4101_v60 = vpop.f32.mrf.mxu1 }
 0x62e   :  { %v4169_v20 = vadd.f32 %v4101_v60, %v3952_v10  ;;  %v4330_v48 = vpop.f32.mrf.mxu2  ;;  %v4674_v10 = vrot.slane %v10189_v23, 6  ;;  %v10790_v60 = vpop.f32.mrf.mxu0 }
 0x630   :  { %v10777_v34 = vadd.f32 %v10693_v3, %v4169_v20  ;;  %7216 = vmatmul.msk.f32.gmra.mxu1 %vm147_vm2, %v4016_v39  ;;  %v4243_v3 = vsel %vm872_vm7, %v4240_v40, %v4242_v59  ;;  %v4460_v39 = vsel %vm196_vm0, %v4457_v18, %v4459_v28  ;;  %v4675_v46 = vsel %vm1309_vm5, %v4672_v53, %v4674_v10  ;;  %v7339_v18 = vld [vmem:[%s12085_s1 + $0x108] sm:$0xff]  ;;  %v7311_v53 = vld [vmem:[%s12085_s1 + $0xf0] sm:$0xff] }
 0x631   :  { %5082 = vmatpush.msra.mxu2 %v7339_v18  ;;  %4959 = vmatpush.msra.mxu1 %v7311_v53  ;;  %v3955_v28 = vadd.f32 %v10319_v22, %v10193_v30 }
 0x632   :  { %12346 = vst [vmem:[#allocation24_spill] sm:$0xff] %v10777_v34 }
 0x633   :  { %7250 = vmatmul.msk.f32.gmra.mxu2 %vm147_vm2, %v4243_v3  ;;  %7279 = vmatmul.msk.f32.gmra.mxu3 %vm147_vm2, %v4460_v39 }
 0x634   :  { %7307 = vmatmul.msk.f32.gmra.mxu0 %vm147_vm2, %v4675_v46  ;;  %5083 = vmatpush.msra.mxu2 %v7338_v43 }
 0x635   :  { %v4104_v15 = vpop.f32.mrf.mxu1 }
 0x636   :  { %v4170_v31 = vadd.f32 %v4104_v15, %v3953_v47  ;;  %v4333_v40 = vpop.f32.mrf.mxu2  ;;  %v10831_v15 = vpop.f32.mrf.mxu0 }
 0x638   :  { %v10796_v8 = vadd.f32 %v10714_v5, %v4170_v31  ;;  %7217 = vmatmul.msk.f32.gmra.mxu1 %vm147_vm2, %v4018_v2  ;;  %v3954_v5 = vadd.f32 %v10297_v55, %v10172_v37  ;;  %v7310_v37 = vld [vmem:[%s12085_s1 + $0xe8] sm:$0xff]  ;;  %v4677_v55 = vsel %vm1309_vm5, %v4674_v10, %v4676_v38  ;;  %v4021_v2 = vrot.slane %v10168_v19, 3 }
 0x639   :  { %4960 = vmatpush.msra.mxu1 %v7310_v37  ;;  %v4023_v19 = vrot.slane %v10189_v23, 3  ;;  %v3957_v23 = vadd.f32 %v10370_v61, %v10262_v56 }
 0x63b   :  { %7343 = vmatmul.msk.f32.vlgmr.msra.gmra.mxu2 %vm147_vm2, %v10355_v42  ;;  %4961 = vmatpush.msra.mxu1 %v7309_v62  ;;  %v4024_v30 = vsel %vm653_vm4, %v4021_v2, %v4023_v19  ;;  %v4851_v62 = vrot.slane %v10394_v29, 7 }
 0x63c   :  { %7308 = vmatmul.msk.f32.gmra.mxu0 %vm147_vm2, %v4677_v55 }
 0x63d   :  { %v4107_v20 = vpop.f32.mrf.mxu1 }
 0x63e   :  { %v4171_v59 = vadd.f32 %v4107_v20, %v3954_v5  ;;  %v4336_v3 = vpop.f32.mrf.mxu2  ;;  %v4847_v20 = vrot.slane %v10355_v42, 7  ;;  %v3959_v42 = vadd.f32 %v10422_v45, %v10314_v16 }
 0x640   :  { %v10825_v47 = vadd.f32 %v10737_v21, %v4171_v59  ;;  %7218 = vmatmul.msk.f32.gmra.mxu1 %vm147_vm2, %v4020_v25  ;;  %v4022_v21 = vsel %vm653_vm4, %v4019_v17, %v4021_v2  ;;  %v3958_v25 = vadd.f32 %v10398_v9, %v10299_v7 }
 0x643   :  { %7344 = vmatmul.msk.f32.gmra.mxu2 %vm147_vm2, %v10375_v50 }
 0x645   :  { %v4110_v10 = vpop.f32.mrf.mxu1 }
 0x646   :  { %v4172_v31 = vadd.f32 %v4110_v10, %v3955_v28  ;;  %v4339_v46 = vpop.f32.mrf.mxu2  ;;  %v12348_v10 = vld [vmem:[#allocation33_spill] sm:$0xff] }
 0x648   :  { %v10841_v39 = vadd.f32 %v10762_v27, %v4172_v31  ;;  %7219 = vmatmul.msk.f32.gmra.mxu1 %vm147_vm2, %v4022_v21  ;;  %v4025_v27 = vrot.slane %v10210_v4, 3  ;;  %v4853_v31 = vrot.slane %v10415_v35, 7 }
 0x64a   :  { %v4026_v26 = vsel %vm653_vm4, %v4023_v19, %v4025_v27 }
 0x64b   :  { %7345 = vmatmul.msk.f32.gmra.mxu2 %vm147_vm2, %v10394_v29  ;;  %v12350_v29 = vld [vmem:[#allocation10_spill] sm:$0xff] }
 0x64d   :  { %v4113_v18 = vpop.f32.mrf.mxu1 }
 0x64e   :  { %v4173_v22 = vadd.f32 %v4113_v18, %v3956_v13  ;;  %v4342_v5 = vpop.f32.mrf.mxu2 }
 0x650   :  { %v10850_v17 = vadd.f32 %v4330_v48, %v4173_v22  ;;  %7220 = vmatmul.msk.f32.gmra.mxu1 %vm147_vm2, %v4024_v30  ;;  %v4846_v48 = vrot.slane %v10349_v11, 7  ;;  %v12351_v22 = vld [vmem:[#allocation12_spill] sm:$0xff] }
 0x652   :  { %v4848_v61 = vsel %vm1528_vm6, %v4846_v48, %v4847_v20 }
 0x653   :  { %7346 = vmatmul.msk.f32.gmra.mxu2 %vm147_vm2, %v10415_v35  ;;  %v12353_v35 = vld [vmem:[#allocation40_spill] sm:$0xff] }
 0x655   :  { %v4116_v53 = vpop.f32.mrf.mxu1 }
 0x656   :  { %v4174_v58 = vadd.f32 %v4116_v53, %v3957_v23  ;;  %v4345_v4 = vpop.f32.mrf.mxu2  ;;  %v12352_v53 = vld [vmem:[#allocation48_spill] sm:$0xff] }
 0x658   :  { %v10859_v43 = vadd.f32 %v4333_v40, %v4174_v58  ;;  %7221 = vmatmul.msk.f32.gmra.mxu1 %vm147_vm2, %v4026_v26  ;;  %v4849_v40 = vrot.slane %v10375_v50, 7  ;;  %v12347_v50 = vld [vmem:[#allocation11_spill] sm:$0xff]  ;;  %v3962_v26 = vadd.f32 %v12353_v35, %v12352_v53  ;;  %v12361_v35 = vld [vmem:[#allocation17_spill] sm:$0xff] }
 0x65a   :  { %v4850_v7 = vsel %vm1528_vm6, %v4847_v20, %v4849_v40  ;;  %v4852_v16 = vsel %vm1528_vm6, %v4849_v40, %v4851_v62 }
 0x65b   :  { %7347 = vmatmul.msk.f32.gmra.mxu2 %vm147_vm2, %v10436_v44 }
 0x65d   :  { %v4119_v56 = vpop.f32.mrf.mxu1 }
 0x65e   :  { %v4175_v38 = vadd.f32 %v4119_v56, %v3958_v25  ;;  %v4348_v11 = vpop.f32.mrf.mxu2  ;;  %v12354_v25 = vld [vmem:[#allocation7_spill] sm:$0xff] }
 0x660   :  { %v10869_v59 = vadd.f32 %v4336_v3, %v4175_v38  ;;  %7314 = vmatmul.msk.f32.vlgmr.msra.gmra.mxu1 %vm147_vm2, %v4848_v61  ;;  %v3960_v3 = vadd.f32 %v12347_v50, %v10331_v49  ;;  %v4854_v49 = vsel %vm1528_vm6, %v4851_v62, %v4853_v31  ;;  %v12355_v38 = vld [vmem:[#allocation21_spill] sm:$0xff] }
 0x661   :  { %v12357_v50 = vld [vmem:[#allocation45_spill] sm:$0xff] }
 0x663   :  { %7348 = vmatmul.msk.f32.gmra.mxu2 %vm147_vm2, %v10459_v57 }
 0x665   :  { %v4122_v37 = vpop.f32.mrf.mxu1 }
 0x666   :  { %v4176_v9 = vadd.f32 %v4122_v37, %v3959_v42  ;;  %v4351_v2 = vpop.f32.mrf.mxu2 }
 0x668   :  { %v10878_v55 = vadd.f32 %v4339_v46, %v4176_v9  ;;  %7315 = vmatmul.msk.f32.gmra.mxu1 %vm147_vm2, %v4850_v7  ;;  %v12349_v46 = vld [vmem:[#allocation25_spill] sm:$0xff] }
 0x669   :  { %v3961_v13 = vadd.f32 %v12350_v29, %v12349_v46  ;;  %v12356_v7 = vld [vmem:[#allocation29_spill] sm:$0xff]  ;;  %v12359_v46 = vld [vmem:[#allocation43_spill] sm:$0xff] }
 0x66b   :  { %7349 = vmatmul.msk.f32.gmra.mxu2 %vm147_vm2, %v12348_v10 }
 0x66d   :  { %v4125_v28 = vpop.f32.mrf.mxu1 }
 0x66e   :  { %v4177_v45 = vadd.f32 %v4125_v28, %v3960_v3  ;;  %v4354_v19 = vpop.f32.mrf.mxu2 }
 0x670   :  { %v10887_v21 = vadd.f32 %v4342_v5, %v4177_v45  ;;  %7316 = vmatmul.msk.f32.gmra.mxu1 %vm147_vm2, %v4852_v16  ;;  %v4855_v5 = vrot.slane %v10436_v44, 7  ;;  %v3963_v44 = vadd.f32 %v10543_v12, %v12355_v38  ;;  %v12358_v16 = vld [vmem:[#allocation26_spill] sm:$0xff]  ;;  %v10948_v38 = vpop.f32.mrf.mxu3 }
 0x671   :  { %12364 = vst [vmem:[#allocation4_spill] sm:$0xff] %v10948_v38 }
 0x672   :  { %v4856_v48 = vsel %vm1528_vm6, %v4853_v31, %v4855_v5 }
 0x673   :  { %7350 = vmatmul.msk.f32.gmra.mxu2 %vm147_vm2, %v12351_v22 }
 0x675   :  { %v4128_v18 = vpop.f32.mrf.mxu1 }
 0x676   :  { %v4178_v30 = vadd.f32 %v4128_v18, %v3961_v13  ;;  %v4357_v23 = vpop.f32.mrf.mxu2 }
 0x678   :  { %v10896_v27 = vadd.f32 %v4345_v4, %v4178_v30  ;;  %7317 = vmatmul.msk.f32.gmra.mxu1 %vm147_vm2, %v4854_v49  ;;  %v4857_v4 = vrot.slane %v10459_v57, 7  ;;  %v3964_v57 = vadd.f32 %v10566_v1, %v12357_v50  ;;  %v12360_v30 = vld [vmem:[#allocation36_spill] sm:$0xff] }
 0x67a   :  { %v4858_v42 = vsel %vm1528_vm6, %v4855_v5, %v4857_v4 }
 0x67b   :  { %7351 = vmatmul.msk.f32.gmra.mxu2 %vm147_vm2, %v12354_v25 }
 0x67d   :  { %v4131_v58 = vpop.f32.mrf.mxu1 }
 0x67e   :  { %v4179_v20 = vadd.f32 %v4131_v58, %v3962_v26  ;;  %v4360_v61 = vpop.f32.mrf.mxu2 }
 0x680   :  { %v10905_v56 = vadd.f32 %v4348_v11, %v4179_v20  ;;  %7318 = vmatmul.msk.f32.gmra.mxu1 %vm147_vm2, %v4856_v48  ;;  %v4859_v11 = vrot.slane %v12348_v10, 7  ;;  %v3965_v10 = vadd.f32 %v10593_v6, %v12359_v46  ;;  %v12363_v48 = vld [vmem:[#allocation9_spill] sm:$0xff] }
 0x681   :  { %v3967_v20 = vadd.f32 %v10654_v33, %v12363_v48 }
 0x682   :  { %v4860_v12 = vsel %vm1528_vm6, %v4857_v4, %v4859_v11 }
 0x683   :  { %7352 = vmatmul.msk.f32.gmra.mxu2 %vm147_vm2, %v12356_v7 }
 0x685   :  { %v4134_v40 = vpop.f32.mrf.mxu1 }
 0x686   :  { %v4180_v37 = vadd.f32 %v4134_v40, %v3963_v44  ;;  %v4363_v62 = vpop.f32.mrf.mxu2 }
 0x688   :  { %v10914_v9 = vadd.f32 %v4351_v2, %v4180_v37  ;;  %7319 = vmatmul.msk.f32.gmra.mxu1 %vm147_vm2, %v4858_v42  ;;  %v4861_v2 = vrot.slane %v12351_v22, 7  ;;  %v3966_v22 = vadd.f32 %v10626_v0, %v12360_v30  ;;  %v10956_v42 = vpop.f32.mrf.mxu0  ;;  %v12367_v37 = vld [vmem:[#allocation8_spill] sm:$0xff] }
 0x689   :  { %12366 = vst [vmem:[#allocation28_spill] sm:$0xff] %v10956_v42  ;;  %v3968_v33 = vadd.f32 %v10680_v14, %v12367_v37  ;;  %v12370_v14 = vld [vmem:[#allocation23_spill] sm:$0xff] }
 0x68a   :  { %v4862_v1 = vsel %vm1528_vm6, %v4859_v11, %v4861_v2 }
 0x68b   :  { %7353 = vmatmul.msk.f32.gmra.mxu2 %vm147_vm2, %v12358_v16 }
 0x68d   :  { %v4137_v3 = vpop.f32.mrf.mxu1 }
 0x68e   :  { %v4181_v28 = vadd.f32 %v4137_v3, %v3964_v57  ;;  %v4366_v31 = vpop.f32.mrf.mxu2  ;;  %v7575_v57 = vld [vmem:[%s12086_s0 + $0x140] sm:$0xff]  ;;  %v10968_v3 = vpop.f32.mrf.mxu3 }
 0x68f   :  { %12369 = vst [vmem:[#allocation16_spill] sm:$0xff] %v10968_v3 }
 0x690   :  { %v10923_v45 = vadd.f32 %v4354_v19, %v4181_v28  ;;  %7320 = vmatmul.msk.f32.gmra.mxu1 %vm147_vm2, %v4860_v12  ;;  %v4863_v19 = vrot.slane %v12354_v25, 7  ;;  %v4869_v12 = vrot.slane %v10598_v32, 7 }
 0x692   :  { %v4864_v6 = vsel %vm1528_vm6, %v4861_v2, %v4863_v19  ;;  %v10973_v2 = vpop.f32.mrf.mxu0 }
 0x693   :  { %7354 = vmatmul.msk.f32.gmra.mxu2 %vm147_vm2, %v10598_v32  ;;  %12371 = vst [vmem:[#allocation58_spill] sm:$0xff] %v10973_v2  ;;  %v4871_v32 = vrot.slane %v12361_v35, 7 }
 0x695   :  { %v4140_v29 = vpop.f32.mrf.mxu1 }
 0x696   :  { %v4182_v13 = vadd.f32 %v4140_v29, %v3965_v10  ;;  %v4369_v49 = vpop.f32.mrf.mxu2 }
 0x698   :  { %v10932_v18 = vadd.f32 %v4357_v23, %v4182_v13  ;;  %7321 = vmatmul.msk.f32.gmra.mxu1 %vm147_vm2, %v4862_v1  ;;  %v4865_v23 = vrot.slane %v12356_v7, 7 }
 0x69a   :  { %v4866_v0 = vsel %vm1528_vm6, %v4863_v19, %v4865_v23  ;;  %v12374_v19 = vld [vmem:[#allocation6_spill] sm:$0xff] }
 0x69b   :  { %7355 = vmatmul.msk.f32.gmra.mxu2 %vm147_vm2, %v12361_v35  ;;  %v3970_v30 = vadd.f32 %v10742_v24, %v12374_v19  ;;  %v4873_v35 = vrot.slane %v10647_v41, 7  ;;  %v12378_v24 = vld [vmem:[#allocation19_spill] sm:$0xff] }
 0x69d   :  { %v4143_v5 = vpop.f32.mrf.mxu1 }
 0x69e   :  { %v4183_v53 = vadd.f32 %v4143_v5, %v3966_v22  ;;  %v4372_v58 = vpop.f32.mrf.mxu2  ;;  %v4872_v5 = vsel %vm1528_vm6, %v4869_v12, %v4871_v32 }
 0x6a0   :  { %v10941_v26 = vadd.f32 %v4360_v61, %v4183_v53  ;;  %7322 = vmatmul.msk.f32.gmra.mxu1 %vm147_vm2, %v4864_v6  ;;  %v4867_v61 = vrot.slane %v12358_v16, 7  ;;  %v3969_v16 = vadd.f32 %v10710_v54, %v12370_v14  ;;  %v10984_v54 = vpop.f32.mrf.mxu3  ;;  %v10989_v53 = vpop.f32.mrf.mxu0 }
 0x6a1   :  { %12373 = vst [vmem:[#allocation18_spill] sm:$0xff] %v10984_v54 }
 0x6a2   :  { %12362 = vst [vmem:[#allocation30_spill] sm:$0xff] %v10941_v26  ;;  %v4868_v11 = vsel %vm1528_vm6, %v4865_v23, %v4867_v61  ;;  %v4870_v10 = vsel %vm1528_vm6, %v4867_v61, %v4869_v12 }
 0x6a3   :  { %7356 = vmatmul.msk.f32.gmra.mxu2 %vm147_vm2, %v10647_v41  ;;  %12375 = vst [vmem:[#allocation50_spill] sm:$0xff] %v10989_v53 }
 0x6a5   :  { %v4146_v25 = vpop.f32.mrf.mxu1 }
 0x6a6   :  { %v4184_v4 = vadd.f32 %v4146_v25, %v3967_v20  ;;  %v4375_v40 = vpop.f32.mrf.mxu2  ;;  %v3971_v20 = vadd.f32 %v10767_v52, %v12378_v24  ;;  %v7581_v24 = vld [vmem:[%s12086_s0 + $0x170] sm:$0xff] }
 0x6a8   :  { %v10952_v44 = vadd.f32 %v4363_v62, %v4184_v4  ;;  %7323 = vmatmul.msk.f32.gmra.mxu1 %vm147_vm2, %v4866_v0  ;;  %v11003_v25 = vpop.f32.mrf.mxu3  ;;  %v4874_v4 = vsel %vm1528_vm6, %v4871_v32, %v4873_v35  ;;  %v11013_v41 = vpop.f32.mrf.mxu0 }
 0x6a9   :  { %12380 = vst [vmem:[#allocation52_spill] sm:$0xff] %v11013_v41 }
 0x6aa   :  { %12365 = vst [vmem:[#allocation49_spill] sm:$0xff] %v10952_v44 }
 0x6ab   :  { %7357 = vmatmul.msk.f32.gmra.mxu2 %vm147_vm2, %v7575_v57 }
 0x6ad   :  { %v4149_v7 = vpop.f32.mrf.mxu1 }
 0x6ae   :  { %v4185_v50 = vadd.f32 %v4149_v7, %v3968_v33  ;;  %v4378_v28 = vpop.f32.mrf.mxu2  ;;  %v4875_v33 = vrot.slane %v7575_v57, 7  ;;  %v12382_v7 = vld [vmem:[#allocation5_spill] sm:$0xff] }
 0x6b0   :  { %v10965_v62 = vadd.f32 %v4366_v31, %v4185_v50  ;;  %7324 = vmatmul.msk.f32.gmra.mxu1 %vm147_vm2, %v4868_v11  ;;  %v7576_v31 = vld [vmem:[%s12086_s0 + $0x148] sm:$0xff]  ;;  %v3972_v11 = vadd.f32 %v10790_v60, %v12382_v7  ;;  %v4876_v12 = vsel %vm1528_vm6, %v4873_v35, %v4875_v33  ;;  %v11031_v60 = vpop.f32.mrf.mxu0 }
 0x6b1   :  { %v4877_v57 = vrot.slane %v7576_v31, 7  ;;  %12385 = vst [vmem:[#allocation2_spill] sm:$0xff] %v11031_v60 }
 0x6b2   :  { %12368 = vst [vmem:[#allocation34_spill] sm:$0xff] %v10965_v62 }
 0x6b3   :  { %7358 = vmatmul.msk.f32.gmra.mxu2 %vm147_vm2, %v7576_v31  ;;  %v4878_v19 = vsel %vm1528_vm6, %v4875_v33, %v4877_v57  ;;  %v7582_v33 = vld [vmem:[%s12086_s0 + $0x178] sm:$0xff] }
 0x6b4   :  { %v4889_v26 = vrot.slane %v7582_v33, 7 }
 0x6b5   :  { %v4152_v46 = vpop.f32.mrf.mxu1 }
 0x6b6   :  { %v4186_v29 = vadd.f32 %v4152_v46, %v3969_v16  ;;  %v4381_v13 = vpop.f32.mrf.mxu2  ;;  %v11020_v16 = vpop.f32.mrf.mxu3 }
 0x6b8   :  { %v10980_v1 = vadd.f32 %v4369_v49, %v4186_v29  ;;  %7325 = vmatmul.msk.f32.gmra.mxu1 %vm147_vm2, %v4870_v10  ;;  %v7577_v49 = vld [vmem:[%s12086_s0 + $0x150] sm:$0xff]  ;;  %v3973_v29 = vadd.f32 %v10831_v15, %v10628_v36  ;;  %v11047_v36 = vpop.f32.mrf.mxu0 }
 0x6ba   :  { %12372 = vst [vmem:[#allocation42_spill] sm:$0xff] %v10980_v1 }
 0x6bb   :  { %7359 = vmatmul.msk.f32.gmra.mxu2 %vm147_vm2, %v7577_v49 }
 0x6bd   :  { %v4155_v22 = vpop.f32.mrf.mxu1 }
 0x6be   :  { %v4187_v6 = vadd.f32 %v4155_v22, %v3970_v30  ;;  %v10999_v48 = vpop.f32.mrf.mxu2  ;;  %v7580_v22 = vld [vmem:[%s12086_s0 + $0x168] sm:$0xff]  ;;  %v11043_v31 = vpop.f32.mrf.mxu3 }
 0x6bf   :  { %12377 = vst [vmem:[#allocation46_spill] sm:$0xff] %v10999_v48 }
 0x6c0   :  { %v10995_v23 = vadd.f32 %v4372_v58, %v4187_v6  ;;  %7326 = vmatmul.msk.f32.gmra.mxu1 %vm147_vm2, %v4872_v5  ;;  %v7578_v58 = vld [vmem:[%s12086_s0 + $0x158] sm:$0xff]  ;;  %v4879_v5 = vrot.slane %v7577_v49, 7 }
 0x6c2   :  { %12376 = vst [vmem:[#allocation59_spill] sm:$0xff] %v10995_v23  ;;  %v4880_v35 = vsel %vm1528_vm6, %v4877_v57, %v4879_v5 }
 0x6c3   :  { %7360 = vmatmul.msk.f32.gmra.mxu2 %vm147_vm2, %v7578_v58 }
 0x6c5   :  { %v4158_v0 = vpop.f32.mrf.mxu1 }
 0x6c6   :  { %v4188_v61 = vadd.f32 %v4158_v0, %v3971_v20  ;;  %v11015_v52 = vpop.f32.mrf.mxu2  ;;  %v11059_v49 = vpop.f32.mrf.mxu3 }
 0x6c7   :  { %12381 = vst [vmem:[#allocation57_spill] sm:$0xff] %v11015_v52 }
 0x6c8   :  { %v11010_v37 = vadd.f32 %v4375_v40, %v4188_v61  ;;  %7327 = vmatmul.msk.f32.gmra.mxu1 %vm147_vm2, %v4874_v4  ;;  %v7579_v40 = vld [vmem:[%s12086_s0 + $0x160] sm:$0xff]  ;;  %v11064_v61 = vpop.f32.mrf.mxu0 }
 0x6c9   :  { %v4883_v7 = vrot.slane %v7579_v40, 7 }
 0x6ca   :  { %12379 = vst [vmem:[#allocation22_spill] sm:$0xff] %v11010_v37 }
 0x6cb   :  { %7361 = vmatmul.msk.f32.gmra.mxu2 %vm147_vm2, %v7579_v40 }
 0x6cd   :  { %v4161_v50 = vpop.f32.mrf.mxu1 }
 0x6ce   :  { %v4189_v14 = vadd.f32 %v4161_v50, %v3972_v11  ;;  %v11029_v10 = vpop.f32.mrf.mxu2  ;;  %v11073_v11 = vpop.f32.mrf.mxu3 }
 0x6cf   :  { %12384 = vst [vmem:[#allocation38_spill] sm:$0xff] %v11029_v10 }
 0x6d0   :  { %v11026_v46 = vadd.f32 %v4378_v28, %v4189_v14  ;;  %7328 = vmatmul.msk.f32.gmra.mxu1 %vm147_vm2, %v4876_v12  ;;  %v7583_v14 = vld [vmem:[%s12086_s0 + $0x180] sm:$0xff]  ;;  %v11083_v57 = vpop.f32.mrf.mxu0 }
 0x6d2   :  { %12383 = vst [vmem:[#allocation27_spill] sm:$0xff] %v11026_v46 }
 0x6d3   :  { %7362 = vmatmul.msk.f32.gmra.mxu2 %vm147_vm2, %v7580_v22 }
 0x6d5   :  { %v4164_v32 = vpop.f32.mrf.mxu1 }
 0x6d6   :  { %v4190_v30 = vadd.f32 %v4164_v32, %v3973_v29  ;;  %v11045_v6 = vpop.f32.mrf.mxu2  ;;  %v4885_v29 = vrot.slane %v7580_v22, 7 }
 0x6d7   :  { %12387 = vst [vmem:[#allocation32_spill] sm:$0xff] %v11045_v6 }
 0x6d8   :  { %v11040_v28 = vadd.f32 %v4381_v13, %v4190_v30  ;;  %7329 = vmatmul.msk.f32.gmra.mxu1 %vm147_vm2, %v4878_v19  ;;  %v4881_v13 = vrot.slane %v7578_v58, 7  ;;  %v4886_v19 = vsel %vm1528_vm6, %v4883_v7, %v4885_v29  ;;  %v11090_v30 = vpop.f32.mrf.mxu3  ;;  %v11099_v22 = vpop.f32.mrf.mxu0 }
 0x6da   :  { %12386 = vst [vmem:[#allocation41_spill] sm:$0xff] %v11040_v28  ;;  %v4882_v4 = vsel %vm1528_vm6, %v4879_v5, %v4881_v13  ;;  %v4884_v12 = vsel %vm1528_vm6, %v4881_v13, %v4883_v7  ;;  %v7584_v5 = vld [vmem:[%s12086_s0 + $0x188] sm:$0xff] }
 0x6db   :  { %7363 = vmatmul.msk.f32.gmra.mxu2 %vm147_vm2, %v7581_v24 }
 0x6dd   :  { %v11049_v15 = vpop.f32.mrf.mxu1 }
 0x6de   :  { %12388 = vst [vmem:[#allocation51_spill] sm:$0xff] %v11049_v15  ;;  %v11057_v20 = vpop.f32.mrf.mxu2 }
 0x6df   :  { %12389 = vst [vmem:[#allocation37_spill] sm:$0xff] %v11057_v20 }
 0x6e0   :  { %7330 = vmatmul.msk.f32.gmra.mxu1 %vm147_vm2, %v4880_v35  ;;  %v4887_v35 = vrot.slane %v7581_v24, 7  ;;  %v4556_v7 = vpop.f32.mrf.mxu3  ;;  %v11107_v62 = vpop.f32.mrf.mxu0 }
 0x6e2   :  { %v4890_v24 = vsel %vm1528_vm6, %v4887_v35, %v4889_v26 }
 0x6e3   :  { %7364 = vmatmul.msk.f32.gmra.mxu2 %vm147_vm2, %v7582_v33  ;;  %v4893_v33 = vrot.slane %v7584_v5, 7 }
 0x6e5   :  { %v11061_v0 = vpop.f32.mrf.mxu1 }
 0x6e6   :  { %12390 = vst [vmem:[#allocation15_spill] sm:$0xff] %v11061_v0  ;;  %v11071_v58 = vpop.f32.mrf.mxu2 }
 0x6e7   :  { %12391 = vst [vmem:[#allocation14_spill] sm:$0xff] %v11071_v58 }
 0x6e8   :  { %7331 = vmatmul.msk.f32.gmra.mxu1 %vm147_vm2, %v4882_v4  ;;  %v4559_v23 = vpop.f32.mrf.mxu3 }
 0x6eb   :  { %7365 = vmatmul.msk.f32.gmra.mxu2 %vm147_vm2, %v7583_v14 }
 0x6ed   :  { %v11075_v50 = vpop.f32.mrf.mxu1 }
 0x6ee   :  { %12392 = vst [vmem:[#allocation35_spill] sm:$0xff] %v11075_v50  ;;  %v11085_v40 = vpop.f32.mrf.mxu2 }
 0x6ef   :  { %12393 = vst [vmem:[#allocation53_spill] sm:$0xff] %v11085_v40 }
 0x6f0   :  { %7332 = vmatmul.msk.f32.gmra.mxu1 %vm147_vm2, %v4884_v12  ;;  %v4888_v12 = vsel %vm1528_vm6, %v4885_v29, %v4887_v35  ;;  %v4562_v48 = vpop.f32.mrf.mxu3 }
 0x6f1   :  { %v4612_v60 = vadd.f32 %v4562_v48, %v10896_v27 }
 0x6f3   :  { %7366 = vmatmul.msk.f32.gmra.mxu2 %vm147_vm2, %v7584_v5 }
 0x6f5   :  { %v11087_v32 = vpop.f32.mrf.mxu1 }
 0x6f6   :  { %12394 = vst [vmem:[#allocation39_spill] sm:$0xff] %v11087_v32  ;;  %v11097_v13 = vpop.f32.mrf.mxu2 }
 0x6f7   :  { %12395 = vst [vmem:[#allocation47_spill] sm:$0xff] %v11097_v13 }
 0x6f8   :  { %7333 = vmatmul.msk.f32.gmra.mxu1 %vm147_vm2, %v4886_v19  ;;  %v4891_v19 = vrot.slane %v7583_v14, 7  ;;  %v4565_v15 = vpop.f32.mrf.mxu3 }
 0x6f9   :  { %v4613_v51 = vadd.f32 %v4565_v15, %v10905_v56 }
 0x6fa   :  { %v4892_v29 = vsel %vm1528_vm6, %v4889_v26, %v4891_v19  ;;  %v4894_v35 = vsel %vm1528_vm6, %v4891_v19, %v4893_v33 }
 0x6fd   :  { %v11101_v4 = vpop.f32.mrf.mxu1 }
 0x6fe   :  { %12396 = vst [vmem:[#allocation3_spill] sm:$0xff] %v11101_v4  ;;  %v11105_v44 = vpop.f32.mrf.mxu2 }
 0x6ff   :  { %12397 = vst [vmem:[#allocation44_spill] sm:$0xff] %v11105_v44 }
 0x700   :  { %7334 = vmatmul.msk.f32.gmra.mxu1 %vm147_vm2, %v4888_v12  ;;  %v4776_v12 = vpop.f32.mrf.mxu0  ;;  %v4568_v42 = vpop.f32.mrf.mxu3 }
 0x701   :  { %v4614_v41 = vadd.f32 %v4568_v42, %v10914_v9  ;;  %v4610_v9 = vadd.f32 %v4556_v7, %v10878_v55  ;;  %v4604_v7 = vadd.f32 %v11003_v25, %v10796_v8 }
 0x703   :  { %v4827_v55 = vadd.f32 %v11107_v62, %v4610_v9  ;;  %v11165_v62 = vld [vmem:[%s12088_s3] ss:$0 sm:$0xff] }
 0x705   :  { %v11109_v28 = vpop.f32.mrf.mxu1 }
 0x706   :  { %12398 = vst [vmem:[#allocation31_spill] sm:$0xff] %v11109_v28  ;;  %v11113_v1 = vpop.f32.mrf.mxu2 }
 0x708   :  { %7335 = vmatmul.msk.f32.gmra.mxu1 %vm147_vm2, %v4890_v24  ;;  %v4779_v14 = vpop.f32.mrf.mxu0  ;;  %v4571_v50 = vpop.f32.mrf.mxu3 }
 0x709   :  { %v4615_v40 = vadd.f32 %v4571_v50, %v10923_v45  ;;  %v4611_v45 = vadd.f32 %v4559_v23, %v10887_v21  ;;  %v4829_v42 = vadd.f32 %v4779_v14, %v4612_v60 }
 0x70d   :  { %v11115_v37 = vpop.f32.mrf.mxu1  ;;  %v12407_v25 = vld [vmem:[#allocation31_spill] sm:$0xff] }
 0x70e   :  { %12399 = vst [vmem:[#allocation13_spill] sm:$0xff] %v11115_v37  ;;  %v11119_v46 = vpop.f32.mrf.mxu2 }
 0x710   :  { %7336 = vmatmul.msk.f32.gmra.mxu1 %vm147_vm2, %v4892_v29  ;;  %v4782_v6 = vpop.f32.mrf.mxu0  ;;  %v4574_v53 = vpop.f32.mrf.mxu3 }
 0x711   :  { %v4616_v34 = vadd.f32 %v4574_v53, %v10932_v18  ;;  %v4830_v50 = vadd.f32 %v4782_v6, %v4613_v51  ;;  %v4828_v18 = vadd.f32 %v4776_v12, %v4611_v45 }
 0x715   :  { %v11121_v52 = vpop.f32.mrf.mxu1 }
 0x716   :  { %v5118_v10 = vpop.f32.mrf.mxu2 }
 0x718   :  { %7337 = vmatmul.msk.f32.gmra.mxu1 %vm147_vm2, %v4894_v35  ;;  %v4785_v29 = vpop.f32.mrf.mxu0  ;;  %v11127_v63 = vpop.f32.mrf.mxu3 }
 0x719   :  { %12400 = vst [vmem:[#allocation56_spill] sm:$0xff] %v11127_v63  ;;  %v4831_v54 = vadd.f32 %v4785_v29, %v4614_v41  ;;  %v4607_v41 = vadd.f32 %v11059_v49, %v10850_v17  ;;  %v12404_v29 = vld [vmem:[#allocation24_spill] sm:$0xff] }
 0x71d   :  { %v11125_v24 = vpop.f32.mrf.mxu1 }
 0x71e   :  { %v5121_v0 = vpop.f32.mrf.mxu2 }
 0x720   :  { %v4788_v58 = vpop.f32.mrf.mxu0  ;;  %v11138_v37 = vpop.f32.mrf.mxu3 }
 0x721   :  { %v4832_v13 = vadd.f32 %v4788_v58, %v4615_v40  ;;  %v4609_v58 = vadd.f32 %v11090_v30, %v10869_v59  ;;  %v4605_v30 = vadd.f32 %v11020_v16, %v10825_v47  ;;  %v12402_v47 = vld [vmem:[#allocation13_spill] sm:$0xff] }
 0x723   :  { %v4826_v60 = vadd.f32 %v11099_v22, %v4609_v58 }
 0x725   :  { %v4990_v26 = vpop.f32.mrf.mxu1 }
 0x726   :  { %v5124_v20 = vpop.f32.mrf.mxu2 }
 0x728   :  { %v4791_v33 = vpop.f32.mrf.mxu0  ;;  %v11170_v49 = vpop.f32.mrf.mxu3 }
 0x729   :  { %v4833_v63 = vadd.f32 %v4791_v33, %v4616_v34  ;;  %v4608_v34 = vadd.f32 %v11073_v11, %v10859_v43  ;;  %v12406_v33 = vld [vmem:[#allocation2_spill] sm:$0xff] }
 0x72a   :  { %v4822_v8 = vadd.f32 %v12406_v33, %v4605_v30  ;;  %v12419_v30 = vld [vmem:[#allocation58_spill] sm:$0xff]  ;;  %v12425_v33 = vld [vmem:[#allocation51_spill] sm:$0xff] }
 0x72b   :  { %v4825_v17 = vadd.f32 %v11083_v57, %v4608_v34  ;;  %v12413_v34 = vld [vmem:[#allocation53_spill] sm:$0xff] }
 0x72d   :  { %v4993_v5 = vpop.f32.mrf.mxu1 }
 0x72e   :  { %v5127_v32 = vpop.f32.mrf.mxu2 }
 0x730   :  { %v11130_v4 = vpop.f32.mrf.mxu0 }
 0x731   :  { %12401 = vst [vmem:[#allocation55_spill] sm:$0xff] %v11130_v4 }
 0x735   :  { %v4996_v2 = vpop.f32.mrf.mxu1 }
 0x736   :  { %v5130_v38 = vpop.f32.mrf.mxu2  ;;  %v5046_v51 = vadd.f32 %v4996_v2, %v4829_v42  ;;  %v5044_v2 = vadd.f32 %v4990_v26, %v4827_v55 }
 0x738   :  { %v11144_v27 = vpop.f32.mrf.mxu0  ;;  %v5166_v57 = vadd.f32 %v11113_v1, %v5044_v2  ;;  %v12416_v2 = vld [vmem:[#allocation50_spill] sm:$0xff] }
 0x73d   :  { %v4999_v19 = vpop.f32.mrf.mxu1 }
 0x73e   :  { %v11134_v28 = vpop.f32.mrf.mxu2  ;;  %v5047_v56 = vadd.f32 %v4999_v19, %v4830_v50 }
 0x740   :  { %v5169_v53 = vadd.f32 %v5121_v0, %v5047_v56  ;;  %v5043_v0 = vadd.f32 %v11125_v24, %v4826_v60  ;;  %v11189_v14 = vpop.f32.mrf.mxu0  ;;  %v12409_v56 = vld [vmem:[#allocation61_spill] sm:$0xff] }
 0x745   :  { %v5002_v35 = vpop.f32.mrf.mxu1 }
 0x746   :  { %v5048_v4 = vadd.f32 %v5002_v35, %v4831_v54  ;;  %v11158_v6 = vpop.f32.mrf.mxu2  ;;  %v12408_v35 = vld [vmem:[#allocation47_spill] sm:$0xff] }
 0x748   :  { %v5170_v21 = vadd.f32 %v5124_v20, %v5048_v4  ;;  %v5168_v20 = vadd.f32 %v5118_v10, %v5046_v51  ;;  %v12412_v51 = vld [vmem:[#allocation3_spill] sm:$0xff] }
 0x74d   :  { %v5005_v3 = vpop.f32.mrf.mxu1 }
 0x74e   :  { %v5049_v44 = vadd.f32 %v5005_v3, %v4832_v13  ;;  %v11149_v3 = vld [vmem:[%s12087_s2] ss:$0 sm:$0xff]  ;;  %v4824_v13 = vadd.f32 %v11064_v61, %v4607_v41  ;;  %v12403_v61 = vld [vmem:[#allocation44_spill] sm:$0xff] }
 0x74f   :  { %v5197_v11 = vmul.f32 %v11149_v3, %v5169_v53  ;;  %v5196_v22 = vmul.f32 %v11149_v3, %v5168_v20  ;;  %v5194_v50 = vmul.f32 %v11149_v3, %v5166_v57  ;;  %v12415_v41 = vld [vmem:[#allocation4_spill] sm:$0xff] }
 0x750   :  { %v5171_v15 = vadd.f32 %v5127_v32, %v5049_v44  ;;  %v5045_v44 = vadd.f32 %v4993_v5, %v4828_v18  ;;  %v5041_v16 = vadd.f32 %v12402_v47, %v4824_v13  ;;  %v12405_v5 = vld [vmem:[#allocation18_spill] sm:$0xff]  ;;  %v12422_v47 = vld [vmem:[#allocation28_spill] sm:$0xff] }
 0x751   :  { %v5225_v26 = vadd.f32 %v11165_v62, %v5197_v11  ;;  %v4603_v19 = vadd.f32 %v12405_v5, %v12404_v29  ;;  %v5224_v42 = vadd.f32 %v11165_v62, %v5196_v22  ;;  %v12421_v22 = vld [vmem:[#allocation37_spill] sm:$0xff] }
 0x752   :  { %v5199_v59 = vmul.f32 %v11149_v3, %v5171_v15  ;;  %v5167_v10 = vadd.f32 %v11119_v46, %v5045_v44  ;;  %v12410_v15 = vld [vmem:[#allocation16_spill] sm:$0xff]  ;;  %v5163_v55 = vadd.f32 %v12413_v34, %v5041_v16 }
 0x753   :  { %v4602_v58 = vadd.f32 %v12410_v15, %v12409_v56  ;;  %v5249_v53 = vmax.f32 %v5225_v26, 0.0  ;;  %v4820_v20 = vadd.f32 %v12416_v2, %v4603_v19  ;;  %v12427_v56 = vld [vmem:[#allocation57_spill] sm:$0xff] }
 0x754   :  { %v5227_v32 = vadd.f32 %v11165_v62, %v5199_v59  ;;  %v5195_v24 = vmul.f32 %v11149_v3, %v5167_v10 }
 0x755   :  { %v5008_v48 = vpop.f32.mrf.mxu1  ;;  %v4819_v13 = vadd.f32 %v12419_v30, %v4602_v58 }
 0x756   :  { %v5050_v54 = vadd.f32 %v5008_v48, %v4833_v63  ;;  %v5198_v63 = vmul.f32 %v11149_v3, %v5170_v21  ;;  %v5251_v1 = vmax.f32 %v5227_v32, 0.0  ;;  %v12411_v48 = vld [vmem:[#allocation52_spill] sm:$0xff]  ;;  %v5039_v21 = vadd.f32 %v12412_v51, %v4822_v8 }
 0x757   :  { %v4821_v18 = vadd.f32 %v12411_v48, %v4604_v7  ;;  %v5223_v59 = vadd.f32 %v11165_v62, %v5195_v24  ;;  %v5222_v32 = vadd.f32 %v11165_v62, %v5194_v50 }
 0x758   :  { %v5172_v23 = vadd.f32 %v5130_v38, %v5050_v54  ;;  %v4606_v38 = vadd.f32 %v11043_v31, %v10841_v39  ;;  %v5042_v39 = vadd.f32 %v11121_v52, %v4825_v17  ;;  %v5226_v4 = vadd.f32 %v11165_v62, %v5198_v63  ;;  %v11206_v54 = vpop.f32.mrf.mxu2  ;;  %v11214_v63 = vpop.f32.mrf.mxu3 }
 0x759   :  { %v5165_v52 = vadd.f32 %v12403_v61, %v5043_v0  ;;  %v12418_v0 = vld [vmem:[#allocation14_spill] sm:$0xff]  ;;  %v5247_v7 = vmax.f32 %v5223_v59, 0.0  ;;  %v11228_v61 = vpop.f32.mrf.mxu0  ;;  %v5246_v5 = vmax.f32 %v5222_v32, 0.0 }
 0x75a   :  { %v5200_v43 = vmul.f32 %v11149_v3, %v5172_v23  ;;  %v4823_v12 = vadd.f32 %v11047_v36, %v4606_v38  ;;  %v5164_v45 = vadd.f32 %v12408_v35, %v5042_v39  ;;  %v5250_v9 = vmax.f32 %v5226_v4, 0.0  ;;  %v12414_v23 = vld [vmem:[#allocation60_spill] sm:$0xff]  ;;  %v12420_v39 = vld [vmem:[#allocation35_spill] sm:$0xff] }
 0x75b   :  { %v5193_v44 = vmul.f32 %v11149_v3, %v5165_v52  ;;  %v4601_v60 = vadd.f32 %v12415_v41, %v12414_v23  ;;  %v5037_v57 = vadd.f32 %v12420_v39, %v4820_v20  ;;  %v5191_v4 = vmul.f32 %v11149_v3, %v5163_v55  ;;  %v12423_v52 = vld [vmem:[#allocation15_spill] sm:$0xff] }
 0x75c   :  { %v5228_v40 = vadd.f32 %v11165_v62, %v5200_v43  ;;  %v5040_v36 = vadd.f32 %v12407_v25, %v4823_v12  ;;  %v12417_v43 = vld [vmem:[#allocation39_spill] sm:$0xff]  ;;  %v5192_v11 = vmul.f32 %v11149_v3, %v5164_v45  ;;  %v5036_v24 = vadd.f32 %v12423_v52, %v4819_v13  ;;  %v12426_v25 = vld [vmem:[#allocation38_spill] sm:$0xff] }
 0x75d   :  { %v11181_v31 = vpop.f32.mrf.mxu1  ;;  %v5038_v38 = vadd.f32 %v12417_v43, %v4821_v18  ;;  %v5221_v12 = vadd.f32 %v11165_v62, %v5193_v44  ;;  %v4818_v16 = vadd.f32 %v12422_v47, %v4601_v60  ;;  %v5219_v50 = vadd.f32 %v11165_v62, %v5191_v4  ;;  %v12429_v52 = vld [vmem:[#allocation27_spill] sm:$0xff] }
 0x75e   :  { %v5252_v46 = vmax.f32 %v5228_v40, 0.0  ;;  %v5162_v10 = vadd.f32 %v12418_v0, %v5040_v36  ;;  %v5248_v40 = vmax.f32 %v5224_v42, 0.0  ;;  %v5220_v19 = vadd.f32 %v11165_v62, %v5192_v11 }
 0x75f   :  { %v5035_v8 = vadd.f32 %v12425_v33, %v4818_v16  ;;  %v5159_v36 = vadd.f32 %v12426_v25, %v5037_v57  ;;  %v5245_v45 = vmax.f32 %v5221_v12, 0.0  ;;  %v5158_v15 = vadd.f32 %v12427_v56, %v5036_v24  ;;  %v5261_v57 = vld [vmem:[%s12089_s7] sm:$0xff]  ;;  %v5263_v12 = vld [vmem:[%s12089_s7 + $0x10] sm:$0xff]  ;;  %v12433_v56 = vld [vmem:[#allocation41_spill] sm:$0xff] }
 0x760   :  { %5321 = vmatpush.msra.mxu3 %v5252_v46  ;;  %5487 = vmatpush.msrb.mxu1 %v5252_v46  ;;  %v5161_v46 = vadd.f32 %v12421_v22, %v5039_v21  ;;  %v5190_v29 = vmul.f32 %v11149_v3, %v5162_v10  ;;  %v11240_v42 = vpop.f32.mrf.mxu2  ;;  %v5244_v48 = vmax.f32 %v5220_v19, 0.0  ;;  %v4589_v51 = vpop.f32.mrf.mxu3  ;;  %v12428_v21 = vld [vmem:[#allocation46_spill] sm:$0xff]  ;;  %v5243_v44 = vmax.f32 %v5219_v50, 0.0 }
 0x761   :  { %v5157_v34 = vadd.f32 %v12428_v21, %v5035_v8  ;;  %v5187_v55 = vmul.f32 %v11149_v3, %v5159_v36  ;;  %v5186_v59 = vmul.f32 %v11149_v3, %v5158_v15  ;;  %v4806_v60 = vpop.f32.mrf.mxu0  ;;  %v12431_v8 = vld [vmem:[#allocation59_spill] sm:$0xff] }
 0x762   :  { %5322 = vmatpush.msra.mxu3 %v5251_v1  ;;  %5488 = vmatpush.msrb.mxu1 %v5251_v1  ;;  %v12424_v1 = vld [vmem:[#allocation32_spill] sm:$0xff]  ;;  %v5189_v35 = vmul.f32 %v11149_v3, %v5161_v46  ;;  %v5218_v18 = vadd.f32 %v11165_v62, %v5190_v29  ;;  %v4621_v25 = vadd.f32 %v4589_v51, %v12431_v8 }
 0x763   :  { %v5160_v26 = vadd.f32 %v12424_v1, %v5038_v38  ;;  %v5185_v2 = vmul.f32 %v11149_v3, %v5157_v34  ;;  %v5215_v43 = vadd.f32 %v11165_v62, %v5187_v55  ;;  %v5214_v10 = vadd.f32 %v11165_v62, %v5186_v59 }
 0x764   :  { %5323 = vmatpush.msra.mxu3 %v5250_v9  ;;  %5489 = vmatpush.msrb.mxu1 %v5250_v9  ;;  %v5242_v23 = vmax.f32 %v5218_v18, 0.0  ;;  %v12434_v18 = vld [vmem:[#allocation34_spill] sm:$0xff]  ;;  %v4838_v34 = vadd.f32 %v4806_v60, %v4621_v25 }
 0x765   :  { %v11217_v17 = vpop.f32.mrf.mxu1  ;;  %v5188_v58 = vmul.f32 %v11149_v3, %v5160_v26  ;;  %v5213_v32 = vadd.f32 %v11165_v62, %v5185_v2  ;;  %v5238_v13 = vmax.f32 %v5214_v10, 0.0  ;;  %v12430_v26 = vld [vmem:[#allocation22_spill] sm:$0xff]  ;;  %v4619_v21 = vadd.f32 %v11170_v49, %v12434_v18 }
 0x766   :  { %5324 = vmatpush.msra.mxu3 %v5249_v53  ;;  %5490 = vmatpush.msrb.mxu1 %v5249_v53  ;;  %v5217_v53 = vadd.f32 %v11165_v62, %v5189_v35  ;;  %v12432_v35 = vld [vmem:[#allocation42_spill] sm:$0xff] }
 0x767   :  { %v5216_v41 = vadd.f32 %v11165_v62, %v5188_v58  ;;  %v5237_v39 = vmax.f32 %v5213_v32, 0.0  ;;  %v12436_v2 = vld [vmem:[#allocation30_spill] sm:$0xff]  ;;  %v4836_v49 = vadd.f32 %v11189_v14, %v4619_v21  ;;  %v5279_v21 = vld [vmem:[%s12089_s7 + $0x90] sm:$0xff] }
 0x768   :  { %5325 = vmatpush.msra.mxu3 %v5248_v40  ;;  %5491 = vmatpush.msrb.mxu1 %v5248_v40  ;;  %v5241_v20 = vmax.f32 %v5217_v53, 0.0  ;;  %v5145_v11 = vpop.f32.mrf.mxu2  ;;  %v5239_v40 = vmax.f32 %v5215_v43, 0.0  ;;  %v4592_v30 = vpop.f32.mrf.mxu3  ;;  %v5427_v18 = vld [vmem:[%s12090_s8] sm:$0xff] }
 0x769   :  { %v5240_v0 = vmax.f32 %v5216_v41, 0.0  ;;  %v4809_v22 = vpop.f32.mrf.mxu0  ;;  %v4622_v29 = vadd.f32 %v4592_v30, %v12430_v26 }
 0x76a   :  { %5326 = vmatpush.msra.mxu3 %v5247_v7  ;;  %5492 = vmatpush.msrb.mxu1 %v5247_v7 }
 0x76b   :  { %v4839_v50 = vadd.f32 %v4809_v22, %v4622_v29 }
 0x76c   :  { %5327 = vmatpush.msra.mxu3 %v5246_v5  ;;  %5493 = vmatpush.msrb.mxu1 %v5246_v5  ;;  %v5265_v5 = vld [vmem:[%s12089_s7 + $0x20] sm:$0xff] }
 0x76d   :  { %v11238_v9 = vpop.f32.mrf.mxu1 }
 0x76e   :  { %5328 = vmatpush.msra.mxu3 %v5245_v45  ;;  %5494 = vmatpush.msrb.mxu1 %v5245_v45  ;;  %v4620_v45 = vadd.f32 %v11214_v63, %v12432_v35  ;;  %v5267_v63 = vld [vmem:[%s12089_s7 + $0x30] sm:$0xff] }
 0x770   :  { %5329 = vmatpush.msra.mxu3 %v5244_v48  ;;  %5495 = vmatpush.msrb.mxu1 %v5244_v48  ;;  %v5148_v4 = vpop.f32.mrf.mxu2  ;;  %v4595_v7 = vpop.f32.mrf.mxu3  ;;  %v4837_v51 = vadd.f32 %v11228_v61, %v4620_v45  ;;  %v5053_v61 = vadd.f32 %v11238_v9, %v4836_v49  ;;  %v5432_v49 = vld [vmem:[%s12090_s8 + $0x28] sm:$0xff] }
 0x771   :  { %v4812_v16 = vpop.f32.mrf.mxu0  ;;  %v4623_v24 = vadd.f32 %v4595_v7, %v12429_v52 }
 0x772   :  { %5330 = vmatpush.msra.mxu3 %v5243_v44  ;;  %5496 = vmatpush.msrb.mxu1 %v5243_v44  ;;  %v12435_v44 = vld [vmem:[#allocation49_spill] sm:$0xff] }
 0x773   :  { %v4840_v36 = vadd.f32 %v4812_v16, %v4623_v24  ;;  %v4618_v53 = vadd.f32 %v11138_v37, %v12435_v44  ;;  %v5281_v44 = vld [vmem:[%s12089_s7 + $0xa0] sm:$0xff] }
 0x774   :  { %5331 = vmatpush.msra.mxu3 %v5242_v23  ;;  %5497 = vmatpush.msrb.mxu1 %v5242_v23 }
 0x775   :  { %v5020_v38 = vpop.f32.mrf.mxu1  ;;  %v4835_v37 = vadd.f32 %v11144_v27, %v4618_v53  ;;  %v5175_v27 = vadd.f32 %v11206_v54, %v5053_v61  ;;  %v5270_v53 = vld [vmem:[%s12089_s7 + $0x48] sm:$0xff]  ;;  %v5441_v61 = vld [vmem:[%s12090_s8 + $0x70] sm:$0xff] }
 0x776   :  { %5332 = vmatpush.msra.mxu3 %v5241_v20  ;;  %5498 = vmatpush.msrb.mxu1 %v5241_v20  ;;  %v12437_v20 = vld [vmem:[#allocation56_spill] sm:$0xff]  ;;  %v5054_v60 = vadd.f32 %v5020_v38, %v4837_v51  ;;  %v5431_v51 = vld [vmem:[%s12090_s8 + $0x20] sm:$0xff] }
 0x777   :  { %v4617_v43 = vadd.f32 %v12437_v20, %v12436_v2  ;;  %v5203_v54 = vmul.f32 %v11149_v3, %v5175_v27  ;;  %v5274_v2 = vld [vmem:[%s12089_s7 + $0x68] sm:$0xff]  ;;  %v5435_v20 = vld [vmem:[%s12090_s8 + $0x40] sm:$0xff] }
 0x778   :  { %5333 = vmatpush.msra.mxu3 %v5240_v0  ;;  %5499 = vmatpush.msrb.mxu1 %v5240_v0  ;;  %v5151_v1 = vpop.f32.mrf.mxu2  ;;  %v4598_v19 = vpop.f32.mrf.mxu3  ;;  %v5176_v7 = vadd.f32 %v11240_v42, %v5054_v60  ;;  %v5278_v60 = vld [vmem:[%s12089_s7 + $0x88] sm:$0xff]  ;;  %v5447_v27 = vld [vmem:[%s12090_s8 + $0xa0] sm:$0xff] }
 0x779   :  { %v4624_v15 = vadd.f32 %v4598_v19, %v12433_v56  ;;  %v4815_v48 = vpop.f32.mrf.mxu0  ;;  %v5262_v56 = vld [vmem:[%s12089_s7 + $0x8] sm:$0xff] }
 0x77a   :  { %5334 = vmatpush.msra.mxu3 %v5239_v40  ;;  %5500 = vmatpush.msrb.mxu1 %v5239_v40 }
 0x77b   :  { %v4841_v59 = vadd.f32 %v4815_v48, %v4624_v15  ;;  %v5264_v15 = vld [vmem:[%s12089_s7 + $0x18] sm:$0xff]  ;;  %v5266_v48 = vld [vmem:[%s12089_s7 + $0x28] sm:$0xff] }
 0x77c   :  { %5335 = vmatpush.msra.mxu3 %v5238_v13  ;;  %5501 = vmatpush.msrb.mxu1 %v5238_v13 }
 0x77d   :  { %v5023_v46 = vpop.f32.mrf.mxu1 }
 0x77e   :  { %5336 = vmatpush.msra.mxu3 %v5237_v39  ;;  %5502 = vmatpush.msrb.mxu1 %v5237_v39  ;;  %v5055_v23 = vadd.f32 %v5023_v46, %v4838_v34  ;;  %v5052_v46 = vadd.f32 %v11217_v17, %v4835_v37  ;;  %v5268_v34 = vld [vmem:[%s12089_s7 + $0x38] sm:$0xff] }
 0x77f   :  { %5337 = vmatmul.f32.vlgmr.msra.gmra.mxu3 %v5261_v57  ;;  %v12438_v57 = vld [vmem:[#allocation55_spill] sm:$0xff]  ;;  %5503 = vmatmul.f32.vlgmr.msrb.gmra.mxu1 %v5427_v18  ;;  %v5280_v37 = vld [vmem:[%s12089_s7 + $0x98] sm:$0xff] }
 0x780   :  { %v5154_v10 = vpop.f32.mrf.mxu2  ;;  %v5177_v30 = vadd.f32 %v5145_v11, %v5055_v23  ;;  %v4834_v22 = vadd.f32 %v12438_v57, %v4617_v43  ;;  %v5174_v42 = vadd.f32 %v11158_v6, %v5052_v46  ;;  %v5272_v23 = vld [vmem:[%s12089_s7 + $0x58] sm:$0xff]  ;;  %v5443_v57 = vld [vmem:[%s12090_s8 + $0x80] sm:$0xff] }
 0x781   :  { %v5430_v43 = vld [vmem:[%s12090_s8 + $0x18] sm:$0xff] }
 0x782   :  { %v5205_v9 = vmul.f32 %v11149_v3, %v5177_v30  ;;  %v5202_v26 = vmul.f32 %v11149_v3, %v5174_v42  ;;  %v5436_v30 = vld [vmem:[%s12090_s8 + $0x48] sm:$0xff]  ;;  %v5284_v46 = vld [vmem:[%s12089_s7 + $0xb8] sm:$0xff] }
 0x784   :  { %v5230_v25 = vadd.f32 %v11165_v62, %v5202_v26  ;;  %v5606_v26 = vld [vmem:[%s12091_s4 + $0x8] sm:$0xff] }
 0x785   :  { %v5026_v47 = vpop.f32.mrf.mxu1  ;;  %5752 = vmatpush.msra.mxu1 %v5606_v26 }
 0x786   :  { %v5056_v55 = vadd.f32 %v5026_v47, %v4839_v50  ;;  %v5204_v47 = vmul.f32 %v11149_v3, %v5176_v7  ;;  %v5254_v35 = vmax.f32 %v5230_v25, 0.0  ;;  %v5273_v50 = vld [vmem:[%s12089_s7 + $0x60] sm:$0xff]  ;;  %v7391_v25 = vld [vmem:[%s12091_s4 + $0x10] sm:$0xff] }
 0x787   :  { %5340 = vmatmul.f32.gmra.mxu3 %v5263_v12  ;;  %v5269_v12 = vld [vmem:[%s12089_s7 + $0x40] sm:$0xff] }
 0x788   :  { %v5178_v40 = vadd.f32 %v5148_v4, %v5056_v55  ;;  %v5051_v4 = vadd.f32 %v11181_v31, %v4834_v22  ;;  %v5232_v29 = vadd.f32 %v11165_v62, %v5204_v47  ;;  %v5429_v55 = vld [vmem:[%s12090_s8 + $0x10] sm:$0xff]  ;;  %v5438_v22 = vld [vmem:[%s12090_s8 + $0x58] sm:$0xff] }
 0x789   :  { %5506 = vmatmul.f32.gmra.mxu1 %v5429_v55  ;;  %v5446_v47 = vld [vmem:[%s12090_s8 + $0x98] sm:$0xff] }
 0x78a   :  { %v5206_v14 = vmul.f32 %v11149_v3, %v5178_v40  ;;  %v5173_v31 = vadd.f32 %v11134_v28, %v5051_v4  ;;  %v5271_v28 = vld [vmem:[%s12089_s7 + $0x50] sm:$0xff]  ;;  %v5256_v8 = vmax.f32 %v5232_v29, 0.0  ;;  %v5439_v40 = vld [vmem:[%s12090_s8 + $0x60] sm:$0xff] }
 0x78c   :  { %v5234_v52 = vadd.f32 %v11165_v62, %v5206_v14  ;;  %v5445_v14 = vld [vmem:[%s12090_s8 + $0x90] sm:$0xff] }
 0x78d   :  { %v5029_v33 = vpop.f32.mrf.mxu1 }
 0x78e   :  { %v5057_v58 = vadd.f32 %v5029_v33, %v4840_v36  ;;  %v5258_v6 = vmax.f32 %v5234_v52, 0.0  ;;  %v5231_v33 = vadd.f32 %v11165_v62, %v5203_v54  ;;  %v5448_v52 = vld [vmem:[%s12090_s8 + $0xa8] sm:$0xff]  ;;  %v5450_v54 = vld [vmem:[%s12090_s8 + $0xb8] sm:$0xff] }
 0x78f   :  { %5343 = vmatmul.f32.gmra.mxu3 %v5265_v5  ;;  %v5201_v5 = vmul.f32 %v11149_v3, %v5173_v31 }
 0x790   :  { %v5179_v41 = vadd.f32 %v5151_v1, %v5057_v58  ;;  %v5233_v1 = vadd.f32 %v11165_v62, %v5205_v9  ;;  %v5255_v36 = vmax.f32 %v5231_v33, 0.0  ;;  %v5277_v58 = vld [vmem:[%s12089_s7 + $0x80] sm:$0xff]  ;;  %v5442_v9 = vld [vmem:[%s12090_s8 + $0x78] sm:$0xff] }
 0x791   :  { %5509 = vmatmul.f32.gmra.mxu1 %v5431_v51  ;;  %v7429_v33 = vld [vmem:[%s12091_s4 + $0x38] sm:$0xff] }
 0x792   :  { %v5207_v13 = vmul.f32 %v11149_v3, %v5179_v41  ;;  %v5257_v19 = vmax.f32 %v5233_v1, 0.0  ;;  %v5433_v41 = vld [vmem:[%s12090_s8 + $0x30] sm:$0xff]  ;;  %5957 = vmatpush.msrb.mxu2 %v7429_v33 }
 0x794   :  { %v5235_v17 = vadd.f32 %v11165_v62, %v5207_v13  ;;  %v5282_v13 = vld [vmem:[%s12089_s7 + $0xa8] sm:$0xff] }
 0x795   :  { %v5032_v0 = vpop.f32.mrf.mxu1 }
 0x796   :  { %v5058_v32 = vadd.f32 %v5032_v0, %v4841_v59  ;;  %v5259_v24 = vmax.f32 %v5235_v17, 0.0  ;;  %v5283_v59 = vld [vmem:[%s12089_s7 + $0xb0] sm:$0xff]  ;;  %v5276_v0 = vld [vmem:[%s12089_s7 + $0x78] sm:$0xff]  ;;  %v5444_v17 = vld [vmem:[%s12090_s8 + $0x88] sm:$0xff] }
 0x797   :  { %5346 = vmatmul.f32.gmra.mxu3 %v5267_v63  ;;  %v5428_v63 = vld [vmem:[%s12090_s8 + $0x8] sm:$0xff] }
 0x798   :  { %v5180_v39 = vadd.f32 %v5154_v10, %v5058_v32  ;;  %v5437_v10 = vld [vmem:[%s12090_s8 + $0x50] sm:$0xff]  ;;  %v5434_v32 = vld [vmem:[%s12090_s8 + $0x38] sm:$0xff] }
 0x799   :  { %5512 = vmatmul.f32.gmra.mxu1 %v5433_v41 }
 0x79a   :  { %v5208_v38 = vmul.f32 %v11149_v3, %v5180_v39  ;;  %v5229_v3 = vadd.f32 %v11165_v62, %v5201_v5 }
 0x79c   :  { %v5236_v11 = vadd.f32 %v11165_v62, %v5208_v38  ;;  %v5253_v45 = vmax.f32 %v5229_v3, 0.0  ;;  %v5275_v62 = vld [vmem:[%s12089_s7 + $0x70] sm:$0xff]  ;;  %v5440_v38 = vld [vmem:[%s12090_s8 + $0x68] sm:$0xff]  ;;  %v7441_v3 = vld [vmem:[%s12091_s4 + $0x40] sm:$0xff] }
 0x79e   :  { %v5260_v16 = vmax.f32 %v5236_v11, 0.0 }
 0x79f   :  { %5349 = vmatmul.f32.gmra.mxu3 %v5269_v12  ;;  %v5449_v12 = vld [vmem:[%s12090_s8 + $0xb0] sm:$0xff] }
 0x7a0   :  { %5382 = vmatpush.msra.mxu0 %v5260_v16  ;;  %5548 = vmatpush.msrb.mxu3 %v5260_v16 }
 0x7a1   :  { %5515 = vmatmul.f32.gmra.mxu1 %v5435_v20 }
 0x7a2   :  { %5383 = vmatpush.msra.mxu0 %v5259_v24  ;;  %5549 = vmatpush.msrb.mxu3 %v5259_v24 }
 0x7a4   :  { %5384 = vmatpush.msra.mxu0 %v5258_v6  ;;  %5550 = vmatpush.msrb.mxu3 %v5258_v6  ;;  %v5605_v6 = vld [vmem:[%s12091_s4] sm:$0xff] }
 0x7a5   :  { %5753 = vmatpush.msra.mxu1 %v5605_v6 }
 0x7a6   :  { %5385 = vmatpush.msra.mxu0 %v5257_v19  ;;  %5551 = vmatpush.msrb.mxu3 %v5257_v19 }
 0x7a7   :  { %5352 = vmatmul.f32.gmra.mxu3 %v5271_v28  ;;  %v7392_v28 = vld [vmem:[%s12091_s4 + $0x18] sm:$0xff] }
 0x7a8   :  { %5386 = vmatpush.msra.mxu0 %v5256_v8  ;;  %5552 = vmatpush.msrb.mxu3 %v5256_v8  ;;  %v7442_v8 = vld [vmem:[%s12091_s4 + $0x48] sm:$0xff] }
 0x7a9   :  { %5518 = vmatmul.f32.gmra.mxu1 %v5437_v10 }
 0x7aa   :  { %5387 = vmatpush.msra.mxu0 %v5255_v36  ;;  %5553 = vmatpush.msrb.mxu3 %v5255_v36  ;;  %v7428_v36 = vld [vmem:[%s12091_s4 + $0x30] sm:$0xff] }
 0x7ab   :  { %5958 = vmatpush.msrb.mxu2 %v7428_v36 }
 0x7ac   :  { %5388 = vmatpush.msra.mxu0 %v5254_v35  ;;  %5554 = vmatpush.msrb.mxu3 %v5254_v35 }
 0x7ae   :  { %5389 = vmatpush.msra.mxu0 %v5253_v45  ;;  %5555 = vmatpush.msrb.mxu3 %v5253_v45 }
 0x7af   :  { %5355 = vmatmul.f32.gmra.mxu3 %v5273_v50  ;;  %7367 = vmatmul.msk.f32.vlgmr.msra.gmra.mxu0 %vm1969_vm8, %v5262_v56 }
 0x7b0   :  { %5680 = vmatpush.msrb.mxu0 %v7392_v28  ;;  %6065 = vmatpush.msra.mxu3 %v7442_v8 }
 0x7b1   :  { %5521 = vmatmul.f32.gmra.mxu1 %v5439_v40 }
 0x7b2   :  { %5681 = vmatpush.msrb.mxu0 %v7391_v25  ;;  %6066 = vmatpush.msra.mxu3 %v7441_v3 }
 0x7b7   :  { %5358 = vmatmul.f32.gmra.mxu3 %v5275_v62  ;;  %7368 = vmatmul.msk.f32.gmra.mxu0 %vm1969_vm8, %v5264_v15 }
 0x7b9   :  { %5524 = vmatmul.f32.gmra.mxu1 %v5441_v61 }
 0x7bf   :  { %5361 = vmatmul.f32.gmra.mxu3 %v5277_v58  ;;  %7369 = vmatmul.msk.f32.gmra.mxu0 %vm1969_vm8, %v5266_v48 }
 0x7c1   :  { %5527 = vmatmul.f32.gmra.mxu1 %v5443_v57 }
 0x7c7   :  { %5364 = vmatmul.f32.gmra.mxu3 %v5279_v21  ;;  %7370 = vmatmul.msk.f32.gmra.mxu0 %vm1969_vm8, %v5268_v34 }
 0x7c9   :  { %5530 = vmatmul.f32.gmra.mxu1 %v5445_v14 }
 0x7cf   :  { %5367 = vmatmul.f32.gmra.mxu3 %v5281_v44  ;;  %7371 = vmatmul.msk.f32.gmra.mxu0 %vm1969_vm8, %v5270_v53 }
 0x7d1   :  { %5533 = vmatmul.f32.gmra.mxu1 %v5447_v27 }
 0x7d7   :  { %5370 = vmatmul.f32.gmra.mxu3 %v5283_v59  ;;  %7372 = vmatmul.msk.f32.gmra.mxu0 %vm1969_vm8, %v5272_v23 }
 0x7d9   :  { %5536 = vmatmul.f32.gmra.mxu1 %v5449_v12 }
 0x7df   :  { %7379 = vmatmul.msk.f32.vlgmr.msrb.gmra.mxu3 %vm1969_vm8, %v5428_v63  ;;  %7373 = vmatmul.msk.f32.gmra.mxu0 %vm1969_vm8, %v5274_v2 }
 0x7e7   :  { %7380 = vmatmul.msk.f32.gmra.mxu3 %vm1969_vm8, %v5430_v43  ;;  %7374 = vmatmul.msk.f32.gmra.mxu0 %vm1969_vm8, %v5276_v0 }
 0x7ef   :  { %7381 = vmatmul.msk.f32.gmra.mxu3 %vm1969_vm8, %v5432_v49  ;;  %7375 = vmatmul.msk.f32.gmra.mxu0 %vm1969_vm8, %v5278_v60 }
 0x7f7   :  { %7382 = vmatmul.msk.f32.gmra.mxu3 %vm1969_vm8, %v5434_v32  ;;  %7376 = vmatmul.msk.f32.gmra.mxu0 %vm1969_vm8, %v5280_v37 }
 0x7fc   :  { %v5504_v19 = vpop.f32.mrf.mxu1 }
 0x7ff   :  { %7383 = vmatmul.msk.f32.gmra.mxu3 %vm1969_vm8, %v5436_v30  ;;  %7377 = vmatmul.msk.f32.gmra.mxu0 %vm1969_vm8, %v5282_v13 }
 0x802   :  { %v5338_v39 = vpop.f32.mrf.mxu3 }
 0x806   :  { %v5507_v50 = vpop.f32.mrf.mxu1 }
 0x807   :  { %7384 = vmatmul.msk.f32.gmra.mxu3 %vm1969_vm8, %v5438_v22  ;;  %7378 = vmatmul.msk.f32.gmra.mxu0 %vm1969_vm8, %v5284_v46 }
 0x80a   :  { %v5341_v7 = vpop.f32.mrf.mxu3 }
 0x80e   :  { %v5510_v15 = vpop.f32.mrf.mxu1 }
 0x80f   :  { %7385 = vmatmul.msk.f32.gmra.mxu3 %vm1969_vm8, %v5440_v38 }
 0x812   :  { %v11435_v4 = vpop.f32.mrf.mxu3 }
 0x816   :  { %v5513_v55 = vpop.f32.mrf.mxu1 }
 0x817   :  { %7386 = vmatmul.msk.f32.gmra.mxu3 %vm1969_vm8, %v5442_v9 }
 0x81a   :  { %v11444_v11 = vpop.f32.mrf.mxu3 }
 0x81e   :  { %v5516_v32 = vpop.f32.mrf.mxu1 }
 0x81f   :  { %7387 = vmatmul.msk.f32.gmra.mxu3 %vm1969_vm8, %v5444_v17 }
 0x822   :  { %v11453_v42 = vpop.f32.mrf.mxu3 }
 0x826   :  { %v5519_v9 = vpop.f32.mrf.mxu1 }
 0x827   :  { %7388 = vmatmul.msk.f32.gmra.mxu3 %vm1969_vm8, %v5446_v47 }
 0x82a   :  { %v11459_v16 = vpop.f32.mrf.mxu3 }
 0x82c   :  { %v5391_v29 = vpop.f32.mrf.mxu0 }
 0x82d   :  { %v5392_v48 = vadd.f32 %v5391_v29, %v5338_v39 }
 0x82e   :  { %v5522_v8 = vpop.f32.mrf.mxu1 }
 0x82f   :  { %7389 = vmatmul.msk.f32.gmra.mxu3 %vm1969_vm8, %v5448_v52 }
 0x832   :  { %v11465_v31 = vpop.f32.mrf.mxu3 }
 0x834   :  { %v5394_v45 = vpop.f32.mrf.mxu0 }
 0x835   :  { %v5395_v53 = vadd.f32 %v5394_v45, %v5341_v7 }
 0x837   :  { %7390 = vmatmul.msk.f32.gmra.mxu3 %vm1969_vm8, %v5450_v54 }
 0x83a   :  { %v11471_v24 = vpop.f32.mrf.mxu3 }
 0x83c   :  { %v5397_v62 = vpop.f32.mrf.mxu0 }
 0x83d   :  { %v5398_v37 = vadd.f32 %v5397_v62, %v11435_v4 }
 0x842   :  { %v11473_v1 = vpop.f32.mrf.mxu3 }
 0x844   :  { %v5400_v34 = vpop.f32.mrf.mxu0 }
 0x845   :  { %v5401_v38 = vadd.f32 %v5400_v34, %v11444_v11 }
 0x84a   :  { %v11481_v5 = vpop.f32.mrf.mxu3 }
 0x84c   :  { %v5403_v60 = vpop.f32.mrf.mxu0 }
 0x84d   :  { %v5404_v29 = vadd.f32 %v5403_v60, %v11453_v42 }
 0x852   :  { %v11501_v35 = vpop.f32.mrf.mxu3 }
 0x854   :  { %v5406_v27 = vpop.f32.mrf.mxu0 }
 0x85a   :  { %v11503_v56 = vpop.f32.mrf.mxu3 }
 0x85c   :  { %v5409_v33 = vpop.f32.mrf.mxu0 }
 0x862   :  { %v5557_v58 = vpop.f32.mrf.mxu3 }
 0x863   :  { %v5558_v18 = vadd.f32 %v5557_v58, %v5504_v19 }
 0x865   :  { %v11505_v21 = vmax.f32 %v5392_v48, %v5558_v18 }
 0x867   :  { %7404 = vmatmul.msk.f32.vlgmr.msra.gmra.mxu1 %vm2330_vm9, %v11505_v21  ;;  %v5621_v23 = vrot.slane %v11505_v21, 1  ;;  %v5898_v41 = vrot.slane %v11505_v21, 3  ;;  %v6006_v20 = vrot.slane %v11505_v21, 4 }
 0x86a   :  { %v5560_v44 = vpop.f32.mrf.mxu3 }
 0x86b   :  { %v5561_v51 = vadd.f32 %v5560_v44, %v5507_v50  ;;  %v5412_v44 = vpop.f32.mrf.mxu0 }
 0x86d   :  { %v11509_v59 = vmax.f32 %v5395_v53, %v5561_v51  ;;  %v5525_v53 = vpop.f32.mrf.mxu1 }
 0x86f   :  { %7405 = vmatmul.msk.f32.gmra.mxu1 %vm2330_vm9, %v11509_v59  ;;  %v5622_v63 = vrot.slane %v11509_v59, 1  ;;  %v5899_v2 = vrot.slane %v11509_v59, 3  ;;  %v6007_v43 = vrot.slane %v11509_v59, 4 }
 0x871   :  { %v5623_v0 = vsel %vm97_vm1, %v5621_v23, %v5622_v63  ;;  %v5900_v10 = vsel %vm653_vm4, %v5898_v41, %v5899_v2  ;;  %v6008_v49 = vsel %vm872_vm7, %v6006_v20, %v6007_v43 }
 0x872   :  { %v5563_v40 = vpop.f32.mrf.mxu3  ;;  %7393 = vmatmul.msk.f32.vlgmr.msrb.gmra.mxu0 %vm2330_vm9, %v5623_v0  ;;  %7430 = vmatmul.msk.f32.vlgmr.msrb.gmra.mxu2 %vm2330_vm9, %v5900_v10 }
 0x873   :  { %v5564_v61 = vadd.f32 %v5563_v40, %v5510_v15  ;;  %7443 = vmatmul.msk.f32.vlgmr.msra.gmra.mxu3 %vm2330_vm9, %v6008_v49  ;;  %v5407_v15 = vadd.f32 %v5406_v27, %v11459_v16  ;;  %v5415_v40 = vpop.f32.mrf.mxu0 }
 0x875   :  { %v11526_v30 = vmax.f32 %v5398_v37, %v5564_v61  ;;  %v5528_v37 = vpop.f32.mrf.mxu1  ;;  %v5413_v61 = vadd.f32 %v5412_v44, %v11471_v24 }
 0x877   :  { %7406 = vmatmul.msk.f32.gmra.mxu1 %vm2330_vm9, %v11526_v30  ;;  %v5624_v13 = vrot.slane %v11526_v30, 1  ;;  %v5901_v39 = vrot.slane %v11526_v30, 3  ;;  %v6009_v57 = vrot.slane %v11526_v30, 4 }
 0x879   :  { %v5625_v22 = vsel %vm97_vm1, %v5622_v63, %v5624_v13  ;;  %v5902_v46 = vsel %vm653_vm4, %v5899_v2, %v5901_v39  ;;  %v6010_v7 = vsel %vm872_vm7, %v6007_v43, %v6009_v57  ;;  %v5410_v63 = vadd.f32 %v5409_v33, %v11465_v31  ;;  %v7415_v33 = vld [vmem:[%s12091_s4 + $0x20] sm:$0xff] }
 0x87a   :  { %v5566_v14 = vpop.f32.mrf.mxu3  ;;  %7394 = vmatmul.msk.f32.gmra.mxu0 %vm2330_vm9, %v5625_v22  ;;  %7431 = vmatmul.msk.f32.gmra.mxu2 %vm2330_vm9, %v5902_v46  ;;  %v7454_v22 = vld [vmem:[%s12091_s4 + $0x50] sm:$0xff] }
 0x87b   :  { %v5567_v4 = vadd.f32 %v5566_v14, %v5513_v55  ;;  %7444 = vmatmul.msk.f32.gmra.mxu3 %vm2330_vm9, %v6010_v7 }
 0x87d   :  { %v11540_v12 = vmax.f32 %v5401_v38, %v5567_v4 }
 0x87f   :  { %7407 = vmatmul.msk.f32.gmra.mxu1 %vm2330_vm9, %v11540_v12  ;;  %v5626_v17 = vrot.slane %v11540_v12, 1  ;;  %v5903_v47 = vrot.slane %v11540_v12, 3  ;;  %v6011_v52 = vrot.slane %v11540_v12, 4 }
 0x881   :  { %v5627_v54 = vsel %vm97_vm1, %v5624_v13, %v5626_v17  ;;  %v5904_v11 = vsel %vm653_vm4, %v5901_v39, %v5903_v47  ;;  %v6012_v26 = vsel %vm872_vm7, %v6009_v57, %v6011_v52  ;;  %v7455_v57 = vld [vmem:[%s12091_s4 + $0x58] sm:$0xff] }
 0x882   :  { %v5569_v6 = vpop.f32.mrf.mxu3  ;;  %7395 = vmatmul.msk.f32.gmra.mxu0 %vm2330_vm9, %v5627_v54  ;;  %7432 = vmatmul.msk.f32.gmra.mxu2 %vm2330_vm9, %v5904_v11  ;;  %v5531_v54 = vpop.f32.mrf.mxu1 }
 0x883   :  { %v5570_v19 = vadd.f32 %v5569_v6, %v5516_v32  ;;  %7445 = vmatmul.msk.f32.gmra.mxu3 %vm2330_vm9, %v6012_v26  ;;  %6173 = vmatpush.msrb.mxu1 %v7455_v57 }
 0x885   :  { %v11554_v28 = vmax.f32 %v5404_v29, %v5570_v19  ;;  %6174 = vmatpush.msrb.mxu1 %v7454_v22  ;;  %v7481_v29 = vld [vmem:[%s12091_s4 + $0x78] sm:$0xff]  ;;  %v7494_v19 = vld [vmem:[%s12091_s4 + $0x88] sm:$0xff] }
 0x886   :  { %6389 = vmatpush.msra.mxu2 %v7481_v29  ;;  %6454 = vmatpush.msrb.mxu3 %v7494_v19  ;;  %v6333_v29 = vrot.slane %v11526_v30, 7 }
 0x887   :  { %7408 = vmatmul.msk.f32.gmra.mxu1 %vm2330_vm9, %v11554_v28  ;;  %v5628_v25 = vrot.slane %v11554_v28, 1  ;;  %v5905_v36 = vrot.slane %v11554_v28, 3  ;;  %v6013_v3 = vrot.slane %v11554_v28, 4 }
 0x889   :  { %v5629_v45 = vsel %vm97_vm1, %v5626_v17, %v5628_v25  ;;  %v5906_v42 = vsel %vm653_vm4, %v5903_v47, %v5905_v36  ;;  %v6014_v50 = vsel %vm872_vm7, %v6011_v52, %v6013_v3  ;;  %v7416_v47 = vld [vmem:[%s12091_s4 + $0x28] sm:$0xff]  ;;  %v5418_v52 = vpop.f32.mrf.mxu0 }
 0x88a   :  { %v5572_v62 = vpop.f32.mrf.mxu3  ;;  %7396 = vmatmul.msk.f32.gmra.mxu0 %vm2330_vm9, %v5629_v45  ;;  %7433 = vmatmul.msk.f32.gmra.mxu2 %vm2330_vm9, %v5906_v42  ;;  %v7493_v45 = vld [vmem:[%s12091_s4 + $0x80] sm:$0xff] }
 0x88b   :  { %v5573_v58 = vadd.f32 %v5572_v62, %v5519_v9  ;;  %7446 = vmatmul.msk.f32.gmra.mxu3 %vm2330_vm9, %v6014_v50  ;;  %v5416_v9 = vadd.f32 %v5415_v40, %v11473_v1  ;;  %5849 = vmatpush.msra.mxu0 %v7416_v47  ;;  %v5419_v50 = vadd.f32 %v5418_v52, %v11481_v5  ;;  %v5790_v47 = vrot.slane %v11505_v21, 2 }
 0x88c   :  { %6455 = vmatpush.msrb.mxu3 %v7493_v45  ;;  %v6330_v52 = vrot.slane %v11505_v21, 7 }
 0x88d   :  { %v11568_v48 = vmax.f32 %v5407_v15, %v5573_v58  ;;  %5850 = vmatpush.msra.mxu0 %v7415_v33 }
 0x88f   :  { %7409 = vmatmul.msk.f32.gmra.mxu1 %vm2330_vm9, %v11568_v48  ;;  %v5630_v18 = vrot.slane %v11568_v48, 1  ;;  %v5907_v34 = vrot.slane %v11568_v48, 3  ;;  %v6015_v55 = vrot.slane %v11568_v48, 4 }
 0x891   :  { %v5631_v51 = vsel %vm97_vm1, %v5628_v25, %v5630_v18  ;;  %v5908_v16 = vsel %vm653_vm4, %v5905_v36, %v5907_v34  ;;  %v6016_v23 = vsel %vm872_vm7, %v6013_v3, %v6015_v55  ;;  %v5421_v58 = vpop.f32.mrf.mxu0 }
 0x892   :  { %v5575_v41 = vpop.f32.mrf.mxu3  ;;  %7397 = vmatmul.msk.f32.gmra.mxu0 %vm2330_vm9, %v5631_v51  ;;  %7434 = vmatmul.msk.f32.gmra.mxu2 %vm2330_vm9, %v5908_v16 }
 0x893   :  { %v5576_v2 = vadd.f32 %v5575_v41, %v5522_v8  ;;  %7447 = vmatmul.msk.f32.gmra.mxu3 %vm2330_vm9, %v6016_v23  ;;  %v7480_v8 = vld [vmem:[%s12091_s4 + $0x70] sm:$0xff]  ;;  %v5422_v23 = vadd.f32 %v5421_v58, %v11501_v35  ;;  %v5797_v58 = vrot.slane %v11554_v28, 2 }
 0x894   :  { %6390 = vmatpush.msra.mxu2 %v7480_v8 }
 0x895   :  { %v11582_v20 = vmax.f32 %v5410_v63, %v5576_v2 }
 0x897   :  { %7410 = vmatmul.msk.f32.gmra.mxu1 %vm2330_vm9, %v11582_v20  ;;  %v5632_v43 = vrot.slane %v11582_v20, 1  ;;  %v5909_v0 = vrot.slane %v11582_v20, 3  ;;  %v6017_v10 = vrot.slane %v11582_v20, 4 }
 0x899   :  { %v5633_v49 = vsel %vm97_vm1, %v5630_v18, %v5632_v43  ;;  %v5910_v60 = vsel %vm653_vm4, %v5907_v34, %v5909_v0  ;;  %v6018_v31 = vsel %vm872_vm7, %v6015_v55, %v6017_v10  ;;  %v5534_v18 = vpop.f32.mrf.mxu1 }
 0x89a   :  { %v5578_v32 = vpop.f32.mrf.mxu3  ;;  %7398 = vmatmul.msk.f32.gmra.mxu0 %vm2330_vm9, %v5633_v49  ;;  %7435 = vmatmul.msk.f32.gmra.mxu2 %vm2330_vm9, %v5910_v60 }
 0x89b   :  { %v5579_v13 = vadd.f32 %v5578_v32, %v5525_v53  ;;  %7448 = vmatmul.msk.f32.gmra.mxu3 %vm2330_vm9, %v6018_v31  ;;  %v6115_v32 = vrot.slane %v11509_v59, 5 }
 0x89d   :  { %v11596_v39 = vmax.f32 %v5413_v61, %v5579_v13  ;;  %v6114_v13 = vrot.slane %v11505_v21, 5 }
 0x89f   :  { %7411 = vmatmul.msk.f32.gmra.mxu1 %vm2330_vm9, %v11596_v39  ;;  %v5634_v46 = vrot.slane %v11596_v39, 1  ;;  %v5911_v24 = vrot.slane %v11596_v39, 3  ;;  %v6019_v7 = vrot.slane %v11596_v39, 4  ;;  %v6116_v22 = vsel %vm196_vm0, %v6114_v13, %v6115_v32 }
 0x8a0   :  { %v6343_v13 = vrot.slane %v11596_v39, 7 }
 0x8a1   :  { %v5635_v14 = vsel %vm97_vm1, %v5632_v43, %v5634_v46  ;;  %v5912_v38 = vsel %vm653_vm4, %v5909_v0, %v5911_v24  ;;  %v6020_v4 = vsel %vm872_vm7, %v6017_v10, %v6019_v7  ;;  %v5424_v10 = vpop.f32.mrf.mxu0  ;;  %v5537_v49 = vpop.f32.mrf.mxu1 }
 0x8a2   :  { %v5581_v27 = vpop.f32.mrf.mxu3  ;;  %7399 = vmatmul.msk.f32.gmra.mxu0 %vm2330_vm9, %v5635_v14  ;;  %7436 = vmatmul.msk.f32.gmra.mxu2 %vm2330_vm9, %v5912_v38 }
 0x8a3   :  { %v5582_v17 = vadd.f32 %v5581_v27, %v5528_v37  ;;  %7449 = vmatmul.msk.f32.gmra.mxu3 %vm2330_vm9, %v6020_v4  ;;  %v5425_v37 = vadd.f32 %v5424_v10, %v11503_v56  ;;  %v6117_v4 = vrot.slane %v11526_v30, 5  ;;  %v5791_v27 = vrot.slane %v11509_v59, 2 }
 0x8a4   :  { %v5801_v10 = vrot.slane %v11582_v20, 2 }
 0x8a5   :  { %v11619_v11 = vmax.f32 %v5416_v9, %v5582_v17  ;;  %v6331_v9 = vrot.slane %v11509_v59, 7  ;;  %v6118_v17 = vsel %vm196_vm0, %v6115_v32, %v6117_v4 }
 0x8a7   :  { %7412 = vmatmul.msk.f32.gmra.mxu1 %vm2330_vm9, %v11619_v11  ;;  %v5636_v26 = vrot.slane %v11619_v11, 1  ;;  %v5913_v6 = vrot.slane %v11619_v11, 3  ;;  %v6021_v1 = vrot.slane %v11619_v11, 4  ;;  %v6334_v8 = vsel %vm1528_vm6, %v6331_v9, %v6333_v29 }
 0x8a8   :  { %v6129_v32 = vrot.slane %v11619_v11, 5 }
 0x8a9   :  { %v5637_v25 = vsel %vm97_vm1, %v5634_v46, %v5636_v26  ;;  %v5914_v36 = vsel %vm653_vm4, %v5911_v24, %v5913_v6  ;;  %v6022_v3 = vsel %vm872_vm7, %v6019_v7, %v6021_v1 }
 0x8aa   :  { %v5584_v42 = vpop.f32.mrf.mxu3  ;;  %7400 = vmatmul.msk.f32.gmra.mxu0 %vm2330_vm9, %v5637_v25  ;;  %7437 = vmatmul.msk.f32.gmra.mxu2 %vm2330_vm9, %v5914_v36  ;;  %v6121_v25 = vrot.slane %v11554_v28, 5  ;;  %v5795_v36 = vrot.slane %v11540_v12, 2 }
 0x8ab   :  { %v5585_v62 = vadd.f32 %v5584_v42, %v5531_v54  ;;  %7450 = vmatmul.msk.f32.gmra.mxu3 %vm2330_vm9, %v6022_v3  ;;  %v5792_v54 = vsel %vm434_vm3, %v5790_v47, %v5791_v27  ;;  %v6335_v3 = vrot.slane %v11540_v12, 7  ;;  %v7467_v47 = vld [vmem:[%s12091_s4 + $0x60] sm:$0xff] }
 0x8ad   :  { %v11648_v15 = vmax.f32 %v5419_v50, %v5585_v62  ;;  %v6336_v50 = vsel %vm1528_vm6, %v6333_v29, %v6335_v3  ;;  %v6123_v62 = vrot.slane %v11568_v48, 5 }
 0x8af   :  { %7413 = vmatmul.msk.f32.gmra.mxu1 %vm2330_vm9, %v11648_v15  ;;  %v5638_v34 = vrot.slane %v11648_v15, 1  ;;  %v5915_v55 = vrot.slane %v11648_v15, 3  ;;  %v6023_v44 = vrot.slane %v11648_v15, 4  ;;  %v6347_v29 = vrot.slane %v11648_v15, 7 }
 0x8b1   :  { %v5639_v5 = vsel %vm97_vm1, %v5636_v26, %v5638_v34  ;;  %v5916_v53 = vsel %vm653_vm4, %v5913_v6, %v5915_v55  ;;  %v6024_v51 = vsel %vm872_vm7, %v6021_v1, %v6023_v44  ;;  %v6332_v26 = vsel %vm1528_vm6, %v6330_v52, %v6331_v9 }
 0x8b2   :  { %v5587_v16 = vpop.f32.mrf.mxu3  ;;  %7401 = vmatmul.msk.f32.gmra.mxu0 %vm2330_vm9, %v5639_v5  ;;  %7438 = vmatmul.msk.f32.gmra.mxu2 %vm2330_vm9, %v5916_v53  ;;  %v6119_v6 = vrot.slane %v11540_v12, 5  ;;  %v5793_v1 = vrot.slane %v11526_v30, 2  ;;  %v6125_v5 = vrot.slane %v11582_v20, 5 }
 0x8b3   :  { %v5588_v41 = vadd.f32 %v5587_v16, %v5534_v18  ;;  %7451 = vmatmul.msk.f32.gmra.mxu3 %vm2330_vm9, %v6024_v51  ;;  %v6337_v18 = vrot.slane %v11554_v28, 7  ;;  %v5799_v51 = vrot.slane %v11568_v48, 2  ;;  %v6339_v16 = vrot.slane %v11568_v48, 7 }
 0x8b4   :  { %v6120_v19 = vsel %vm196_vm0, %v6117_v4, %v6119_v6  ;;  %v5794_v33 = vsel %vm434_vm3, %v5791_v27, %v5793_v1  ;;  %v6122_v45 = vsel %vm196_vm0, %v6119_v6, %v6121_v25  ;;  %v5796_v42 = vsel %vm434_vm3, %v5793_v1, %v5795_v36 }
 0x8b5   :  { %v11662_v63 = vmax.f32 %v5422_v23, %v5588_v41  ;;  %v6126_v23 = vsel %vm196_vm0, %v6123_v62, %v6125_v5  ;;  %v5800_v41 = vsel %vm434_vm3, %v5797_v58, %v5799_v51  ;;  %v6345_v4 = vrot.slane %v11619_v11, 7 }
 0x8b6   :  { %v5807_v1 = vrot.slane %v11648_v15, 2 }
 0x8b7   :  { %7414 = vmatmul.msk.f32.gmra.mxu1 %vm2330_vm9, %v11662_v63  ;;  %v5640_v2 = vrot.slane %v11662_v63, 1  ;;  %v5917_v43 = vrot.slane %v11662_v63, 3  ;;  %v6025_v0 = vrot.slane %v11662_v63, 4 }
 0x8b9   :  { %v5641_v60 = vsel %vm97_vm1, %v5638_v34, %v5640_v2  ;;  %v5918_v35 = vsel %vm653_vm4, %v5915_v55, %v5917_v43  ;;  %v6026_v31 = vsel %vm872_vm7, %v6023_v44, %v6025_v0  ;;  %v6124_v34 = vsel %vm196_vm0, %v6121_v25, %v6123_v62 }
 0x8ba   :  { %v5590_v40 = vpop.f32.mrf.mxu3  ;;  %7402 = vmatmul.msk.f32.gmra.mxu0 %vm2330_vm9, %v5641_v60  ;;  %7439 = vmatmul.msk.f32.gmra.mxu2 %vm2330_vm9, %v5918_v35  ;;  %v5798_v55 = vsel %vm434_vm3, %v5795_v36, %v5797_v58  ;;  %v6338_v44 = vsel %vm1528_vm6, %v6335_v3, %v6337_v18  ;;  %v6348_v25 = vsel %vm1528_vm6, %v6345_v4, %v6347_v29 }
 0x8bb   :  { %v5591_v61 = vadd.f32 %v5590_v40, %v5537_v49  ;;  %7452 = vmatmul.msk.f32.gmra.mxu3 %vm2330_vm9, %v6026_v31  ;;  %v6341_v49 = vrot.slane %v11582_v20, 7  ;;  %v5802_v31 = vsel %vm434_vm3, %v5799_v51, %v5801_v10 }
 0x8bd   :  { %v11678_v57 = vmax.f32 %v5425_v37, %v5591_v61  ;;  %v6342_v40 = vsel %vm1528_vm6, %v6339_v16, %v6341_v49  ;;  %v5803_v61 = vrot.slane %v11596_v39, 2 }
 0x8bf   :  { %7456 = vmatmul.msk.f32.vlgmr.msrb.gmra.mxu1 %vm2330_vm9, %v6116_v22  ;;  %v5642_v46 = vrot.slane %v11678_v57, 1  ;;  %v5919_v24 = vrot.slane %v11678_v57, 3  ;;  %v6027_v7 = vrot.slane %v11678_v57, 4  ;;  %v6135_v36 = vrot.slane %v11678_v57, 5 }
 0x8c1   :  { %v5643_v14 = vsel %vm97_vm1, %v5640_v2, %v5642_v46  ;;  %v5920_v56 = vsel %vm653_vm4, %v5917_v43, %v5919_v24  ;;  %v6028_v38 = vsel %vm872_vm7, %v6025_v0, %v6027_v7  ;;  %v6340_v2 = vsel %vm1528_vm6, %v6337_v18, %v6339_v16 }
 0x8c2   :  { %7403 = vmatmul.msk.f32.gmra.mxu0 %vm2330_vm9, %v5643_v14  ;;  %7440 = vmatmul.msk.f32.gmra.mxu2 %vm2330_vm9, %v5920_v56  ;;  %v6127_v43 = vrot.slane %v11596_v39, 5  ;;  %v5804_v24 = vsel %vm434_vm3, %v5801_v10, %v5803_v61  ;;  %v6344_v7 = vsel %vm1528_vm6, %v6341_v49, %v6343_v13  ;;  %v6131_v14 = vrot.slane %v11648_v15, 5 }
 0x8c3   :  { %7453 = vmatmul.msk.f32.gmra.mxu3 %vm2330_vm9, %v6028_v38  ;;  %v5805_v38 = vrot.slane %v11619_v11, 2  ;;  %v6222_v10 = vrot.slane %v11505_v21, 6 }
 0x8c4   :  { %v6128_v60 = vsel %vm196_vm0, %v6125_v5, %v6127_v43  ;;  %v6130_v22 = vsel %vm196_vm0, %v6127_v43, %v6129_v32  ;;  %v6132_v27 = vsel %vm196_vm0, %v6129_v32, %v6131_v14 }
 0x8c5   :  { %v5806_v52 = vsel %vm434_vm3, %v5803_v61, %v5805_v38 }
 0x8c7   :  { %7457 = vmatmul.msk.f32.gmra.mxu1 %vm2330_vm9, %v6118_v17  ;;  %v7468_v17 = vld [vmem:[%s12091_s4 + $0x68] sm:$0xff] }
 0x8c8   :  { %6281 = vmatpush.msrb.mxu0 %v7468_v17 }
 0x8ca   :  { %7417 = vmatmul.msk.f32.vlgmr.msra.gmra.mxu0 %vm2330_vm9, %v5792_v54  ;;  %7482 = vmatmul.msk.f32.vlgmr.msra.gmra.mxu2 %vm2330_vm9, %v6332_v26  ;;  %v6346_v54 = vsel %vm1528_vm6, %v6343_v13, %v6345_v4  ;;  %v6133_v26 = vrot.slane %v11662_v63, 5 }
 0x8cb   :  { %7495 = vmatmul.msk.f32.vlgmr.msrb.gmra.mxu3 %vm2330_vm9, %v11509_v59  ;;  %6282 = vmatpush.msrb.mxu0 %v7467_v47  ;;  %v6231_v47 = vrot.slane %v11568_v48, 6 }
 0x8cf   :  { %7458 = vmatmul.msk.f32.gmra.mxu1 %vm2330_vm9, %v6120_v19  ;;  %v6134_v19 = vsel %vm196_vm0, %v6131_v14, %v6133_v26 }
 0x8d2   :  { %7418 = vmatmul.msk.f32.gmra.mxu0 %vm2330_vm9, %v5794_v33  ;;  %7483 = vmatmul.msk.f32.gmra.mxu2 %vm2330_vm9, %v6334_v8  ;;  %v5808_v8 = vsel %vm434_vm3, %v5805_v38, %v5807_v1  ;;  %v6229_v38 = vrot.slane %v11554_v28, 6 }
 0x8d3   :  { %7496 = vmatmul.msk.f32.gmra.mxu3 %vm2330_vm9, %v11526_v30 }
 0x8d7   :  { %7459 = vmatmul.msk.f32.gmra.mxu1 %vm2330_vm9, %v6122_v45  ;;  %v5809_v45 = vrot.slane %v11662_v63, 2 }
 0x8d9   :  { %v5810_v58 = vsel %vm434_vm3, %v5807_v1, %v5809_v45  ;;  %v6232_v1 = vsel %vm1309_vm5, %v6229_v38, %v6231_v47 }
 0x8da   :  { %7419 = vmatmul.msk.f32.gmra.mxu0 %vm2330_vm9, %v5796_v42  ;;  %7484 = vmatmul.msk.f32.gmra.mxu2 %vm2330_vm9, %v6336_v50  ;;  %v6349_v42 = vrot.slane %v11662_v63, 7  ;;  %v6136_v50 = vsel %vm196_vm0, %v6133_v26, %v6135_v36 }
 0x8db   :  { %7497 = vmatmul.msk.f32.gmra.mxu3 %vm2330_vm9, %v11540_v12 }
 0x8dc   :  { %v6350_v18 = vsel %vm1528_vm6, %v6347_v29, %v6349_v42 }
 0x8df   :  { %7460 = vmatmul.msk.f32.gmra.mxu1 %vm2330_vm9, %v6124_v34 }
 0x8e2   :  { %7420 = vmatmul.msk.f32.gmra.mxu0 %vm2330_vm9, %v5798_v55  ;;  %7485 = vmatmul.msk.f32.gmra.mxu2 %vm2330_vm9, %v6338_v44  ;;  %v5811_v55 = vrot.slane %v11678_v57, 2  ;;  %v6351_v44 = vrot.slane %v11678_v57, 7 }
 0x8e3   :  { %7498 = vmatmul.msk.f32.gmra.mxu3 %vm2330_vm9, %v11554_v28  ;;  %v6233_v28 = vrot.slane %v11582_v20, 6 }
 0x8e4   :  { %v11738_v53 = vpop.f32.mrf.mxu1  ;;  %v5812_v51 = vsel %vm434_vm3, %v5809_v45, %v5811_v55  ;;  %v6352_v16 = vsel %vm1528_vm6, %v6349_v42, %v6351_v44 }
 0x8e7   :  { %7461 = vmatmul.msk.f32.gmra.mxu1 %vm2330_vm9, %v6126_v23  ;;  %v6223_v23 = vrot.slane %v11509_v59, 6 }
 0x8ea   :  { %7421 = vmatmul.msk.f32.gmra.mxu0 %vm2330_vm9, %v5800_v41  ;;  %7486 = vmatmul.msk.f32.gmra.mxu2 %vm2330_vm9, %v6340_v2 }
 0x8eb   :  { %7499 = vmatmul.msk.f32.gmra.mxu3 %vm2330_vm9, %v11568_v48  ;;  %v6234_v48 = vsel %vm1309_vm5, %v6231_v47, %v6233_v28 }
 0x8ec   :  { %v11751_v0 = vpop.f32.mrf.mxu1 }
 0x8ef   :  { %v11756_v35 = vpop.f32.mrf.mxu0  ;;  %7462 = vmatmul.msk.f32.gmra.mxu1 %vm2330_vm9, %v6128_v60  ;;  %v6224_v60 = vsel %vm1309_vm5, %v6222_v10, %v6223_v23  ;;  %v6237_v10 = vrot.slane %v11619_v11, 6 }
 0x8f0   :  { %v5756_v29 = vadd.f32 %v11738_v53, %v11756_v35 }
 0x8f2   :  { %7422 = vmatmul.msk.f32.gmra.mxu0 %vm2330_vm9, %v5802_v31  ;;  %7487 = vmatmul.msk.f32.gmra.mxu2 %vm2330_vm9, %v6342_v40  ;;  %v6225_v31 = vrot.slane %v11526_v30, 6 }
 0x8f3   :  { %7500 = vmatmul.msk.f32.gmra.mxu3 %vm2330_vm9, %v11582_v20 }
 0x8f4   :  { %v11766_v37 = vpop.f32.mrf.mxu1  ;;  %v6226_v59 = vsel %vm1309_vm5, %v6223_v23, %v6225_v31 }
 0x8f5   :  { %v5960_v41 = vpop.f32.mrf.mxu2 }
 0x8f6   :  { %v6068_v49 = vpop.f32.mrf.mxu3 }
 0x8f7   :  { %v11771_v46 = vpop.f32.mrf.mxu0  ;;  %7463 = vmatmul.msk.f32.gmra.mxu1 %vm2330_vm9, %v6130_v22  ;;  %v6227_v22 = vrot.slane %v11540_v12, 6 }
 0x8f8   :  { %v5759_v20 = vadd.f32 %v11751_v0, %v11771_v46 }
 0x8fa   :  { %7423 = vmatmul.msk.f32.gmra.mxu0 %vm2330_vm9, %v5804_v24  ;;  %7488 = vmatmul.msk.f32.gmra.mxu2 %vm2330_vm9, %v6344_v7  ;;  %v6228_v24 = vsel %vm1309_vm5, %v6225_v31, %v6227_v22 }
 0x8fb   :  { %7501 = vmatmul.msk.f32.gmra.mxu3 %vm2330_vm9, %v11596_v39 }
 0x8fc   :  { %v11781_v56 = vpop.f32.mrf.mxu1 }
 0x8fd   :  { %v5963_v32 = vpop.f32.mrf.mxu2 }
 0x8fe   :  { %v6071_v13 = vpop.f32.mrf.mxu3 }
 0x8ff   :  { %v11786_v9 = vpop.f32.mrf.mxu0  ;;  %7464 = vmatmul.msk.f32.gmra.mxu1 %vm2330_vm9, %v6132_v27  ;;  %v6230_v27 = vsel %vm1309_vm5, %v6227_v22, %v6229_v38 }
 0x902   :  { %7424 = vmatmul.msk.f32.gmra.mxu0 %vm2330_vm9, %v5806_v52  ;;  %7489 = vmatmul.msk.f32.gmra.mxu2 %vm2330_vm9, %v6346_v54 }
 0x903   :  { %7502 = vmatmul.msk.f32.gmra.mxu3 %vm2330_vm9, %v11619_v11 }
 0x904   :  { %v11802_v6 = vpop.f32.mrf.mxu1 }
 0x905   :  { %v5966_v7 = vpop.f32.mrf.mxu2 }
 0x906   :  { %v6074_v14 = vpop.f32.mrf.mxu3 }
 0x907   :  { %v11807_v33 = vpop.f32.mrf.mxu0  ;;  %7465 = vmatmul.msk.f32.gmra.mxu1 %vm2330_vm9, %v6134_v19 }
 0x908   :  { %v5765_v11 = vadd.f32 %v11781_v56, %v11807_v33  ;;  %v6243_v33 = vrot.slane %v11678_v57, 6 }
 0x90a   :  { %7425 = vmatmul.msk.f32.gmra.mxu0 %vm2330_vm9, %v5808_v8  ;;  %7490 = vmatmul.msk.f32.gmra.mxu2 %vm2330_vm9, %v6348_v25 }
 0x90b   :  { %7503 = vmatmul.msk.f32.gmra.mxu3 %vm2330_vm9, %v11648_v15 }
 0x90c   :  { %v11817_v3 = vpop.f32.mrf.mxu1 }
 0x90d   :  { %v5969_v17 = vpop.f32.mrf.mxu2 }
 0x90e   :  { %v6077_v52 = vpop.f32.mrf.mxu3 }
 0x90f   :  { %v11822_v62 = vpop.f32.mrf.mxu0  ;;  %7466 = vmatmul.msk.f32.gmra.mxu1 %vm2330_vm9, %v6136_v50 }
 0x912   :  { %7426 = vmatmul.msk.f32.gmra.mxu0 %vm2330_vm9, %v5810_v58  ;;  %7491 = vmatmul.msk.f32.gmra.mxu2 %vm2330_vm9, %v6350_v18  ;;  %v6235_v58 = vrot.slane %v11596_v39, 6  ;;  %v5762_v39 = vadd.f32 %v11766_v37, %v11786_v9 }
 0x913   :  { %7504 = vmatmul.msk.f32.gmra.mxu3 %vm2330_vm9, %v11662_v63 }
 0x914   :  { %v11831_v34 = vpop.f32.mrf.mxu1 }
 0x915   :  { %v11878_v19 = vpop.f32.mrf.mxu2 }
 0x916   :  { %v11880_v45 = vpop.f32.mrf.mxu3 }
 0x917   :  { %v11835_v5 = vpop.f32.mrf.mxu0 }
 0x91a   :  { %7427 = vmatmul.msk.f32.gmra.mxu0 %vm2330_vm9, %v5812_v51  ;;  %7492 = vmatmul.msk.f32.gmra.mxu2 %vm2330_vm9, %v6352_v16  ;;  %v6236_v51 = vsel %vm1309_vm5, %v6233_v28, %v6235_v58 }
 0x91b   :  { %7505 = vmatmul.msk.f32.gmra.mxu3 %vm2330_vm9, %v11678_v57 }
 0x91c   :  { %v11844_v2 = vpop.f32.mrf.mxu1 }
 0x91d   :  { %v11887_v55 = vpop.f32.mrf.mxu2 }
 0x91e   :  { %v11891_v23 = vpop.f32.mrf.mxu3 }
 0x91f   :  { %v11846_v43 = vpop.f32.mrf.mxu0 }
 0x922   :  { %7469 = vmatmul.msk.f32.vlgmr.msrb.gmra.mxu0 %vm2330_vm9, %v6224_v60  ;;  %v6238_v60 = vsel %vm1309_vm5, %v6235_v58, %v6237_v10 }
 0x924   :  { %v11854_v61 = vpop.f32.mrf.mxu1 }
 0x927   :  { %v11852_v40 = vpop.f32.mrf.mxu0 }
 0x92a   :  { %7470 = vmatmul.msk.f32.gmra.mxu0 %vm2330_vm9, %v6226_v59  ;;  %v11898_v59 = vpop.f32.mrf.mxu2 }
 0x92c   :  { %v11863_v30 = vpop.f32.mrf.mxu1 }
 0x92f   :  { %v11859_v21 = vpop.f32.mrf.mxu0 }
 0x932   :  { %7471 = vmatmul.msk.f32.gmra.mxu0 %vm2330_vm9, %v6228_v24  ;;  %v11900_v24 = vpop.f32.mrf.mxu3  ;;  %v11907_v47 = vpop.f32.mrf.mxu2 }
 0x934   :  { %v5785_v12 = vpop.f32.mrf.mxu1 }
 0x937   :  { %v11866_v4 = vpop.f32.mrf.mxu0 }
 0x93a   :  { %7472 = vmatmul.msk.f32.gmra.mxu0 %vm2330_vm9, %v6230_v27  ;;  %v11910_v28 = vpop.f32.mrf.mxu3 }
 0x93c   :  { %v6176_v8 = vpop.f32.mrf.mxu1 }
 0x93f   :  { %v5713_v54 = vpop.f32.mrf.mxu0 }
 0x940   :  { %v11871_v26 = vadd.f32 %v5785_v12, %v5713_v54 }
 0x942   :  { %7473 = vmatmul.msk.f32.gmra.mxu0 %vm2330_vm9, %v6232_v1 }
 0x944   :  { %v6179_v44 = vpop.f32.mrf.mxu1 }
 0x947   :  { %v5852_v25 = vpop.f32.mrf.mxu0 }
 0x948   :  { %v5885_v36 = vadd.f32 %v5852_v25, %v5756_v29 }
 0x94a   :  { %v5993_v42 = vadd.f32 %v5960_v41, %v5885_v36  ;;  %7474 = vmatmul.msk.f32.gmra.mxu0 %vm2330_vm9, %v6234_v48 }
 0x94c   :  { %v6101_v50 = vadd.f32 %v6068_v49, %v5993_v42 }
 0x94e   :  { %v6209_v18 = vadd.f32 %v6176_v8, %v6101_v50 }
 0x94f   :  { %v5855_v53 = vpop.f32.mrf.mxu0 }
 0x950   :  { %v5886_v35 = vadd.f32 %v5855_v53, %v5759_v20  ;;  %v5783_v20 = vadd.f32 %v11863_v30, %v11866_v4 }
 0x952   :  { %v5994_v16 = vadd.f32 %v5963_v32, %v5886_v35  ;;  %7475 = vmatmul.msk.f32.gmra.mxu0 %vm2330_vm9, %v6236_v51  ;;  %v6182_v32 = vpop.f32.mrf.mxu1 }
 0x954   :  { %v6102_v41 = vadd.f32 %v6071_v13, %v5994_v16  ;;  %v6239_v13 = vrot.slane %v11648_v15, 6 }
 0x956   :  { %v6210_v0 = vadd.f32 %v6179_v44, %v6102_v41  ;;  %v6240_v27 = vsel %vm1309_vm5, %v6237_v10, %v6239_v13 }
 0x957   :  { %v5858_v46 = vpop.f32.mrf.mxu0 }
 0x958   :  { %v5887_v49 = vadd.f32 %v5858_v46, %v5762_v39 }
 0x95a   :  { %v5995_v31 = vadd.f32 %v5966_v7, %v5887_v49  ;;  %7476 = vmatmul.msk.f32.gmra.mxu0 %vm2330_vm9, %v6238_v60  ;;  %v6185_v54 = vpop.f32.mrf.mxu1 }
 0x95c   :  { %v6103_v22 = vadd.f32 %v6074_v14, %v5995_v31  ;;  %v6241_v14 = vrot.slane %v11662_v63, 6 }
 0x95e   :  { %v6211_v37 = vadd.f32 %v6182_v32, %v6103_v22  ;;  %v6242_v56 = vsel %vm1309_vm5, %v6239_v13, %v6241_v14  ;;  %v6244_v8 = vsel %vm1309_vm5, %v6241_v14, %v6243_v33 }
 0x95f   :  { %v5861_v9 = vpop.f32.mrf.mxu0 }
 0x960   :  { %v5888_v38 = vadd.f32 %v5861_v9, %v5765_v11 }
 0x962   :  { %v5996_v12 = vadd.f32 %v5969_v17, %v5888_v38  ;;  %7477 = vmatmul.msk.f32.gmra.mxu0 %vm2330_vm9, %v6240_v27  ;;  %v11917_v17 = vpop.f32.mrf.mxu2  ;;  %v11950_v11 = vpop.f32.mrf.mxu1 }
 0x964   :  { %v6104_v7 = vadd.f32 %v6077_v52, %v5996_v12  ;;  %v11921_v52 = vpop.f32.mrf.mxu3 }
 0x966   :  { %v6212_v1 = vadd.f32 %v6185_v54, %v6104_v7 }
 0x967   :  { %v11912_v15 = vpop.f32.mrf.mxu0 }
 0x96a   :  { %7478 = vmatmul.msk.f32.gmra.mxu0 %vm2330_vm9, %v6242_v56  ;;  %v5987_v25 = vpop.f32.mrf.mxu2  ;;  %v6191_v12 = vpop.f32.mrf.mxu1 }
 0x96c   :  { %v6095_v36 = vpop.f32.mrf.mxu3 }
 0x96f   :  { %v11919_v29 = vpop.f32.mrf.mxu0 }
 0x972   :  { %7479 = vmatmul.msk.f32.gmra.mxu0 %vm2330_vm9, %v6244_v8  ;;  %v11925_v42 = vpop.f32.mrf.mxu2 }
 0x974   :  { %v11927_v50 = vpop.f32.mrf.mxu3 }
 0x977   :  { %v5870_v63 = vpop.f32.mrf.mxu0 }
 0x97a   :  { %v11929_v57 = vpop.f32.mrf.mxu2 }
 0x97b   :  { %12439 = vst [vmem:[#allocation54_spill] sm:$0xff] %v11929_v57 }
 0x97c   :  { %v11933_v53 = vpop.f32.mrf.mxu3 }
 0x97d   :  { %12440 = vst [vmem:[#allocation20_spill] sm:$0xff] %v11933_v53 }
 0x97f   :  { %v5873_v48 = vpop.f32.mrf.mxu0 }
 0x982   :  { %v11935_v51 = vpop.f32.mrf.mxu2 }
 0x984   :  { %v11938_v10 = vpop.f32.mrf.mxu3 }
 0x985   :  { %12441 = vst [vmem:[#allocation11_spill] sm:$0xff] %v11938_v10 }
 0x987   :  { %v5876_v58 = vpop.f32.mrf.mxu0 }
 0x98a   :  { %v11942_v49 = vpop.f32.mrf.mxu2 }
 0x98c   :  { %v11944_v60 = vpop.f32.mrf.mxu3 }
 0x98d   :  { %12443 = vst [vmem:[#allocation25_spill] sm:$0xff] %v11944_v60  ;;  %v5771_v60 = vadd.f32 %v11817_v3, %v11835_v5 }
 0x98f   :  { %v5879_v35 = vpop.f32.mrf.mxu0 }
 0x990   :  { %v5894_v44 = vadd.f32 %v5879_v35, %v5783_v20 }
 0x992   :  { %v6401_v4 = vpop.f32.mrf.mxu2  ;;  %v6002_v53 = vadd.f32 %v5987_v25, %v5894_v44 }
 0x994   :  { %v6466_v32 = vpop.f32.mrf.mxu3 }
 0x997   :  { %v5882_v16 = vpop.f32.mrf.mxu0 }
 0x998   :  { %v5895_v41 = vadd.f32 %v5882_v16, %v11871_v26 }
 0x99a   :  { %v11952_v26 = vpop.f32.mrf.mxu2  ;;  %v6003_v5 = vadd.f32 %v11925_v42, %v5895_v41 }
 0x99c   :  { %v11954_v9 = vpop.f32.mrf.mxu3 }
 0x99f   :  { %v6284_v39 = vpop.f32.mrf.mxu0 }
 0x9a0   :  { %v11940_v46 = vadd.f32 %v6284_v39, %v6209_v18 }
 0x9a2   :  { %12442 = vst [vmem:[#allocation33_spill] sm:$0xff] %v11940_v46  ;;  %v11958_v54 = vpop.f32.mrf.mxu2 }
 0x9a4   :  { %v11962_v14 = vpop.f32.mrf.mxu3 }
 0x9a7   :  { %v6287_v31 = vpop.f32.mrf.mxu0 }
 0x9a8   :  { %v11946_v30 = vadd.f32 %v6287_v31, %v6210_v0 }
 0x9aa   :  { %v6410_v33 = vpop.f32.mrf.mxu2 }
 0x9ac   :  { %v11964_v8 = vpop.f32.mrf.mxu3 }
 0x9af   :  { %v6290_v22 = vpop.f32.mrf.mxu0 }
 0x9b0   :  { %v11948_v13 = vadd.f32 %v6290_v22, %v6211_v37  ;;  %v6194_v37 = vpop.f32.mrf.mxu1 }
 0x9b2   :  { %v6413_v16 = vpop.f32.mrf.mxu2 }
 0x9b4   :  { %v6478_v39 = vpop.f32.mrf.mxu3 }
 0x9b7   :  { %v6293_v18 = vpop.f32.mrf.mxu0 }
 0x9b8   :  { %v6320_v38 = vadd.f32 %v6293_v18, %v6212_v1  ;;  %v6197_v20 = vpop.f32.mrf.mxu1 }
 0x9ba   :  { %v6428_v27 = vadd.f32 %v6401_v4, %v6320_v38  ;;  %v5780_v4 = vadd.f32 %v11854_v61, %v11859_v21  ;;  %v6416_v18 = vpop.f32.mrf.mxu2  ;;  %v5774_v38 = vadd.f32 %v11831_v34, %v11846_v43  ;;  %v5768_v61 = vadd.f32 %v11802_v6, %v11822_v62 }
 0x9bb   :  { %v6110_v21 = vadd.f32 %v6095_v36, %v6002_v53 }
 0x9bc   :  { %v11956_v7 = vadd.f32 %v6466_v32, %v6428_v27  ;;  %v5777_v32 = vadd.f32 %v11844_v2, %v11852_v40  ;;  %v5893_v22 = vadd.f32 %v5876_v58, %v5780_v4  ;;  %v5891_v57 = vadd.f32 %v5870_v63, %v5774_v38 }
 0x9bd   :  { %v5890_v2 = vadd.f32 %v11919_v29, %v5771_v60  ;;  %v5889_v34 = vadd.f32 %v11912_v15, %v5768_v61 }
 0x9be   :  { %12444 = vst [vmem:[#allocation10_spill] sm:$0xff] %v11956_v7  ;;  %v5892_v27 = vadd.f32 %v5873_v48, %v5777_v32  ;;  %v6481_v7 = vpop.f32.mrf.mxu3  ;;  %v6001_v46 = vadd.f32 %v11917_v17, %v5893_v22  ;;  %v5999_v25 = vadd.f32 %v11898_v59, %v5891_v57 }
 0x9bf   :  { %v11960_v0 = vpop.f32.mrf.mxu0  ;;  %v5998_v3 = vadd.f32 %v11887_v55, %v5890_v2  ;;  %v5997_v6 = vadd.f32 %v11878_v19, %v5889_v34  ;;  %v6111_v55 = vadd.f32 %v11927_v50, %v6003_v5  ;;  %v12445_v5 = vld [vmem:[#allocation33_spill] sm:$0xff] }
 0x9c0   :  { %v6200_v31 = vpop.f32.mrf.mxu1  ;;  %v6000_v40 = vadd.f32 %v11907_v47, %v5892_v27  ;;  %v6109_v48 = vadd.f32 %v11921_v52, %v6001_v46  ;;  %v6107_v47 = vadd.f32 %v11900_v24, %v5999_v25 }
 0x9c1   :  { %v6106_v59 = vadd.f32 %v11891_v23, %v5998_v3  ;;  %v6105_v42 = vadd.f32 %v11880_v45, %v5997_v6 }
 0x9c2   :  { %v6108_v17 = vadd.f32 %v11910_v28, %v6000_v40  ;;  %v6419_v62 = vpop.f32.mrf.mxu2  ;;  %v6217_v36 = vadd.f32 %v6200_v31, %v6109_v48  ;;  %v6215_v53 = vadd.f32 %v6194_v37, %v6107_v47 }
 0x9c3   :  { %v6214_v19 = vadd.f32 %v6191_v12, %v6106_v59  ;;  %v6213_v24 = vadd.f32 %v11950_v11, %v6105_v42  ;;  %v7534_v12 = vld [vmem:[%s12092_s5] ss:$0 sm:$0xff] }
 0x9c4   :  { %v6216_v57 = vadd.f32 %v6197_v20, %v6108_v17 }
 0x9c5   :  { %v6321_v50 = vadd.f32 %v11960_v0, %v6213_v24 }
 0x9c6   :  { %v6484_v58 = vpop.f32.mrf.mxu3 }
 0x9c7   :  { %v6299_v56 = vpop.f32.mrf.mxu0 }
 0x9c8   :  { %v6203_v43 = vpop.f32.mrf.mxu1  ;;  %v6322_v32 = vadd.f32 %v6299_v56, %v6214_v19  ;;  %v6429_v56 = vadd.f32 %v11952_v26, %v6321_v50  ;;  %v6547_v50 = vld [vmem:[%s12094_s9 + $0x28] sm:$0xf] }
 0x9c9   :  { %v6218_v63 = vadd.f32 %v6203_v43, %v6110_v21 }
 0x9cf   :  { %v6302_v35 = vpop.f32.mrf.mxu0 }
 0x9d0   :  { %v6206_v41 = vpop.f32.mrf.mxu1  ;;  %v6323_v46 = vadd.f32 %v6302_v35, %v6215_v53  ;;  %v6487_v35 = vpop.f32.mrf.mxu3 }
 0x9d1   :  { %v6219_v4 = vadd.f32 %v6206_v41, %v6111_v55 }
 0x9d2   :  { %v6431_v38 = vadd.f32 %v6410_v33, %v6323_v46 }
 0x9d7   :  { %v6305_v1 = vpop.f32.mrf.mxu0 }
 0x9d8   :  { %v6324_v28 = vadd.f32 %v6305_v1, %v6216_v57  ;;  %v6430_v1 = vadd.f32 %v11958_v54, %v6322_v32  ;;  %v6427_v54 = vadd.f32 %v11942_v49, %v11948_v13  ;;  %v6542_v32 = vld [vmem:[%s12094_s9] sm:$0xff] }
 0x9da   :  { %v6432_v22 = vadd.f32 %v6413_v16, %v6324_v28  ;;  %v6496_v16 = vadd.f32 %v11964_v8, %v6431_v38  ;;  %v6495_v33 = vadd.f32 %v11962_v14, %v6430_v1  ;;  %v6426_v8 = vadd.f32 %v11935_v51, %v11946_v30  ;;  %v12446_v14 = vld [vmem:[#allocation54_spill] sm:$0xff]  ;;  %v12450_v30 = vld [vmem:[#allocation20_spill] sm:$0xff]  ;;  %v6606_v1 = vld [vmem:[%s12095_s10 + $0x28] sm:$0xf] }
 0x9db   :  { %v6425_v17 = vadd.f32 %v12446_v14, %v12445_v5  ;;  %v6601_v38 = vld [vmem:[%s12095_s10] sm:$0xff] }
 0x9dc   :  { %v6511_v43 = vmul.f32 %v7534_v12, %v6496_v16  ;;  %v6510_v3 = vmul.f32 %v7534_v12, %v6495_v33 }
 0x9df   :  { %v6308_v10 = vpop.f32.mrf.mxu0 }
 0x9e0   :  { %v6325_v52 = vadd.f32 %v6308_v10, %v6217_v36  ;;  %v6422_v10 = vpop.f32.mrf.mxu2 }
 0x9e2   :  { %v6433_v60 = vadd.f32 %v6416_v18, %v6325_v52  ;;  %v6497_v18 = vadd.f32 %v6478_v39, %v6432_v22  ;;  %v6494_v39 = vadd.f32 %v11954_v9, %v6429_v56  ;;  %v12448_v9 = vld [vmem:[#allocation11_spill] sm:$0xff] }
 0x9e3   :  { %v6543_v22 = vld [vmem:[%s12094_s9 + $0x8] sm:$0xff] }
 0x9e4   :  { %v6498_v45 = vadd.f32 %v6481_v7, %v6433_v60  ;;  %v7535_v7 = vld [vmem:[%s12093_s6] ss:$0 sm:$0xff]  ;;  %v6512_v21 = vmul.f32 %v7534_v12, %v6497_v18  ;;  %v6509_v13 = vmul.f32 %v7534_v12, %v6494_v39 }
 0x9e5   :  { %v6526_v49 = vadd.f32 %v7535_v7, %v6511_v43  ;;  %v6525_v36 = vadd.f32 %v7535_v7, %v6510_v3 }
 0x9e6   :  { %v6513_v0 = vmul.f32 %v7534_v12, %v6498_v45  ;;  %v6527_v48 = vadd.f32 %v7535_v7, %v6512_v21  ;;  %v6524_v57 = vadd.f32 %v7535_v7, %v6509_v13  ;;  %v6602_v45 = vld [vmem:[%s12095_s10 + $0x8] sm:$0xff] }
 0x9e7   :  { %v6311_v29 = vpop.f32.mrf.mxu0  ;;  %v6537_v59 = vmax.f32 %v6526_v49, 0.0  ;;  %v6536_v55 = vmax.f32 %v6525_v36, 0.0 }
 0x9e8   :  { %v6326_v15 = vadd.f32 %v6311_v29, %v6218_v63  ;;  %v6528_v26 = vadd.f32 %v7535_v7, %v6513_v0  ;;  %v12447_v63 = vld [vmem:[#allocation25_spill] sm:$0xff]  ;;  %v6491_v29 = vadd.f32 %v12448_v9, %v6426_v8  ;;  %v6538_v47 = vmax.f32 %v6527_v48, 0.0 }
 0x9e9   :  { %v6492_v6 = vadd.f32 %v12447_v63, %v6427_v54  ;;  %v6535_v28 = vmax.f32 %v6524_v57, 0.0 }
 0x9ea   :  { %v6434_v44 = vadd.f32 %v6419_v62, %v6326_v15  ;;  %v6539_v62 = vmax.f32 %v6528_v26, 0.0  ;;  %v12449_v15 = vld [vmem:[#allocation10_spill] sm:$0xff]  ;;  %v6506_v53 = vmul.f32 %v7534_v12, %v6491_v29 }
 0x9eb   :  { %v6508_v51 = vmul.f32 %v7534_v12, %v12449_v15  ;;  %v6507_v52 = vmul.f32 %v7534_v12, %v6492_v6 }
 0x9ec   :  { %v6499_v23 = vadd.f32 %v6484_v58, %v6434_v44  ;;  %v6490_v58 = vadd.f32 %v12450_v30, %v6425_v17  ;;  %v6521_v46 = vadd.f32 %v7535_v7, %v6506_v53 }
 0x9ed   :  { %v6523_v42 = vadd.f32 %v7535_v7, %v6508_v51  ;;  %v6522_v44 = vadd.f32 %v7535_v7, %v6507_v52 }
 0x9ee   :  { %v6514_v27 = vmul.f32 %v7534_v12, %v6499_v23  ;;  %v6505_v41 = vmul.f32 %v7534_v12, %v6490_v58  ;;  %v6532_v24 = vmax.f32 %v6521_v46, 0.0  ;;  %v6544_v23 = vld [vmem:[%s12094_s9 + $0x10] sm:$0xff] }
 0x9ef   :  { %v6314_v31 = vpop.f32.mrf.mxu0  ;;  %v6534_v19 = vmax.f32 %v6523_v42, 0.0  ;;  %v6533_v60 = vmax.f32 %v6522_v44, 0.0 }
 0x9f0   :  { %v6327_v20 = vadd.f32 %v6314_v31, %v6219_v4  ;;  %v6529_v40 = vadd.f32 %v7535_v7, %v6514_v27  ;;  %v6520_v4 = vadd.f32 %v7535_v7, %v6505_v41 }
 0x9f2   :  { %v6435_v37 = vadd.f32 %v6422_v10, %v6327_v20  ;;  %v6540_v25 = vmax.f32 %v6529_v40, 0.0  ;;  %v6531_v31 = vmax.f32 %v6520_v4, 0.0  ;;  %v6545_v20 = vld [vmem:[%s12094_s9 + $0x18] sm:$0xff]  ;;  %v6546_v10 = vld [vmem:[%s12094_s9 + $0x20] sm:$0xff] }
 0x9f4   :  { %v6500_v11 = vadd.f32 %v6487_v35, %v6435_v37  ;;  %v6603_v37 = vld [vmem:[%s12095_s10 + $0x10] sm:$0xff]  ;;  %v6605_v35 = vld [vmem:[%s12095_s10 + $0x20] sm:$0xff] }
 0x9f6   :  { %v6515_v61 = vmul.f32 %v7534_v12, %v6500_v11  ;;  %v6604_v12 = vld [vmem:[%s12095_s10 + $0x18] sm:$0xff] }
 0x9f8   :  { %v6530_v2 = vadd.f32 %v7535_v7, %v6515_v61 }
 0x9fa   :  { %v6541_v34 = vmax.f32 %v6530_v2, 0.0 }
 0x9fc   :  { %6571 = vmatpush.msra.mxu1 %v6541_v34 }
 0x9fe   :  { %6572 = vmatpush.msra.mxu1 %v6540_v25 }
 0xa00   :  { %6573 = vmatpush.msra.mxu1 %v6539_v62 }
 0xa02   :  { %6574 = vmatpush.msra.mxu1 %v6538_v47 }
 0xa04   :  { %6575 = vmatpush.msra.mxu1 %v6537_v59 }
 0xa06   :  { %6576 = vmatpush.msra.mxu1 %v6536_v55 }
 0xa08   :  { %6577 = vmatpush.msra.mxu1 %v6535_v28 }
 0xa0a   :  { %6578 = vmatpush.msra.mxu1 %v6534_v19 }
 0xa0c   :  { %6579 = vmatpush.msra.mxu1 %v6533_v60 }
 0xa0e   :  { %6580 = vmatpush.msra.mxu1 %v6532_v24 }
 0xa10   :  { %6581 = vmatpush.msra.mxu1 %v6531_v31 }
 0xa11   :  { %7506 = vmatmul.msk.f32.vlgmr.msra.gmra.mxu1 %vm3242_vm10, %v6542_v32 }
 0xa12   :  { %6630 = vmatpush.msrb.mxu1 %v6541_v34 }
 0xa14   :  { %6631 = vmatpush.msrb.mxu1 %v6540_v25 }
 0xa16   :  { %6632 = vmatpush.msrb.mxu1 %v6539_v62 }
 0xa18   :  { %6633 = vmatpush.msrb.mxu1 %v6538_v47 }
 0xa19   :  { %7507 = vmatmul.msk.f32.gmra.mxu1 %vm3242_vm10, %v6543_v22 }
 0xa1a   :  { %6634 = vmatpush.msrb.mxu1 %v6537_v59 }
 0xa1c   :  { %6635 = vmatpush.msrb.mxu1 %v6536_v55 }
 0xa1e   :  { %6636 = vmatpush.msrb.mxu1 %v6535_v28 }
 0xa20   :  { %6637 = vmatpush.msrb.mxu1 %v6534_v19 }
 0xa21   :  { %7508 = vmatmul.msk.f32.gmra.mxu1 %vm3242_vm10, %v6544_v23 }
 0xa22   :  { %6638 = vmatpush.msrb.mxu1 %v6533_v60 }
 0xa24   :  { %6639 = vmatpush.msrb.mxu1 %v6532_v24 }
 0xa26   :  { %6640 = vmatpush.msrb.mxu1 %v6531_v31 }
 0xa29   :  { %7509 = vmatmul.msk.f32.gmra.mxu1 %vm3242_vm10, %v6545_v20 }
 0xa31   :  { %7510 = vmatmul.msk.f32.gmra.mxu1 %vm3242_vm10, %v6546_v10 }
 0xa39   :  { %7511 = vmatmul.msk.f32.gmra.mxu1 %vm3242_vm10, %v6547_v50 }
 0xa41   :  { %7512 = vmatmul.msk.f32.vlgmr.msrb.gmra.mxu1 %vm3242_vm10, %v6601_v38 }
 0xa49   :  { %7513 = vmatmul.msk.f32.gmra.mxu1 %vm3242_vm10, %v6602_v45 }
 0xa51   :  { %7514 = vmatmul.msk.f32.gmra.mxu1 %vm3242_vm10, %v6603_v37 }
 0xa59   :  { %7515 = vmatmul.msk.f32.gmra.mxu1 %vm3242_vm10, %v6604_v12 }
 0xa61   :  { %7516 = vmatmul.msk.f32.gmra.mxu1 %vm3242_vm10, %v6605_v35 }
 0xa69   :  { %7517 = vmatmul.msk.f32.gmra.mxu1 %vm3242_vm10, %v6606_v1 }
 0xa8e   :  { %v6583_v18 = vpop.f32.mrf.mxu1 }
 0xa96   :  { %v6586_v11 = vpop.f32.mrf.mxu1 }
 0xa9e   :  { %v6589_v27 = vpop.f32.mrf.mxu1 }
 0xaa6   :  { %v6592_v56 = vpop.f32.mrf.mxu1 }
 0xaae   :  { %v6595_v16 = vpop.f32.mrf.mxu1 }
 0xab6   :  { %v6598_v61 = vpop.f32.mrf.mxu1 }
 0xabe   :  { %v6642_v7 = vpop.f32.mrf.mxu1 }
 0xabf   :  { %v6660_v0 = vmax.f32 %v6583_v18, %v6642_v7 }
 0xac1   :  { %7518 = vst.msk [vmem:[%s12096_s11 + $0x30] sm:$0xff] %vm3361_vm11, %v6660_v0 }
 0xac6   :  { %v6645_v33 = vpop.f32.mrf.mxu1 }
 0xac7   :  { %v6661_v2 = vmax.f32 %v6586_v11, %v6645_v33 }
 0xac9   :  { %7519 = vst.msk [vmem:[%s12096_s11 + $0x38] sm:$0xff] %vm3361_vm11, %v6661_v2 }
 0xace   :  { %v6648_v40 = vpop.f32.mrf.mxu1 }
 0xacf   :  { %v6662_v21 = vmax.f32 %v6589_v27, %v6648_v40 }
 0xad1   :  { %7520 = vst.msk [vmem:[%s12096_s11 + $0x40] sm:$0xff] %vm3361_vm11, %v6662_v21 }
 0xad6   :  { %v6651_v54 = vpop.f32.mrf.mxu1 }
 0xad7   :  { %v6663_v39 = vmax.f32 %v6592_v56, %v6651_v54 }
 0xad9   :  { %7521 = vst.msk [vmem:[%s12096_s11 + $0x48] sm:$0xff] %vm3361_vm11, %v6663_v39 }
 0xade   :  { %v6654_v34 = vpop.f32.mrf.mxu1 }
 0xadf   :  { %v6664_v26 = vmax.f32 %v6595_v16, %v6654_v34 }
 0xae1   :  { %7522 = vst.msk [vmem:[%s12096_s11 + $0x50] sm:$0xff] %vm3361_vm11, %v6664_v26 }
 0xae6   :  { %v6657_v43 = vpop.f32.mrf.mxu1 }
 0xae7   :  { %v6665_v8 = vmax.f32 %v6598_v61, %v6657_v43 }
 0xae9   :  { %7523 = vst.msk [vmem:[%s12096_s11 + $0x58] sm:$0xf] %vm3367_vm12, %v6665_v8 }

</bundles_post_ra>
